<compile_context>
chip_gen: v7x
topology: tpu7x:2x2x1
jax: 0.10.0
libtpu: 0.0.40
codegen_flags: <defaults>
</compile_context>

<pallas_src>
import functools

import jax
import jax.numpy as jnp
from jax.experimental import pallas as pl
from jax.experimental.pallas import tpu as pltpu


# ---------------------------------------------------------------------------
# The single fused kernel
# ---------------------------------------------------------------------------
def _disc_kernel(p1_ref, w1_ref, b1_ref,                    # conv1 (block-diag)
                 w2_ref, b2_ref, g2_ref, be2_ref,           # conv2 + BN2d
                 fc1_hbm, bf1_ref, g1_ref, be1_ref,         # fc1 (HBM) + BN1d
                 w3_ref, b3_ref,                            # fc2
                 o_ref,                                     # (8, 128) output
                 y1pad_ref, p2_ref, fc1_vmem, h_ref, sem,   # scratch
                 *, batch, s1, s2, slope, eps):
    C1 = 64                  # conv1 output channels
    K = 4                    # conv kernel size (both convs)
    G = 8                    # rows per (spatial, batch) group == f32 tile height
    n_sp = s2 * s2           # conv2 output positions (fc1 spatial groups)
    lanes1 = (s1 + 2) * C1   # padded-width * channels lane layout of y1

    # -- (1) kick off the 4 MiB fc1-weight DMA; it overlaps the conv front ---
    fc1_copy = pltpu.make_async_copy(fc1_hbm, fc1_vmem, sem)
    fc1_copy.start()

    # -- (2) conv1 as a block-diagonal matmul.  Rows (oh, b_pad8); output
    #        lanes (w_pad*64 + c); width zero-padding is baked into the packed
    #        weight/bias (pad lanes stay exactly 0 through LeakyReLU). --------
    y1 = jnp.dot(p1_ref[...], w1_ref[...], preferred_element_type=jnp.float32)
    y1 = y1 + b1_ref[...]
    y1 = jnp.where(y1 > 0, y1, slope * y1)
    rb = jax.lax.broadcasted_iota(jnp.int32, y1.shape, 0) % G
    y1 = jnp.where(rb < batch, y1, 0.0)                # zero the batch-pad rows

    # -- (3) height-pad into the (h_pad, b_pad8, w_pad*64+c) scratch ---------
    zplane = jnp.zeros((1, G, lanes1), jnp.float32)
    y1pad_ref[0:1, :, :] = zplane
    y1pad_ref[s1 + 1:s1 + 2, :, :] = zplane
    y1pad_ref[1:s1 + 1, :, :] = y1.reshape(s1, G, lanes1)

    # -- (4) conv2 im2col built in-kernel: every copy is an (8, 256) f32 block
    #        with tile-aligned source (lane offset 128*ow, full sublanes) and
    #        tile-aligned destination (row s*8, lane kh*256). -----------------
    for oh in range(s2):
        for ow in range(s2):
            s = oh * s2 + ow
            for kh in range(K):
                p2_ref[s * G:(s + 1) * G, kh * K * C1:(kh + 1) * K * C1] = (
                    y1pad_ref[2 * oh + kh, :, 2 * ow * C1:(2 * ow + K) * C1])

    # -- (5) conv2 matmul + bias (K-chunked so the bf16 LHS cast stays small) -
    y2 = b2_ref[...]
    for kh in range(K):
        y2 = y2 + jnp.dot(
            p2_ref[:, kh * K * C1:(kh + 1) * K * C1].astype(jnp.bfloat16),
            w2_ref[kh * K * C1:(kh + 1) * K * C1, :],
            preferred_element_type=jnp.float32)

    # -- (6) BatchNorm2d with masked current-batch statistics (train mode) ---
    mrow = (jax.lax.broadcasted_iota(jnp.int32, (n_sp * G, 1), 0) % G
            < batch).astype(jnp.float32)
    inv_n2 = 1.0 / float(n_sp * batch)
    m2 = jnp.sum(y2 * mrow, axis=0, keepdims=True) * inv_n2
    d2 = y2 - m2
    v2 = jnp.sum(d2 * d2 * mrow, axis=0, keepdims=True) * inv_n2
    y2 = d2 * jax.lax.rsqrt(v2 + eps) * g2_ref[...] + be2_ref[...]
    y2 = jnp.where(y2 > 0, y2, slope * y2)
    y2b = y2.astype(jnp.bfloat16)                 # hoisted: ONE bf16 cast

    # -- (7) fc1: wait for the prefetched weight, accumulate per spatial s
    #        into a VMEM scratch (MRB-friendly accumulation on v7x). ---------
    fc1_copy.wait()
    h_ref[...] = jnp.zeros_like(h_ref)
    for s in range(n_sp):
        h_ref[...] += jnp.dot(y2b[s * G:(s + 1) * G, :],
                              fc1_vmem[s * 128:(s + 1) * 128, :],
                              preferred_element_type=jnp.float32)
    h = h_ref[...] + bf1_ref[...]

    # -- (8) BatchNorm1d (masked to the real batch rows) + LeakyReLU ---------
    mb = (jax.lax.broadcasted_iota(jnp.int32, (G, 1), 0)
          < batch).astype(jnp.float32)
    inv_n1 = 1.0 / float(batch)
    m1 = jnp.sum(h * mb, axis=0, keepdims=True) * inv_n1
    d1 = h - m1
    v1 = jnp.sum(d1 * d1 * mb, axis=0, keepdims=True) * inv_n1
    h = d1 * jax.lax.rsqrt(v1 + eps) * g1_ref[...] + be1_ref[...]
    h = jnp.where(h > 0, h, slope * h)

    # -- (9) fc2 with a 128-lane-dense padded output store --------------------
    out = jnp.dot(h.astype(jnp.bfloat16), w3_ref[...],
                  preferred_element_type=jnp.float32)
    o_ref[...] = out + b3_ref[...]


# ---------------------------------------------------------------------------
# pallas_call wrapper (no grid: single full-array block, single-buffered)
# ---------------------------------------------------------------------------
def _discriminator_call(p1, pk, *, batch, s1, s2, slope=0.2, eps=1e-5):
    C1, K, G = 64, 4, 8
    n_sp = s2 * s2
    kernel = functools.partial(_disc_kernel, batch=batch, s1=s1, s2=s2,
                               slope=slope, eps=eps)
    vmem = pltpu.MemorySpace.VMEM
    in_specs = [pl.BlockSpec(memory_space=vmem) for _ in range(13)]
    in_specs[7] = pl.BlockSpec(memory_space=pl.ANY)   # fc1_w: stays in HBM,
                                                      # DMA'd manually (overlap)
    # NOTE(v7x, large batch): add a leading "parallel" grid axis over batch
    # groups to use both TensorCores; irrelevant at B<=8.
    return pl.pallas_call(
        kernel,
        out_shape=jax.ShapeDtypeStruct((G, 128), jnp.float32),
        in_specs=in_specs,
        out_specs=pl.BlockSpec(memory_space=vmem),
        scratch_shapes=[
            pltpu.VMEM((s1 + 2, G, (s1 + 2) * C1), jnp.float32),  # padded y1
            pltpu.VMEM((n_sp * G, K * K * C1), jnp.float32),      # conv2 im2col
            pltpu.VMEM((n_sp * 128, 1024), jnp.bfloat16),         # fc1 weight buf
            pltpu.VMEM((G, 1024), jnp.float32),                   # fc1 accumulator
            pltpu.SemaphoreType.DMA,                              # fc1 DMA sem
        ],
    )(p1, pk["conv1_w"], pk["conv1_b"], pk["conv2_w"], pk["conv2_b"],
      pk["bn2_g"], pk["bn2_b"], pk["fc1_w"], pk["fc1_b"],
      pk["bn1_g"], pk["bn1_b"], pk["fc2_w"], pk["fc2_b"])


# ---------------------------------------------------------------------------
# Host glue: tiny conv1 im2col (layout plumbing on the raw input, under jit)
# ---------------------------------------------------------------------------
def _build_p1(x, *, k=4, stride=2, pad=1, group=8):
    """x (B,C,H,W) -> p1 (OH*group, OW*k*k*C); rows (oh, b_pad8),
    cols (ow, kh, kw, ci) to match the block-diagonal conv1 weight."""
    B, C, H, W = x.shape
    OH = (H + 2 * pad - k) // stride + 1
    OW = (W + 2 * pad - k) // stride + 1
    xp = jnp.pad(x, ((0, 0), (0, 0), (pad, pad), (pad, pad)))
    cols = [xp[:, :, i:i + stride * OH:stride, j:j + stride * OW:stride]
            for i in range(k) for j in range(k)]           # each (B,C,OH,OW)
    p = jnp.stack(cols, axis=-1)                           # (B,C,OH,OW,kk)
    p = p.transpose(2, 0, 3, 4, 1)                         # (OH,B,OW,kk,C)
    p = p.reshape(OH, B, OW * k * k * C)
    p = jnp.pad(p, ((0, 0), (0, group - B), (0, 0)))       # pad batch -> 8
    return p.reshape(OH * group, OW * k * k * C)


# ---------------------------------------------------------------------------
# Parameters: torch-shaped synthetic init + ONE-TIME re-layout to kernel form
# ---------------------------------------------------------------------------
def init_params(key, input_dim=1, output_dim=1, input_size=16,
                len_discrete_code=10, len_continuous_code=2):
    keys = jax.random.split(key, 6)
    s = input_size // 4
    fc_in = 128 * s * s
    fc_out = output_dim + len_continuous_code + len_discrete_code
    return dict(
        conv1_w=0.02 * jax.random.normal(keys[0], (64, input_dim, 4, 4), jnp.float32),
        conv1_b=jnp.zeros((64,), jnp.float32),
        conv2_w=0.02 * jax.random.normal(keys[1], (128, 64, 4, 4), jnp.float32),
        conv2_b=jnp.zeros((128,), jnp.float32),
        bn2_g=1.0 + 0.02 * jax.random.normal(keys[2], (128,), jnp.float32),
        bn2_b=jnp.zeros((128,), jnp.float32),
        fc1_w=0.02 * jax.random.normal(keys[3], (1024, fc_in), jnp.float32),
        fc1_b=jnp.zeros((1024,), jnp.float32),
        bn1d_g=1.0 + 0.02 * jax.random.normal(keys[4], (1024,), jnp.float32),
        bn1d_b=jnp.zeros((1024,), jnp.float32),
        fc2_w=0.02 * jax.random.normal(keys[5], (fc_out, 1024), jnp.float32),
        fc2_b=jnp.zeros((fc_out,), jnp.float32),
    )


def pack_params(params, *, input_size=16, pad_out=128):
    """One-time host-side re-layout into the kernel's weight formats."""
    s1 = input_size // 2                      # conv1 output spatial
    s2 = input_size // 4                      # conv2 output spatial
    n_sp = s2 * s2
    c1 = params["conv1_w"]                    # (64, Cin, 4, 4)
    co1, ci1, kh, kw = c1.shape
    kkci = kh * kw * ci1

    # conv1: block-diagonal (ow-block) weight with width padding baked in.
    blk = c1.transpose(2, 3, 1, 0).reshape(kkci, co1)       # rows (kh,kw,ci)
    w1 = jnp.zeros((s1 * kkci, (s1 + 2) * co1), jnp.float32)
    for ow in range(s1):
        w1 = w1.at[ow * kkci:(ow + 1) * kkci,
                   (ow + 1) * co1:(ow + 2) * co1].set(blk)
    b1 = jnp.zeros((1, (s1 + 2) * co1), jnp.float32)
    b1 = b1.at[0, co1:(s1 + 1) * co1].set(jnp.tile(params["conv1_b"], s1))

    # conv2: standard im2col order (kh, kw, ci) -> co.
    w2 = params["conv2_w"].transpose(2, 3, 1, 0).reshape(16 * 64, 128)

    # fc1: PyTorch flatten order (c, h, w) regrouped as (s, c) row blocks.
    fc1 = params["fc1_w"].reshape(1024, 128, n_sp).transpose(2, 1, 0)
    fc1 = fc1.reshape(128 * n_sp, 1024)

    # fc2: transposed + zero-padded to 128 output lanes (dense store).
    fc_out = params["fc2_w"].shape[0]
    fc2 = jnp.zeros((1024, pad_out), jnp.float32).at[:, :fc_out].set(params["fc2_w"].T)
    fc2b = jnp.zeros((pad_out,), jnp.float32).at[:fc_out].set(params["fc2_b"])

    row = lambda v: v.reshape(1, -1).astype(jnp.float32)
    return dict(
        conv1_w=w1.astype(jnp.bfloat16), conv1_b=b1,
        conv2_w=w2.astype(jnp.bfloat16), conv2_b=row(params["conv2_b"]),
        bn2_g=row(params["bn2_g"]), bn2_b=row(params["bn2_b"]),
        fc1_w=fc1.astype(jnp.bfloat16), fc1_b=row(params["fc1_b"]),
        bn1_g=row(params["bn1d_g"]), bn1_b=row(params["bn1d_b"]),
        fc2_w=fc2.astype(jnp.bfloat16), fc2_b=row(fc2b),
    )


# ---------------------------------------------------------------------------
# Forward pass (mirrors discriminator.forward)
# ---------------------------------------------------------------------------
def discriminator_forward(packed, x, *, input_size=16, output_dim=1,
                          len_discrete_code=10, len_continuous_code=2):
    B = x.shape[0]
    assert B <= 8, "single-block kernel handles B<=8; grid over batch otherwise"
    s1, s2 = input_size // 2, input_size // 4

    p1 = _build_p1(x).astype(jnp.bfloat16)                  # tiny, on raw input
    logits = _discriminator_call(p1, packed, batch=B, s1=s1, s2=s2)  # (8, 128)

    fc_out = output_dim + len_continuous_code + len_discrete_code
    out = logits[:B, :fc_out]
    # Reproduces the original module exactly, including x[:, output_dim]
    # (a single column) overlapping the continuous-code slice.
    a = jax.nn.sigmoid(out[:, output_dim])
    b = out[:, output_dim:output_dim + len_continuous_code]
    c = out[:, output_dim + len_continuous_code:]
    return a, b, c


if __name__ == "__main__":
    key = jax.random.PRNGKey(0)
    pkey, xkey = jax.random.split(key)

    B, C, S = 4, 1, 16
    params = init_params(pkey, input_dim=C, input_size=S)
    packed = pack_params(params, input_size=S)              # one-time re-layout
    x = jax.random.normal(xkey, (B, C, S, S), jnp.float32)

    fwd = jax.jit(functools.partial(discriminator_forward, input_size=S))
    a, b, c = fwd(packed, x)
    jax.block_until_ready((a, b, c))

    assert a.shape == (B,)
    assert b.shape == (B, 2)
    assert c.shape == (B, 10)
    assert bool(jnp.all((a >= 0.0) & (a <= 1.0)))
    assert bool(jnp.all(jnp.isfinite(b))) and bool(jnp.all(jnp.isfinite(c)))
    print("KERNEL_OK")
</pallas_src>

<mosaic_0001>
module attributes {stable_mosaic.version = 11 : i64} {
  func.func @_disc_kernel(%arg0: memref<64x128xbf16, #tpu.memory_space<vmem>>, %arg1: memref<128x640xbf16, #tpu.memory_space<vmem>>, %arg2: memref<1x640xf32, #tpu.memory_space<vmem>>, %arg3: memref<1024x128xbf16, #tpu.memory_space<vmem>>, %arg4: memref<1x128xf32, #tpu.memory_space<vmem>>, %arg5: memref<1x128xf32, #tpu.memory_space<vmem>>, %arg6: memref<1x128xf32, #tpu.memory_space<vmem>>, %arg7: memref<2048x1024xbf16, #tpu.memory_space<any>>, %arg8: memref<1x1024xf32, #tpu.memory_space<vmem>>, %arg9: memref<1x1024xf32, #tpu.memory_space<vmem>>, %arg10: memref<1x1024xf32, #tpu.memory_space<vmem>>, %arg11: memref<1024x128xbf16, #tpu.memory_space<vmem>>, %arg12: memref<1x128xf32, #tpu.memory_space<vmem>>, %arg13: memref<8x128xf32, #tpu.memory_space<vmem>>, %arg14: memref<10x8x640xf32, #tpu.memory_space<vmem>>, %arg15: memref<128x1024xf32, #tpu.memory_space<vmem>>, %arg16: memref<2048x1024xbf16, #tpu.memory_space<vmem>>, %arg17: memref<8x1024xf32, #tpu.memory_space<vmem>>, %arg18: memref<!tpu.dma_semaphore, #tpu.memory_space<semaphore_mem>>) attributes {dimension_semantics = [], scalar_prefetch = 0 : i64, scratch_operands = 5 : i64, tpu.core_type = #tpu.core_type<tc>} {
    tpu.enqueue_dma source(%arg7 : memref<2048x1024xbf16, #tpu.memory_space<any>>) target(%arg16 : memref<2048x1024xbf16, #tpu.memory_space<vmem>>) target_semaphore(%arg18 : memref<!tpu.dma_semaphore, #tpu.memory_space<semaphore_mem>>)
    %c0 = arith.constant 0 : index
    %c0_0 = arith.constant 0 : index
    %0 = vector.load %arg0[%c0, %c0_0] : memref<64x128xbf16, #tpu.memory_space<vmem>>, vector<64x128xbf16>
    %c0_1 = arith.constant 0 : index
    %c0_2 = arith.constant 0 : index
    %1 = vector.load %arg1[%c0_1, %c0_2] : memref<128x640xbf16, #tpu.memory_space<vmem>>, vector<128x640xbf16>
    %cst = arith.constant dense<0.000000e+00> : vector<64x640xf32>
    %2 = tpu.matmul %0, %1, %cst {dimension_numbers = #tpu.dot_dimension_numbers<[1], [0], [0], [1], [0, 0, 1, 1], [], []>} : vector<64x128xbf16>, vector<128x640xbf16>, vector<64x640xf32> -> vector<64x640xf32>
    %c0_3 = arith.constant 0 : index
    %c0_4 = arith.constant 0 : index
    %3 = vector.load %arg2[%c0_3, %c0_4] : memref<1x640xf32, #tpu.memory_space<vmem>>, vector<1x640xf32>
    %4 = vector.broadcast %3 : vector<1x640xf32> to vector<64x640xf32>
    %5 = arith.addf %2, %4 : vector<64x640xf32>
    %cst_5 = arith.constant 0.000000e+00 : f32
    %6 = vector.broadcast %cst_5 : f32 to vector<64x640xf32>
    %7 = arith.cmpf ogt, %5, %6 : vector<64x640xf32>
    %cst_6 = arith.constant 2.000000e-01 : f32
    %8 = vector.broadcast %cst_6 : f32 to vector<64x640xf32>
    %9 = arith.mulf %8, %5 : vector<64x640xf32>
    %10 = arith.select %7, %5, %9 : vector<64x640xi1>, vector<64x640xf32>
    %11 = tpu.iota {dimensions = array<i32: 0>} : vector<64x640xi32>
    %c8_i32 = arith.constant 8 : i32
    %c0_i32 = arith.constant 0 : i32
    %12 = arith.cmpi eq, %c8_i32, %c0_i32 : i32
    %c1_i32 = arith.constant 1 : i32
    %13 = arith.select %12, %c1_i32, %c8_i32 : i32
    %14 = vector.broadcast %13 : i32 to vector<64x640xi32>
    %15 = arith.remsi %11, %14 : vector<64x640xi32>
    %c0_i32_7 = arith.constant 0 : i32
    %16 = vector.broadcast %c0_i32_7 : i32 to vector<64x640xi32>
    %17 = arith.cmpi ne, %15, %16 : vector<64x640xi32>
    %c0_i32_8 = arith.constant 0 : i32
    %18 = vector.broadcast %c0_i32_8 : i32 to vector<64x640xi32>
    %19 = arith.cmpi slt, %15, %18 : vector<64x640xi32>
    %c0_i32_9 = arith.constant 0 : i32
    %20 = arith.cmpi slt, %13, %c0_i32_9 : i32
    %21 = vector.broadcast %20 : i1 to vector<64x640xi1>
    %22 = vector.broadcast %21 : vector<64x640xi1> to vector<64x640xi1>
    %23 = arith.xori %19, %22 : vector<64x640xi1>
    %24 = arith.andi %23, %17 : vector<64x640xi1>
    %25 = vector.broadcast %13 : i32 to vector<64x640xi32>
    %26 = arith.addi %15, %25 : vector<64x640xi32>
    %27 = arith.select %24, %26, %15 : vector<64x640xi1>, vector<64x640xi32>
    %c4_i32 = arith.constant 4 : i32
    %28 = vector.broadcast %c4_i32 : i32 to vector<64x640xi32>
    %29 = arith.cmpi slt, %27, %28 : vector<64x640xi32>
    %cst_10 = arith.constant 0.000000e+00 : f32
    %30 = vector.broadcast %cst_10 : f32 to vector<64x640xf32>
    %31 = arith.select %29, %10, %30 : vector<64x640xi1>, vector<64x640xf32>
    %cst_11 = arith.constant 0.000000e+00 : f32
    %32 = vector.broadcast %cst_11 : f32 to vector<1x8x640xf32>
    %c0_12 = arith.constant 0 : index
    %c0_13 = arith.constant 0 : index
    %c0_14 = arith.constant 0 : index
    %33 = vector.load %arg14[%c0_12, %c0_13, %c0_14] : memref<10x8x640xf32, #tpu.memory_space<vmem>>, vector<1x8x640xf32>
    tpu.vector_store %arg14[%c0_12, %c0_13, %c0_14], %32 {strides = array<i32>} : memref<10x8x640xf32, #tpu.memory_space<vmem>>, vector<1x8x640xf32>,
    %c9 = arith.constant 9 : index
    %c0_15 = arith.constant 0 : index
    %c0_16 = arith.constant 0 : index
    %34 = vector.load %arg14[%c9, %c0_15, %c0_16] : memref<10x8x640xf32, #tpu.memory_space<vmem>>, vector<1x8x640xf32>
    tpu.vector_store %arg14[%c9, %c0_15, %c0_16], %32 {strides = array<i32>} : memref<10x8x640xf32, #tpu.memory_space<vmem>>, vector<1x8x640xf32>,
    %35 = vector.shape_cast %31 : vector<64x640xf32> to vector<8x8x640xf32>
    %c1 = arith.constant 1 : index
    %c0_17 = arith.constant 0 : index
    %c0_18 = arith.constant 0 : index
    %36 = vector.load %arg14[%c1, %c0_17, %c0_18] : memref<10x8x640xf32, #tpu.memory_space<vmem>>, vector<8x8x640xf32>
    tpu.vector_store %arg14[%c1, %c0_17, %c0_18], %35 {strides = array<i32>} : memref<10x8x640xf32, #tpu.memory_space<vmem>>, vector<8x8x640xf32>,
    %c0_19 = arith.constant 0 : index
    %c0_20 = arith.constant 0 : index
    %c0_21 = arith.constant 0 : index
    %37 = vector.load %arg14[%c0_19, %c0_20, %c0_21] : memref<10x8x640xf32, #tpu.memory_space<vmem>>, vector<1x8x256xf32>
    %38 = vector.shape_cast %37 : vector<1x8x256xf32> to vector<8x256xf32>
    %c0_22 = arith.constant 0 : index
    %c0_23 = arith.constant 0 : index
    %39 = vector.load %arg15[%c0_22, %c0_23] : memref<128x1024xf32, #tpu.memory_space<vmem>>, vector<8x256xf32>
    tpu.vector_store %arg15[%c0_22, %c0_23], %38 {strides = array<i32>} : memref<128x1024xf32, #tpu.memory_space<vmem>>, vector<8x256xf32>,
    %c1_24 = arith.constant 1 : index
    %c0_25 = arith.constant 0 : index
    %c0_26 = arith.constant 0 : index
    %40 = vector.load %arg14[%c1_24, %c0_25, %c0_26] : memref<10x8x640xf32, #tpu.memory_space<vmem>>, vector<1x8x256xf32>
    %41 = vector.shape_cast %40 : vector<1x8x256xf32> to vector<8x256xf32>
    %c0_27 = arith.constant 0 : index
    %c256 = arith.constant 256 : index
    %42 = vector.load %arg15[%c0_27, %c256] : memref<128x1024xf32, #tpu.memory_space<vmem>>, vector<8x256xf32>
    tpu.vector_store %arg15[%c0_27, %c256], %41 {strides = array<i32>} : memref<128x1024xf32, #tpu.memory_space<vmem>>, vector<8x256xf32>,
    %c2 = arith.constant 2 : index
    %c0_28 = arith.constant 0 : index
    %c0_29 = arith.constant 0 : index
    %43 = vector.load %arg14[%c2, %c0_28, %c0_29] : memref<10x8x640xf32, #tpu.memory_space<vmem>>, vector<1x8x256xf32>
    %44 = vector.shape_cast %43 : vector<1x8x256xf32> to vector<8x256xf32>
    %c0_30 = arith.constant 0 : index
    %c512 = arith.constant 512 : index
    %45 = vector.load %arg15[%c0_30, %c512] : memref<128x1024xf32, #tpu.memory_space<vmem>>, vector<8x256xf32>
    tpu.vector_store %arg15[%c0_30, %c512], %44 {strides = array<i32>} : memref<128x1024xf32, #tpu.memory_space<vmem>>, vector<8x256xf32>,
    %c3 = arith.constant 3 : index
    %c0_31 = arith.constant 0 : index
    %c0_32 = arith.constant 0 : index
    %46 = vector.load %arg14[%c3, %c0_31, %c0_32] : memref<10x8x640xf32, #tpu.memory_space<vmem>>, vector<1x8x256xf32>
    %47 = vector.shape_cast %46 : vector<1x8x256xf32> to vector<8x256xf32>
    %c0_33 = arith.constant 0 : index
    %c768 = arith.constant 768 : index
    %48 = vector.load %arg15[%c0_33, %c768] : memref<128x1024xf32, #tpu.memory_space<vmem>>, vector<8x256xf32>
    tpu.vector_store %arg15[%c0_33, %c768], %47 {strides = array<i32>} : memref<128x1024xf32, #tpu.memory_space<vmem>>, vector<8x256xf32>,
    %c0_34 = arith.constant 0 : index
    %c0_35 = arith.constant 0 : index
    %c128 = arith.constant 128 : index
    %49 = vector.load %arg14[%c0_34, %c0_35, %c128] : memref<10x8x640xf32, #tpu.memory_space<vmem>>, vector<1x8x256xf32>
    %50 = vector.shape_cast %49 : vector<1x8x256xf32> to vector<8x256xf32>
    %c8 = arith.constant 8 : index
    %c0_36 = arith.constant 0 : index
    %51 = vector.load %arg15[%c8, %c0_36] : memref<128x1024xf32, #tpu.memory_space<vmem>>, vector<8x256xf32>
    tpu.vector_store %arg15[%c8, %c0_36], %50 {strides = array<i32>} : memref<128x1024xf32, #tpu.memory_space<vmem>>, vector<8x256xf32>,
    %c1_37 = arith.constant 1 : index
    %c0_38 = arith.constant 0 : index
    %c128_39 = arith.constant 128 : index
    %52 = vector.load %arg14[%c1_37, %c0_38, %c128_39] : memref<10x8x640xf32, #tpu.memory_space<vmem>>, vector<1x8x256xf32>
    %53 = vector.shape_cast %52 : vector<1x8x256xf32> to vector<8x256xf32>
    %c8_40 = arith.constant 8 : index
    %c256_41 = arith.constant 256 : index
    %54 = vector.load %arg15[%c8_40, %c256_41] : memref<128x1024xf32, #tpu.memory_space<vmem>>, vector<8x256xf32>
    tpu.vector_store %arg15[%c8_40, %c256_41], %53 {strides = array<i32>} : memref<128x1024xf32, #tpu.memory_space<vmem>>, vector<8x256xf32>,
    %c2_42 = arith.constant 2 : index
    %c0_43 = arith.constant 0 : index
    %c128_44 = arith.constant 128 : index
    %55 = vector.load %arg14[%c2_42, %c0_43, %c128_44] : memref<10x8x640xf32, #tpu.memory_space<vmem>>, vector<1x8x256xf32>
    %56 = vector.shape_cast %55 : vector<1x8x256xf32> to vector<8x256xf32>
    %c8_45 = arith.constant 8 : index
    %c512_46 = arith.constant 512 : index
    %57 = vector.load %arg15[%c8_45, %c512_46] : memref<128x1024xf32, #tpu.memory_space<vmem>>, vector<8x256xf32>
    tpu.vector_store %arg15[%c8_45, %c512_46], %56 {strides = array<i32>} : memref<128x1024xf32, #tpu.memory_space<vmem>>, vector<8x256xf32>,
    %c3_47 = arith.constant 3 : index
    %c0_48 = arith.constant 0 : index
    %c128_49 = arith.constant 128 : index
    %58 = vector.load %arg14[%c3_47, %c0_48, %c128_49] : memref<10x8x640xf32, #tpu.memory_space<vmem>>, vector<1x8x256xf32>
    %59 = vector.shape_cast %58 : vector<1x8x256xf32> to vector<8x256xf32>
    %c8_50 = arith.constant 8 : index
    %c768_51 = arith.constant 768 : index
    %60 = vector.load %arg15[%c8_50, %c768_51] : memref<128x1024xf32, #tpu.memory_space<vmem>>, vector<8x256xf32>
    tpu.vector_store %arg15[%c8_50, %c768_51], %59 {strides = array<i32>} : memref<128x1024xf32, #tpu.memory_space<vmem>>, vector<8x256xf32>,
    %c0_52 = arith.constant 0 : index
    %c0_53 = arith.constant 0 : index
    %c256_54 = arith.constant 256 : index
    %61 = vector.load %arg14[%c0_52, %c0_53, %c256_54] : memref<10x8x640xf32, #tpu.memory_space<vmem>>, vector<1x8x256xf32>
    %62 = vector.shape_cast %61 : vector<1x8x256xf32> to vector<8x256xf32>
    %c16 = arith.constant 16 : index
    %c0_55 = arith.constant 0 : index
    %63 = vector.load %arg15[%c16, %c0_55] : memref<128x1024xf32, #tpu.memory_space<vmem>>, vector<8x256xf32>
    tpu.vector_store %arg15[%c16, %c0_55], %62 {strides = array<i32>} : memref<128x1024xf32, #tpu.memory_space<vmem>>, vector<8x256xf32>,
    %c1_56 = arith.constant 1 : index
    %c0_57 = arith.constant 0 : index
    %c256_58 = arith.constant 256 : index
    %64 = vector.load %arg14[%c1_56, %c0_57, %c256_58] : memref<10x8x640xf32, #tpu.memory_space<vmem>>, vector<1x8x256xf32>
    %65 = vector.shape_cast %64 : vector<1x8x256xf32> to vector<8x256xf32>
    %c16_59 = arith.constant 16 : index
    %c256_60 = arith.constant 256 : index
    %66 = vector.load %arg15[%c16_59, %c256_60] : memref<128x1024xf32, #tpu.memory_space<vmem>>, vector<8x256xf32>
    tpu.vector_store %arg15[%c16_59, %c256_60], %65 {strides = array<i32>} : memref<128x1024xf32, #tpu.memory_space<vmem>>, vector<8x256xf32>,
    %c2_61 = arith.constant 2 : index
    %c0_62 = arith.constant 0 : index
    %c256_63 = arith.constant 256 : index
    %67 = vector.load %arg14[%c2_61, %c0_62, %c256_63] : memref<10x8x640xf32, #tpu.memory_space<vmem>>, vector<1x8x256xf32>
    %68 = vector.shape_cast %67 : vector<1x8x256xf32> to vector<8x256xf32>
    %c16_64 = arith.constant 16 : index
    %c512_65 = arith.constant 512 : index
    %69 = vector.load %arg15[%c16_64, %c512_65] : memref<128x1024xf32, #tpu.memory_space<vmem>>, vector<8x256xf32>
    tpu.vector_store %arg15[%c16_64, %c512_65], %68 {strides = array<i32>} : memref<128x1024xf32, #tpu.memory_space<vmem>>, vector<8x256xf32>,
    %c3_66 = arith.constant 3 : index
    %c0_67 = arith.constant 0 : index
    %c256_68 = arith.constant 256 : index
    %70 = vector.load %arg14[%c3_66, %c0_67, %c256_68] : memref<10x8x640xf32, #tpu.memory_space<vmem>>, vector<1x8x256xf32>
    %71 = vector.shape_cast %70 : vector<1x8x256xf32> to vector<8x256xf32>
    %c16_69 = arith.constant 16 : index
    %c768_70 = arith.constant 768 : index
    %72 = vector.load %arg15[%c16_69, %c768_70] : memref<128x1024xf32, #tpu.memory_space<vmem>>, vector<8x256xf32>
    tpu.vector_store %arg15[%c16_69, %c768_70], %71 {strides = array<i32>} : memref<128x1024xf32, #tpu.memory_space<vmem>>, vector<8x256xf32>,
    %c0_71 = arith.constant 0 : index
    %c0_72 = arith.constant 0 : index
    %c384 = arith.constant 384 : index
    %73 = vector.load %arg14[%c0_71, %c0_72, %c384] : memref<10x8x640xf32, #tpu.memory_space<vmem>>, vector<1x8x256xf32>
    %74 = vector.shape_cast %73 : vector<1x8x256xf32> to vector<8x256xf32>
    %c24 = arith.constant 24 : index
    %c0_73 = arith.constant 0 : index
    %75 = vector.load %arg15[%c24, %c0_73] : memref<128x1024xf32, #tpu.memory_space<vmem>>, vector<8x256xf32>
    tpu.vector_store %arg15[%c24, %c0_73], %74 {strides = array<i32>} : memref<128x1024xf32, #tpu.memory_space<vmem>>, vector<8x256xf32>,
    %c1_74 = arith.constant 1 : index
    %c0_75 = arith.constant 0 : index
    %c384_76 = arith.constant 384 : index
    %76 = vector.load %arg14[%c1_74, %c0_75, %c384_76] : memref<10x8x640xf32, #tpu.memory_space<vmem>>, vector<1x8x256xf32>
    %77 = vector.shape_cast %76 : vector<1x8x256xf32> to vector<8x256xf32>
    %c24_77 = arith.constant 24 : index
    %c256_78 = arith.constant 256 : index
    %78 = vector.load %arg15[%c24_77, %c256_78] : memref<128x1024xf32, #tpu.memory_space<vmem>>, vector<8x256xf32>
    tpu.vector_store %arg15[%c24_77, %c256_78], %77 {strides = array<i32>} : memref<128x1024xf32, #tpu.memory_space<vmem>>, vector<8x256xf32>,
    %c2_79 = arith.constant 2 : index
    %c0_80 = arith.constant 0 : index
    %c384_81 = arith.constant 384 : index
    %79 = vector.load %arg14[%c2_79, %c0_80, %c384_81] : memref<10x8x640xf32, #tpu.memory_space<vmem>>, vector<1x8x256xf32>
    %80 = vector.shape_cast %79 : vector<1x8x256xf32> to vector<8x256xf32>
    %c24_82 = arith.constant 24 : index
    %c512_83 = arith.constant 512 : index
    %81 = vector.load %arg15[%c24_82, %c512_83] : memref<128x1024xf32, #tpu.memory_space<vmem>>, vector<8x256xf32>
    tpu.vector_store %arg15[%c24_82, %c512_83], %80 {strides = array<i32>} : memref<128x1024xf32, #tpu.memory_space<vmem>>, vector<8x256xf32>,
    %c3_84 = arith.constant 3 : index
    %c0_85 = arith.constant 0 : index
    %c384_86 = arith.constant 384 : index
    %82 = vector.load %arg14[%c3_84, %c0_85, %c384_86] : memref<10x8x640xf32, #tpu.memory_space<vmem>>, vector<1x8x256xf32>
    %83 = vector.shape_cast %82 : vector<1x8x256xf32> to vector<8x256xf32>
    %c24_87 = arith.constant 24 : index
    %c768_88 = arith.constant 768 : index
    %84 = vector.load %arg15[%c24_87, %c768_88] : memref<128x1024xf32, #tpu.memory_space<vmem>>, vector<8x256xf32>
    tpu.vector_store %arg15[%c24_87, %c768_88], %83 {strides = array<i32>} : memref<128x1024xf32, #tpu.memory_space<vmem>>, vector<8x256xf32>,
    %c2_89 = arith.constant 2 : index
    %c0_90 = arith.constant 0 : index
    %c0_91 = arith.constant 0 : index
    %85 = vector.load %arg14[%c2_89, %c0_90, %c0_91] : memref<10x8x640xf32, #tpu.memory_space<vmem>>, vector<1x8x256xf32>
    %86 = vector.shape_cast %85 : vector<1x8x256xf32> to vector<8x256xf32>
    %c32 = arith.constant 32 : index
    %c0_92 = arith.constant 0 : index
    %87 = vector.load %arg15[%c32, %c0_92] : memref<128x1024xf32, #tpu.memory_space<vmem>>, vector<8x256xf32>
    tpu.vector_store %arg15[%c32, %c0_92], %86 {strides = array<i32>} : memref<128x1024xf32, #tpu.memory_space<vmem>>, vector<8x256xf32>,
    %c3_93 = arith.constant 3 : index
    %c0_94 = arith.constant 0 : index
    %c0_95 = arith.constant 0 : index
    %88 = vector.load %arg14[%c3_93, %c0_94, %c0_95] : memref<10x8x640xf32, #tpu.memory_space<vmem>>, vector<1x8x256xf32>
    %89 = vector.shape_cast %88 : vector<1x8x256xf32> to vector<8x256xf32>
    %c32_96 = arith.constant 32 : index
    %c256_97 = arith.constant 256 : index
    %90 = vector.load %arg15[%c32_96, %c256_97] : memref<128x1024xf32, #tpu.memory_space<vmem>>, vector<8x256xf32>
    tpu.vector_store %arg15[%c32_96, %c256_97], %89 {strides = array<i32>} : memref<128x1024xf32, #tpu.memory_space<vmem>>, vector<8x256xf32>,
    %c4 = arith.constant 4 : index
    %c0_98 = arith.constant 0 : index
    %c0_99 = arith.constant 0 : index
    %91 = vector.load %arg14[%c4, %c0_98, %c0_99] : memref<10x8x640xf32, #tpu.memory_space<vmem>>, vector<1x8x256xf32>
    %92 = vector.shape_cast %91 : vector<1x8x256xf32> to vector<8x256xf32>
    %c32_100 = arith.constant 32 : index
    %c512_101 = arith.constant 512 : index
    %93 = vector.load %arg15[%c32_100, %c512_101] : memref<128x1024xf32, #tpu.memory_space<vmem>>, vector<8x256xf32>
    tpu.vector_store %arg15[%c32_100, %c512_101], %92 {strides = array<i32>} : memref<128x1024xf32, #tpu.memory_space<vmem>>, vector<8x256xf32>,
    %c5 = arith.constant 5 : index
    %c0_102 = arith.constant 0 : index
    %c0_103 = arith.constant 0 : index
    %94 = vector.load %arg14[%c5, %c0_102, %c0_103] : memref<10x8x640xf32, #tpu.memory_space<vmem>>, vector<1x8x256xf32>
    %95 = vector.shape_cast %94 : vector<1x8x256xf32> to vector<8x256xf32>
    %c32_104 = arith.constant 32 : index
    %c768_105 = arith.constant 768 : index
    %96 = vector.load %arg15[%c32_104, %c768_105] : memref<128x1024xf32, #tpu.memory_space<vmem>>, vector<8x256xf32>
    tpu.vector_store %arg15[%c32_104, %c768_105], %95 {strides = array<i32>} : memref<128x1024xf32, #tpu.memory_space<vmem>>, vector<8x256xf32>,
    %c2_106 = arith.constant 2 : index
    %c0_107 = arith.constant 0 : index
    %c128_108 = arith.constant 128 : index
    %97 = vector.load %arg14[%c2_106, %c0_107, %c128_108] : memref<10x8x640xf32, #tpu.memory_space<vmem>>, vector<1x8x256xf32>
    %98 = vector.shape_cast %97 : vector<1x8x256xf32> to vector<8x256xf32>
    %c40 = arith.constant 40 : index
    %c0_109 = arith.constant 0 : index
    %99 = vector.load %arg15[%c40, %c0_109] : memref<128x1024xf32, #tpu.memory_space<vmem>>, vector<8x256xf32>
    tpu.vector_store %arg15[%c40, %c0_109], %98 {strides = array<i32>} : memref<128x1024xf32, #tpu.memory_space<vmem>>, vector<8x256xf32>,
    %c3_110 = arith.constant 3 : index
    %c0_111 = arith.constant 0 : index
    %c128_112 = arith.constant 128 : index
    %100 = vector.load %arg14[%c3_110, %c0_111, %c128_112] : memref<10x8x640xf32, #tpu.memory_space<vmem>>, vector<1x8x256xf32>
    %101 = vector.shape_cast %100 : vector<1x8x256xf32> to vector<8x256xf32>
    %c40_113 = arith.constant 40 : index
    %c256_114 = arith.constant 256 : index
    %102 = vector.load %arg15[%c40_113, %c256_114] : memref<128x1024xf32, #tpu.memory_space<vmem>>, vector<8x256xf32>
    tpu.vector_store %arg15[%c40_113, %c256_114], %101 {strides = array<i32>} : memref<128x1024xf32, #tpu.memory_space<vmem>>, vector<8x256xf32>,
    %c4_115 = arith.constant 4 : index
    %c0_116 = arith.constant 0 : index
    %c128_117 = arith.constant 128 : index
    %103 = vector.load %arg14[%c4_115, %c0_116, %c128_117] : memref<10x8x640xf32, #tpu.memory_space<vmem>>, vector<1x8x256xf32>
    %104 = vector.shape_cast %103 : vector<1x8x256xf32> to vector<8x256xf32>
    %c40_118 = arith.constant 40 : index
    %c512_119 = arith.constant 512 : index
    %105 = vector.load %arg15[%c40_118, %c512_119] : memref<128x1024xf32, #tpu.memory_space<vmem>>, vector<8x256xf32>
    tpu.vector_store %arg15[%c40_118, %c512_119], %104 {strides = array<i32>} : memref<128x1024xf32, #tpu.memory_space<vmem>>, vector<8x256xf32>,
    %c5_120 = arith.constant 5 : index
    %c0_121 = arith.constant 0 : index
    %c128_122 = arith.constant 128 : index
    %106 = vector.load %arg14[%c5_120, %c0_121, %c128_122] : memref<10x8x640xf32, #tpu.memory_space<vmem>>, vector<1x8x256xf32>
    %107 = vector.shape_cast %106 : vector<1x8x256xf32> to vector<8x256xf32>
    %c40_123 = arith.constant 40 : index
    %c768_124 = arith.constant 768 : index
    %108 = vector.load %arg15[%c40_123, %c768_124] : memref<128x1024xf32, #tpu.memory_space<vmem>>, vector<8x256xf32>
    tpu.vector_store %arg15[%c40_123, %c768_124], %107 {strides = array<i32>} : memref<128x1024xf32, #tpu.memory_space<vmem>>, vector<8x256xf32>,
    %c2_125 = arith.constant 2 : index
    %c0_126 = arith.constant 0 : index
    %c256_127 = arith.constant 256 : index
    %109 = vector.load %arg14[%c2_125, %c0_126, %c256_127] : memref<10x8x640xf32, #tpu.memory_space<vmem>>, vector<1x8x256xf32>
    %110 = vector.shape_cast %109 : vector<1x8x256xf32> to vector<8x256xf32>
    %c48 = arith.constant 48 : index
    %c0_128 = arith.constant 0 : index
    %111 = vector.load %arg15[%c48, %c0_128] : memref<128x1024xf32, #tpu.memory_space<vmem>>, vector<8x256xf32>
    tpu.vector_store %arg15[%c48, %c0_128], %110 {strides = array<i32>} : memref<128x1024xf32, #tpu.memory_space<vmem>>, vector<8x256xf32>,
    %c3_129 = arith.constant 3 : index
    %c0_130 = arith.constant 0 : index
    %c256_131 = arith.constant 256 : index
    %112 = vector.load %arg14[%c3_129, %c0_130, %c256_131] : memref<10x8x640xf32, #tpu.memory_space<vmem>>, vector<1x8x256xf32>
    %113 = vector.shape_cast %112 : vector<1x8x256xf32> to vector<8x256xf32>
    %c48_132 = arith.constant 48 : index
    %c256_133 = arith.constant 256 : index
    %114 = vector.load %arg15[%c48_132, %c256_133] : memref<128x1024xf32, #tpu.memory_space<vmem>>, vector<8x256xf32>
    tpu.vector_store %arg15[%c48_132, %c256_133], %113 {strides = array<i32>} : memref<128x1024xf32, #tpu.memory_space<vmem>>, vector<8x256xf32>,
    %c4_134 = arith.constant 4 : index
    %c0_135 = arith.constant 0 : index
    %c256_136 = arith.constant 256 : index
    %115 = vector.load %arg14[%c4_134, %c0_135, %c256_136] : memref<10x8x640xf32, #tpu.memory_space<vmem>>, vector<1x8x256xf32>
    %116 = vector.shape_cast %115 : vector<1x8x256xf32> to vector<8x256xf32>
    %c48_137 = arith.constant 48 : index
    %c512_138 = arith.constant 512 : index
    %117 = vector.load %arg15[%c48_137, %c512_138] : memref<128x1024xf32, #tpu.memory_space<vmem>>, vector<8x256xf32>
    tpu.vector_store %arg15[%c48_137, %c512_138], %116 {strides = array<i32>} : memref<128x1024xf32, #tpu.memory_space<vmem>>, vector<8x256xf32>,
    %c5_139 = arith.constant 5 : index
    %c0_140 = arith.constant 0 : index
    %c256_141 = arith.constant 256 : index
    %118 = vector.load %arg14[%c5_139, %c0_140, %c256_141] : memref<10x8x640xf32, #tpu.memory_space<vmem>>, vector<1x8x256xf32>
    %119 = vector.shape_cast %118 : vector<1x8x256xf32> to vector<8x256xf32>
    %c48_142 = arith.constant 48 : index
    %c768_143 = arith.constant 768 : index
    %120 = vector.load %arg15[%c48_142, %c768_143] : memref<128x1024xf32, #tpu.memory_space<vmem>>, vector<8x256xf32>
    tpu.vector_store %arg15[%c48_142, %c768_143], %119 {strides = array<i32>} : memref<128x1024xf32, #tpu.memory_space<vmem>>, vector<8x256xf32>,
    %c2_144 = arith.constant 2 : index
    %c0_145 = arith.constant 0 : index
    %c384_146 = arith.constant 384 : index
    %121 = vector.load %arg14[%c2_144, %c0_145, %c384_146] : memref<10x8x640xf32, #tpu.memory_space<vmem>>, vector<1x8x256xf32>
    %122 = vector.shape_cast %121 : vector<1x8x256xf32> to vector<8x256xf32>
    %c56 = arith.constant 56 : index
    %c0_147 = arith.constant 0 : index
    %123 = vector.load %arg15[%c56, %c0_147] : memref<128x1024xf32, #tpu.memory_space<vmem>>, vector<8x256xf32>
    tpu.vector_store %arg15[%c56, %c0_147], %122 {strides = array<i32>} : memref<128x1024xf32, #tpu.memory_space<vmem>>, vector<8x256xf32>,
    %c3_148 = arith.constant 3 : index
    %c0_149 = arith.constant 0 : index
    %c384_150 = arith.constant 384 : index
    %124 = vector.load %arg14[%c3_148, %c0_149, %c384_150] : memref<10x8x640xf32, #tpu.memory_space<vmem>>, vector<1x8x256xf32>
    %125 = vector.shape_cast %124 : vector<1x8x256xf32> to vector<8x256xf32>
    %c56_151 = arith.constant 56 : index
    %c256_152 = arith.constant 256 : index
    %126 = vector.load %arg15[%c56_151, %c256_152] : memref<128x1024xf32, #tpu.memory_space<vmem>>, vector<8x256xf32>
    tpu.vector_store %arg15[%c56_151, %c256_152], %125 {strides = array<i32>} : memref<128x1024xf32, #tpu.memory_space<vmem>>, vector<8x256xf32>,
    %c4_153 = arith.constant 4 : index
    %c0_154 = arith.constant 0 : index
    %c384_155 = arith.constant 384 : index
    %127 = vector.load %arg14[%c4_153, %c0_154, %c384_155] : memref<10x8x640xf32, #tpu.memory_space<vmem>>, vector<1x8x256xf32>
    %128 = vector.shape_cast %127 : vector<1x8x256xf32> to vector<8x256xf32>
    %c56_156 = arith.constant 56 : index
    %c512_157 = arith.constant 512 : index
    %129 = vector.load %arg15[%c56_156, %c512_157] : memref<128x1024xf32, #tpu.memory_space<vmem>>, vector<8x256xf32>
    tpu.vector_store %arg15[%c56_156, %c512_157], %128 {strides = array<i32>} : memref<128x1024xf32, #tpu.memory_space<vmem>>, vector<8x256xf32>,
    %c5_158 = arith.constant 5 : index
    %c0_159 = arith.constant 0 : index
    %c384_160 = arith.constant 384 : index
    %130 = vector.load %arg14[%c5_158, %c0_159, %c384_160] : memref<10x8x640xf32, #tpu.memory_space<vmem>>, vector<1x8x256xf32>
    %131 = vector.shape_cast %130 : vector<1x8x256xf32> to vector<8x256xf32>
    %c56_161 = arith.constant 56 : index
    %c768_162 = arith.constant 768 : index
    %132 = vector.load %arg15[%c56_161, %c768_162] : memref<128x1024xf32, #tpu.memory_space<vmem>>, vector<8x256xf32>
    tpu.vector_store %arg15[%c56_161, %c768_162], %131 {strides = array<i32>} : memref<128x1024xf32, #tpu.memory_space<vmem>>, vector<8x256xf32>,
    %c4_163 = arith.constant 4 : index
    %c0_164 = arith.constant 0 : index
    %c0_165 = arith.constant 0 : index
    %133 = vector.load %arg14[%c4_163, %c0_164, %c0_165] : memref<10x8x640xf32, #tpu.memory_space<vmem>>, vector<1x8x256xf32>
    %134 = vector.shape_cast %133 : vector<1x8x256xf32> to vector<8x256xf32>
    %c64 = arith.constant 64 : index
    %c0_166 = arith.constant 0 : index
    %135 = vector.load %arg15[%c64, %c0_166] : memref<128x1024xf32, #tpu.memory_space<vmem>>, vector<8x256xf32>
    tpu.vector_store %arg15[%c64, %c0_166], %134 {strides = array<i32>} : memref<128x1024xf32, #tpu.memory_space<vmem>>, vector<8x256xf32>,
    %c5_167 = arith.constant 5 : index
    %c0_168 = arith.constant 0 : index
    %c0_169 = arith.constant 0 : index
    %136 = vector.load %arg14[%c5_167, %c0_168, %c0_169] : memref<10x8x640xf32, #tpu.memory_space<vmem>>, vector<1x8x256xf32>
    %137 = vector.shape_cast %136 : vector<1x8x256xf32> to vector<8x256xf32>
    %c64_170 = arith.constant 64 : index
    %c256_171 = arith.constant 256 : index
    %138 = vector.load %arg15[%c64_170, %c256_171] : memref<128x1024xf32, #tpu.memory_space<vmem>>, vector<8x256xf32>
    tpu.vector_store %arg15[%c64_170, %c256_171], %137 {strides = array<i32>} : memref<128x1024xf32, #tpu.memory_space<vmem>>, vector<8x256xf32>,
    %c6 = arith.constant 6 : index
    %c0_172 = arith.constant 0 : index
    %c0_173 = arith.constant 0 : index
    %139 = vector.load %arg14[%c6, %c0_172, %c0_173] : memref<10x8x640xf32, #tpu.memory_space<vmem>>, vector<1x8x256xf32>
    %140 = vector.shape_cast %139 : vector<1x8x256xf32> to vector<8x256xf32>
    %c64_174 = arith.constant 64 : index
    %c512_175 = arith.constant 512 : index
    %141 = vector.load %arg15[%c64_174, %c512_175] : memref<128x1024xf32, #tpu.memory_space<vmem>>, vector<8x256xf32>
    tpu.vector_store %arg15[%c64_174, %c512_175], %140 {strides = array<i32>} : memref<128x1024xf32, #tpu.memory_space<vmem>>, vector<8x256xf32>,
    %c7 = arith.constant 7 : index
    %c0_176 = arith.constant 0 : index
    %c0_177 = arith.constant 0 : index
    %142 = vector.load %arg14[%c7, %c0_176, %c0_177] : memref<10x8x640xf32, #tpu.memory_space<vmem>>, vector<1x8x256xf32>
    %143 = vector.shape_cast %142 : vector<1x8x256xf32> to vector<8x256xf32>
    %c64_178 = arith.constant 64 : index
    %c768_179 = arith.constant 768 : index
    %144 = vector.load %arg15[%c64_178, %c768_179] : memref<128x1024xf32, #tpu.memory_space<vmem>>, vector<8x256xf32>
    tpu.vector_store %arg15[%c64_178, %c768_179], %143 {strides = array<i32>} : memref<128x1024xf32, #tpu.memory_space<vmem>>, vector<8x256xf32>,
    %c4_180 = arith.constant 4 : index
    %c0_181 = arith.constant 0 : index
    %c128_182 = arith.constant 128 : index
    %145 = vector.load %arg14[%c4_180, %c0_181, %c128_182] : memref<10x8x640xf32, #tpu.memory_space<vmem>>, vector<1x8x256xf32>
    %146 = vector.shape_cast %145 : vector<1x8x256xf32> to vector<8x256xf32>
    %c72 = arith.constant 72 : index
    %c0_183 = arith.constant 0 : index
    %147 = vector.load %arg15[%c72, %c0_183] : memref<128x1024xf32, #tpu.memory_space<vmem>>, vector<8x256xf32>
    tpu.vector_store %arg15[%c72, %c0_183], %146 {strides = array<i32>} : memref<128x1024xf32, #tpu.memory_space<vmem>>, vector<8x256xf32>,
    %c5_184 = arith.constant 5 : index
    %c0_185 = arith.constant 0 : index
    %c128_186 = arith.constant 128 : index
    %148 = vector.load %arg14[%c5_184, %c0_185, %c128_186] : memref<10x8x640xf32, #tpu.memory_space<vmem>>, vector<1x8x256xf32>
    %149 = vector.shape_cast %148 : vector<1x8x256xf32> to vector<8x256xf32>
    %c72_187 = arith.constant 72 : index
    %c256_188 = arith.constant 256 : index
    %150 = vector.load %arg15[%c72_187, %c256_188] : memref<128x1024xf32, #tpu.memory_space<vmem>>, vector<8x256xf32>
    tpu.vector_store %arg15[%c72_187, %c256_188], %149 {strides = array<i32>} : memref<128x1024xf32, #tpu.memory_space<vmem>>, vector<8x256xf32>,
    %c6_189 = arith.constant 6 : index
    %c0_190 = arith.constant 0 : index
    %c128_191 = arith.constant 128 : index
    %151 = vector.load %arg14[%c6_189, %c0_190, %c128_191] : memref<10x8x640xf32, #tpu.memory_space<vmem>>, vector<1x8x256xf32>
    %152 = vector.shape_cast %151 : vector<1x8x256xf32> to vector<8x256xf32>
    %c72_192 = arith.constant 72 : index
    %c512_193 = arith.constant 512 : index
    %153 = vector.load %arg15[%c72_192, %c512_193] : memref<128x1024xf32, #tpu.memory_space<vmem>>, vector<8x256xf32>
    tpu.vector_store %arg15[%c72_192, %c512_193], %152 {strides = array<i32>} : memref<128x1024xf32, #tpu.memory_space<vmem>>, vector<8x256xf32>,
    %c7_194 = arith.constant 7 : index
    %c0_195 = arith.constant 0 : index
    %c128_196 = arith.constant 128 : index
    %154 = vector.load %arg14[%c7_194, %c0_195, %c128_196] : memref<10x8x640xf32, #tpu.memory_space<vmem>>, vector<1x8x256xf32>
    %155 = vector.shape_cast %154 : vector<1x8x256xf32> to vector<8x256xf32>
    %c72_197 = arith.constant 72 : index
    %c768_198 = arith.constant 768 : index
    %156 = vector.load %arg15[%c72_197, %c768_198] : memref<128x1024xf32, #tpu.memory_space<vmem>>, vector<8x256xf32>
    tpu.vector_store %arg15[%c72_197, %c768_198], %155 {strides = array<i32>} : memref<128x1024xf32, #tpu.memory_space<vmem>>, vector<8x256xf32>,
    %c4_199 = arith.constant 4 : index
    %c0_200 = arith.constant 0 : index
    %c256_201 = arith.constant 256 : index
    %157 = vector.load %arg14[%c4_199, %c0_200, %c256_201] : memref<10x8x640xf32, #tpu.memory_space<vmem>>, vector<1x8x256xf32>
    %158 = vector.shape_cast %157 : vector<1x8x256xf32> to vector<8x256xf32>
    %c80 = arith.constant 80 : index
    %c0_202 = arith.constant 0 : index
    %159 = vector.load %arg15[%c80, %c0_202] : memref<128x1024xf32, #tpu.memory_space<vmem>>, vector<8x256xf32>
    tpu.vector_store %arg15[%c80, %c0_202], %158 {strides = array<i32>} : memref<128x1024xf32, #tpu.memory_space<vmem>>, vector<8x256xf32>,
    %c5_203 = arith.constant 5 : index
    %c0_204 = arith.constant 0 : index
    %c256_205 = arith.constant 256 : index
    %160 = vector.load %arg14[%c5_203, %c0_204, %c256_205] : memref<10x8x640xf32, #tpu.memory_space<vmem>>, vector<1x8x256xf32>
    %161 = vector.shape_cast %160 : vector<1x8x256xf32> to vector<8x256xf32>
    %c80_206 = arith.constant 80 : index
    %c256_207 = arith.constant 256 : index
    %162 = vector.load %arg15[%c80_206, %c256_207] : memref<128x1024xf32, #tpu.memory_space<vmem>>, vector<8x256xf32>
    tpu.vector_store %arg15[%c80_206, %c256_207], %161 {strides = array<i32>} : memref<128x1024xf32, #tpu.memory_space<vmem>>, vector<8x256xf32>,
    %c6_208 = arith.constant 6 : index
    %c0_209 = arith.constant 0 : index
    %c256_210 = arith.constant 256 : index
    %163 = vector.load %arg14[%c6_208, %c0_209, %c256_210] : memref<10x8x640xf32, #tpu.memory_space<vmem>>, vector<1x8x256xf32>
    %164 = vector.shape_cast %163 : vector<1x8x256xf32> to vector<8x256xf32>
    %c80_211 = arith.constant 80 : index
    %c512_212 = arith.constant 512 : index
    %165 = vector.load %arg15[%c80_211, %c512_212] : memref<128x1024xf32, #tpu.memory_space<vmem>>, vector<8x256xf32>
    tpu.vector_store %arg15[%c80_211, %c512_212], %164 {strides = array<i32>} : memref<128x1024xf32, #tpu.memory_space<vmem>>, vector<8x256xf32>,
    %c7_213 = arith.constant 7 : index
    %c0_214 = arith.constant 0 : index
    %c256_215 = arith.constant 256 : index
    %166 = vector.load %arg14[%c7_213, %c0_214, %c256_215] : memref<10x8x640xf32, #tpu.memory_space<vmem>>, vector<1x8x256xf32>
    %167 = vector.shape_cast %166 : vector<1x8x256xf32> to vector<8x256xf32>
    %c80_216 = arith.constant 80 : index
    %c768_217 = arith.constant 768 : index
    %168 = vector.load %arg15[%c80_216, %c768_217] : memref<128x1024xf32, #tpu.memory_space<vmem>>, vector<8x256xf32>
    tpu.vector_store %arg15[%c80_216, %c768_217], %167 {strides = array<i32>} : memref<128x1024xf32, #tpu.memory_space<vmem>>, vector<8x256xf32>,
    %c4_218 = arith.constant 4 : index
    %c0_219 = arith.constant 0 : index
    %c384_220 = arith.constant 384 : index
    %169 = vector.load %arg14[%c4_218, %c0_219, %c384_220] : memref<10x8x640xf32, #tpu.memory_space<vmem>>, vector<1x8x256xf32>
    %170 = vector.shape_cast %169 : vector<1x8x256xf32> to vector<8x256xf32>
    %c88 = arith.constant 88 : index
    %c0_221 = arith.constant 0 : index
    %171 = vector.load %arg15[%c88, %c0_221] : memref<128x1024xf32, #tpu.memory_space<vmem>>, vector<8x256xf32>
    tpu.vector_store %arg15[%c88, %c0_221], %170 {strides = array<i32>} : memref<128x1024xf32, #tpu.memory_space<vmem>>, vector<8x256xf32>,
    %c5_222 = arith.constant 5 : index
    %c0_223 = arith.constant 0 : index
    %c384_224 = arith.constant 384 : index
    %172 = vector.load %arg14[%c5_222, %c0_223, %c384_224] : memref<10x8x640xf32, #tpu.memory_space<vmem>>, vector<1x8x256xf32>
    %173 = vector.shape_cast %172 : vector<1x8x256xf32> to vector<8x256xf32>
    %c88_225 = arith.constant 88 : index
    %c256_226 = arith.constant 256 : index
    %174 = vector.load %arg15[%c88_225, %c256_226] : memref<128x1024xf32, #tpu.memory_space<vmem>>, vector<8x256xf32>
    tpu.vector_store %arg15[%c88_225, %c256_226], %173 {strides = array<i32>} : memref<128x1024xf32, #tpu.memory_space<vmem>>, vector<8x256xf32>,
    %c6_227 = arith.constant 6 : index
    %c0_228 = arith.constant 0 : index
    %c384_229 = arith.constant 384 : index
    %175 = vector.load %arg14[%c6_227, %c0_228, %c384_229] : memref<10x8x640xf32, #tpu.memory_space<vmem>>, vector<1x8x256xf32>
    %176 = vector.shape_cast %175 : vector<1x8x256xf32> to vector<8x256xf32>
    %c88_230 = arith.constant 88 : index
    %c512_231 = arith.constant 512 : index
    %177 = vector.load %arg15[%c88_230, %c512_231] : memref<128x1024xf32, #tpu.memory_space<vmem>>, vector<8x256xf32>
    tpu.vector_store %arg15[%c88_230, %c512_231], %176 {strides = array<i32>} : memref<128x1024xf32, #tpu.memory_space<vmem>>, vector<8x256xf32>,
    %c7_232 = arith.constant 7 : index
    %c0_233 = arith.constant 0 : index
    %c384_234 = arith.constant 384 : index
    %178 = vector.load %arg14[%c7_232, %c0_233, %c384_234] : memref<10x8x640xf32, #tpu.memory_space<vmem>>, vector<1x8x256xf32>
    %179 = vector.shape_cast %178 : vector<1x8x256xf32> to vector<8x256xf32>
    %c88_235 = arith.constant 88 : index
    %c768_236 = arith.constant 768 : index
    %180 = vector.load %arg15[%c88_235, %c768_236] : memref<128x1024xf32, #tpu.memory_space<vmem>>, vector<8x256xf32>
    tpu.vector_store %arg15[%c88_235, %c768_236], %179 {strides = array<i32>} : memref<128x1024xf32, #tpu.memory_space<vmem>>, vector<8x256xf32>,
    %c6_237 = arith.constant 6 : index
    %c0_238 = arith.constant 0 : index
    %c0_239 = arith.constant 0 : index
    %181 = vector.load %arg14[%c6_237, %c0_238, %c0_239] : memref<10x8x640xf32, #tpu.memory_space<vmem>>, vector<1x8x256xf32>
    %182 = vector.shape_cast %181 : vector<1x8x256xf32> to vector<8x256xf32>
    %c96 = arith.constant 96 : index
    %c0_240 = arith.constant 0 : index
    %183 = vector.load %arg15[%c96, %c0_240] : memref<128x1024xf32, #tpu.memory_space<vmem>>, vector<8x256xf32>
    tpu.vector_store %arg15[%c96, %c0_240], %182 {strides = array<i32>} : memref<128x1024xf32, #tpu.memory_space<vmem>>, vector<8x256xf32>,
    %c7_241 = arith.constant 7 : index
    %c0_242 = arith.constant 0 : index
    %c0_243 = arith.constant 0 : index
    %184 = vector.load %arg14[%c7_241, %c0_242, %c0_243] : memref<10x8x640xf32, #tpu.memory_space<vmem>>, vector<1x8x256xf32>
    %185 = vector.shape_cast %184 : vector<1x8x256xf32> to vector<8x256xf32>
    %c96_244 = arith.constant 96 : index
    %c256_245 = arith.constant 256 : index
    %186 = vector.load %arg15[%c96_244, %c256_245] : memref<128x1024xf32, #tpu.memory_space<vmem>>, vector<8x256xf32>
    tpu.vector_store %arg15[%c96_244, %c256_245], %185 {strides = array<i32>} : memref<128x1024xf32, #tpu.memory_space<vmem>>, vector<8x256xf32>,
    %c8_246 = arith.constant 8 : index
    %c0_247 = arith.constant 0 : index
    %c0_248 = arith.constant 0 : index
    %187 = vector.load %arg14[%c8_246, %c0_247, %c0_248] : memref<10x8x640xf32, #tpu.memory_space<vmem>>, vector<1x8x256xf32>
    %188 = vector.shape_cast %187 : vector<1x8x256xf32> to vector<8x256xf32>
    %c96_249 = arith.constant 96 : index
    %c512_250 = arith.constant 512 : index
    %189 = vector.load %arg15[%c96_249, %c512_250] : memref<128x1024xf32, #tpu.memory_space<vmem>>, vector<8x256xf32>
    tpu.vector_store %arg15[%c96_249, %c512_250], %188 {strides = array<i32>} : memref<128x1024xf32, #tpu.memory_space<vmem>>, vector<8x256xf32>,
    %c9_251 = arith.constant 9 : index
    %c0_252 = arith.constant 0 : index
    %c0_253 = arith.constant 0 : index
    %190 = vector.load %arg14[%c9_251, %c0_252, %c0_253] : memref<10x8x640xf32, #tpu.memory_space<vmem>>, vector<1x8x256xf32>
    %191 = vector.shape_cast %190 : vector<1x8x256xf32> to vector<8x256xf32>
    %c96_254 = arith.constant 96 : index
    %c768_255 = arith.constant 768 : index
    %192 = vector.load %arg15[%c96_254, %c768_255] : memref<128x1024xf32, #tpu.memory_space<vmem>>, vector<8x256xf32>
    tpu.vector_store %arg15[%c96_254, %c768_255], %191 {strides = array<i32>} : memref<128x1024xf32, #tpu.memory_space<vmem>>, vector<8x256xf32>,
    %c6_256 = arith.constant 6 : index
    %c0_257 = arith.constant 0 : index
    %c128_258 = arith.constant 128 : index
    %193 = vector.load %arg14[%c6_256, %c0_257, %c128_258] : memref<10x8x640xf32, #tpu.memory_space<vmem>>, vector<1x8x256xf32>
    %194 = vector.shape_cast %193 : vector<1x8x256xf32> to vector<8x256xf32>
    %c104 = arith.constant 104 : index
    %c0_259 = arith.constant 0 : index
    %195 = vector.load %arg15[%c104, %c0_259] : memref<128x1024xf32, #tpu.memory_space<vmem>>, vector<8x256xf32>
    tpu.vector_store %arg15[%c104, %c0_259], %194 {strides = array<i32>} : memref<128x1024xf32, #tpu.memory_space<vmem>>, vector<8x256xf32>,
    %c7_260 = arith.constant 7 : index
    %c0_261 = arith.constant 0 : index
    %c128_262 = arith.constant 128 : index
    %196 = vector.load %arg14[%c7_260, %c0_261, %c128_262] : memref<10x8x640xf32, #tpu.memory_space<vmem>>, vector<1x8x256xf32>
    %197 = vector.shape_cast %196 : vector<1x8x256xf32> to vector<8x256xf32>
    %c104_263 = arith.constant 104 : index
    %c256_264 = arith.constant 256 : index
    %198 = vector.load %arg15[%c104_263, %c256_264] : memref<128x1024xf32, #tpu.memory_space<vmem>>, vector<8x256xf32>
    tpu.vector_store %arg15[%c104_263, %c256_264], %197 {strides = array<i32>} : memref<128x1024xf32, #tpu.memory_space<vmem>>, vector<8x256xf32>,
    %c8_265 = arith.constant 8 : index
    %c0_266 = arith.constant 0 : index
    %c128_267 = arith.constant 128 : index
    %199 = vector.load %arg14[%c8_265, %c0_266, %c128_267] : memref<10x8x640xf32, #tpu.memory_space<vmem>>, vector<1x8x256xf32>
    %200 = vector.shape_cast %199 : vector<1x8x256xf32> to vector<8x256xf32>
    %c104_268 = arith.constant 104 : index
    %c512_269 = arith.constant 512 : index
    %201 = vector.load %arg15[%c104_268, %c512_269] : memref<128x1024xf32, #tpu.memory_space<vmem>>, vector<8x256xf32>
    tpu.vector_store %arg15[%c104_268, %c512_269], %200 {strides = array<i32>} : memref<128x1024xf32, #tpu.memory_space<vmem>>, vector<8x256xf32>,
    %c9_270 = arith.constant 9 : index
    %c0_271 = arith.constant 0 : index
    %c128_272 = arith.constant 128 : index
    %202 = vector.load %arg14[%c9_270, %c0_271, %c128_272] : memref<10x8x640xf32, #tpu.memory_space<vmem>>, vector<1x8x256xf32>
    %203 = vector.shape_cast %202 : vector<1x8x256xf32> to vector<8x256xf32>
    %c104_273 = arith.constant 104 : index
    %c768_274 = arith.constant 768 : index
    %204 = vector.load %arg15[%c104_273, %c768_274] : memref<128x1024xf32, #tpu.memory_space<vmem>>, vector<8x256xf32>
    tpu.vector_store %arg15[%c104_273, %c768_274], %203 {strides = array<i32>} : memref<128x1024xf32, #tpu.memory_space<vmem>>, vector<8x256xf32>,
    %c6_275 = arith.constant 6 : index
    %c0_276 = arith.constant 0 : index
    %c256_277 = arith.constant 256 : index
    %205 = vector.load %arg14[%c6_275, %c0_276, %c256_277] : memref<10x8x640xf32, #tpu.memory_space<vmem>>, vector<1x8x256xf32>
    %206 = vector.shape_cast %205 : vector<1x8x256xf32> to vector<8x256xf32>
    %c112 = arith.constant 112 : index
    %c0_278 = arith.constant 0 : index
    %207 = vector.load %arg15[%c112, %c0_278] : memref<128x1024xf32, #tpu.memory_space<vmem>>, vector<8x256xf32>
    tpu.vector_store %arg15[%c112, %c0_278], %206 {strides = array<i32>} : memref<128x1024xf32, #tpu.memory_space<vmem>>, vector<8x256xf32>,
    %c7_279 = arith.constant 7 : index
    %c0_280 = arith.constant 0 : index
    %c256_281 = arith.constant 256 : index
    %208 = vector.load %arg14[%c7_279, %c0_280, %c256_281] : memref<10x8x640xf32, #tpu.memory_space<vmem>>, vector<1x8x256xf32>
    %209 = vector.shape_cast %208 : vector<1x8x256xf32> to vector<8x256xf32>
    %c112_282 = arith.constant 112 : index
    %c256_283 = arith.constant 256 : index
    %210 = vector.load %arg15[%c112_282, %c256_283] : memref<128x1024xf32, #tpu.memory_space<vmem>>, vector<8x256xf32>
    tpu.vector_store %arg15[%c112_282, %c256_283], %209 {strides = array<i32>} : memref<128x1024xf32, #tpu.memory_space<vmem>>, vector<8x256xf32>,
    %c8_284 = arith.constant 8 : index
    %c0_285 = arith.constant 0 : index
    %c256_286 = arith.constant 256 : index
    %211 = vector.load %arg14[%c8_284, %c0_285, %c256_286] : memref<10x8x640xf32, #tpu.memory_space<vmem>>, vector<1x8x256xf32>
    %212 = vector.shape_cast %211 : vector<1x8x256xf32> to vector<8x256xf32>
    %c112_287 = arith.constant 112 : index
    %c512_288 = arith.constant 512 : index
    %213 = vector.load %arg15[%c112_287, %c512_288] : memref<128x1024xf32, #tpu.memory_space<vmem>>, vector<8x256xf32>
    tpu.vector_store %arg15[%c112_287, %c512_288], %212 {strides = array<i32>} : memref<128x1024xf32, #tpu.memory_space<vmem>>, vector<8x256xf32>,
    %c9_289 = arith.constant 9 : index
    %c0_290 = arith.constant 0 : index
    %c256_291 = arith.constant 256 : index
    %214 = vector.load %arg14[%c9_289, %c0_290, %c256_291] : memref<10x8x640xf32, #tpu.memory_space<vmem>>, vector<1x8x256xf32>
    %215 = vector.shape_cast %214 : vector<1x8x256xf32> to vector<8x256xf32>
    %c112_292 = arith.constant 112 : index
    %c768_293 = arith.constant 768 : index
    %216 = vector.load %arg15[%c112_292, %c768_293] : memref<128x1024xf32, #tpu.memory_space<vmem>>, vector<8x256xf32>
    tpu.vector_store %arg15[%c112_292, %c768_293], %215 {strides = array<i32>} : memref<128x1024xf32, #tpu.memory_space<vmem>>, vector<8x256xf32>,
    %c6_294 = arith.constant 6 : index
    %c0_295 = arith.constant 0 : index
    %c384_296 = arith.constant 384 : index
    %217 = vector.load %arg14[%c6_294, %c0_295, %c384_296] : memref<10x8x640xf32, #tpu.memory_space<vmem>>, vector<1x8x256xf32>
    %218 = vector.shape_cast %217 : vector<1x8x256xf32> to vector<8x256xf32>
    %c120 = arith.constant 120 : index
    %c0_297 = arith.constant 0 : index
    %219 = vector.load %arg15[%c120, %c0_297] : memref<128x1024xf32, #tpu.memory_space<vmem>>, vector<8x256xf32>
    tpu.vector_store %arg15[%c120, %c0_297], %218 {strides = array<i32>} : memref<128x1024xf32, #tpu.memory_space<vmem>>, vector<8x256xf32>,
    %c7_298 = arith.constant 7 : index
    %c0_299 = arith.constant 0 : index
    %c384_300 = arith.constant 384 : index
    %220 = vector.load %arg14[%c7_298, %c0_299, %c384_300] : memref<10x8x640xf32, #tpu.memory_space<vmem>>, vector<1x8x256xf32>
    %221 = vector.shape_cast %220 : vector<1x8x256xf32> to vector<8x256xf32>
    %c120_301 = arith.constant 120 : index
    %c256_302 = arith.constant 256 : index
    %222 = vector.load %arg15[%c120_301, %c256_302] : memref<128x1024xf32, #tpu.memory_space<vmem>>, vector<8x256xf32>
    tpu.vector_store %arg15[%c120_301, %c256_302], %221 {strides = array<i32>} : memref<128x1024xf32, #tpu.memory_space<vmem>>, vector<8x256xf32>,
    %c8_303 = arith.constant 8 : index
    %c0_304 = arith.constant 0 : index
    %c384_305 = arith.constant 384 : index
    %223 = vector.load %arg14[%c8_303, %c0_304, %c384_305] : memref<10x8x640xf32, #tpu.memory_space<vmem>>, vector<1x8x256xf32>
    %224 = vector.shape_cast %223 : vector<1x8x256xf32> to vector<8x256xf32>
    %c120_306 = arith.constant 120 : index
    %c512_307 = arith.constant 512 : index
    %225 = vector.load %arg15[%c120_306, %c512_307] : memref<128x1024xf32, #tpu.memory_space<vmem>>, vector<8x256xf32>
    tpu.vector_store %arg15[%c120_306, %c512_307], %224 {strides = array<i32>} : memref<128x1024xf32, #tpu.memory_space<vmem>>, vector<8x256xf32>,
    %c9_308 = arith.constant 9 : index
    %c0_309 = arith.constant 0 : index
    %c384_310 = arith.constant 384 : index
    %226 = vector.load %arg14[%c9_308, %c0_309, %c384_310] : memref<10x8x640xf32, #tpu.memory_space<vmem>>, vector<1x8x256xf32>
    %227 = vector.shape_cast %226 : vector<1x8x256xf32> to vector<8x256xf32>
    %c120_311 = arith.constant 120 : index
    %c768_312 = arith.constant 768 : index
    %228 = vector.load %arg15[%c120_311, %c768_312] : memref<128x1024xf32, #tpu.memory_space<vmem>>, vector<8x256xf32>
    tpu.vector_store %arg15[%c120_311, %c768_312], %227 {strides = array<i32>} : memref<128x1024xf32, #tpu.memory_space<vmem>>, vector<8x256xf32>,
    %c0_313 = arith.constant 0 : index
    %c0_314 = arith.constant 0 : index
    %229 = vector.load %arg4[%c0_313, %c0_314] : memref<1x128xf32, #tpu.memory_space<vmem>>, vector<1x128xf32>
    %c0_315 = arith.constant 0 : index
    %c0_316 = arith.constant 0 : index
    %230 = vector.load %arg15[%c0_315, %c0_316] : memref<128x1024xf32, #tpu.memory_space<vmem>>, vector<128x256xf32>
    %231 = arith.truncf %230 : vector<128x256xf32> to vector<128x256xbf16>
    %c0_317 = arith.constant 0 : index
    %c0_318 = arith.constant 0 : index
    %232 = vector.load %arg3[%c0_317, %c0_318] : memref<1024x128xbf16, #tpu.memory_space<vmem>>, vector<256x128xbf16>
    %cst_319 = arith.constant dense<0.000000e+00> : vector<128x128xf32>
    %233 = tpu.matmul %231, %232, %cst_319 {dimension_numbers = #tpu.dot_dimension_numbers<[1], [0], [0], [1], [0, 0, 1, 1], [], []>} : vector<128x256xbf16>, vector<256x128xbf16>, vector<128x128xf32> -> vector<128x128xf32>
    %234 = vector.broadcast %229 : vector<1x128xf32> to vector<128x128xf32>
    %235 = arith.addf %234, %233 : vector<128x128xf32>
    %c0_320 = arith.constant 0 : index
    %c256_321 = arith.constant 256 : index
    %236 = vector.load %arg15[%c0_320, %c256_321] : memref<128x1024xf32, #tpu.memory_space<vmem>>, vector<128x256xf32>
    %237 = arith.truncf %236 : vector<128x256xf32> to vector<128x256xbf16>
    %c256_322 = arith.constant 256 : index
    %c0_323 = arith.constant 0 : index
    %238 = vector.load %arg3[%c256_322, %c0_323] : memref<1024x128xbf16, #tpu.memory_space<vmem>>, vector<256x128xbf16>
    %cst_324 = arith.constant dense<0.000000e+00> : vector<128x128xf32>
    %239 = tpu.matmul %237, %238, %cst_324 {dimension_numbers = #tpu.dot_dimension_numbers<[1], [0], [0], [1], [0, 0, 1, 1], [], []>} : vector<128x256xbf16>, vector<256x128xbf16>, vector<128x128xf32> -> vector<128x128xf32>
    %240 = arith.addf %235, %239 : vector<128x128xf32>
    %c0_325 = arith.constant 0 : index
    %c512_326 = arith.constant 512 : index
    %241 = vector.load %arg15[%c0_325, %c512_326] : memref<128x1024xf32, #tpu.memory_space<vmem>>, vector<128x256xf32>
    %242 = arith.truncf %241 : vector<128x256xf32> to vector<128x256xbf16>
    %c512_327 = arith.constant 512 : index
    %c0_328 = arith.constant 0 : index
    %243 = vector.load %arg3[%c512_327, %c0_328] : memref<1024x128xbf16, #tpu.memory_space<vmem>>, vector<256x128xbf16>
    %cst_329 = arith.constant dense<0.000000e+00> : vector<128x128xf32>
    %244 = tpu.matmul %242, %243, %cst_329 {dimension_numbers = #tpu.dot_dimension_numbers<[1], [0], [0], [1], [0, 0, 1, 1], [], []>} : vector<128x256xbf16>, vector<256x128xbf16>, vector<128x128xf32> -> vector<128x128xf32>
    %245 = arith.addf %240, %244 : vector<128x128xf32>
    %c0_330 = arith.constant 0 : index
    %c768_331 = arith.constant 768 : index
    %246 = vector.load %arg15[%c0_330, %c768_331] : memref<128x1024xf32, #tpu.memory_space<vmem>>, vector<128x256xf32>
    %247 = arith.truncf %246 : vector<128x256xf32> to vector<128x256xbf16>
    %c768_332 = arith.constant 768 : index
    %c0_333 = arith.constant 0 : index
    %248 = vector.load %arg3[%c768_332, %c0_333] : memref<1024x128xbf16, #tpu.memory_space<vmem>>, vector<256x128xbf16>
    %cst_334 = arith.constant dense<0.000000e+00> : vector<128x128xf32>
    %249 = tpu.matmul %247, %248, %cst_334 {dimension_numbers = #tpu.dot_dimension_numbers<[1], [0], [0], [1], [0, 0, 1, 1], [], []>} : vector<128x256xbf16>, vector<256x128xbf16>, vector<128x128xf32> -> vector<128x128xf32>
    %250 = arith.addf %245, %249 : vector<128x128xf32>
    %251 = tpu.iota {dimensions = array<i32: 0>} : vector<128x1xi32>
    %c8_i32_335 = arith.constant 8 : i32
    %c0_i32_336 = arith.constant 0 : i32
    %252 = arith.cmpi eq, %c8_i32_335, %c0_i32_336 : i32
    %c1_i32_337 = arith.constant 1 : i32
    %253 = arith.select %252, %c1_i32_337, %c8_i32_335 : i32
    %254 = vector.broadcast %253 : i32 to vector<128x1xi32>
    %255 = arith.remsi %251, %254 : vector<128x1xi32>
    %c0_i32_338 = arith.constant 0 : i32
    %256 = vector.broadcast %c0_i32_338 : i32 to vector<128x1xi32>
    %257 = arith.cmpi ne, %255, %256 : vector<128x1xi32>
    %c0_i32_339 = arith.constant 0 : i32
    %258 = vector.broadcast %c0_i32_339 : i32 to vector<128x1xi32>
    %259 = arith.cmpi slt, %255, %258 : vector<128x1xi32>
    %c0_i32_340 = arith.constant 0 : i32
    %260 = arith.cmpi slt, %253, %c0_i32_340 : i32
    %261 = vector.broadcast %260 : i1 to vector<128x1xi1>
    %262 = vector.broadcast %261 : vector<128x1xi1> to vector<128x1xi1>
    %263 = arith.xori %259, %262 : vector<128x1xi1>
    %264 = arith.andi %263, %257 : vector<128x1xi1>
    %265 = vector.broadcast %253 : i32 to vector<128x1xi32>
    %266 = arith.addi %255, %265 : vector<128x1xi32>
    %267 = arith.select %264, %266, %255 : vector<128x1xi1>, vector<128x1xi32>
    %c4_i32_341 = arith.constant 4 : i32
    %268 = vector.broadcast %c4_i32_341 : i32 to vector<128x1xi32>
    %269 = arith.cmpi slt, %267, %268 : vector<128x1xi32>
    %270 = arith.extui %269 : vector<128x1xi1> to vector<128x1xi32>
    %271 = arith.sitofp %270 : vector<128x1xi32> to vector<128x1xf32>
    %272 = vector.broadcast %271 : vector<128x1xf32> to vector<128x128xf32>
    %273 = arith.mulf %250, %272 : vector<128x128xf32>
    %cst_342 = arith.constant dense<0.000000e+00> : vector<128xf32>
    %274 = vector.multi_reduction <add>, %273, %cst_342 [0] : vector<128x128xf32> to vector<128xf32>
    %275 = vector.shape_cast %274 : vector<128xf32> to vector<1x128xf32>
    %cst_343 = arith.constant 1.562500e-02 : f32
    %276 = vector.broadcast %cst_343 : f32 to vector<1x128xf32>
    %277 = arith.mulf %275, %276 : vector<1x128xf32>
    %278 = vector.broadcast %277 : vector<1x128xf32> to vector<128x128xf32>
    %279 = arith.subf %250, %278 : vector<128x128xf32>
    %280 = arith.mulf %279, %279 : vector<128x128xf32>
    %281 = vector.broadcast %271 : vector<128x1xf32> to vector<128x128xf32>
    %282 = arith.mulf %280, %281 : vector<128x128xf32>
    %cst_344 = arith.constant dense<0.000000e+00> : vector<128xf32>
    %283 = vector.multi_reduction <add>, %282, %cst_344 [0] : vector<128x128xf32> to vector<128xf32>
    %284 = vector.shape_cast %283 : vector<128xf32> to vector<1x128xf32>
    %cst_345 = arith.constant 1.562500e-02 : f32
    %285 = vector.broadcast %cst_345 : f32 to vector<1x128xf32>
    %286 = arith.mulf %284, %285 : vector<1x128xf32>
    %cst_346 = arith.constant 9.99999974E-6 : f32
    %287 = vector.broadcast %cst_346 : f32 to vector<1x128xf32>
    %288 = arith.addf %286, %287 : vector<1x128xf32>
    %289 = math.rsqrt %288 : vector<1x128xf32>
    %290 = vector.broadcast %289 : vector<1x128xf32> to vector<128x128xf32>
    %291 = arith.mulf %279, %290 : vector<128x128xf32>
    %c0_347 = arith.constant 0 : index
    %c0_348 = arith.constant 0 : index
    %292 = vector.load %arg5[%c0_347, %c0_348] : memref<1x128xf32, #tpu.memory_space<vmem>>, vector<1x128xf32>
    %293 = vector.broadcast %292 : vector<1x128xf32> to vector<128x128xf32>
    %294 = arith.mulf %291, %293 : vector<128x128xf32>
    %c0_349 = arith.constant 0 : index
    %c0_350 = arith.constant 0 : index
    %295 = vector.load %arg6[%c0_349, %c0_350] : memref<1x128xf32, #tpu.memory_space<vmem>>, vector<1x128xf32>
    %296 = vector.broadcast %295 : vector<1x128xf32> to vector<128x128xf32>
    %297 = arith.addf %294, %296 : vector<128x128xf32>
    %cst_351 = arith.constant 0.000000e+00 : f32
    %298 = vector.broadcast %cst_351 : f32 to vector<128x128xf32>
    %299 = arith.cmpf ogt, %297, %298 : vector<128x128xf32>
    %cst_352 = arith.constant 2.000000e-01 : f32
    %300 = vector.broadcast %cst_352 : f32 to vector<128x128xf32>
    %301 = arith.mulf %300, %297 : vector<128x128xf32>
    %302 = arith.select %299, %297, %301 : vector<128x128xi1>, vector<128x128xf32>
    %303 = arith.truncf %302 : vector<128x128xf32> to vector<128x128xbf16>
    tpu.wait_dma2 semaphore(%arg18 : memref<!tpu.dma_semaphore, #tpu.memory_space<semaphore_mem>>) src(%arg7 : memref<2048x1024xbf16, #tpu.memory_space<any>>) dst(%arg16 : memref<2048x1024xbf16, #tpu.memory_space<vmem>>)
    %cst_353 = arith.constant 0.000000e+00 : f32
    %304 = vector.broadcast %cst_353 : f32 to vector<8x1024xf32>
    %c0_354 = arith.constant 0 : index
    %c0_355 = arith.constant 0 : index
    %305 = vector.load %arg17[%c0_354, %c0_355] : memref<8x1024xf32, #tpu.memory_space<vmem>>, vector<8x1024xf32>
    tpu.vector_store %arg17[%c0_354, %c0_355], %304 {strides = array<i32>} : memref<8x1024xf32, #tpu.memory_space<vmem>>, vector<8x1024xf32>,
    %c0_356 = arith.constant 0 : index
    %c0_357 = arith.constant 0 : index
    %306 = vector.load %arg17[%c0_356, %c0_357] : memref<8x1024xf32, #tpu.memory_space<vmem>>, vector<8x1024xf32>
    %307 = vector.extract_strided_slice %303 {offsets = [0, 0], sizes = [8, 128], strides = [1, 1]} : vector<128x128xbf16> to vector<8x128xbf16>
    %c0_358 = arith.constant 0 : index
    %c0_359 = arith.constant 0 : index
    %308 = vector.load %arg16[%c0_358, %c0_359] : memref<2048x1024xbf16, #tpu.memory_space<vmem>>, vector<128x1024xbf16>
    %cst_360 = arith.constant dense<0.000000e+00> : vector<8x1024xf32>
    %309 = tpu.matmul %307, %308, %cst_360 {dimension_numbers = #tpu.dot_dimension_numbers<[1], [0], [0], [1], [0, 0, 1, 1], [], []>} : vector<8x128xbf16>, vector<128x1024xbf16>, vector<8x1024xf32> -> vector<8x1024xf32>
    %310 = arith.addf %306, %309 : vector<8x1024xf32>
    %c0_361 = arith.constant 0 : index
    %c0_362 = arith.constant 0 : index
    %311 = vector.load %arg17[%c0_361, %c0_362] : memref<8x1024xf32, #tpu.memory_space<vmem>>, vector<8x1024xf32>
    tpu.vector_store %arg17[%c0_361, %c0_362], %310 {strides = array<i32>} : memref<8x1024xf32, #tpu.memory_space<vmem>>, vector<8x1024xf32>,
    %c0_363 = arith.constant 0 : index
    %c0_364 = arith.constant 0 : index
    %312 = vector.load %arg17[%c0_363, %c0_364] : memref<8x1024xf32, #tpu.memory_space<vmem>>, vector<8x1024xf32>
    %313 = vector.extract_strided_slice %303 {offsets = [8, 0], sizes = [8, 128], strides = [1, 1]} : vector<128x128xbf16> to vector<8x128xbf16>
    %c128_365 = arith.constant 128 : index
    %c0_366 = arith.constant 0 : index
    %314 = vector.load %arg16[%c128_365, %c0_366] : memref<2048x1024xbf16, #tpu.memory_space<vmem>>, vector<128x1024xbf16>
    %cst_367 = arith.constant dense<0.000000e+00> : vector<8x1024xf32>
    %315 = tpu.matmul %313, %314, %cst_367 {dimension_numbers = #tpu.dot_dimension_numbers<[1], [0], [0], [1], [0, 0, 1, 1], [], []>} : vector<8x128xbf16>, vector<128x1024xbf16>, vector<8x1024xf32> -> vector<8x1024xf32>
    %316 = arith.addf %312, %315 : vector<8x1024xf32>
    %c0_368 = arith.constant 0 : index
    %c0_369 = arith.constant 0 : index
    %317 = vector.load %arg17[%c0_368, %c0_369] : memref<8x1024xf32, #tpu.memory_space<vmem>>, vector<8x1024xf32>
    tpu.vector_store %arg17[%c0_368, %c0_369], %316 {strides = array<i32>} : memref<8x1024xf32, #tpu.memory_space<vmem>>, vector<8x1024xf32>,
    %c0_370 = arith.constant 0 : index
    %c0_371 = arith.constant 0 : index
    %318 = vector.load %arg17[%c0_370, %c0_371] : memref<8x1024xf32, #tpu.memory_space<vmem>>, vector<8x1024xf32>
    %319 = vector.extract_strided_slice %303 {offsets = [16, 0], sizes = [8, 128], strides = [1, 1]} : vector<128x128xbf16> to vector<8x128xbf16>
    %c256_372 = arith.constant 256 : index
    %c0_373 = arith.constant 0 : index
    %320 = vector.load %arg16[%c256_372, %c0_373] : memref<2048x1024xbf16, #tpu.memory_space<vmem>>, vector<128x1024xbf16>
    %cst_374 = arith.constant dense<0.000000e+00> : vector<8x1024xf32>
    %321 = tpu.matmul %319, %320, %cst_374 {dimension_numbers = #tpu.dot_dimension_numbers<[1], [0], [0], [1], [0, 0, 1, 1], [], []>} : vector<8x128xbf16>, vector<128x1024xbf16>, vector<8x1024xf32> -> vector<8x1024xf32>
    %322 = arith.addf %318, %321 : vector<8x1024xf32>
    %c0_375 = arith.constant 0 : index
    %c0_376 = arith.constant 0 : index
    %323 = vector.load %arg17[%c0_375, %c0_376] : memref<8x1024xf32, #tpu.memory_space<vmem>>, vector<8x1024xf32>
    tpu.vector_store %arg17[%c0_375, %c0_376], %322 {strides = array<i32>} : memref<8x1024xf32, #tpu.memory_space<vmem>>, vector<8x1024xf32>,
    %c0_377 = arith.constant 0 : index
    %c0_378 = arith.constant 0 : index
    %324 = vector.load %arg17[%c0_377, %c0_378] : memref<8x1024xf32, #tpu.memory_space<vmem>>, vector<8x1024xf32>
    %325 = vector.extract_strided_slice %303 {offsets = [24, 0], sizes = [8, 128], strides = [1, 1]} : vector<128x128xbf16> to vector<8x128xbf16>
    %c384_379 = arith.constant 384 : index
    %c0_380 = arith.constant 0 : index
    %326 = vector.load %arg16[%c384_379, %c0_380] : memref<2048x1024xbf16, #tpu.memory_space<vmem>>, vector<128x1024xbf16>
    %cst_381 = arith.constant dense<0.000000e+00> : vector<8x1024xf32>
    %327 = tpu.matmul %325, %326, %cst_381 {dimension_numbers = #tpu.dot_dimension_numbers<[1], [0], [0], [1], [0, 0, 1, 1], [], []>} : vector<8x128xbf16>, vector<128x1024xbf16>, vector<8x1024xf32> -> vector<8x1024xf32>
    %328 = arith.addf %324, %327 : vector<8x1024xf32>
    %c0_382 = arith.constant 0 : index
    %c0_383 = arith.constant 0 : index
    %329 = vector.load %arg17[%c0_382, %c0_383] : memref<8x1024xf32, #tpu.memory_space<vmem>>, vector<8x1024xf32>
    tpu.vector_store %arg17[%c0_382, %c0_383], %328 {strides = array<i32>} : memref<8x1024xf32, #tpu.memory_space<vmem>>, vector<8x1024xf32>,
    %c0_384 = arith.constant 0 : index
    %c0_385 = arith.constant 0 : index
    %330 = vector.load %arg17[%c0_384, %c0_385] : memref<8x1024xf32, #tpu.memory_space<vmem>>, vector<8x1024xf32>
    %331 = vector.extract_strided_slice %303 {offsets = [32, 0], sizes = [8, 128], strides = [1, 1]} : vector<128x128xbf16> to vector<8x128xbf16>
    %c512_386 = arith.constant 512 : index
    %c0_387 = arith.constant 0 : index
    %332 = vector.load %arg16[%c512_386, %c0_387] : memref<2048x1024xbf16, #tpu.memory_space<vmem>>, vector<128x1024xbf16>
    %cst_388 = arith.constant dense<0.000000e+00> : vector<8x1024xf32>
    %333 = tpu.matmul %331, %332, %cst_388 {dimension_numbers = #tpu.dot_dimension_numbers<[1], [0], [0], [1], [0, 0, 1, 1], [], []>} : vector<8x128xbf16>, vector<128x1024xbf16>, vector<8x1024xf32> -> vector<8x1024xf32>
    %334 = arith.addf %330, %333 : vector<8x1024xf32>
    %c0_389 = arith.constant 0 : index
    %c0_390 = arith.constant 0 : index
    %335 = vector.load %arg17[%c0_389, %c0_390] : memref<8x1024xf32, #tpu.memory_space<vmem>>, vector<8x1024xf32>
    tpu.vector_store %arg17[%c0_389, %c0_390], %334 {strides = array<i32>} : memref<8x1024xf32, #tpu.memory_space<vmem>>, vector<8x1024xf32>,
    %c0_391 = arith.constant 0 : index
    %c0_392 = arith.constant 0 : index
    %336 = vector.load %arg17[%c0_391, %c0_392] : memref<8x1024xf32, #tpu.memory_space<vmem>>, vector<8x1024xf32>
    %337 = vector.extract_strided_slice %303 {offsets = [40, 0], sizes = [8, 128], strides = [1, 1]} : vector<128x128xbf16> to vector<8x128xbf16>
    %c640 = arith.constant 640 : index
    %c0_393 = arith.constant 0 : index
    %338 = vector.load %arg16[%c640, %c0_393] : memref<2048x1024xbf16, #tpu.memory_space<vmem>>, vector<128x1024xbf16>
    %cst_394 = arith.constant dense<0.000000e+00> : vector<8x1024xf32>
    %339 = tpu.matmul %337, %338, %cst_394 {dimension_numbers = #tpu.dot_dimension_numbers<[1], [0], [0], [1], [0, 0, 1, 1], [], []>} : vector<8x128xbf16>, vector<128x1024xbf16>, vector<8x1024xf32> -> vector<8x1024xf32>
    %340 = arith.addf %336, %339 : vector<8x1024xf32>
    %c0_395 = arith.constant 0 : index
    %c0_396 = arith.constant 0 : index
    %341 = vector.load %arg17[%c0_395, %c0_396] : memref<8x1024xf32, #tpu.memory_space<vmem>>, vector<8x1024xf32>
    tpu.vector_store %arg17[%c0_395, %c0_396], %340 {strides = array<i32>} : memref<8x1024xf32, #tpu.memory_space<vmem>>, vector<8x1024xf32>,
    %c0_397 = arith.constant 0 : index
    %c0_398 = arith.constant 0 : index
    %342 = vector.load %arg17[%c0_397, %c0_398] : memref<8x1024xf32, #tpu.memory_space<vmem>>, vector<8x1024xf32>
    %343 = vector.extract_strided_slice %303 {offsets = [48, 0], sizes = [8, 128], strides = [1, 1]} : vector<128x128xbf16> to vector<8x128xbf16>
    %c768_399 = arith.constant 768 : index
    %c0_400 = arith.constant 0 : index
    %344 = vector.load %arg16[%c768_399, %c0_400] : memref<2048x1024xbf16, #tpu.memory_space<vmem>>, vector<128x1024xbf16>
    %cst_401 = arith.constant dense<0.000000e+00> : vector<8x1024xf32>
    %345 = tpu.matmul %343, %344, %cst_401 {dimension_numbers = #tpu.dot_dimension_numbers<[1], [0], [0], [1], [0, 0, 1, 1], [], []>} : vector<8x128xbf16>, vector<128x1024xbf16>, vector<8x1024xf32> -> vector<8x1024xf32>
    %346 = arith.addf %342, %345 : vector<8x1024xf32>
    %c0_402 = arith.constant 0 : index
    %c0_403 = arith.constant 0 : index
    %347 = vector.load %arg17[%c0_402, %c0_403] : memref<8x1024xf32, #tpu.memory_space<vmem>>, vector<8x1024xf32>
    tpu.vector_store %arg17[%c0_402, %c0_403], %346 {strides = array<i32>} : memref<8x1024xf32, #tpu.memory_space<vmem>>, vector<8x1024xf32>,
    %c0_404 = arith.constant 0 : index
    %c0_405 = arith.constant 0 : index
    %348 = vector.load %arg17[%c0_404, %c0_405] : memref<8x1024xf32, #tpu.memory_space<vmem>>, vector<8x1024xf32>
    %349 = vector.extract_strided_slice %303 {offsets = [56, 0], sizes = [8, 128], strides = [1, 1]} : vector<128x128xbf16> to vector<8x128xbf16>
    %c896 = arith.constant 896 : index
    %c0_406 = arith.constant 0 : index
    %350 = vector.load %arg16[%c896, %c0_406] : memref<2048x1024xbf16, #tpu.memory_space<vmem>>, vector<128x1024xbf16>
    %cst_407 = arith.constant dense<0.000000e+00> : vector<8x1024xf32>
    %351 = tpu.matmul %349, %350, %cst_407 {dimension_numbers = #tpu.dot_dimension_numbers<[1], [0], [0], [1], [0, 0, 1, 1], [], []>} : vector<8x128xbf16>, vector<128x1024xbf16>, vector<8x1024xf32> -> vector<8x1024xf32>
    %352 = arith.addf %348, %351 : vector<8x1024xf32>
    %c0_408 = arith.constant 0 : index
    %c0_409 = arith.constant 0 : index
    %353 = vector.load %arg17[%c0_408, %c0_409] : memref<8x1024xf32, #tpu.memory_space<vmem>>, vector<8x1024xf32>
    tpu.vector_store %arg17[%c0_408, %c0_409], %352 {strides = array<i32>} : memref<8x1024xf32, #tpu.memory_space<vmem>>, vector<8x1024xf32>,
    %c0_410 = arith.constant 0 : index
    %c0_411 = arith.constant 0 : index
    %354 = vector.load %arg17[%c0_410, %c0_411] : memref<8x1024xf32, #tpu.memory_space<vmem>>, vector<8x1024xf32>
    %355 = vector.extract_strided_slice %303 {offsets = [64, 0], sizes = [8, 128], strides = [1, 1]} : vector<128x128xbf16> to vector<8x128xbf16>
    %c1024 = arith.constant 1024 : index
    %c0_412 = arith.constant 0 : index
    %356 = vector.load %arg16[%c1024, %c0_412] : memref<2048x1024xbf16, #tpu.memory_space<vmem>>, vector<128x1024xbf16>
    %cst_413 = arith.constant dense<0.000000e+00> : vector<8x1024xf32>
    %357 = tpu.matmul %355, %356, %cst_413 {dimension_numbers = #tpu.dot_dimension_numbers<[1], [0], [0], [1], [0, 0, 1, 1], [], []>} : vector<8x128xbf16>, vector<128x1024xbf16>, vector<8x1024xf32> -> vector<8x1024xf32>
    %358 = arith.addf %354, %357 : vector<8x1024xf32>
    %c0_414 = arith.constant 0 : index
    %c0_415 = arith.constant 0 : index
    %359 = vector.load %arg17[%c0_414, %c0_415] : memref<8x1024xf32, #tpu.memory_space<vmem>>, vector<8x1024xf32>
    tpu.vector_store %arg17[%c0_414, %c0_415], %358 {strides = array<i32>} : memref<8x1024xf32, #tpu.memory_space<vmem>>, vector<8x1024xf32>,
    %c0_416 = arith.constant 0 : index
    %c0_417 = arith.constant 0 : index
    %360 = vector.load %arg17[%c0_416, %c0_417] : memref<8x1024xf32, #tpu.memory_space<vmem>>, vector<8x1024xf32>
    %361 = vector.extract_strided_slice %303 {offsets = [72, 0], sizes = [8, 128], strides = [1, 1]} : vector<128x128xbf16> to vector<8x128xbf16>
    %c1152 = arith.constant 1152 : index
    %c0_418 = arith.constant 0 : index
    %362 = vector.load %arg16[%c1152, %c0_418] : memref<2048x1024xbf16, #tpu.memory_space<vmem>>, vector<128x1024xbf16>
    %cst_419 = arith.constant dense<0.000000e+00> : vector<8x1024xf32>
    %363 = tpu.matmul %361, %362, %cst_419 {dimension_numbers = #tpu.dot_dimension_numbers<[1], [0], [0], [1], [0, 0, 1, 1], [], []>} : vector<8x128xbf16>, vector<128x1024xbf16>, vector<8x1024xf32> -> vector<8x1024xf32>
    %364 = arith.addf %360, %363 : vector<8x1024xf32>
    %c0_420 = arith.constant 0 : index
    %c0_421 = arith.constant 0 : index
    %365 = vector.load %arg17[%c0_420, %c0_421] : memref<8x1024xf32, #tpu.memory_space<vmem>>, vector<8x1024xf32>
    tpu.vector_store %arg17[%c0_420, %c0_421], %364 {strides = array<i32>} : memref<8x1024xf32, #tpu.memory_space<vmem>>, vector<8x1024xf32>,
    %c0_422 = arith.constant 0 : index
    %c0_423 = arith.constant 0 : index
    %366 = vector.load %arg17[%c0_422, %c0_423] : memref<8x1024xf32, #tpu.memory_space<vmem>>, vector<8x1024xf32>
    %367 = vector.extract_strided_slice %303 {offsets = [80, 0], sizes = [8, 128], strides = [1, 1]} : vector<128x128xbf16> to vector<8x128xbf16>
    %c1280 = arith.constant 1280 : index
    %c0_424 = arith.constant 0 : index
    %368 = vector.load %arg16[%c1280, %c0_424] : memref<2048x1024xbf16, #tpu.memory_space<vmem>>, vector<128x1024xbf16>
    %cst_425 = arith.constant dense<0.000000e+00> : vector<8x1024xf32>
    %369 = tpu.matmul %367, %368, %cst_425 {dimension_numbers = #tpu.dot_dimension_numbers<[1], [0], [0], [1], [0, 0, 1, 1], [], []>} : vector<8x128xbf16>, vector<128x1024xbf16>, vector<8x1024xf32> -> vector<8x1024xf32>
    %370 = arith.addf %366, %369 : vector<8x1024xf32>
    %c0_426 = arith.constant 0 : index
    %c0_427 = arith.constant 0 : index
    %371 = vector.load %arg17[%c0_426, %c0_427] : memref<8x1024xf32, #tpu.memory_space<vmem>>, vector<8x1024xf32>
    tpu.vector_store %arg17[%c0_426, %c0_427], %370 {strides = array<i32>} : memref<8x1024xf32, #tpu.memory_space<vmem>>, vector<8x1024xf32>,
    %c0_428 = arith.constant 0 : index
    %c0_429 = arith.constant 0 : index
    %372 = vector.load %arg17[%c0_428, %c0_429] : memref<8x1024xf32, #tpu.memory_space<vmem>>, vector<8x1024xf32>
    %373 = vector.extract_strided_slice %303 {offsets = [88, 0], sizes = [8, 128], strides = [1, 1]} : vector<128x128xbf16> to vector<8x128xbf16>
    %c1408 = arith.constant 1408 : index
    %c0_430 = arith.constant 0 : index
    %374 = vector.load %arg16[%c1408, %c0_430] : memref<2048x1024xbf16, #tpu.memory_space<vmem>>, vector<128x1024xbf16>
    %cst_431 = arith.constant dense<0.000000e+00> : vector<8x1024xf32>
    %375 = tpu.matmul %373, %374, %cst_431 {dimension_numbers = #tpu.dot_dimension_numbers<[1], [0], [0], [1], [0, 0, 1, 1], [], []>} : vector<8x128xbf16>, vector<128x1024xbf16>, vector<8x1024xf32> -> vector<8x1024xf32>
    %376 = arith.addf %372, %375 : vector<8x1024xf32>
    %c0_432 = arith.constant 0 : index
    %c0_433 = arith.constant 0 : index
    %377 = vector.load %arg17[%c0_432, %c0_433] : memref<8x1024xf32, #tpu.memory_space<vmem>>, vector<8x1024xf32>
    tpu.vector_store %arg17[%c0_432, %c0_433], %376 {strides = array<i32>} : memref<8x1024xf32, #tpu.memory_space<vmem>>, vector<8x1024xf32>,
    %c0_434 = arith.constant 0 : index
    %c0_435 = arith.constant 0 : index
    %378 = vector.load %arg17[%c0_434, %c0_435] : memref<8x1024xf32, #tpu.memory_space<vmem>>, vector<8x1024xf32>
    %379 = vector.extract_strided_slice %303 {offsets = [96, 0], sizes = [8, 128], strides = [1, 1]} : vector<128x128xbf16> to vector<8x128xbf16>
    %c1536 = arith.constant 1536 : index
    %c0_436 = arith.constant 0 : index
    %380 = vector.load %arg16[%c1536, %c0_436] : memref<2048x1024xbf16, #tpu.memory_space<vmem>>, vector<128x1024xbf16>
    %cst_437 = arith.constant dense<0.000000e+00> : vector<8x1024xf32>
    %381 = tpu.matmul %379, %380, %cst_437 {dimension_numbers = #tpu.dot_dimension_numbers<[1], [0], [0], [1], [0, 0, 1, 1], [], []>} : vector<8x128xbf16>, vector<128x1024xbf16>, vector<8x1024xf32> -> vector<8x1024xf32>
    %382 = arith.addf %378, %381 : vector<8x1024xf32>
    %c0_438 = arith.constant 0 : index
    %c0_439 = arith.constant 0 : index
    %383 = vector.load %arg17[%c0_438, %c0_439] : memref<8x1024xf32, #tpu.memory_space<vmem>>, vector<8x1024xf32>
    tpu.vector_store %arg17[%c0_438, %c0_439], %382 {strides = array<i32>} : memref<8x1024xf32, #tpu.memory_space<vmem>>, vector<8x1024xf32>,
    %c0_440 = arith.constant 0 : index
    %c0_441 = arith.constant 0 : index
    %384 = vector.load %arg17[%c0_440, %c0_441] : memref<8x1024xf32, #tpu.memory_space<vmem>>, vector<8x1024xf32>
    %385 = vector.extract_strided_slice %303 {offsets = [104, 0], sizes = [8, 128], strides = [1, 1]} : vector<128x128xbf16> to vector<8x128xbf16>
    %c1664 = arith.constant 1664 : index
    %c0_442 = arith.constant 0 : index
    %386 = vector.load %arg16[%c1664, %c0_442] : memref<2048x1024xbf16, #tpu.memory_space<vmem>>, vector<128x1024xbf16>
    %cst_443 = arith.constant dense<0.000000e+00> : vector<8x1024xf32>
    %387 = tpu.matmul %385, %386, %cst_443 {dimension_numbers = #tpu.dot_dimension_numbers<[1], [0], [0], [1], [0, 0, 1, 1], [], []>} : vector<8x128xbf16>, vector<128x1024xbf16>, vector<8x1024xf32> -> vector<8x1024xf32>
    %388 = arith.addf %384, %387 : vector<8x1024xf32>
    %c0_444 = arith.constant 0 : index
    %c0_445 = arith.constant 0 : index
    %389 = vector.load %arg17[%c0_444, %c0_445] : memref<8x1024xf32, #tpu.memory_space<vmem>>, vector<8x1024xf32>
    tpu.vector_store %arg17[%c0_444, %c0_445], %388 {strides = array<i32>} : memref<8x1024xf32, #tpu.memory_space<vmem>>, vector<8x1024xf32>,
    %c0_446 = arith.constant 0 : index
    %c0_447 = arith.constant 0 : index
    %390 = vector.load %arg17[%c0_446, %c0_447] : memref<8x1024xf32, #tpu.memory_space<vmem>>, vector<8x1024xf32>
    %391 = vector.extract_strided_slice %303 {offsets = [112, 0], sizes = [8, 128], strides = [1, 1]} : vector<128x128xbf16> to vector<8x128xbf16>
    %c1792 = arith.constant 1792 : index
    %c0_448 = arith.constant 0 : index
    %392 = vector.load %arg16[%c1792, %c0_448] : memref<2048x1024xbf16, #tpu.memory_space<vmem>>, vector<128x1024xbf16>
    %cst_449 = arith.constant dense<0.000000e+00> : vector<8x1024xf32>
    %393 = tpu.matmul %391, %392, %cst_449 {dimension_numbers = #tpu.dot_dimension_numbers<[1], [0], [0], [1], [0, 0, 1, 1], [], []>} : vector<8x128xbf16>, vector<128x1024xbf16>, vector<8x1024xf32> -> vector<8x1024xf32>
    %394 = arith.addf %390, %393 : vector<8x1024xf32>
    %c0_450 = arith.constant 0 : index
    %c0_451 = arith.constant 0 : index
    %395 = vector.load %arg17[%c0_450, %c0_451] : memref<8x1024xf32, #tpu.memory_space<vmem>>, vector<8x1024xf32>
    tpu.vector_store %arg17[%c0_450, %c0_451], %394 {strides = array<i32>} : memref<8x1024xf32, #tpu.memory_space<vmem>>, vector<8x1024xf32>,
    %c0_452 = arith.constant 0 : index
    %c0_453 = arith.constant 0 : index
    %396 = vector.load %arg17[%c0_452, %c0_453] : memref<8x1024xf32, #tpu.memory_space<vmem>>, vector<8x1024xf32>
    %397 = vector.extract_strided_slice %303 {offsets = [120, 0], sizes = [8, 128], strides = [1, 1]} : vector<128x128xbf16> to vector<8x128xbf16>
    %c1920 = arith.constant 1920 : index
    %c0_454 = arith.constant 0 : index
    %398 = vector.load %arg16[%c1920, %c0_454] : memref<2048x1024xbf16, #tpu.memory_space<vmem>>, vector<128x1024xbf16>
    %cst_455 = arith.constant dense<0.000000e+00> : vector<8x1024xf32>
    %399 = tpu.matmul %397, %398, %cst_455 {dimension_numbers = #tpu.dot_dimension_numbers<[1], [0], [0], [1], [0, 0, 1, 1], [], []>} : vector<8x128xbf16>, vector<128x1024xbf16>, vector<8x1024xf32> -> vector<8x1024xf32>
    %400 = arith.addf %396, %399 : vector<8x1024xf32>
    %c0_456 = arith.constant 0 : index
    %c0_457 = arith.constant 0 : index
    %401 = vector.load %arg17[%c0_456, %c0_457] : memref<8x1024xf32, #tpu.memory_space<vmem>>, vector<8x1024xf32>
    tpu.vector_store %arg17[%c0_456, %c0_457], %400 {strides = array<i32>} : memref<8x1024xf32, #tpu.memory_space<vmem>>, vector<8x1024xf32>,
    %c0_458 = arith.constant 0 : index
    %c0_459 = arith.constant 0 : index
    %402 = vector.load %arg17[%c0_458, %c0_459] : memref<8x1024xf32, #tpu.memory_space<vmem>>, vector<8x1024xf32>
    %c0_460 = arith.constant 0 : index
    %c0_461 = arith.constant 0 : index
    %403 = vector.load %arg8[%c0_460, %c0_461] : memref<1x1024xf32, #tpu.memory_space<vmem>>, vector<1x1024xf32>
    %404 = vector.broadcast %403 : vector<1x1024xf32> to vector<8x1024xf32>
    %405 = arith.addf %402, %404 : vector<8x1024xf32>
    %406 = tpu.iota {dimensions = array<i32: 0>} : vector<8x1xi32>
    %c4_i32_462 = arith.constant 4 : i32
    %407 = vector.broadcast %c4_i32_462 : i32 to vector<8x1xi32>
    %408 = arith.cmpi slt, %406, %407 : vector<8x1xi32>
    %409 = arith.extui %408 : vector<8x1xi1> to vector<8x1xi32>
    %410 = arith.sitofp %409 : vector<8x1xi32> to vector<8x1xf32>
    %411 = vector.broadcast %410 : vector<8x1xf32> to vector<8x1024xf32>
    %412 = arith.mulf %405, %411 : vector<8x1024xf32>
    %cst_463 = arith.constant dense<0.000000e+00> : vector<1024xf32>
    %413 = vector.multi_reduction <add>, %412, %cst_463 [0] : vector<8x1024xf32> to vector<1024xf32>
    %414 = vector.shape_cast %413 : vector<1024xf32> to vector<1x1024xf32>
    %cst_464 = arith.constant 2.500000e-01 : f32
    %415 = vector.broadcast %cst_464 : f32 to vector<1x1024xf32>
    %416 = arith.mulf %414, %415 : vector<1x1024xf32>
    %417 = vector.broadcast %416 : vector<1x1024xf32> to vector<8x1024xf32>
    %418 = arith.subf %405, %417 : vector<8x1024xf32>
    %419 = arith.mulf %418, %418 : vector<8x1024xf32>
    %420 = vector.broadcast %410 : vector<8x1xf32> to vector<8x1024xf32>
    %421 = arith.mulf %419, %420 : vector<8x1024xf32>
    %cst_465 = arith.constant dense<0.000000e+00> : vector<1024xf32>
    %422 = vector.multi_reduction <add>, %421, %cst_465 [0] : vector<8x1024xf32> to vector<1024xf32>
    %423 = vector.shape_cast %422 : vector<1024xf32> to vector<1x1024xf32>
    %cst_466 = arith.constant 2.500000e-01 : f32
    %424 = vector.broadcast %cst_466 : f32 to vector<1x1024xf32>
    %425 = arith.mulf %423, %424 : vector<1x1024xf32>
    %cst_467 = arith.constant 9.99999974E-6 : f32
    %426 = vector.broadcast %cst_467 : f32 to vector<1x1024xf32>
    %427 = arith.addf %425, %426 : vector<1x1024xf32>
    %428 = math.rsqrt %427 : vector<1x1024xf32>
    %429 = vector.broadcast %428 : vector<1x1024xf32> to vector<8x1024xf32>
    %430 = arith.mulf %418, %429 : vector<8x1024xf32>
    %c0_468 = arith.constant 0 : index
    %c0_469 = arith.constant 0 : index
    %431 = vector.load %arg9[%c0_468, %c0_469] : memref<1x1024xf32, #tpu.memory_space<vmem>>, vector<1x1024xf32>
    %432 = vector.broadcast %431 : vector<1x1024xf32> to vector<8x1024xf32>
    %433 = arith.mulf %430, %432 : vector<8x1024xf32>
    %c0_470 = arith.constant 0 : index
    %c0_471 = arith.constant 0 : index
    %434 = vector.load %arg10[%c0_470, %c0_471] : memref<1x1024xf32, #tpu.memory_space<vmem>>, vector<1x1024xf32>
    %435 = vector.broadcast %434 : vector<1x1024xf32> to vector<8x1024xf32>
    %436 = arith.addf %433, %435 : vector<8x1024xf32>
    %cst_472 = arith.constant 0.000000e+00 : f32
    %437 = vector.broadcast %cst_472 : f32 to vector<8x1024xf32>
    %438 = arith.cmpf ogt, %436, %437 : vector<8x1024xf32>
    %cst_473 = arith.constant 2.000000e-01 : f32
    %439 = vector.broadcast %cst_473 : f32 to vector<8x1024xf32>
    %440 = arith.mulf %439, %436 : vector<8x1024xf32>
    %441 = arith.select %438, %436, %440 : vector<8x1024xi1>, vector<8x1024xf32>
    %442 = arith.truncf %441 : vector<8x1024xf32> to vector<8x1024xbf16>
    %c0_474 = arith.constant 0 : index
    %c0_475 = arith.constant 0 : index
    %443 = vector.load %arg11[%c0_474, %c0_475] : memref<1024x128xbf16, #tpu.memory_space<vmem>>, vector<1024x128xbf16>
    %cst_476 = arith.constant dense<0.000000e+00> : vector<8x128xf32>
    %444 = tpu.matmul %442, %443, %cst_476 {dimension_numbers = #tpu.dot_dimension_numbers<[1], [0], [0], [1], [0, 0, 1, 1], [], []>} : vector<8x1024xbf16>, vector<1024x128xbf16>, vector<8x128xf32> -> vector<8x128xf32>
    %c0_477 = arith.constant 0 : index
    %c0_478 = arith.constant 0 : index
    %445 = vector.load %arg12[%c0_477, %c0_478] : memref<1x128xf32, #tpu.memory_space<vmem>>, vector<1x128xf32>
    %446 = vector.broadcast %445 : vector<1x128xf32> to vector<8x128xf32>
    %447 = arith.addf %444, %446 : vector<8x128xf32>
    %c0_479 = arith.constant 0 : index
    %c0_480 = arith.constant 0 : index
    %448 = vector.load %arg13[%c0_479, %c0_480] : memref<8x128xf32, #tpu.memory_space<vmem>>, vector<8x128xf32>
    tpu.vector_store %arg13[%c0_479, %c0_480], %447 {strides = array<i32>} : memref<8x128xf32, #tpu.memory_space<vmem>>, vector<8x128xf32>,
    return
  }
}

</mosaic_0001>

<bundles_post_ra>
// kernel: discriminator_forward.1
= control target key start
LH: loop header
LB: loop body
LE: loop exit
PB: predicated region body
PF: predicated region fallthrough
CT: control target
= control target key end

     0   :  { %18 = vsyncpa [#allocation8], 0  ;;  %s10889_s0 = inlined_call_operand.vmem [shape: bf16[64,128], index: 0, kind: input, shape index: {}]   ;;  %s10890_s1 = inlined_call_operand.hbm [shape: bf16[128,640], index: 1, kind: input, shape index: {}]   ;;  %s10891_s2 = inlined_call_operand.hbm [shape: f32[1,640], index: 2, kind: input, shape index: {}]   ;;  %s10892_s3 = inlined_call_operand.hbm [shape: bf16[1024,128], index: 3, kind: input, shape index: {}]   ;;  %s10893_s4 = inlined_call_operand.hbm [shape: f32[1,128], index: 4, kind: input, shape index: {}]   ;;  %s10894_s5 = inlined_call_operand.hbm [shape: f32[1,128], index: 5, kind: input, shape index: {}]   ;;  %s10895_s6 = inlined_call_operand.hbm [shape: f32[1,128], index: 6, kind: input, shape index: {}]   ;;  %s10896_s7 = inlined_call_operand.hbm [shape: bf16[2048,1024], index: 7, kind: input, shape index: {}]   ;;  %s10897_s8 = inlined_call_operand.hbm [shape: f32[1,1024], index: 8, kind: input, shape index: {}]   ;;  %s10898_s9 = inlined_call_operand.hbm [shape: f32[1,1024], index: 9, kind: input, shape index: {}]   ;;  %s10899_s10 = inlined_call_operand.hbm [shape: f32[1,1024], index: 10, kind: input, shape index: {}]   ;;  %s10900_s11 = inlined_call_operand.hbm [shape: bf16[1024,128], index: 11, kind: input, shape index: {}]   ;;  %s10901_s12 = inlined_call_operand.hbm [shape: f32[1,128], index: 12, kind: input, shape index: {}]   ;;  %s10902_s13 = inlined_call_operand.vmem [shape: f32[8,128], index: 13, kind: output, shape index: {}]  }
   0x1   :  { %19 = vsyncpa [#allocation10], 0 }
   0x2   :  { %20 = vsyncpa [#allocation13], 0 }
   0x3   :  { %21 = vsyncpa [#allocation16], 0 }
   0x4   :  { %22 = vsyncpa [#allocation19], 0 }
   0x5   :  { %23 = vsyncpa [#allocation22], 0  ;;  %s9217_s25 = smov [#allocation9]   ;;  %s9218_s27 = smov [#allocation12]  }
   0x6   :  { %s44_s26 = sshll.u32 %s9217_s25, 4  ;;  %s66_s28 = sshll.u32 %s9218_s27, 4  ;;  %s45_s26 = int_to_ptr.vmem [resolvable:$true] %s44_s26  ;;  %s67_s28 = int_to_ptr.vmem [resolvable:$true] %s66_s28 }
   0x7   :  { %s8961_s14 = scalar_lea.hbm %s10891_s2, 80 }
   0x8   :  { %p8962_p0 = scmp.ne.s32.totalorder %s10891_s2, %s8961_s14  ;;  %p8965_p1 = scmp.lt.u32.totalorder %s8961_s14, %s10891_s2 }
   0xa   :  { %p8967_p2 = pnand %p8965_p1, %p8962_p0 }
   0xc   :  { %8970 = shalt.err (!%p8967_p2)
}
   0xd   :  { %s8971_s19 = scalar_lea.vmem %s45_s26, 80  ;;  %s8975_s20 = scalar_lea.vmem %s45_s26, 96 }
   0xe   :  { %p8972_p3 = scmp.ne.s32.totalorder %s45_s26, %s8971_s19  ;;  %p8976_p4 = scmp.lt.s32.totalorder %s45_s26, %s45_s26 }
   0xf   :  { %p8977_p5 = scmp.lt.s32.totalorder %s8975_s20, %s8971_s19 }
  0x11   :  { %p8978_p6 = por %p8977_p5, %p8976_p4 }
  0x13   :  { %p8979_p7 = pnand %p8978_p6, %p8972_p3 }
  0x15   :  { %8982 = shalt.err (!%p8979_p7)
}
  0x16   :  { %47 = dma.hbm_to_vmem [thread:$0]  %s10891_s2, 80, %s45_s26, [#allocation10]  }
  0x17   :  { %s8983_s25 = scalar_lea.hbm %s10893_s4, 16 }
  0x18   :  { %p8984_p8 = scmp.ne.s32.totalorder %s10893_s4, %s8983_s25  ;;  %p8987_p9 = scmp.lt.u32.totalorder %s8983_s25, %s10893_s4 }
  0x1a   :  { %p8989_p10 = pnand %p8987_p9, %p8984_p8 }
  0x1c   :  { %8992 = shalt.err (!%p8989_p10)
}
  0x1d   :  { %s8993_s15 = scalar_lea.vmem %s67_s28, 16  ;;  %s8997_s16 = scalar_lea.vmem %s67_s28, 32 }
  0x1e   :  { %p8994_p11 = scmp.ne.s32.totalorder %s67_s28, %s8993_s15  ;;  %p8998_p12 = scmp.lt.s32.totalorder %s67_s28, %s67_s28 }
  0x1f   :  { %p8999_p13 = scmp.lt.s32.totalorder %s8997_s16, %s8993_s15 }
  0x21   :  { %p9000_p0 = por %p8999_p13, %p8998_p12 }
  0x23   :  { %p9001_p1 = pnand %p9000_p0, %p8994_p11 }
  0x25   :  { %9004 = shalt.err (!%p9001_p1)
}
  0x26   :  { %69 = dma.hbm_to_vmem [thread:$0]  %s10893_s4, 16, %s67_s28, [#allocation13]  }
  0x27   :  { %s9219_s17 = smov [#allocation15]   ;;  %s9220_s19 = smov [#allocation18]  }
  0x28   :  { %s86_s18 = sshll.u32 %s9219_s17, 4  ;;  %s106_s20 = sshll.u32 %s9220_s19, 4  ;;  %s87_s18 = int_to_ptr.vmem [resolvable:$true] %s86_s18  ;;  %s107_s20 = int_to_ptr.vmem [resolvable:$true] %s106_s20 }
  0x29   :  { %s9005_s23 = scalar_lea.hbm %s10895_s6, 16 }
  0x2a   :  { %p9006_p2 = scmp.ne.s32.totalorder %s10895_s6, %s9005_s23  ;;  %p9009_p3 = scmp.lt.u32.totalorder %s9005_s23, %s10895_s6 }
  0x2c   :  { %p9011_p4 = pnand %p9009_p3, %p9006_p2 }
  0x2e   :  { %9014 = shalt.err (!%p9011_p4)
}
  0x2f   :  { %s9015_s4 = scalar_lea.vmem %s87_s18, 16  ;;  %s9019_s28 = scalar_lea.vmem %s87_s18, 32 }
  0x30   :  { %p9016_p5 = scmp.ne.s32.totalorder %s87_s18, %s9015_s4  ;;  %p9020_p6 = scmp.lt.s32.totalorder %s87_s18, %s87_s18 }
  0x31   :  { %p9021_p7 = scmp.lt.s32.totalorder %s9019_s28, %s9015_s4 }
  0x33   :  { %p9022_p8 = por %p9021_p7, %p9020_p6 }
  0x35   :  { %p9023_p9 = pnand %p9022_p8, %p9016_p5 }
  0x37   :  { %9026 = shalt.err (!%p9023_p9)
}
  0x38   :  { %89 = dma.hbm_to_vmem [thread:$0]  %s10895_s6, 16, %s87_s18, [#allocation16]  }
  0x39   :  { %s9027_s2 = scalar_lea.hbm %s10898_s9, 128 }
  0x3a   :  { %p9028_p10 = scmp.ne.s32.totalorder %s10898_s9, %s9027_s2  ;;  %p9031_p11 = scmp.lt.u32.totalorder %s9027_s2, %s10898_s9 }
  0x3c   :  { %p9033_p12 = pnand %p9031_p11, %p9028_p10 }
  0x3e   :  { %9036 = shalt.err (!%p9033_p12)
}
  0x3f   :  { %s9037_s22 = scalar_lea.vmem %s107_s20, 128  ;;  %p9042_p0 = scmp.lt.s32.totalorder %s107_s20, %s107_s20 }
  0x40   :  { %p9038_p13 = scmp.ne.s32.totalorder %s107_s20, %s9037_s22  ;;  %p9043_p1 = scmp.lt.s32.totalorder %s9037_s22, %s9037_s22 }
  0x42   :  { %p9044_p2 = por %p9043_p1, %p9042_p0 }
  0x44   :  { %p9045_p3 = pnand %p9044_p2, %p9038_p13 }
  0x46   :  { %9048 = shalt.err (!%p9045_p3)
}
  0x47   :  { %109 = dma.hbm_to_vmem [thread:$0]  %s10898_s9, 128, %s107_s20, [#allocation19]  }
  0x48   :  { %s9221_s23 = smov [#allocation21]   ;;  %s9222_s25 = smov [#allocation7]  }
  0x49   :  { %s125_s24 = sshll.u32 %s9221_s23, 4  ;;  %s31_s27 = sshll.u32 %s9222_s25, 4  ;;  %s126_s24 = int_to_ptr.vmem [resolvable:$true] %s125_s24  ;;  %s9361_s27 = int_to_ptr.vmem [resolvable:$true] %s31_s27 }
  0x4a   :  { %s9049_s28 = scalar_lea.hbm %s10900_s11, 8192 }
  0x4b   :  { %p9050_p4 = scmp.ne.s32.totalorder %s10900_s11, %s9049_s28  ;;  %p9053_p5 = scmp.lt.u32.totalorder %s9049_s28, %s10900_s11 }
  0x4d   :  { %p9055_p6 = pnand %p9053_p5, %p9050_p4 }
  0x4f   :  { %9058 = shalt.err (!%p9055_p6)
}
  0x50   :  { %s9059_s9 = scalar_lea.vmem %s126_s24, 8192  ;;  %p9064_p8 = scmp.lt.s32.totalorder %s126_s24, %s126_s24 }
  0x51   :  { %p9060_p7 = scmp.ne.s32.totalorder %s126_s24, %s9059_s9  ;;  %p9065_p9 = scmp.lt.s32.totalorder %s9059_s9, %s9059_s9 }
  0x53   :  { %p9066_p10 = por %p9065_p9, %p9064_p8 }
  0x55   :  { %p9067_p11 = pnand %p9066_p10, %p9060_p7 }
  0x57   :  { %9070 = shalt.err (!%p9067_p11)
}
  0x58   :  { %s9223_s20 = smov 64   ;;  %s9224_s2 = smov 4  }
  0x59   :  { %131 = dma.hbm_to_vmem [thread:$0]  %s10900_s11, 8192, %s126_s24, [#allocation22], %s9223_s20, %s9223_s20, %s9224_s2  }
  0x5a   :  { %s9071_s22 = scalar_lea.hbm %s10890_s1, 5120 }
  0x5b   :  { %p9072_p12 = scmp.ne.s32.totalorder %s10890_s1, %s9071_s22  ;;  %p9075_p13 = scmp.lt.u32.totalorder %s9071_s22, %s10890_s1 }
  0x5d   :  { %p9077_p0 = pnand %p9075_p13, %p9072_p12 }
  0x5f   :  { %9080 = shalt.err (!%p9077_p0)
}
  0x60   :  { %s9081_s29 = scalar_lea.vmem %s9361_s27, 5120  ;;  %p9086_p2 = scmp.lt.s32.totalorder %s9361_s27, %s9361_s27 }
  0x61   :  { %p9082_p1 = scmp.ne.s32.totalorder %s9361_s27, %s9081_s29  ;;  %p9087_p3 = scmp.lt.s32.totalorder %s9081_s29, %s9081_s29 }
  0x63   :  { %p9088_p4 = por %p9087_p3, %p9086_p2 }
  0x65   :  { %p9089_p5 = pnand %p9088_p4, %p9082_p1 }
  0x67   :  { %9092 = shalt.err (!%p9089_p5)
}
  0x68   :  { %s9225_s11 = smov 320   ;;  %s9226_s24 = smov 20  }
  0x69   :  { %37 = dma.hbm_to_vmem [thread:$0]  %s10890_s1, 5120, %s9361_s27, [#allocation8], %s9225_s11, %s9225_s11, %s9226_s24  }
  0x6a   :  { %s9227_s30 = smov [#allocation11]   ;;  %s9228_s15 = smov [#allocation14]  }
  0x6b   :  { %s53_s14 = sshll.u32 %s9227_s30, 4  ;;  %s76_s16 = sshll.u32 %s9228_s15, 4  ;;  %s54_s14 = int_to_ptr.vmem [resolvable:$true] %s53_s14  ;;  %s77_s16 = int_to_ptr.vmem [resolvable:$true] %s76_s16 }
  0x6c   :  { %s9093_s17 = scalar_lea.hbm %s10892_s3, 8192 }
  0x6d   :  { %p9094_p6 = scmp.ne.s32.totalorder %s10892_s3, %s9093_s17  ;;  %p9097_p7 = scmp.lt.u32.totalorder %s9093_s17, %s10892_s3 }
  0x6f   :  { %p9099_p8 = pnand %p9097_p7, %p9094_p6 }
  0x71   :  { %9102 = shalt.err (!%p9099_p8)
}
  0x72   :  { %s9103_s1 = scalar_lea.vmem %s54_s14, 8192  ;;  %p9108_p10 = scmp.lt.s32.totalorder %s54_s14, %s54_s14 }
  0x73   :  { %p9104_p9 = scmp.ne.s32.totalorder %s54_s14, %s9103_s1  ;;  %p9109_p11 = scmp.lt.s32.totalorder %s9103_s1, %s9103_s1 }
  0x75   :  { %p9110_p12 = por %p9109_p11, %p9108_p10 }
  0x77   :  { %p9111_p13 = pnand %p9110_p12, %p9104_p9 }
  0x79   :  { %9114 = shalt.err (!%p9111_p13)
}
  0x7a   :  { %59 = dma.hbm_to_vmem [thread:$0]  %s10892_s3, 8192, %s54_s14, [#allocation10], %s9223_s20, %s9223_s20, %s9224_s2  }
  0x7b   :  { %s9115_s29 = scalar_lea.hbm %s10894_s5, 16 }
  0x7c   :  { %p9116_p0 = scmp.ne.s32.totalorder %s10894_s5, %s9115_s29  ;;  %p9119_p1 = scmp.lt.u32.totalorder %s9115_s29, %s10894_s5 }
  0x7e   :  { %p9121_p2 = pnand %p9119_p1, %p9116_p0 }
  0x80   :  { %9124 = shalt.err (!%p9121_p2)
}
  0x81   :  { %s9125_s30 = scalar_lea.vmem %s77_s16, 16  ;;  %s9129_s15 = scalar_lea.vmem %s77_s16, 32 }
  0x82   :  { %p9126_p3 = scmp.ne.s32.totalorder %s77_s16, %s9125_s30  ;;  %p9130_p4 = scmp.lt.s32.totalorder %s77_s16, %s77_s16 }
  0x83   :  { %p9131_p5 = scmp.lt.s32.totalorder %s9129_s15, %s9125_s30 }
  0x85   :  { %p9132_p6 = por %p9131_p5, %p9130_p4 }
  0x87   :  { %p9133_p7 = pnand %p9132_p6, %p9126_p3 }
  0x89   :  { %9136 = shalt.err (!%p9133_p7)
}
  0x8a   :  { %79 = dma.hbm_to_vmem [thread:$0]  %s10894_s5, 16, %s77_s16, [#allocation13]  }
  0x8b   :  { %s9229_s9 = smov [#allocation17]   ;;  %s9230_s17 = smov [#allocation20]  }
  0x8c   :  { %s96_s26 = sshll.u32 %s9229_s9, 4  ;;  %s116_s19 = sshll.u32 %s9230_s17, 4  ;;  %s97_s26 = int_to_ptr.vmem [resolvable:$true] %s96_s26  ;;  %s117_s19 = int_to_ptr.vmem [resolvable:$true] %s116_s19 }
  0x8d   :  { %s9137_s6 = scalar_lea.hbm %s10897_s8, 128 }
  0x8e   :  { %p9138_p8 = scmp.ne.s32.totalorder %s10897_s8, %s9137_s6  ;;  %p9141_p9 = scmp.lt.u32.totalorder %s9137_s6, %s10897_s8 }
  0x90   :  { %p9143_p10 = pnand %p9141_p9, %p9138_p8 }
  0x92   :  { %9146 = shalt.err (!%p9143_p10)
}
  0x93   :  { %s9147_s5 = scalar_lea.vmem %s97_s26, 128  ;;  %p9152_p12 = scmp.lt.s32.totalorder %s97_s26, %s97_s26 }
  0x94   :  { %p9148_p11 = scmp.ne.s32.totalorder %s97_s26, %s9147_s5  ;;  %p9153_p13 = scmp.lt.s32.totalorder %s9147_s5, %s9147_s5 }
  0x96   :  { %p9154_p0 = por %p9153_p13, %p9152_p12 }
  0x98   :  { %p9155_p1 = pnand %p9154_p0, %p9148_p11 }
  0x9a   :  { %9158 = shalt.err (!%p9155_p1)
}
  0x9b   :  { %99 = dma.hbm_to_vmem [thread:$0]  %s10897_s8, 128, %s97_s26, [#allocation16]  }
  0x9c   :  { %s9159_s24 = scalar_lea.hbm %s10899_s10, 128 }
  0x9d   :  { %p9160_p2 = scmp.ne.s32.totalorder %s10899_s10, %s9159_s24  ;;  %p9163_p3 = scmp.lt.u32.totalorder %s9159_s24, %s10899_s10 }
  0x9f   :  { %p9165_p4 = pnand %p9163_p3, %p9160_p2 }
  0xa1   :  { %9168 = shalt.err (!%p9165_p4)
}
  0xa2   :  { %s9169_s3 = scalar_lea.vmem %s117_s19, 128  ;;  %p9174_p6 = scmp.lt.s32.totalorder %s117_s19, %s117_s19 }
  0xa3   :  { %p9170_p5 = scmp.ne.s32.totalorder %s117_s19, %s9169_s3  ;;  %p9175_p7 = scmp.lt.s32.totalorder %s9169_s3, %s9169_s3 }
  0xa5   :  { %p9176_p8 = por %p9175_p7, %p9174_p6 }
  0xa7   :  { %p9177_p9 = pnand %p9176_p8, %p9170_p5 }
  0xa9   :  { %9180 = shalt.err (!%p9177_p9)
}
  0xaa   :  { %119 = dma.hbm_to_vmem [thread:$0]  %s10899_s10, 128, %s117_s19, [#allocation19]  }
  0xab   :  { %s9231_s9 = smov [#allocation23]   ;;  %s9181_s22 = scalar_lea.hbm %s10901_s12, 16 }
  0xac   :  { %s138_s26 = sshll.u32 %s9231_s9, 4  ;;  %p9182_p10 = scmp.ne.s32.totalorder %s10901_s12, %s9181_s22  ;;  %s139_s26 = int_to_ptr.vmem [resolvable:$true] %s138_s26 }
  0xad   :  { %p9185_p11 = scmp.lt.u32.totalorder %s9181_s22, %s10901_s12 }
  0xaf   :  { %p9187_p12 = pnand %p9185_p11, %p9182_p10 }
  0xb1   :  { %9190 = shalt.err (!%p9187_p12)
}
  0xb2   :  { %s9191_s23 = scalar_lea.vmem %s139_s26, 16  ;;  %s9195_s10 = scalar_lea.vmem %s139_s26, 32 }
  0xb3   :  { %p9192_p13 = scmp.ne.s32.totalorder %s139_s26, %s9191_s23  ;;  %p9196_p0 = scmp.lt.s32.totalorder %s139_s26, %s139_s26 }
  0xb4   :  { %p9197_p1 = scmp.lt.s32.totalorder %s9195_s10, %s9191_s23 }
  0xb6   :  { %p9198_p2 = por %p9197_p1, %p9196_p0 }
  0xb8   :  { %p9199_p3 = pnand %p9198_p2, %p9192_p13 }
  0xba   :  { %9202 = shalt.err (!%p9199_p3)
}
  0xbb   :  { %141 = dma.hbm_to_vmem [thread:$0]  %s10901_s12, 16, %s139_s26, [#allocation22]  }
  0xbc   :  { %9203 = dma.done.wait [#allocation8], 5120  }
  0xbd   :  { %9204 = vsyncadd [#allocation8], 4294962176 }
  0xbe   :  { %9205 = dma.done.wait [#allocation10], 8272  }
  0xbf   :  { %9206 = vsyncadd [#allocation10], 4294959024 }
  0xc0   :  { %9207 = dma.done.wait [#allocation13], 32  }
  0xc1   :  { %9208 = vsyncadd [#allocation13], 4294967264 }
  0xc2   :  { %9209 = dma.done.wait [#allocation16], 144  }
  0xc3   :  { %9210 = vsyncadd [#allocation16], 4294967152 }
  0xc4   :  { %9211 = dma.done.wait [#allocation19], 256  }
  0xc5   :  { %9212 = vsyncadd [#allocation19], 4294967040 }
  0xc6   :  { %9213 = dma.done.wait [#allocation22], 8208  }
  0xc7   :  { %9214 = vsyncadd [#allocation22], 4294959088  ;;  %s180_s16 = sld [smem:[#allocation0]]   ;;  %s9232_s25 = smov 1024   ;;  %v10903_v0 = vmov 0   ;;  %v10905_v63 = vmov 0.0|0.0  }
  0xc8   :  { %192 = sst [smem:[#allocation25]] %s9232_s25  ;;  %558 = vmatprep.mubr.bf16.mxu0 %v10903_v0  ;;  %631 = vmatprep.mubr.bf16.mxu1 %v10903_v0  ;;  %s9234_s12 = smov 8  }
  0xc9   :  { %194 = sst [smem:[#allocation25 + $0x1]] %s9232_s25  ;;  %s9235_s29 = smov 128  }
  0xca   :  { %196 = sst [smem:[#allocation25 + $0x2]] %s9234_s12  ;;  %s9236_s11 = smov 2  }
  0xcb   :  { %198 = sst [smem:[#allocation25 + $0x3]] %s9223_s20  ;;  %s9237_s24 = smov [#allocation4]  }
  0xcc   :  { %200 = sst [smem:[#allocation25 + $0x4]] %s9235_s29  ;;  %s188_s4 = sshll.u32 %s9237_s24, 4  ;;  %s189_s4 = int_to_ptr.vmem [resolvable:$true] %s188_s4 }
  0xcd   :  { %202 = sst [smem:[#allocation25 + $0x5]] %s9236_s11  ;;  %s7985_s28 = sshll.u32 %s180_s16, 26 }
  0xce   :  { %s9238_s30 = smov 512   ;;  %s7986_s15 = sadd.s32 134217728, %s7985_s28 }
  0xcf   :  { %204 = sst [smem:[#allocation25 + $0x6]] %s9238_s30  ;;  %s9239_s3 = smov [#allocation6]  }
  0xd0   :  { %206 = sst [smem:[#allocation25 + $0x7]] %s9223_s20  ;;  %s9240_s8 = smov [#allocation24]  }
  0xd1   :  { %208 = sst [smem:[#allocation25 + $0x8]] %s9224_s2 }
  0xd2   :  { %210 = dma.general %s10896_s7, 131072, %s189_s4, %s9239_s3, %s9240_s8, [#allocation25], %s7986_s15, 0  }
  0xd3   :  { %v8755_v1 = vld [vmem:[#allocation7 + $0x4] ss:$20 sps:$4 sm:$0xff]   ;;  %v8757_v2 = vld [vmem:[#allocation7] ss:$20 sps:$4 sm:$0xff]   ;;  %v8760_v4 = vld [vmem:[#allocation7 + $0x8] ss:$20 sps:$4 sm:$0xff]  }
  0xd4   :  { %526 = vmatprep.subr.bf16.mxu0 %v8755_v1  ;;  %v8758_v3 = vld [vmem:[#allocation7 + $0xc] ss:$20 sps:$4 sm:$0xff]   ;;  %v8763_v6 = vld [vmem:[#allocation7 + $0x28] ss:$20 sps:$4 sm:$0xff]   ;;  %v8766_v8 = vld [vmem:[#allocation7 + $0x30] ss:$20 sps:$4 sm:$0xff]  }
  0xd5   :  { %527 = vmatpush1.bf16.msra.mxu0 %v8757_v2  ;;  %v8761_v5 = vld [vmem:[#allocation7 + $0x2c] ss:$20 sps:$4 sm:$0xff]   ;;  %599 = vmatprep.subr.bf16.mxu1 %v8758_v3  ;;  %v8764_v7 = vld [vmem:[#allocation7 + $0x34] ss:$20 sps:$4 sm:$0xff]   ;;  %v8769_v10 = vld [vmem:[#allocation7 + $0x50] ss:$20 sps:$4 sm:$0xff]  }
  0xd6   :  { %600 = vmatpush1.bf16.msra.mxu1 %v8760_v4  ;;  %528 = vmatprep.subr.bf16.mxu0 %v8761_v5  ;;  %v8767_v9 = vld [vmem:[#allocation7 + $0x54] ss:$20 sps:$4 sm:$0xff]   ;;  %v8770_v11 = vld [vmem:[#allocation7 + $0x5c] ss:$20 sps:$4 sm:$0xff]   ;;  %v8772_v13 = vld [vmem:[#allocation7 + $0x58] ss:$20 sps:$4 sm:$0xff]  }
  0xd7   :  { %601 = vmatprep.subr.bf16.mxu1 %v8764_v7  ;;  %v8773_v12 = vld [vmem:[#allocation7 + $0x7c] ss:$20 sps:$4 sm:$0xff]   ;;  %v8776_v14 = vld [vmem:[#allocation7 + $0x84] ss:$20 sps:$4 sm:$0xff]   ;;  %v8778_v17 = vld [vmem:[#allocation7 + $0x80] ss:$20 sps:$4 sm:$0xff]  }
  0xd8   :  { %v8775_v15 = vld [vmem:[#allocation7 + $0x78] ss:$20 sps:$4 sm:$0xff]   ;;  %v8781_v19 = vld [vmem:[#allocation7 + $0xa0] ss:$20 sps:$4 sm:$0xff]   ;;  %v8784_v21 = vld [vmem:[#allocation7 + $0xa8] ss:$20 sps:$4 sm:$0xff]  }
  0xd9   :  { %529 = vmatpush1.bf16.msra.mxu0 %v8763_v6  ;;  %v8779_v16 = vld [vmem:[#allocation7 + $0xa4] ss:$20 sps:$4 sm:$0xff]   ;;  %v8782_v18 = vld [vmem:[#allocation7 + $0xac] ss:$20 sps:$4 sm:$0xff]   ;;  %v8788_v22 = vld [vmem:[#allocation7 + $0xd4] ss:$20 sps:$4 sm:$0xff]  }
  0xda   :  { %530 = vmatprep.subr.bf16.mxu0 %v8767_v9  ;;  %602 = vmatpush1.bf16.msra.mxu1 %v8766_v8  ;;  %v8785_v20 = vld [vmem:[#allocation7 + $0xcc] ss:$20 sps:$4 sm:$0xff]   ;;  %v8787_v23 = vld [vmem:[#allocation7 + $0xc8] ss:$20 sps:$4 sm:$0xff]   ;;  %v8790_v25 = vld [vmem:[#allocation7 + $0xd0] ss:$20 sps:$4 sm:$0xff]  }
  0xdb   :  { %603 = vmatprep.subr.bf16.mxu1 %v8770_v11  ;;  %v8791_v24 = vld [vmem:[#allocation7 + $0xf4] ss:$20 sps:$4 sm:$0xff]   ;;  %v8794_v26 = vld [vmem:[#allocation7 + $0xfc] ss:$20 sps:$4 sm:$0xff]   ;;  %v8796_v29 = vld [vmem:[#allocation7 + $0xf8] ss:$20 sps:$4 sm:$0xff]  }
  0xdc   :  { %v8793_v27 = vld [vmem:[#allocation7 + $0xf0] ss:$20 sps:$4 sm:$0xff]   ;;  %v8799_v31 = vld [vmem:[#allocation7 + $0x118] ss:$20 sps:$4 sm:$0xff]   ;;  %v8802_v33 = vld [vmem:[#allocation7 + $0x120] ss:$20 sps:$4 sm:$0xff]  }
  0xdd   :  { %531 = vmatpush1.bf16.msra.mxu0 %v8769_v10  ;;  %v8797_v28 = vld [vmem:[#allocation7 + $0x11c] ss:$20 sps:$4 sm:$0xff]   ;;  %v8800_v30 = vld [vmem:[#allocation7 + $0x124] ss:$20 sps:$4 sm:$0xff]   ;;  %v8807_v36 = vld [vmem:[#allocation7 + $0x60] ss:$20 sps:$4 sm:$0xff]  }
  0xde   :  { %532 = vmatprep.subr.bf16.mxu0 %v8773_v12  ;;  %604 = vmatpush1.bf16.msra.mxu1 %v8772_v13  ;;  %v8804_v32 = vld [vmem:[#allocation7 + $0x10] ss:$20 sps:$4 sm:$0xff]   ;;  %v8805_v35 = vld [vmem:[#allocation7 + $0x38] ss:$20 sps:$4 sm:$0xff]   ;;  %v8808_v42 = vld [vmem:[#allocation7 + $0x88] ss:$20 sps:$4 sm:$0xff]  }
  0xdf   :  { %605 = vmatprep.subr.bf16.mxu1 %v8776_v14  ;;  %v9469_v34 = vld [vmem:[%s10889_s0] sm:$0xff]   ;;  %v8817_v39 = vld [vmem:[#allocation11 + $0x48] sm:$0xff]   ;;  %v8819_v43 = vld [vmem:[#allocation11 + $0x50] sm:$0xff]  }
  0xe0   :  { %v8815_v37 = vld [vmem:[#allocation11 + $0x40] sm:$0xff]   ;;  %v8818_v41 = vld [vmem:[#allocation11 + $0x8] sm:$0xff]   ;;  %v8820_v44 = vld [vmem:[#allocation11 + $0x10] sm:$0xff]  }
  0xe1   :  { %533 = vmatpush1.bf16.msra.mxu0 %v8775_v15  ;;  %v8816_v38 = vld [vmem:[#allocation11] sm:$0xff]   ;;  %v8821_v45 = vld [vmem:[#allocation11 + $0x58] sm:$0xff]   ;;  %v8809_v47 = vld [vmem:[%s10889_s0 + $0x10] sm:$0xff]  }
  0xe2   :  { %534 = vmatprep.subr.bf16.mxu0 %v8779_v16  ;;  %606 = vmatpush1.bf16.msra.mxu1 %v8778_v17  ;;  %v9477_v40 = vld [vmem:[%s10889_s0 + $0x8] sm:$0xff]   ;;  %v8810_v46 = vld [vmem:[#allocation7 + $0xb0] ss:$20 sps:$4 sm:$0xff]   ;;  %v8813_v53 = vld [vmem:[#allocation7 + $0x100] ss:$20 sps:$4 sm:$0xff]  }
  0xe3   :  { %607 = vmatprep.subr.bf16.mxu1 %v8782_v18  ;;  %v8822_v48 = vld [vmem:[#allocation11 + $0x18] sm:$0xff]   ;;  %v8811_v49 = vld [vmem:[#allocation7 + $0xd8] ss:$20 sps:$4 sm:$0xff]  }
  0xe4   :  { %v8825_v50 = vld [vmem:[#allocation11 + $0x60] sm:$0xff]   ;;  %v8829_v52 = vld [vmem:[#allocation11 + $0x68] sm:$0xff]   ;;  %v8812_v54 = vld [vmem:[%s10889_s0 + $0x18] sm:$0xff]  }
  0xe5   :  { %535 = vmatpush1.bf16.msra.mxu0 %v8781_v19  ;;  %v8826_v51 = vld [vmem:[#allocation11 + $0x20] sm:$0xff]   ;;  %v8830_v55 = vld [vmem:[#allocation11 + $0x28] sm:$0xff]   ;;  %v8833_v57 = vld [vmem:[#allocation11 + $0x70] sm:$0xff]  }
  0xe6   :  { %536 = vmatprep.subr.bf16.mxu0 %v8785_v20  ;;  %608 = vmatpush1.bf16.msra.mxu1 %v8784_v21  ;;  %v8814_v56 = vld [vmem:[#allocation7 + $0x128] ss:$20 sps:$4 sm:$0xff]   ;;  %v8827_v1 = vld [vmem:[#allocation11 + $0xc8] sm:$0xff]  }
  0xe7   :  { %609 = vmatprep.subr.bf16.mxu1 %v8788_v22  ;;  %v8834_v58 = vld [vmem:[#allocation11 + $0x30] sm:$0xff]   ;;  %v8837_v59 = vld [vmem:[#allocation11 + $0x78] sm:$0xff]   ;;  %v8823_v60 = vld [vmem:[#allocation11 + $0xc0] sm:$0xff]  }
  0xe8   :  { %v8824_v61 = vld [vmem:[#allocation11 + $0x80] sm:$0xff]   ;;  %v8838_v62 = vld [vmem:[#allocation11 + $0x38] sm:$0xff]   ;;  %v8828_v2 = vld [vmem:[#allocation11 + $0x88] sm:$0xff]  }
  0xe9   :  { %537 = vmatpush1.bf16.msra.mxu0 %v8787_v23  ;;  %v8831_v3 = vld [vmem:[#allocation11 + $0xd0] sm:$0xff]   ;;  %v8835_v5 = vld [vmem:[#allocation11 + $0xd8] sm:$0xff]   ;;  %v8839_v7 = vld [vmem:[#allocation11 + $0xe0] sm:$0xff]  }
  0xea   :  { %538 = vmatprep.subr.bf16.mxu0 %v8791_v24  ;;  %610 = vmatpush1.bf16.msra.mxu1 %v8790_v25  ;;  %v8832_v4 = vld [vmem:[#allocation11 + $0x90] sm:$0xff]   ;;  %v8836_v6 = vld [vmem:[#allocation11 + $0x98] sm:$0xff]   ;;  %v8840_v8 = vld [vmem:[#allocation11 + $0xa0] sm:$0xff]  }
  0xeb   :  { %611 = vmatprep.subr.bf16.mxu1 %v8794_v26  ;;  %v8841_v9 = vld [vmem:[#allocation11 + $0xe8] sm:$0xff]   ;;  %v8843_v11 = vld [vmem:[#allocation11 + $0xf0] sm:$0xff]   ;;  %v8845_v13 = vld [vmem:[#allocation11 + $0xf8] sm:$0xff]  }
  0xec   :  { %v8842_v10 = vld [vmem:[#allocation11 + $0xa8] sm:$0xff]   ;;  %v8844_v12 = vld [vmem:[#allocation11 + $0xb0] sm:$0xff]   ;;  %v8846_v14 = vld [vmem:[#allocation11 + $0xb8] sm:$0xff]  }
  0xed   :  { %539 = vmatpush1.bf16.msra.mxu0 %v8793_v27  ;;  %v8847_v15 = vld [vmem:[#allocation11 + $0x140] sm:$0xff]   ;;  %v8851_v18 = vld [vmem:[#allocation11 + $0x148] sm:$0xff]   ;;  %v8855_v20 = vld [vmem:[#allocation11 + $0x150] sm:$0xff]  }
  0xee   :  { %540 = vmatprep.subr.bf16.mxu0 %v8797_v28  ;;  %612 = vmatpush1.bf16.msra.mxu1 %v8796_v29  ;;  %v8848_v16 = vld [vmem:[#allocation11 + $0x100] sm:$0xff]   ;;  %v8852_v19 = vld [vmem:[#allocation11 + $0x108] sm:$0xff]   ;;  %v8856_v21 = vld [vmem:[#allocation11 + $0x110] sm:$0xff]  }
  0xef   :  { %613 = vmatprep.subr.bf16.mxu1 %v8800_v30  ;;  %v8849_v17 = vld [vmem:[#allocation11 + $0x1c0] sm:$0xff]   ;;  %v8859_v22 = vld [vmem:[#allocation11 + $0x158] sm:$0xff]   ;;  %v8867_v26 = vld [vmem:[#allocation11 + $0x168] sm:$0xff]  }
  0xf0   :  { %v8860_v23 = vld [vmem:[#allocation11 + $0x118] sm:$0xff]   ;;  %v8863_v24 = vld [vmem:[#allocation11 + $0x160] sm:$0xff]   ;;  %v8868_v27 = vld [vmem:[#allocation11 + $0x128] sm:$0xff]  }
  0xf1   :  { %541 = vmatpush1.bf16.msra.mxu0 %v8799_v31  ;;  %v8864_v25 = vld [vmem:[#allocation11 + $0x120] sm:$0xff]   ;;  %v8871_v28 = vld [vmem:[#allocation11 + $0x170] sm:$0xff]   ;;  %v8873_v30 = vld [vmem:[#allocation11 + $0x178] sm:$0xff]  }
  0xf2   :  { %8705 = vmatprep.subr.bf16.mxu0 %v8804_v32  ;;  %614 = vmatpush1.bf16.msra.mxu1 %v8802_v33  ;;  %v8872_v29 = vld [vmem:[#allocation11 + $0x130] sm:$0xff]   ;;  %v8874_v31 = vld [vmem:[#allocation11 + $0x138] sm:$0xff]  }
  0xf3   :  { %8361 = vmatprep.subr.bf16.mxu1 %v8815_v37 }
  0xf4   :  { %559 = vmatmul.mubr.bf16.vlgmr.msra.gmra.mrb[0].mxu0 %v9469_v34 }
  0xf5   :  { %8706 = vmatpush3.bf16.msra.mxu0 %v8804_v32  ;;  %568 = vmatprep.mubr.bf16.mxu0 %v10903_v0  ;;  %v269_v32 = vlaneseq }
  0xf6   :  { %632 = vmatmul.mubr.bf16.vlgmr.msra.gmra.mrb[0].mxu1 %v9469_v34  ;;  %8707 = vmatprep.subr.bf16.mxu0 %v8805_v35 }
  0xf7   :  { %641 = vmatprep.mubr.bf16.mxu1 %v10903_v0  ;;  %8362 = vmatpush3.bf16.msra.mxu1 %v8816_v38  ;;  %v9498_v33 = vshrl.u32 %v269_v32, 7 }
  0xf8   :  { %8363 = vmatprep.subr.bf16.mxu1 %v8817_v39 }
  0xf9   :  { %8708 = vmatpush3.bf16.msra.mxu0 %v8805_v35  ;;  %v859_v35 = vadd.s32 8, %v9498_v33  ;;  %v9505_v37 = vsub.s32 1, %v9498_v33  ;;  %v9508_v38 = vsub.s32 2, %v9498_v33  ;;  %v9511_v39 = vsub.s32 3, %v9498_v33 }
  0xfa   :  { %8709 = vmatprep.subr.bf16.mxu0 %v8807_v36 }
  0xfb   :  { %8364 = vmatpush3.bf16.msra.mxu1 %v8818_v41  ;;  %10913 = vst [vmem:[#allocation33_spill] sm:$0xff] %v9505_v37  ;;  %10914 = vst [vmem:[#allocation34_spill] sm:$0xff] %v9511_v39  ;;  %v870_v41 = vand.u32 7, %v9498_v33 }
  0xfc   :  { %569 = vmatmul.mubr.bf16.gmra.mrb[4].mxu0 %v9477_v40  ;;  %8365 = vmatprep.subr.bf16.mxu1 %v8819_v43 }
  0xfd   :  { %8710 = vmatpush3.bf16.msra.mxu0 %v8807_v36  ;;  %578 = vmatprep.mubr.bf16.mxu0 %v10903_v0  ;;  %v267_v36 = vld [vmem:[#allocation9] sm:$0x1f]  ;;  %vm9536_vm0 = vcmp.lt.s32.totalorder %v870_v41, 4 }
  0xfe   :  { %642 = vmatmul.mubr.bf16.gmra.mrb[4].mxu1 %v9477_v40  ;;  %8711 = vmatprep.subr.bf16.mxu0 %v8808_v42  ;;  %v9518_v43 = vrot.slane %v267_v36, %v9505_v37  ;;  %vm9559_vm8 = vmpackc.low %vm9536_vm0, %vm9536_vm0 }
  0xff   :  { %651 = vmatprep.mubr.bf16.mxu1 %v10903_v0  ;;  %8366 = vmatpush3.bf16.msra.mxu1 %v8820_v44  ;;  %v9521_v44 = vsub.s32 4, %v9498_v33 }
 0x100   :  { %8367 = vmatprep.subr.bf16.mxu1 %v8821_v45  ;;  %v9524_v45 = vadd.s32 16, %v9498_v33 }
 0x101   :  { %8712 = vmatpush3.bf16.msra.mxu0 %v8808_v42  ;;  %v877_v42 = vand.u32 7, %v859_v35  ;;  %10915 = vst [vmem:[#allocation35_spill] sm:$0xff] %v9521_v44 }
 0x102   :  { %8713 = vmatprep.subr.bf16.mxu0 %v8810_v46 }
 0x103   :  { %8368 = vmatpush3.bf16.msra.mxu1 %v8822_v48  ;;  %vm9540_vm1 = vcmp.lt.s32.totalorder %v877_v42, 4 }
 0x104   :  { %579 = vmatmul.mubr.bf16.gmra.mrb[8].mxu0 %v8809_v47  ;;  %8369 = vmatprep.subr.bf16.mxu1 %v8825_v50  ;;  %vm9582_vm13 = vmpackc.low %vm9540_vm1, %vm9540_vm1 }
 0x105   :  { %8714 = vmatpush3.bf16.msra.mxu0 %v8810_v46  ;;  %588 = vmatprep.mubr.bf16.mxu0 %v10903_v0  ;;  %v9527_v46 = vadd.s32 24, %v9498_v33 }
 0x106   :  { %652 = vmatmul.mubr.bf16.gmra.mrb[8].mxu1 %v8809_v47  ;;  %8715 = vmatprep.subr.bf16.mxu0 %v8811_v49 }
 0x107   :  { %661 = vmatprep.mubr.bf16.mxu1 %v10903_v0  ;;  %8370 = vmatpush3.bf16.msra.mxu1 %v8826_v51 }
 0x108   :  { %8371 = vmatprep.subr.bf16.mxu1 %v8829_v52 }
 0x109   :  { %8716 = vmatpush3.bf16.msra.mxu0 %v8811_v49  ;;  %v9533_v49 = vrot.slane %v267_v36, %v9511_v39 }
 0x10a   :  { %8717 = vmatprep.subr.bf16.mxu0 %v8813_v53 }
 0x10b   :  { %8372 = vmatpush3.bf16.msra.mxu1 %v8830_v55 }
 0x10c   :  { %589 = vmatmul.mubr.bf16.gmra.mrb[12].mxu0 %v8812_v54  ;;  %8373 = vmatprep.subr.bf16.mxu1 %v8833_v57  ;;  %v9546_v57 = vrot.slane %v267_v36, %v9521_v44 }
 0x10d   :  { %8718 = vmatpush3.bf16.msra.mxu0 %v8813_v53  ;;  %8721 = vmatprep.mubr.bf16.mxu0 %v9469_v34  ;;  %v9501_v34 = vsub.s32 0, %v9498_v33 }
 0x10e   :  { %662 = vmatmul.mubr.bf16.gmra.mrb[12].mxu1 %v8812_v54  ;;  %8719 = vmatprep.subr.bf16.mxu0 %v8814_v56 }
 0x10f   :  { %1534 = vmatprep.mubr.bf16.mxu1 %v10905_v63  ;;  %8374 = vmatpush3.bf16.msra.mxu1 %v8834_v58 }
 0x110   :  { %8375 = vmatprep.subr.bf16.mxu1 %v8837_v59 }
 0x111   :  { %8720 = vmatpush3.bf16.msra.mxu0 %v8814_v56 }
 0x112   :  { %8425 = vmatprep.subr.bf16.mxu0 %v8823_v60 }
 0x113   :  { %8376 = vmatpush3.bf16.msra.mxu1 %v8838_v62 }
 0x114   :  { %8722 = vmatmul.mubr.bf16.vlgmr.msra.gmra.mrb[16].mxu0 %v9477_v40  ;;  %8489 = vmatprep.subr.bf16.mxu1 %v8847_v15  ;;  %v9514_v40 = vrot.slane %v267_v36, %v9501_v34 }
 0x115   :  { %8725 = vmatprep.mubr.bf16.mxu0 %v8809_v47  ;;  %8426 = vmatpush3.bf16.msra.mxu0 %v8824_v61  ;;  %v9530_v47 = vrot.slane %v267_v36, %v9508_v38 }
 0x116   :  { %8427 = vmatprep.subr.bf16.mxu0 %v8827_v1  ;;  %1535 = vmatmul.mubr.bf16.vlgmr.msra.gmra.mrb[16].mxu1 %v10905_v63 }
 0x117   :  { %1542 = vmatprep.mubr.bf16.mxu1 %v10905_v63  ;;  %8490 = vmatpush3.bf16.msra.mxu1 %v8848_v16 }
 0x118   :  { %8491 = vmatprep.subr.bf16.mxu1 %v8851_v18 }
 0x119   :  { %8428 = vmatpush3.bf16.msra.mxu0 %v8828_v2 }
 0x11a   :  { %8429 = vmatprep.subr.bf16.mxu0 %v8831_v3 }
 0x11b   :  { %8492 = vmatpush3.bf16.msra.mxu1 %v8852_v19 }
 0x11c   :  { %8726 = vmatmul.mubr.bf16.gmra.mrb[20].mxu0 %v8812_v54  ;;  %8493 = vmatprep.subr.bf16.mxu1 %v8855_v20 }
 0x11d   :  { %8430 = vmatpush3.bf16.msra.mxu0 %v8832_v4 }
 0x11e   :  { %8431 = vmatprep.subr.bf16.mxu0 %v8835_v5  ;;  %1543 = vmatmul.mubr.bf16.gmra.mrb[20].mxu1 %v10905_v63 }
 0x11f   :  { %8494 = vmatpush3.bf16.msra.mxu1 %v8856_v21 }
 0x120   :  { %8495 = vmatprep.subr.bf16.mxu1 %v8859_v22  ;;  %v8850_v22 = vld [vmem:[#allocation11 + $0x180] sm:$0xff]  }
 0x121   :  { %8432 = vmatpush3.bf16.msra.mxu0 %v8836_v6 }
 0x122   :  { %8433 = vmatprep.subr.bf16.mxu0 %v8839_v7 }
 0x123   :  { %8496 = vmatpush3.bf16.msra.mxu1 %v8860_v23 }
 0x124   :  { %8497 = vmatprep.subr.bf16.mxu1 %v8863_v24 }
 0x125   :  { %8434 = vmatpush3.bf16.msra.mxu0 %v8840_v8 }
 0x126   :  { %8435 = vmatprep.subr.bf16.mxu0 %v8841_v9 }
 0x127   :  { %8498 = vmatpush3.bf16.msra.mxu1 %v8864_v25 }
 0x128   :  { %8499 = vmatprep.subr.bf16.mxu1 %v8867_v26 }
 0x129   :  { %8436 = vmatpush3.bf16.msra.mxu0 %v8842_v10 }
 0x12a   :  { %8437 = vmatprep.subr.bf16.mxu0 %v8843_v11 }
 0x12b   :  { %8500 = vmatpush3.bf16.msra.mxu1 %v8868_v27 }
 0x12c   :  { %8501 = vmatprep.subr.bf16.mxu1 %v8871_v28  ;;  %v8853_v28 = vld [vmem:[#allocation11 + $0x1c8] sm:$0xff]  }
 0x12d   :  { %8438 = vmatpush3.bf16.msra.mxu0 %v8844_v12 }
 0x12e   :  { %8439 = vmatprep.subr.bf16.mxu0 %v8845_v13 }
 0x12f   :  { %8502 = vmatpush3.bf16.msra.mxu1 %v8872_v29 }
 0x130   :  { %8503 = vmatprep.subr.bf16.mxu1 %v8873_v30 }
 0x131   :  { %8440 = vmatpush3.bf16.msra.mxu0 %v8846_v14 }
 0x132   :  { %8553 = vmatprep.subr.bf16.mxu0 %v8849_v17 }
 0x133   :  { %8504 = vmatpush3.bf16.msra.mxu1 %v8874_v31 }
 0x1c7   :  { %v560_v48 = vpop.f32.mrb[0].mxu0 }
 0x1c8   :  { %v561_v50 = vadd.f32 %v560_v48, %v9514_v40  ;;  %v562_v51 = vpop.f32.mrb[1].mxu0 }
 0x1c9   :  { %v563_v54 = vadd.f32 %v562_v51, %v9518_v43  ;;  %v633_v55 = vpop.f32.mrb[0].mxu1  ;;  %v564_v56 = vpop.f32.mrb[2].mxu0 }
 0x1ca   :  { %vm737_vm2 = vcmp.gt.f32.partialorder %v561_v50, 0.0  ;;  %v777_v60 = vmul.f32 0.2, %v561_v50  ;;  %v634_v61 = vadd.f32 %v633_v55, %v9530_v47  ;;  %v565_v62 = vadd.f32 %v564_v56, %v9514_v40  ;;  %v635_v1 = vpop.f32.mrb[1].mxu1  ;;  %v566_v2 = vpop.f32.mrb[3].mxu0 }
 0x1cb   :  { %vm738_vm3 = vcmp.gt.f32.partialorder %v563_v54, 0.0  ;;  %v778_v3 = vmul.f32 0.2, %v563_v54  ;;  %v636_v4 = vadd.f32 %v635_v1, %v9533_v49  ;;  %v567_v5 = vadd.f32 %v566_v2, %v9518_v43  ;;  %v637_v6 = vpop.f32.mrb[2].mxu1  ;;  %v8854_v2 = vld [vmem:[#allocation11 + $0x188] sm:$0xff]  }
 0x1cc   :  { %v817_v7 = vsel %vm737_vm2, %v561_v50, %v777_v60  ;;  %vm739_vm4 = vcmp.gt.f32.partialorder %v634_v61, 0.0  ;;  %v779_v8 = vmul.f32 0.2, %v634_v61  ;;  %vm742_vm5 = vcmp.gt.f32.partialorder %v565_v62, 0.0  ;;  %v639_v9 = vpop.f32.mrb[3].mxu1 }
 0x1cd   :  { %v818_v10 = vsel %vm738_vm3, %v563_v54, %v778_v3  ;;  %v782_v11 = vmul.f32 0.2, %v565_v62  ;;  %vm740_vm6 = vcmp.gt.f32.partialorder %v636_v4, 0.0  ;;  %v780_v12 = vmul.f32 0.2, %v636_v4 }
 0x1ce   :  { %v8221_v13 = vpack.c.bf16 %v818_v10, %v817_v7  ;;  %v9554_v14 = vsel %vm739_vm4, %v634_v61, %v779_v8  ;;  %vm743_vm7 = vcmp.gt.f32.partialorder %v567_v5, 0.0  ;;  %v783_v15 = vmul.f32 0.2, %v567_v5  ;;  %v8857_v7 = vld [vmem:[#allocation11 + $0x1d0] sm:$0xff]  }
 0x1cf   :  { %v8218_v17 = vpack.c.bf16 %v9554_v14, %v818_v10  ;;  %v822_v18 = vsel %vm742_vm5, %v565_v62, %v782_v11  ;;  %v9564_v19 = vsel %vm740_vm6, %v636_v4, %v780_v12  ;;  %v638_v20 = vadd.f32 %v637_v6, %v9530_v47  ;;  %v570_v21 = vpop.f32.mrb[4].mxu0 }
 0x1d0   :  { %v823_v24 = vsel %vm743_vm7, %v567_v5, %v783_v15  ;;  %v571_v25 = vadd.f32 %v570_v21, %v9514_v40  ;;  %v640_v26 = vadd.f32 %v639_v9, %v9533_v49  ;;  %v572_v27 = vpop.f32.mrb[5].mxu0 }
 0x1d1   :  { %v9571_v29 = vpack.c.bf16 %v823_v24, %v822_v18  ;;  %vm744_vm9 = vcmp.gt.f32.partialorder %v638_v20, 0.0  ;;  %v784_v30 = vmul.f32 0.2, %v638_v20  ;;  %v573_v31 = vadd.f32 %v572_v27, %v9518_v43  ;;  %v643_v32 = vpop.f32.mrb[4].mxu1  ;;  %8219 = vmatprep.mubr.msk.bf16.mxu0 %vm9559_vm8, %v8218_v17  ;;  %v574_v35 = vpop.f32.mrb[6].mxu0 }
 0x1d2   :  { %vm747_vm10 = vcmp.gt.f32.partialorder %v571_v25, 0.0  ;;  %v787_v36 = vmul.f32 0.2, %v571_v25  ;;  %vm745_vm11 = vcmp.gt.f32.partialorder %v640_v26, 0.0  ;;  %v785_v41 = vmul.f32 0.2, %v640_v26  ;;  %8222 = vmatmul.mubr.msk.bf16.vlgmr.msra.gmra.mrb[24].mxu0 %vm9559_vm8, %v8221_v13 }
 0x1d3   :  { %v824_v42 = vsel %vm744_vm9, %v638_v20, %v784_v30  ;;  %vm748_vm12 = vcmp.gt.f32.partialorder %v573_v31, 0.0  ;;  %v788_v48 = vmul.f32 0.2, %v573_v31  ;;  %v644_v50 = vadd.f32 %v643_v32, %v9530_v47  ;;  %v645_v51 = vpop.f32.mrb[5].mxu1  ;;  %v576_v54 = vpop.f32.mrb[7].mxu0  ;;  %8554 = vmatpush3.bf16.msra.mxu0 %v8850_v22 }
 0x1d4   :  { %v9586_v56 = vpack.c.bf16 %v824_v42, %v823_v24  ;;  %v827_v60 = vsel %vm747_vm10, %v571_v25, %v787_v36  ;;  %v9588_v61 = vsel %vm745_vm11, %v640_v26, %v785_v41  ;;  %v575_v62 = vadd.f32 %v574_v35, %v9514_v40  ;;  %v647_v1 = vpop.f32.mrb[6].mxu1  ;;  %8555 = vmatprep.subr.bf16.mxu0 %v8853_v28  ;;  %v8858_v24 = vld [vmem:[#allocation11 + $0x190] sm:$0xff]   ;;  %v8861_v25 = vld [vmem:[#allocation11 + $0x1d8] sm:$0xff]  }
 0x1d5   :  { %v9592_v3 = vpack.c.bf16 %v9588_v61, %v824_v42  ;;  %v828_v4 = vsel %vm748_vm12, %v573_v31, %v788_v48  ;;  %vm749_vm14 = vcmp.gt.f32.partialorder %v644_v50, 0.0  ;;  %v789_v5 = vmul.f32 0.2, %v644_v50  ;;  %v649_v6 = vpop.f32.mrb[7].mxu1 }
 0x1d6   :  { %v9594_v8 = vpack.c.bf16 %v828_v4, %v827_v60  ;;  %vm752_vm15 = vcmp.gt.f32.partialorder %v575_v62, 0.0  ;;  %v792_v9 = vmul.f32 0.2, %v575_v62  ;;  %v646_v10 = vadd.f32 %v645_v51, %v9533_v49  ;;  %8183 = vmatprep.mubr.msk.bf16.mxu1 %vm9582_vm13, %v9586_v56 }
 0x1d7   :  { %v829_v11 = vsel %vm749_vm14, %v644_v50, %v789_v5  ;;  %v577_v12 = vadd.f32 %v576_v54, %v9518_v43  ;;  %v648_v13 = vadd.f32 %v647_v1, %v9530_v47  ;;  %8186 = vmatmul.mubr.msk.bf16.gmra.mrb[24].mxu1 %vm9582_vm13, %v9571_v29  ;;  %v580_v15 = vpop.f32.mrb[8].mxu0  ;;  %v650_v17 = vadd.f32 %v649_v6, %v9533_v49 }
 0x1d8   :  { %v9606_v18 = vpack.c.bf16 %v829_v11, %v828_v4  ;;  %v832_v20 = vsel %vm752_vm15, %v575_v62, %v792_v9  ;;  %vm750_vm2 = vcmp.gt.f32.partialorder %v646_v10, 0.0  ;;  %v790_v21 = vmul.f32 0.2, %v646_v10  ;;  %v582_v22 = vpop.f32.mrb[9].mxu0  ;;  %8556 = vmatpush3.bf16.msra.mxu0 %v8854_v2  ;;  %v8862_v2 = vld [vmem:[#allocation11 + $0x198] sm:$0xff]   ;;  %v8865_v9 = vld [vmem:[#allocation11 + $0x1e0] sm:$0xff]  }
 0x1d9   :  { %vm753_vm3 = vcmp.gt.f32.partialorder %v577_v12, 0.0  ;;  %v793_v26 = vmul.f32 0.2, %v577_v12  ;;  %vm754_vm4 = vcmp.gt.f32.partialorder %v648_v13, 0.0  ;;  %v794_v27 = vmul.f32 0.2, %v648_v13  ;;  %8557 = vmatprep.subr.bf16.mxu0 %v8857_v7 }
 0x1da   :  { %v9608_v28 = vsel %vm750_vm2, %v646_v10, %v790_v21  ;;  %v581_v30 = vadd.f32 %v580_v15, %v9514_v40  ;;  %vm755_vm5 = vcmp.gt.f32.partialorder %v650_v17, 0.0  ;;  %v795_v31 = vmul.f32 0.2, %v650_v17  ;;  %v653_v32 = vpop.f32.mrb[8].mxu1  ;;  %v584_v35 = vpop.f32.mrb[10].mxu0 }
 0x1db   :  { %v9612_v36 = vpack.c.bf16 %v9608_v28, %v829_v11  ;;  %v833_v41 = vsel %vm753_vm3, %v577_v12, %v793_v26  ;;  %v834_v42 = vsel %vm754_vm4, %v648_v13, %v794_v27  ;;  %v583_v48 = vadd.f32 %v582_v22, %v9518_v43  ;;  %v655_v50 = vpop.f32.mrb[9].mxu1  ;;  %v586_v51 = vpop.f32.mrb[11].mxu0  ;;  %v8866_v22 = vld [vmem:[#allocation11 + $0x1a0] sm:$0xff]   ;;  %v8869_v27 = vld [vmem:[#allocation11 + $0x1e8] sm:$0xff]  }
 0x1dc   :  { %v9615_v54 = vpack.c.bf16 %v833_v41, %v832_v20  ;;  %v9617_v60 = vpack.c.bf16 %v834_v42, %v833_v41  ;;  %vm757_vm6 = vcmp.gt.f32.partialorder %v581_v30, 0.0  ;;  %v797_v62 = vmul.f32 0.2, %v581_v30  ;;  %v657_v1 = vpop.f32.mrb[10].mxu1  ;;  %8558 = vmatpush3.bf16.msra.mxu0 %v8858_v24 }
 0x1dd   :  { %v9620_v4 = vsel %vm755_vm5, %v650_v17, %v795_v31  ;;  %vm758_vm7 = vcmp.gt.f32.partialorder %v583_v48, 0.0  ;;  %v798_v5 = vmul.f32 0.2, %v583_v48  ;;  %v654_v6 = vadd.f32 %v653_v32, %v9530_v47  ;;  %v659_v7 = vpop.f32.mrb[11].mxu1  ;;  %8559 = vmatprep.subr.bf16.mxu0 %v8861_v25 }
 0x1de   :  { %v837_v10 = vsel %vm757_vm6, %v581_v30, %v797_v62  ;;  %v9624_v11 = vpack.c.bf16 %v9620_v4, %v834_v42  ;;  %v585_v12 = vadd.f32 %v584_v35, %v9514_v40  ;;  %v656_v13 = vadd.f32 %v655_v50, %v9533_v49 }
 0x1df   :  { %v838_v15 = vsel %vm758_vm7, %v583_v48, %v798_v5  ;;  %vm759_vm9 = vcmp.gt.f32.partialorder %v654_v6, 0.0  ;;  %v799_v20 = vmul.f32 0.2, %v654_v6  ;;  %v587_v17 = vadd.f32 %v586_v51, %v9518_v43  ;;  %v590_v21 = vpop.f32.mrb[12].mxu0 }
 0x1e0   :  { %v9629_v24 = vpack.c.bf16 %v838_v15, %v837_v10  ;;  %vm762_vm10 = vcmp.gt.f32.partialorder %v585_v12, 0.0  ;;  %v802_v25 = vmul.f32 0.2, %v585_v12  ;;  %vm760_vm11 = vcmp.gt.f32.partialorder %v656_v13, 0.0  ;;  %v592_v26 = vpop.f32.mrb[13].mxu0  ;;  %8560 = vmatpush3.bf16.msra.mxu0 %v8862_v2 }
 0x1e1   :  { %v839_v30 = vsel %vm759_vm9, %v654_v6, %v799_v20  ;;  %v800_v31 = vmul.f32 0.2, %v656_v13  ;;  %vm763_vm12 = vcmp.gt.f32.partialorder %v587_v17, 0.0  ;;  %v803_v32 = vmul.f32 0.2, %v587_v17  ;;  %v663_v35 = vpop.f32.mrb[12].mxu1  ;;  %8561 = vmatprep.subr.bf16.mxu0 %v8865_v9 }
 0x1e2   :  { %v9631_v41 = vpack.c.bf16 %v839_v30, %v838_v15  ;;  %v842_v42 = vsel %vm762_vm10, %v585_v12, %v802_v25  ;;  %v658_v48 = vadd.f32 %v657_v1, %v9530_v47  ;;  %v591_v50 = vadd.f32 %v590_v21, %v9514_v40  ;;  %v594_v51 = vpop.f32.mrb[14].mxu0  ;;  %v665_v62 = vpop.f32.mrb[13].mxu1  ;;  %v8870_v21 = vld [vmem:[#allocation11 + $0x1a8] sm:$0xff]  }
 0x1e3   :  { %v9636_v5 = vsel %vm760_vm11, %v656_v13, %v800_v31  ;;  %v843_v2 = vsel %vm763_vm12, %v587_v17, %v803_v32  ;;  %v660_v6 = vadd.f32 %v659_v7, %v9533_v49  ;;  %v593_v10 = vadd.f32 %v592_v26, %v9518_v43  ;;  %v596_v20 = vpop.f32.mrb[15].mxu0  ;;  %v667_v0 = vpop.f32.mrb[14].mxu1  ;;  %v8875_v13 = vld [vmem:[#allocation11 + $0x1f0] sm:$0xff]  }
 0x1e4   :  { %v9641_v9 = vpack.c.bf16 %v9636_v5, %v839_v30  ;;  %v9643_v12 = vpack.c.bf16 %v843_v2, %v842_v42  ;;  %vm764_vm14 = vcmp.gt.f32.partialorder %v658_v48, 0.0  ;;  %v804_v1 = vmul.f32 0.2, %v658_v48  ;;  %v9645_v15 = vpop.f32.mrb[15].mxu1  ;;  %8562 = vmatpush3.bf16.msra.mxu0 %v8866_v22 }
 0x1e5   :  { %vm767_vm15 = vcmp.gt.f32.partialorder %v591_v50, 0.0  ;;  %v807_v17 = vmul.f32 0.2, %v591_v50  ;;  %vm765_vm2 = vcmp.gt.f32.partialorder %v660_v6, 0.0  ;;  %v805_v7 = vmul.f32 0.2, %v660_v6  ;;  %8563 = vmatprep.subr.bf16.mxu0 %v8869_v27 }
 0x1e6   :  { %v844_v25 = vsel %vm764_vm14, %v658_v48, %v804_v1  ;;  %vm768_vm3 = vcmp.gt.f32.partialorder %v593_v10, 0.0  ;;  %v808_v26 = vmul.f32 0.2, %v593_v10  ;;  %v664_v30 = vadd.f32 %v663_v35, %v9530_v47  ;;  %v8876_v48 = vld [vmem:[#allocation11 + $0x1b0] sm:$0xff]  }
 0x1e7   :  { %v9648_v31 = vpack.c.bf16 %v844_v25, %v843_v2  ;;  %v847_v32 = vsel %vm767_vm15, %v591_v50, %v807_v17  ;;  %v9650_v42 = vsel %vm765_vm2, %v660_v6, %v805_v7  ;;  %v595_v63 = vadd.f32 %v594_v51, %v9514_v40  ;;  %v8723_v22 = vpop.f32.mrb[16].mxu0  ;;  %v8877_v51 = vld [vmem:[#allocation11 + $0x1f8] sm:$0xff]  }
 0x1e8   :  { %v9654_v23 = vpack.c.bf16 %v9650_v42, %v844_v25  ;;  %v848_v59 = vsel %vm768_vm3, %v593_v10, %v808_v26  ;;  %vm769_vm4 = vcmp.gt.f32.partialorder %v664_v30, 0.0  ;;  %v809_v58 = vmul.f32 0.2, %v664_v30  ;;  %v706_v27 = vpop.f32.mrb[17].mxu0  ;;  %8564 = vmatpush3.bf16.msra.mxu0 %v8870_v21 }
 0x1e9   :  { %v9656_v1 = vpack.c.bf16 %v848_v59, %v847_v32  ;;  %vm772_vm5 = vcmp.gt.f32.partialorder %v595_v63, 0.0  ;;  %v812_v35 = vmul.f32 0.2, %v595_v63  ;;  %v666_v50 = vadd.f32 %v665_v62, %v9533_v49  ;;  %v8724_v2 = vpop.f32.mrb[18].mxu0  ;;  %8565 = vmatprep.subr.bf16.mxu0 %v8875_v13  ;;  %v8377_v26 = vpop.f32.mrb[16].mxu1 }
 0x1ea   :  { %v10924_v6 = vand.u32 7, %v9524_v45  ;;  %v849_v10 = vsel %vm769_vm4, %v664_v30, %v809_v58  ;;  %v597_v17 = vadd.f32 %v596_v20, %v9518_v43  ;;  %v668_v21 = vadd.f32 %v667_v0, %v9530_v47  ;;  %v709_v25 = vpop.f32.mrb[19].mxu0  ;;  %v8378_v44 = vpop.f32.mrb[17].mxu1 }
 0x1eb   :  { %v715_v7 = vadd.f32 %v8723_v22, %v9546_v57  ;;  %v9668_v32 = vpack.c.bf16 %v849_v10, %v848_v59  ;;  %v9670_v62 = vsel %vm772_vm5, %v595_v63, %v812_v35  ;;  %vm770_vm7 = vcmp.gt.f32.partialorder %v666_v50, 0.0  ;;  %v8380_v20 = vpop.f32.mrb[18].mxu1 }
 0x1ec   :  { %vm9661_vm6 = vcmp.lt.s32.totalorder %v10924_v6, 4  ;;  %v810_v45 = vmul.f32 0.2, %v666_v50  ;;  %v8878_v6 = vld [vmem:[#allocation11 + $0x1b8] sm:$0xff]   ;;  %vm773_vm9 = vcmp.gt.f32.partialorder %v597_v17, 0.0  ;;  %vm774_vm10 = vcmp.gt.f32.partialorder %v668_v21, 0.0  ;;  %8566 = vmatpush3.bf16.msra.mxu0 %v8876_v48 }
 0x1ed   :  { %v813_v13 = vmul.f32 0.2, %v597_v17  ;;  %v814_v58 = vmul.f32 0.2, %v668_v21  ;;  %v10927_v43 = vand.u32 7, %v9527_v46  ;;  %vm751_vm12 = vcmp.gt.f32.partialorder %v715_v7, 0.0  ;;  %8567 = vmatprep.subr.bf16.mxu0 %v8877_v51  ;;  %vm9708_vm3 = vmpackc.low %vm9661_vm6, %vm9661_vm6 }
 0x1ee   :  { %v850_v47 = vsel %vm770_vm7, %v666_v50, %v810_v45  ;;  %v791_v59 = vmul.f32 0.2, %v715_v7  ;;  %v707_v63 = vadd.f32 %v706_v27, %v9546_v57  ;;  %v718_v46 = vadd.f32 %v8724_v2, %v9546_v57 }
 0x1ef   :  { %vm9674_vm11 = vcmp.lt.s32.totalorder %v10927_v43, 4  ;;  %v9679_v30 = vpack.c.bf16 %v850_v47, %v849_v10  ;;  %v9681_v22 = vsel %vm773_vm9, %v597_v17, %v813_v13  ;;  %v9683_v35 = vsel %vm774_vm10, %v668_v21, %v814_v58  ;;  %v8381_v43 = vpop.f32.mrb[19].mxu1  ;;  %v8727_v27 = vpop.f32.mrb[20].mxu0 }
 0x1f0   :  { %v831_v50 = vsel %vm751_vm12, %v715_v7, %v791_v59  ;;  %vm741_vm14 = vcmp.gt.f32.partialorder %v707_v63, 0.0  ;;  %v781_v10 = vmul.f32 0.2, %v707_v63  ;;  %vm756_vm15 = vcmp.gt.f32.partialorder %v718_v46, 0.0  ;;  %v722_v21 = vpop.f32.mrb[21].mxu0  ;;  %8568 = vmatpush3.bf16.msra.mxu0 %v8878_v6  ;;  %vm9727_vm9 = vmpackc.low %vm9674_vm11, %vm9674_vm11 }
 0x1f1   :  { %v9691_v51 = vpack.c.bf16 %v831_v50, %v9608_v28  ;;  %v796_v17 = vmul.f32 0.2, %v718_v46  ;;  %v710_v2 = vadd.f32 %v709_v25, %v9546_v57  ;;  %v731_v45 = vadd.f32 %v8727_v27, %v9546_v57  ;;  %v8728_v58 = vpop.f32.mrb[22].mxu0  ;;  %v8383_v37 = vpop.f32.mrb[20].mxu1 }
 0x1f2   :  { %v723_v13 = vadd.f32 %v722_v21, %v9546_v57  ;;  %v670_v7 = vadd.f32 %v9645_v15, %v9533_v49  ;;  %v821_v59 = vsel %vm741_vm14, %v707_v63, %v781_v10  ;;  %v734_v28 = vadd.f32 %v8728_v58, %v9546_v57  ;;  %v725_v50 = vpop.f32.mrb[23].mxu0  ;;  %v8384_v21 = vpop.f32.mrb[21].mxu1 }
 0x1f3   :  { %v836_v39 = vsel %vm756_vm15, %v718_v46, %v796_v17  ;;  %v9699_v48 = vadd.f32 %v8378_v44, %v8377_v26  ;;  %v8224_v6 = vpack.c.bf16 %v821_v59, %v9564_v19  ;;  %vm746_vm2 = vcmp.gt.f32.partialorder %v710_v2, 0.0  ;;  %v8386_v63 = vpop.f32.mrb[22].mxu1 }
 0x1f4   :  { %v9703_v25 = vpack.c.bf16 %v836_v39, %v9620_v4  ;;  %v786_v27 = vmul.f32 0.2, %v710_v2  ;;  %vm771_vm4 = vcmp.gt.f32.partialorder %v731_v45, 0.0  ;;  %v811_v15 = vmul.f32 0.2, %v731_v45 }
 0x1f5   :  { %vm761_vm5 = vcmp.gt.f32.partialorder %v723_v13, 0.0  ;;  %v801_v44 = vmul.f32 0.2, %v723_v13  ;;  %8225 = vmatprep.mubr.msk.bf16.mxu0 %vm9559_vm8, %v8224_v6  ;;  %vm776_vm7 = vcmp.gt.f32.partialorder %v734_v28, 0.0  ;;  %v816_v39 = vmul.f32 0.2, %v734_v28 }
 0x1f6   :  { %v826_v26 = vsel %vm746_vm2, %v710_v2, %v786_v27  ;;  %v726_v4 = vadd.f32 %v725_v50, %v9546_v57  ;;  %v10932_v10 = vpack.c.bf16 %v9564_v19, %v9554_v14  ;;  %v851_v17 = vsel %vm771_vm4, %v731_v45, %v811_v15 }
 0x1f7   :  { %v8188_v46 = vpack.c.bf16 %v826_v26, %v9588_v61  ;;  %v841_v58 = vsel %vm761_vm5, %v723_v13, %v801_v44  ;;  %v9731_v61 = vpack.c.bf16 %v851_v17, %v850_v47  ;;  %v9738_v16 = vsel %vm776_vm7, %v734_v28, %v816_v39 }
 0x1f8   :  { %8228 = vmatmul.mubr.msk.bf16.gmra.mrb[28].mxu0 %vm9559_vm8, %v10932_v10  ;;  %v9734_v14 = vpack.c.bf16 %v841_v58, %v9636_v5  ;;  %vm766_vm10 = vcmp.gt.f32.partialorder %v726_v4, 0.0  ;;  %vm775_vm8 = vcmp.gt.f32.partialorder %v670_v7, 0.0  ;;  %v806_v19 = vmul.f32 0.2, %v726_v4 }
 0x1f9   :  { %8231 = vmatprep.mubr.msk.bf16.mxu0 %vm9708_vm3, %v9606_v18  ;;  %8189 = vmatprep.mubr.msk.bf16.mxu1 %vm9582_vm13, %v8188_v46  ;;  %v815_v2 = vmul.f32 0.2, %v670_v7  ;;  %v9740_v45 = vadd.f32 %v8381_v43, %v8380_v20  ;;  %v862_v47 = vadd.s32 32, %v9498_v33  ;;  %v9746_v13 = vadd.f32 %v8384_v21, %v8383_v37 }
 0x1fa   :  { %8192 = vmatmul.mubr.msk.bf16.gmra.mrb[28].mxu1 %vm9582_vm13, %v9592_v3  ;;  %v846_v5 = vsel %vm766_vm10, %v726_v4, %v806_v19  ;;  %v863_v50 = vadd.s32 40, %v9498_v33  ;;  %v864_v15 = vadd.s32 48, %v9498_v33  ;;  %v8387_v4 = vpop.f32.mrb[23].mxu1 }
 0x1fb   :  { %8195 = vmatprep.mubr.msk.bf16.mxu1 %vm9727_vm9, %v9617_v60  ;;  %v9751_v59 = vsel %vm775_vm8, %v670_v7, %v815_v2  ;;  %v8212_v28 = vpack.c.bf16 %v846_v5, %v9650_v42  ;;  %v898_v6 = vand.u32 7, %v862_v47 }
 0x1fc   :  { %v8308_v20 = vpack.c.bf16 %v9738_v16, %v9751_v59  ;;  %v8311_v43 = vpack.c.bf16 %v9751_v59, %v9683_v35  ;;  %v905_v37 = vand.u32 7, %v863_v50  ;;  %v912_v44 = vand.u32 7, %v864_v15 }
 0x1fd   :  { %vm9768_vm12 = vcmp.lt.s32.totalorder %v898_v6, 4 }
 0x1fe   :  { %vm9778_vm14 = vmpackc.low %vm9768_vm12, %vm9768_vm12  ;;  %vm9782_vm15 = vcmp.lt.s32.totalorder %v905_v37, 4  ;;  %vm9815_vm4 = vcmp.lt.s32.totalorder %v912_v44, 4 }
 0x1ff   :  { %vm9795_vm2 = vmpackc.low %vm9782_vm15, %vm9782_vm15 }
 0x200   :  { %8234 = vmatmul.mubr.msk.bf16.gmra.mrb[32].mxu0 %vm9708_vm3, %v9594_v8  ;;  %vm9824_vm5 = vmpackc.low %vm9815_vm4, %vm9815_vm4 }
 0x201   :  { %8237 = vmatprep.mubr.msk.bf16.mxu0 %vm9708_vm3, %v9691_v51 }
 0x202   :  { %8198 = vmatmul.mubr.msk.bf16.gmra.mrb[32].mxu1 %vm9727_vm9, %v9615_v54 }
 0x203   :  { %8201 = vmatprep.mubr.msk.bf16.mxu1 %vm9727_vm9, %v9703_v25 }
 0x208   :  { %8240 = vmatmul.mubr.msk.bf16.gmra.mrb[36].mxu0 %vm9708_vm3, %v9612_v36 }
 0x209   :  { %8243 = vmatprep.mubr.msk.bf16.mxu0 %vm9778_vm14, %v9631_v41 }
 0x20a   :  { %8204 = vmatmul.mubr.msk.bf16.gmra.mrb[36].mxu1 %vm9727_vm9, %v9624_v11 }
 0x20b   :  { %8207 = vmatprep.mubr.msk.bf16.mxu1 %vm9795_vm2, %v9648_v31 }
 0x210   :  { %8246 = vmatmul.mubr.msk.bf16.gmra.mrb[40].mxu0 %vm9778_vm14, %v9629_v24 }
 0x211   :  { %8249 = vmatprep.mubr.msk.bf16.mxu0 %vm9778_vm14, %v9734_v14 }
 0x212   :  { %8210 = vmatmul.mubr.msk.bf16.gmra.mrb[40].mxu1 %vm9795_vm2, %v9643_v12 }
 0x213   :  { %8213 = vmatprep.mubr.msk.bf16.mxu1 %vm9795_vm2, %v8212_v28 }
 0x218   :  { %8252 = vmatmul.mubr.msk.bf16.gmra.mrb[44].mxu0 %vm9778_vm14, %v9641_v9 }
 0x219   :  { %8255 = vmatprep.mubr.msk.bf16.mxu0 %vm9824_vm5, %v9668_v32 }
 0x21a   :  { %8216 = vmatmul.mubr.msk.bf16.gmra.mrb[44].mxu1 %vm9795_vm2, %v9654_v23 }
 0x21b   :  { %8267 = vmatprep.mubr.msk.bf16.mxu1 %vm9582_vm13, %v9586_v56  ;;  %v8388_v56 = vadd.f32 %v8387_v4, %v8386_v63 }
 0x220   :  { %8258 = vmatmul.mubr.msk.bf16.gmra.mrb[48].mxu0 %vm9824_vm5, %v9656_v1 }
 0x221   :  { %8261 = vmatprep.mubr.msk.bf16.mxu0 %vm9824_vm5, %v9731_v61 }
 0x222   :  { %8270 = vmatmul.mubr.msk.bf16.vlgmr.msra.gmra.mrb[48].mxu1 %vm9582_vm13, %v9571_v29  ;;  %v865_v29 = vadd.s32 56, %v9498_v33 }
 0x223   :  { %8273 = vmatprep.mubr.msk.bf16.mxu1 %vm9582_vm13, %v8188_v46 }
 0x224   :  { %v919_v55 = vand.u32 7, %v865_v29 }
 0x228   :  { %8264 = vmatmul.mubr.msk.bf16.gmra.mrb[52].mxu0 %vm9824_vm5, %v9679_v30 }
 0x229   :  { %8315 = vmatprep.mubr.msk.bf16.mxu0 %vm9708_vm3, %v9606_v18  ;;  %v10950_v18 = vpack.c.bf16 %v9681_v22, %v9670_v62 }
 0x22a   :  { %8276 = vmatmul.mubr.msk.bf16.gmra.mrb[52].mxu1 %vm9582_vm13, %v9592_v3  ;;  %vm9899_vm13 = vcmp.lt.s32.totalorder %v919_v55, 4  ;;  %v2490_v3 = vadd.s32 80, %v9498_v33 }
 0x22b   :  { %8279 = vmatprep.mubr.msk.bf16.mxu1 %vm9727_vm9, %v9617_v60 }
 0x230   :  { %8318 = vmatmul.mubr.msk.bf16.vlgmr.msra.gmra.mrb[56].mxu0 %vm9708_vm3, %v9594_v8  ;;  %v10949_v8 = vpack.c.bf16 %v9683_v35, %v9681_v22 }
 0x231   :  { %8321 = vmatprep.mubr.msk.bf16.mxu0 %vm9708_vm3, %v9691_v51 }
 0x232   :  { %8282 = vmatmul.mubr.msk.bf16.gmra.mrb[56].mxu1 %vm9727_vm9, %v9615_v54 }
 0x233   :  { %8285 = vmatprep.mubr.msk.bf16.mxu1 %vm9727_vm9, %v9703_v25 }
 0x238   :  { %8324 = vmatmul.mubr.msk.bf16.gmra.mrb[60].mxu0 %vm9708_vm3, %v9612_v36  ;;  %vm8301_vm3 = vmpackc.low %vm9899_vm13, %vm9899_vm13  ;;  %v9937_v36 = vld [vmem:[#allocation12] ss:$0 sm:$0xff] }
 0x239   :  { %8327 = vmatprep.mubr.msk.bf16.mxu0 %vm9778_vm14, %v9631_v41  ;;  %v1605_v54 = vadd.f32 %v9699_v48, %v9937_v36  ;;  %v1607_v48 = vadd.f32 %v9746_v13, %v9937_v36  ;;  %v1608_v57 = vadd.f32 %v8388_v56, %v9937_v36 }
 0x23a   :  { %8288 = vmatmul.mubr.msk.bf16.gmra.mrb[60].mxu1 %vm9727_vm9, %v9624_v11 }
 0x23b   :  { %8291 = vmatprep.mubr.msk.bf16.mxu1 %vm9795_vm2, %v9648_v31 }
 0x240   :  { %8330 = vmatmul.mubr.msk.bf16.gmra.mrb[64].mxu0 %vm9778_vm14, %v9629_v24  ;;  %v1606_v24 = vadd.f32 %v9740_v45, %v9937_v36 }
 0x241   :  { %8333 = vmatprep.mubr.msk.bf16.mxu0 %vm9778_vm14, %v9734_v14 }
 0x242   :  { %8294 = vmatmul.mubr.msk.bf16.gmra.mrb[64].mxu1 %vm9795_vm2, %v9643_v12 }
 0x243   :  { %8297 = vmatprep.mubr.msk.bf16.mxu1 %vm9795_vm2, %v8212_v28 }
 0x248   :  { %8336 = vmatmul.mubr.msk.bf16.gmra.mrb[68].mxu0 %vm9778_vm14, %v9641_v9 }
 0x249   :  { %8339 = vmatprep.mubr.msk.bf16.mxu0 %vm9824_vm5, %v9668_v32 }
 0x24a   :  { %8300 = vmatmul.mubr.msk.bf16.gmra.mrb[68].mxu1 %vm9795_vm2, %v9654_v23  ;;  %v10951_v23 = vmov 0.0|0.0  }
 0x24b   :  { %8303 = vmatprep.mubr.msk.bf16.mxu1 %vm8301_vm3, %v10949_v8 }
 0x250   :  { %8342 = vmatmul.mubr.msk.bf16.gmra.mrb[72].mxu0 %vm9824_vm5, %v9656_v1 }
 0x251   :  { %8345 = vmatprep.mubr.msk.bf16.mxu0 %vm9824_vm5, %v9731_v61 }
 0x252   :  { %8306 = vmatmul.mubr.msk.bf16.gmra.mrb[72].mxu1 %vm8301_vm3, %v10950_v18 }
 0x253   :  { %8309 = vmatprep.mubr.msk.bf16.mxu1 %vm8301_vm3, %v8308_v20 }
 0x258   :  { %8348 = vmatmul.mubr.msk.bf16.gmra.mrb[76].mxu0 %vm9824_vm5, %v9679_v30 }
 0x259   :  { %2455 = vmatprep.mubr.bf16.mxu0 %v10951_v23 }
 0x25a   :  { %8312 = vmatmul.mubr.msk.bf16.gmra.mrb[76].mxu1 %vm8301_vm3, %v8311_v43 }
 0x260   :  { %2456 = vmatmul.mubr.bf16.gmra.mrb[80].mxu0 %v10951_v23 }
 0x261   :  { %2463 = vmatprep.mubr.bf16.mxu0 %v10951_v23 }
 0x268   :  { %2464 = vmatmul.mubr.bf16.gmra.mrb[84].mxu0 %v10951_v23 }
 0x2a5   :  { %v8441_v60 = vpop.f32.mrb[24].mxu0 }
 0x2a6   :  { %v8442_v11 = vpop.f32.mrb[25].mxu0 }
 0x2a7   :  { %v8443_v41 = vadd.f32 %v8442_v11, %v8441_v60  ;;  %v8444_v9 = vpop.f32.mrb[26].mxu0 }
 0x2a8   :  { %v8445_v12 = vpop.f32.mrb[27].mxu0 }
 0x2a9   :  { %v9943_v31 = vadd.f32 %v8443_v41, %v1605_v54  ;;  %v8446_v1 = vadd.f32 %v8445_v12, %v8444_v9 }
 0x2aa   :  { %v8389_v32 = vpop.f32.mrb[24].mxu1 }
 0x2ab   :  { %v8390_v62 = vpop.f32.mrb[25].mxu1  ;;  %v9945_v30 = vadd.f32 %v8446_v1, %v1606_v24 }
 0x2ac   :  { %v8391_v22 = vadd.f32 %v8390_v62, %v8389_v32  ;;  %v8392_v35 = vpop.f32.mrb[26].mxu1 }
 0x2ad   :  { %v8393_v51 = vpop.f32.mrb[27].mxu1 }
 0x2ae   :  { %v8394_v25 = vadd.f32 %v8393_v51, %v8392_v35  ;;  %v1609_v28 = vadd.f32 %v8391_v22, %v9937_v36 }
 0x2b0   :  { %v1610_v37 = vadd.f32 %v8394_v25, %v9937_v36 }
 0x2cb   :  { %v8447_v49 = vpop.f32.mrb[28].mxu0 }
 0x2cc   :  { %v8448_v63 = vpop.f32.mrb[29].mxu0 }
 0x2cd   :  { %v8449_v46 = vadd.f32 %v8448_v63, %v8447_v49  ;;  %v8450_v10 = vpop.f32.mrb[30].mxu0  ;;  %v8395_v17 = vpop.f32.mrb[28].mxu1 }
 0x2ce   :  { %v8451_v58 = vpop.f32.mrb[31].mxu0  ;;  %v8396_v14 = vpop.f32.mrb[29].mxu1 }
 0x2cf   :  { %v9950_v61 = vadd.f32 %v8449_v46, %v1607_v48  ;;  %v8452_v16 = vadd.f32 %v8451_v58, %v8450_v10  ;;  %v8397_v19 = vadd.f32 %v8396_v14, %v8395_v17  ;;  %v8398_v2 = vpop.f32.mrb[30].mxu1 }
 0x2d0   :  { %v8399_v47 = vpop.f32.mrb[31].mxu1 }
 0x2d1   :  { %v9952_v45 = vadd.f32 %v8452_v16, %v1608_v57  ;;  %v8400_v5 = vadd.f32 %v8399_v47, %v8398_v2  ;;  %v1611_v18 = vadd.f32 %v8397_v19, %v9937_v36 }
 0x2d3   :  { %v8453_v59 = vpop.f32.mrb[32].mxu0  ;;  %v1612_v24 = vadd.f32 %v8400_v5, %v9937_v36 }
 0x2d4   :  { %v8454_v13 = vpop.f32.mrb[33].mxu0 }
 0x2d5   :  { %v8455_v20 = vadd.f32 %v8454_v13, %v8453_v59  ;;  %v8456_v43 = vpop.f32.mrb[34].mxu0  ;;  %v8401_v50 = vpop.f32.mrb[32].mxu1 }
 0x2d6   :  { %v8457_v6 = vpop.f32.mrb[35].mxu0  ;;  %v8402_v21 = vpop.f32.mrb[33].mxu1 }
 0x2d7   :  { %v9956_v7 = vadd.f32 %v8455_v20, %v1609_v28  ;;  %v8458_v15 = vadd.f32 %v8457_v6, %v8456_v43  ;;  %v8403_v44 = vadd.f32 %v8402_v21, %v8401_v50  ;;  %v8404_v39 = vpop.f32.mrb[34].mxu1 }
 0x2d8   :  { %v8405_v56 = vpop.f32.mrb[35].mxu1 }
 0x2d9   :  { %v9958_v4 = vadd.f32 %v8458_v15, %v1610_v37  ;;  %v8406_v29 = vadd.f32 %v8405_v56, %v8404_v39  ;;  %v1613_v48 = vadd.f32 %v8403_v44, %v9937_v36 }
 0x2db   :  { %v8459_v55 = vpop.f32.mrb[36].mxu0  ;;  %v1614_v17 = vadd.f32 %v8406_v29, %v9937_v36 }
 0x2dc   :  { %v8460_v8 = vpop.f32.mrb[37].mxu0 }
 0x2dd   :  { %v8461_v23 = vadd.f32 %v8460_v8, %v8459_v55  ;;  %v8462_v54 = vpop.f32.mrb[38].mxu0  ;;  %v8407_v60 = vpop.f32.mrb[36].mxu1 }
 0x2de   :  { %v8463_v11 = vpop.f32.mrb[39].mxu0  ;;  %v8408_v9 = vpop.f32.mrb[37].mxu1 }
 0x2df   :  { %v9962_v41 = vadd.f32 %v8461_v23, %v1611_v18  ;;  %v8464_v12 = vadd.f32 %v8463_v11, %v8462_v54  ;;  %v8409_v1 = vadd.f32 %v8408_v9, %v8407_v60  ;;  %v8410_v32 = vpop.f32.mrb[38].mxu1 }
 0x2e0   :  { %v8411_v22 = vpop.f32.mrb[39].mxu1 }
 0x2e1   :  { %v9964_v62 = vadd.f32 %v8464_v12, %v1612_v24  ;;  %v8412_v35 = vadd.f32 %v8411_v22, %v8410_v32  ;;  %v1615_v28 = vadd.f32 %v8409_v1, %v9937_v36 }
 0x2e3   :  { %v8465_v51 = vpop.f32.mrb[40].mxu0  ;;  %v1616_v37 = vadd.f32 %v8412_v35, %v9937_v36 }
 0x2e4   :  { %v8466_v25 = vpop.f32.mrb[41].mxu0 }
 0x2e5   :  { %v8467_v49 = vadd.f32 %v8466_v25, %v8465_v51  ;;  %v8468_v63 = vpop.f32.mrb[42].mxu0  ;;  %v8413_v46 = vpop.f32.mrb[40].mxu1 }
 0x2e6   :  { %v8469_v10 = vpop.f32.mrb[43].mxu0  ;;  %v8414_v57 = vpop.f32.mrb[41].mxu1 }
 0x2e7   :  { %v9968_v58 = vadd.f32 %v8467_v49, %v1613_v48  ;;  %v8470_v14 = vadd.f32 %v8469_v10, %v8468_v63  ;;  %v8415_v16 = vadd.f32 %v8414_v57, %v8413_v46  ;;  %v8416_v19 = vpop.f32.mrb[42].mxu1 }
 0x2e8   :  { %v8417_v47 = vpop.f32.mrb[43].mxu1 }
 0x2e9   :  { %v9970_v2 = vadd.f32 %v8470_v14, %v1614_v17  ;;  %v8418_v5 = vadd.f32 %v8417_v47, %v8416_v19  ;;  %v1617_v54 = vadd.f32 %v8415_v16, %v9937_v36 }
 0x2eb   :  { %v8471_v59 = vpop.f32.mrb[44].mxu0  ;;  %v1618_v12 = vadd.f32 %v8418_v5, %v9937_v36 }
 0x2ec   :  { %v8472_v13 = vpop.f32.mrb[45].mxu0 }
 0x2ed   :  { %v8473_v20 = vadd.f32 %v8472_v13, %v8471_v59  ;;  %v8474_v43 = vpop.f32.mrb[46].mxu0  ;;  %v8419_v50 = vpop.f32.mrb[44].mxu1 }
 0x2ee   :  { %v8475_v6 = vpop.f32.mrb[47].mxu0  ;;  %v8420_v15 = vpop.f32.mrb[45].mxu1 }
 0x2ef   :  { %v9974_v21 = vadd.f32 %v8473_v20, %v1615_v28  ;;  %v8476_v44 = vadd.f32 %v8475_v6, %v8474_v43  ;;  %v8421_v39 = vadd.f32 %v8420_v15, %v8419_v50  ;;  %v8422_v56 = vpop.f32.mrb[46].mxu1 }
 0x2f0   :  { %v8423_v55 = vpop.f32.mrb[47].mxu1 }
 0x2f1   :  { %v9976_v29 = vadd.f32 %v8476_v44, %v1616_v37  ;;  %v8424_v8 = vadd.f32 %v8423_v55, %v8422_v56  ;;  %v1619_v57 = vadd.f32 %v8421_v39, %v9937_v36 }
 0x2f3   :  { %v8477_v18 = vpop.f32.mrb[48].mxu0  ;;  %v1620_v5 = vadd.f32 %v8424_v8, %v9937_v36 }
 0x2f4   :  { %v8478_v23 = vpop.f32.mrb[49].mxu0 }
 0x2f5   :  { %v8479_v60 = vadd.f32 %v8478_v23, %v8477_v18  ;;  %v8480_v11 = vpop.f32.mrb[50].mxu0  ;;  %v8505_v24 = vpop.f32.mrb[48].mxu1 }
 0x2f6   :  { %v8481_v9 = vpop.f32.mrb[51].mxu0  ;;  %v8506_v22 = vpop.f32.mrb[49].mxu1 }
 0x2f7   :  { %v9980_v1 = vadd.f32 %v8479_v60, %v1617_v54  ;;  %v8482_v32 = vadd.f32 %v8481_v9, %v8480_v11  ;;  %v8507_v35 = vadd.f32 %v8506_v22, %v8505_v24  ;;  %v8508_v51 = vpop.f32.mrb[50].mxu1  ;;  %v9242_v54 = vmov 0.0  }
 0x2f8   :  { %v8509_v48 = vpop.f32.mrb[51].mxu1  ;;  %v9999_v60 = vsel %vm9536_vm0, 1.0, %v9242_v54 }
 0x2f9   :  { %v9982_v25 = vadd.f32 %v8482_v32, %v1618_v12  ;;  %v2183_v49 = vadd.f32 %v8507_v35, %v9943_v31  ;;  %v8510_v63 = vadd.f32 %v8509_v48, %v8508_v51 }
 0x2fb   :  { %v8483_v46 = vpop.f32.mrb[52].mxu0  ;;  %v2184_v10 = vadd.f32 %v8510_v63, %v9945_v30 }
 0x2fc   :  { %v8484_v17 = vpop.f32.mrb[53].mxu0 }
 0x2fd   :  { %v8485_v14 = vadd.f32 %v8484_v17, %v8483_v46  ;;  %v8486_v16 = vpop.f32.mrb[54].mxu0  ;;  %v8511_v19 = vpop.f32.mrb[52].mxu1  ;;  %v10017_v46 = vsel %vm9661_vm6, 1.0, %v9242_v54 }
 0x2fe   :  { %v8487_v47 = vpop.f32.mrb[55].mxu0  ;;  %v8512_v28 = vpop.f32.mrb[53].mxu1 }
 0x2ff   :  { %v9988_v59 = vadd.f32 %v8485_v14, %v1619_v57  ;;  %v8488_v13 = vadd.f32 %v8487_v47, %v8486_v16  ;;  %v8513_v20 = vadd.f32 %v8512_v28, %v8511_v19  ;;  %v8514_v43 = vpop.f32.mrb[54].mxu1 }
 0x300   :  { %v8515_v50 = vpop.f32.mrb[55].mxu1 }
 0x301   :  { %v9990_v31 = vadd.f32 %v8488_v13, %v1620_v5  ;;  %v2185_v30 = vadd.f32 %v8513_v20, %v9950_v61  ;;  %v8516_v6 = vadd.f32 %v8515_v50, %v8514_v43 }
 0x303   :  { %v8569_v37 = vpop.f32.mrb[56].mxu0  ;;  %v2186_v15 = vadd.f32 %v8516_v6, %v9952_v45  ;;  %v10004_v45 = vsel %vm9540_vm1, 1.0, %v9242_v54 }
 0x304   :  { %v8570_v44 = vpop.f32.mrb[57].mxu0 }
 0x305   :  { %v8571_v39 = vadd.f32 %v8570_v44, %v8569_v37  ;;  %v8572_v56 = vpop.f32.mrb[58].mxu0  ;;  %v8517_v55 = vpop.f32.mrb[56].mxu1 }
 0x306   :  { %v8573_v36 = vpop.f32.mrb[59].mxu0  ;;  %v8518_v18 = vpop.f32.mrb[57].mxu1 }
 0x307   :  { %v9994_v8 = vadd.f32 %v8571_v39, %v2183_v49  ;;  %v8574_v23 = vadd.f32 %v8573_v36, %v8572_v56  ;;  %v8519_v61 = vadd.f32 %v8518_v18, %v8517_v55  ;;  %v8520_v11 = vpop.f32.mrb[58].mxu1 }
 0x308   :  { %v8521_v9 = vpop.f32.mrb[59].mxu1 }
 0x309   :  { %v10006_v24 = vadd.f32 %v8574_v23, %v2184_v10  ;;  %v2187_v12 = vadd.f32 %v8519_v61, %v9956_v7  ;;  %v8522_v32 = vadd.f32 %v8521_v9, %v8520_v11  ;;  %v2632_v22 = vmul.f32 %v9999_v60, %v9994_v8 }
 0x30b   :  { %v2633_v52 = vmul.f32 %v10004_v45, %v10006_v24  ;;  %v8575_v35 = vpop.f32.mrb[60].mxu0  ;;  %v2188_v51 = vadd.f32 %v8522_v32, %v9958_v4  ;;  %v10024_v4 = vsel %vm9674_vm11, 1.0, %v9242_v54 }
 0x30c   :  { %v8576_v48 = vpop.f32.mrb[61].mxu0 }
 0x30d   :  { %v2648_v53 = vadd.f32 %v2633_v52, %v2632_v22  ;;  %v8577_v49 = vadd.f32 %v8576_v48, %v8575_v35  ;;  %v8578_v63 = vpop.f32.mrb[62].mxu0  ;;  %v8523_v7 = vpop.f32.mrb[60].mxu1  ;;  %v2488_v35 = vadd.s32 64, %v9498_v33 }
 0x30e   :  { %v8579_v10 = vpop.f32.mrb[63].mxu0  ;;  %v8524_v57 = vpop.f32.mrb[61].mxu1 }
 0x30f   :  { %v10019_v17 = vadd.f32 %v8577_v49, %v2185_v30  ;;  %v8580_v14 = vadd.f32 %v8579_v10, %v8578_v63  ;;  %v8525_v16 = vadd.f32 %v8524_v57, %v8523_v7  ;;  %v8526_v19 = vpop.f32.mrb[62].mxu1 }
 0x310   :  { %v8527_v40 = vpop.f32.mrb[63].mxu1 }
 0x311   :  { %v2634_v47 = vmul.f32 %v10017_v46, %v10019_v17  ;;  %v10028_v5 = vadd.f32 %v8580_v14, %v2186_v15  ;;  %v2189_v13 = vadd.f32 %v8525_v16, %v9962_v41  ;;  %v8528_v28 = vadd.f32 %v8527_v40, %v8526_v19 }
 0x312   :  { %v10037_v15 = vsel %vm9768_vm12, 1.0, %v9242_v54  ;;  %v2500_v19 = vand.u32 7, %v2488_v35 }
 0x313   :  { %v2649_v20 = vadd.f32 %v2648_v53, %v2634_v47  ;;  %v2635_v43 = vmul.f32 %v10024_v4, %v10028_v5  ;;  %v8581_v50 = vpop.f32.mrb[64].mxu0  ;;  %v2190_v30 = vadd.f32 %v8528_v28, %v9964_v62  ;;  %v10044_v62 = vsel %vm9782_vm15, 1.0, %v9242_v54 }
 0x314   :  { %v8582_v0 = vpop.f32.mrb[65].mxu0  ;;  %vm2592_vm0 = vcmp.lt.s32.totalorder %v2500_v19, 4 }
 0x315   :  { %v2650_v6 = vadd.f32 %v2649_v20, %v2635_v43  ;;  %v8583_v37 = vadd.f32 %v8582_v0, %v8581_v50  ;;  %v8584_v44 = vpop.f32.mrb[66].mxu0  ;;  %v8529_v39 = vpop.f32.mrb[64].mxu1 }
 0x316   :  { %v8585_v56 = vpop.f32.mrb[67].mxu0  ;;  %v8530_v55 = vpop.f32.mrb[65].mxu1 }
 0x317   :  { %v10039_v41 = vadd.f32 %v8583_v37, %v2187_v12  ;;  %v8586_v36 = vadd.f32 %v8585_v56, %v8584_v44  ;;  %v8531_v18 = vadd.f32 %v8530_v55, %v8529_v39  ;;  %v8532_v23 = vpop.f32.mrb[66].mxu1 }
 0x318   :  { %v8533_v42 = vpop.f32.mrb[67].mxu1 }
 0x319   :  { %v2636_v61 = vmul.f32 %v10037_v15, %v10039_v41  ;;  %v10048_v11 = vadd.f32 %v8586_v36, %v2188_v51  ;;  %v2191_v9 = vadd.f32 %v8531_v18, %v9968_v58  ;;  %v8534_v32 = vadd.f32 %v8533_v42, %v8532_v23 }
 0x31a   :  { %v2489_v51 = vadd.s32 72, %v9498_v33  ;;  %v10059_v58 = vsel %vm9815_vm4, 1.0, %v9242_v54  ;;  %v2491_v36 = vadd.s32 88, %v9498_v33 }
 0x31b   :  { %v2651_v12 = vadd.f32 %v2650_v6, %v2636_v61  ;;  %v2637_v22 = vmul.f32 %v10044_v62, %v10048_v11  ;;  %v8587_v52 = vpop.f32.mrb[68].mxu0  ;;  %v2192_v27 = vadd.f32 %v8534_v32, %v9970_v2  ;;  %v10066_v2 = vsel %vm9899_vm13, 1.0, %v9242_v54 }
 0x31c   :  { %v8588_v48 = vpop.f32.mrb[69].mxu0  ;;  %v2507_v43 = vand.u32 7, %v2489_v51 }
 0x31d   :  { %v2652_v53 = vadd.f32 %v2651_v12, %v2637_v22  ;;  %v8589_v49 = vadd.f32 %v8588_v48, %v8587_v52  ;;  %v8590_v63 = vpop.f32.mrb[70].mxu0  ;;  %v8535_v7 = vpop.f32.mrb[68].mxu1  ;;  %v2514_v12 = vand.u32 7, %v2490_v3 }
 0x31e   :  { %v8591_v10 = vpop.f32.mrb[71].mxu0  ;;  %v8536_v14 = vpop.f32.mrb[69].mxu1  ;;  %vm2593_vm1 = vcmp.lt.s32.totalorder %v2507_v43, 4 }
 0x31f   :  { %v10061_v57 = vadd.f32 %v8589_v49, %v2189_v13  ;;  %v8592_v16 = vadd.f32 %v8591_v10, %v8590_v63  ;;  %v8537_v47 = vadd.f32 %v8536_v14, %v8535_v7  ;;  %v8538_v40 = vpop.f32.mrb[70].mxu1  ;;  %v2521_v49 = vand.u32 7, %v2491_v36 }
 0x320   :  { %v8539_v20 = vpop.f32.mrb[71].mxu1  ;;  %vm2594_vm6 = vcmp.lt.s32.totalorder %v2514_v12, 4  ;;  %v2492_v14 = vadd.s32 96, %v9498_v33  ;;  %v2494_v12 = vadd.s32 112, %v9498_v33 }
 0x321   :  { %v2638_v28 = vmul.f32 %v10059_v58, %v10061_v57  ;;  %v10070_v26 = vadd.f32 %v8592_v16, %v2190_v30  ;;  %v2193_v13 = vadd.f32 %v8537_v47, %v9974_v21  ;;  %v8540_v50 = vadd.f32 %v8539_v20, %v8538_v40 }
 0x322   :  { %v10079_v21 = vsel %vm2592_vm0, 1.0, %v9242_v54  ;;  %vm2595_vm11 = vcmp.lt.s32.totalorder %v2521_v49, 4  ;;  %v2495_v49 = vadd.s32 120, %v9498_v33 }
 0x323   :  { %v2653_v0 = vadd.f32 %v2652_v53, %v2638_v28  ;;  %v2639_v6 = vmul.f32 %v10066_v2, %v10070_v26  ;;  %v8593_v37 = vpop.f32.mrb[72].mxu0  ;;  %v2194_v44 = vadd.f32 %v8540_v50, %v9976_v29  ;;  %v10084_v29 = vsel %vm2593_vm1, 1.0, %v9242_v54 }
 0x324   :  { %v8594_v39 = vpop.f32.mrb[73].mxu0  ;;  %v2493_v28 = vadd.s32 104, %v9498_v33 }
 0x325   :  { %v2654_v56 = vadd.f32 %v2653_v0, %v2639_v6  ;;  %v8595_v55 = vadd.f32 %v8594_v39, %v8593_v37  ;;  %v8596_v30 = vpop.f32.mrb[74].mxu0  ;;  %v8541_v18 = vpop.f32.mrb[72].mxu1  ;;  %v2528_v37 = vand.u32 7, %v2492_v14 }
 0x326   :  { %v8597_v23 = vpop.f32.mrb[75].mxu0  ;;  %v8542_v42 = vpop.f32.mrb[73].mxu1  ;;  %v2535_v36 = vand.u32 7, %v2493_v28 }
 0x327   :  { %v10081_v61 = vadd.f32 %v8595_v55, %v2191_v9  ;;  %v8598_v32 = vadd.f32 %v8597_v23, %v8596_v30  ;;  %v8543_v22 = vadd.f32 %v8542_v42, %v8541_v18  ;;  %v8544_v52 = vpop.f32.mrb[74].mxu1  ;;  %vm2596_vm7 = vcmp.lt.s32.totalorder %v2528_v37, 4 }
 0x328   :  { %v8545_v53 = vpop.f32.mrb[75].mxu1  ;;  %vm2597_vm9 = vcmp.lt.s32.totalorder %v2535_v36, 4 }
 0x329   :  { %v2640_v35 = vmul.f32 %v10079_v21, %v10081_v61  ;;  %v10088_v48 = vadd.f32 %v8598_v32, %v2192_v27  ;;  %v2195_v63 = vadd.f32 %v8543_v22, %v9980_v1  ;;  %v8546_v51 = vadd.f32 %v8545_v53, %v8544_v52 }
 0x32a   :  { %v10097_v1 = vsel %vm2594_vm6, 1.0, %v9242_v54  ;;  %v10118_v14 = vsel %vm2597_vm9, 1.0, %v9242_v54 }
 0x32b   :  { %v2655_v9 = vadd.f32 %v2654_v56, %v2640_v35  ;;  %v2641_v7 = vmul.f32 %v10084_v29, %v10088_v48  ;;  %v8599_v10 = vpop.f32.mrb[76].mxu0  ;;  %v2196_v16 = vadd.f32 %v8546_v51, %v9982_v25  ;;  %v10102_v25 = vsel %vm2595_vm11, 1.0, %v9242_v54 }
 0x32c   :  { %v8600_v19 = vpop.f32.mrb[77].mxu0 }
 0x32d   :  { %v2656_v47 = vadd.f32 %v2655_v9, %v2641_v7  ;;  %v8601_v40 = vadd.f32 %v8600_v19, %v8599_v10  ;;  %v8602_v27 = vpop.f32.mrb[78].mxu0  ;;  %v8547_v20 = vpop.f32.mrb[76].mxu1  ;;  %v2542_v10 = vand.u32 7, %v2494_v12 }
 0x32e   :  { %v8603_v43 = vpop.f32.mrb[79].mxu0  ;;  %v8548_v0 = vpop.f32.mrb[77].mxu1 }
 0x32f   :  { %v10099_v50 = vadd.f32 %v8601_v40, %v2193_v13  ;;  %v8604_v6 = vadd.f32 %v8603_v43, %v8602_v27  ;;  %v8549_v3 = vadd.f32 %v8548_v0, %v8547_v20  ;;  %v8550_v39 = vpop.f32.mrb[78].mxu1  ;;  %vm2598_vm10 = vcmp.lt.s32.totalorder %v2542_v10, 4 }
 0x330   :  { %v8551_v30 = vpop.f32.mrb[79].mxu1 }
 0x331   :  { %v2642_v56 = vmul.f32 %v10097_v1, %v10099_v50  ;;  %v10106_v55 = vadd.f32 %v8604_v6, %v2194_v44  ;;  %v2197_v18 = vadd.f32 %v8549_v3, %v9988_v59  ;;  %v8552_v23 = vadd.f32 %v8551_v30, %v8550_v39 }
 0x332   :  { %v10115_v59 = vsel %vm2596_vm7, 1.0, %v9242_v54 }
 0x333   :  { %v2657_v13 = vadd.f32 %v2656_v47, %v2642_v56  ;;  %v2643_v42 = vmul.f32 %v10102_v25, %v10106_v55  ;;  %v8605_v32 = vpop.f32.mrb[80].mxu0  ;;  %v2198_v22 = vadd.f32 %v8552_v23, %v9990_v31  ;;  %v2549_v47 = vand.u32 7, %v2495_v49 }
 0x334   :  { %v8606_v52 = vpop.f32.mrb[81].mxu0 }
 0x335   :  { %v2658_v35 = vadd.f32 %v2657_v13, %v2643_v42  ;;  %v8607_v53 = vadd.f32 %v8606_v52, %v8605_v32  ;;  %v8608_v44 = vpop.f32.mrb[82].mxu0  ;;  %vm2599_vm8 = vcmp.lt.s32.totalorder %v2549_v47, 4 }
 0x336   :  { %v8609_v51 = vpop.f32.mrb[83].mxu0  ;;  %v10126_v56 = vsel %vm2599_vm8, 1.0, %v9242_v54 }
 0x337   :  { %v2484_v9 = vadd.f32 %v8607_v53, %v2195_v63  ;;  %v8610_v7 = vadd.f32 %v8609_v51, %v8608_v44  ;;  %v10123_v63 = vsel %vm2598_vm10, 1.0, %v9242_v54 }
 0x339   :  { %v2644_v19 = vmul.f32 %v10115_v59, %v2484_v9  ;;  %v2485_v31 = vadd.f32 %v8610_v7, %v2196_v16 }
 0x33b   :  { %v2659_v40 = vadd.f32 %v2658_v35, %v2644_v19  ;;  %v2645_v27 = vmul.f32 %v10118_v14, %v2485_v31  ;;  %v8611_v28 = vpop.f32.mrb[84].mxu0 }
 0x33c   :  { %v8612_v20 = vpop.f32.mrb[85].mxu0 }
 0x33d   :  { %v2660_v43 = vadd.f32 %v2659_v40, %v2645_v27  ;;  %v8613_v0 = vadd.f32 %v8612_v20, %v8611_v28  ;;  %v8614_v6 = vpop.f32.mrb[86].mxu0 }
 0x33e   :  { %v8615_v37 = vpop.f32.mrb[87].mxu0 }
 0x33f   :  { %v2486_v3 = vadd.f32 %v8613_v0, %v2197_v18  ;;  %v8616_v39 = vadd.f32 %v8615_v37, %v8614_v6 }
 0x341   :  { %v2646_v16 = vmul.f32 %v10123_v63, %v2486_v3  ;;  %v2487_v30 = vadd.f32 %v8616_v39, %v2198_v22 }
 0x343   :  { %v2661_v36 = vadd.f32 %v2660_v43, %v2646_v16  ;;  %v2647_v23 = vmul.f32 %v10126_v56, %v2487_v30 }
 0x345   :  { %v2662_v13 = vadd.f32 %v2661_v36, %v2647_v23 }
 0x347   :  { %v2663_v42 = vrot.slane %v2662_v13, 4 }
 0x349   :  { %v2664_v32 = vadd.f32 %v2663_v42, %v2662_v13 }
 0x34b   :  { %v2665_v12 = vrot.slane %v2664_v32, 2 }
 0x34d   :  { %v2666_v52 = vadd.f32 %v2665_v12, %v2664_v32 }
 0x34f   :  { %v2667_v35 = vrot.slane %v2666_v52, 1 }
 0x351   :  { %v2668_v53 = vadd.f32 %v2667_v35, %v2666_v52 }
 0x353   :  { %v2669_v44 = vmul.f32 0.015625, %v2668_v53 }
 0x355   :  { %v10131_v18 = vsub.f32 %v9994_v8, %v2669_v44  ;;  %v10134_v49 = vsub.f32 %v10006_v24, %v2669_v44  ;;  %v10137_v51 = vsub.f32 %v10019_v17, %v2669_v44  ;;  %v10140_v22 = vsub.f32 %v10028_v5, %v2669_v44 }
 0x356   :  { %v10143_v7 = vsub.f32 %v10039_v41, %v2669_v44  ;;  %v10146_v10 = vsub.f32 %v10048_v11, %v2669_v44  ;;  %v10149_v19 = vsub.f32 %v10061_v57, %v2669_v44  ;;  %v10152_v8 = vsub.f32 %v10070_v26, %v2669_v44 }
 0x357   :  { %v10155_v24 = vsub.f32 %v10081_v61, %v2669_v44  ;;  %v10158_v17 = vsub.f32 %v10088_v48, %v2669_v44  ;;  %v10161_v5 = vsub.f32 %v10099_v50, %v2669_v44  ;;  %v10164_v41 = vsub.f32 %v10106_v55, %v2669_v44 }
 0x358   :  { %v10166_v11 = vsub.f32 %v2484_v9, %v2669_v44  ;;  %v10168_v47 = vsub.f32 %v2485_v31, %v2669_v44  ;;  %v10170_v57 = vsub.f32 %v2486_v3, %v2669_v44  ;;  %v10172_v26 = vsub.f32 %v2487_v30, %v2669_v44 }
 0x359   :  { %v2686_v61 = vmul.f32 %v10131_v18, %v10131_v18  ;;  %v2687_v48 = vmul.f32 %v10134_v49, %v10134_v49  ;;  %v2688_v50 = vmul.f32 %v10137_v51, %v10137_v51  ;;  %v2689_v31 = vmul.f32 %v10140_v22, %v10140_v22 }
 0x35a   :  { %v2690_v40 = vmul.f32 %v10143_v7, %v10143_v7  ;;  %v2691_v20 = vmul.f32 %v10146_v10, %v10146_v10  ;;  %v2693_v37 = vmul.f32 %v10152_v8, %v10152_v8 }
 0x35b   :  { %v2702_v55 = vmul.f32 %v9999_v60, %v2686_v61  ;;  %v2703_v9 = vmul.f32 %v10004_v45, %v2687_v48  ;;  %v2704_v27 = vmul.f32 %v10017_v46, %v2688_v50  ;;  %v2705_v43 = vmul.f32 %v10024_v4, %v2689_v31 }
 0x35c   :  { %v2692_v60 = vmul.f32 %v10149_v19, %v10149_v19  ;;  %v2706_v45 = vmul.f32 %v10037_v15, %v2690_v40  ;;  %v2707_v3 = vmul.f32 %v10044_v62, %v2691_v20  ;;  %v2694_v46 = vmul.f32 %v10155_v24, %v10155_v24 }
 0x35d   :  { %v2718_v28 = vadd.f32 %v2703_v9, %v2702_v55  ;;  %v2695_v4 = vmul.f32 %v10158_v17, %v10158_v17  ;;  %v2709_v36 = vmul.f32 %v10066_v2, %v2693_v37  ;;  %v2696_v15 = vmul.f32 %v10161_v5, %v10161_v5 }
 0x35e   :  { %v2708_v16 = vmul.f32 %v10059_v58, %v2692_v60  ;;  %v2710_v13 = vmul.f32 %v10079_v21, %v2694_v46  ;;  %v2697_v62 = vmul.f32 %v10164_v41, %v10164_v41  ;;  %v2698_v58 = vmul.f32 %v10166_v11, %v10166_v11 }
 0x35f   :  { %v2719_v0 = vadd.f32 %v2718_v28, %v2704_v27  ;;  %v2711_v32 = vmul.f32 %v10084_v29, %v2695_v4  ;;  %v2712_v52 = vmul.f32 %v10097_v1, %v2696_v15  ;;  %v2699_v2 = vmul.f32 %v10168_v47, %v10168_v47 }
 0x360   :  { %v2713_v53 = vmul.f32 %v10102_v25, %v2697_v62  ;;  %v2700_v21 = vmul.f32 %v10170_v57, %v10170_v57  ;;  %v2714_v61 = vmul.f32 %v10115_v59, %v2698_v58  ;;  %v2701_v29 = vmul.f32 %v10172_v26, %v10172_v26  ;;  %v8113_v62 = vld [vmem:[#allocation15] ss:$0 sm:$0xff] }
 0x361   :  { %v2720_v6 = vadd.f32 %v2719_v0, %v2705_v43  ;;  %v2715_v50 = vmul.f32 %v10118_v14, %v2699_v2 }
 0x362   :  { %v2716_v1 = vmul.f32 %v10123_v63, %v2700_v21  ;;  %v2717_v31 = vmul.f32 %v10126_v56, %v2701_v29 }
 0x363   :  { %v2721_v39 = vadd.f32 %v2720_v6, %v2706_v45 }
 0x365   :  { %v2722_v30 = vadd.f32 %v2721_v39, %v2707_v3 }
 0x367   :  { %v2723_v23 = vadd.f32 %v2722_v30, %v2708_v16  ;;  %v8112_v30 = vld [vmem:[#allocation14] ss:$0 sm:$0xff] }
 0x369   :  { %v2724_v42 = vadd.f32 %v2723_v23, %v2709_v36 }
 0x36b   :  { %v2725_v12 = vadd.f32 %v2724_v42, %v2710_v13 }
 0x36d   :  { %v2726_v35 = vadd.f32 %v2725_v12, %v2711_v32 }
 0x36f   :  { %v2727_v44 = vadd.f32 %v2726_v35, %v2712_v52 }
 0x371   :  { %v2728_v48 = vadd.f32 %v2727_v44, %v2713_v53 }
 0x373   :  { %v2729_v55 = vadd.f32 %v2728_v48, %v2714_v61 }
 0x375   :  { %v2730_v9 = vadd.f32 %v2729_v55, %v2715_v50 }
 0x377   :  { %v2731_v40 = vadd.f32 %v2730_v9, %v2716_v1 }
 0x379   :  { %v2732_v25 = vadd.f32 %v2731_v40, %v2717_v31 }
 0x37b   :  { %v2733_v27 = vrot.slane %v2732_v25, 4 }
 0x37d   :  { %v2734_v28 = vadd.f32 %v2733_v27, %v2732_v25 }
 0x37f   :  { %v2735_v20 = vrot.slane %v2734_v28, 2 }
 0x381   :  { %v2736_v43 = vadd.f32 %v2735_v20, %v2734_v28 }
 0x383   :  { %v2737_v0 = vrot.slane %v2736_v43, 1 }
 0x385   :  { %v2738_v59 = vadd.f32 %v2737_v0, %v2736_v43 }
 0x387   :  { %v2739_v60 = vmul.f32 0.015625, %v2738_v59 }
 0x389   :  { %v2740_v45 = vadd.f32 1e-05, %v2739_v60 }
 0x38b   :  { %8879 = vrsqrt.f32 %v2740_v45 }
 0x395   :  { %v8880_v6 = vpop.eup %8879 }
 0x396   :  { %v2742_v14 = vmul.f32 %v8880_v6, %v10131_v18  ;;  %v2743_v37 = vmul.f32 %v8880_v6, %v10134_v49  ;;  %v2744_v63 = vmul.f32 %v8880_v6, %v10137_v51  ;;  %v2745_v56 = vmul.f32 %v8880_v6, %v10140_v22 }
 0x397   :  { %v2746_v3 = vmul.f32 %v8880_v6, %v10143_v7  ;;  %v2747_v39 = vmul.f32 %v8880_v6, %v10146_v10  ;;  %v2748_v46 = vmul.f32 %v8880_v6, %v10149_v19  ;;  %v2749_v16 = vmul.f32 %v8880_v6, %v10152_v8 }
 0x398   :  { %v2750_v4 = vmul.f32 %v8880_v6, %v10155_v24  ;;  %v2751_v36 = vmul.f32 %v8880_v6, %v10158_v17  ;;  %v2752_v18 = vmul.f32 %v8880_v6, %v10161_v5  ;;  %v2753_v49 = vmul.f32 %v8880_v6, %v10164_v41 }
 0x399   :  { %v2754_v51 = vmul.f32 %v8880_v6, %v10166_v11  ;;  %v2755_v22 = vmul.f32 %v8880_v6, %v10168_v47  ;;  %v2756_v7 = vmul.f32 %v8880_v6, %v10170_v57  ;;  %v2757_v10 = vmul.f32 %v8880_v6, %v10172_v26 }
 0x39a   :  { %v2765_v19 = vmul.f32 %v8112_v30, %v2742_v14  ;;  %v2766_v23 = vmul.f32 %v8112_v30, %v2743_v37  ;;  %v2767_v8 = vmul.f32 %v8112_v30, %v2744_v63  ;;  %v2768_v15 = vmul.f32 %v8112_v30, %v2745_v56 }
 0x39b   :  { %v2769_v13 = vmul.f32 %v8112_v30, %v2746_v3  ;;  %v2770_v24 = vmul.f32 %v8112_v30, %v2747_v39  ;;  %v2771_v42 = vmul.f32 %v8112_v30, %v2748_v46  ;;  %v2772_v17 = vmul.f32 %v8112_v30, %v2749_v16 }
 0x39c   :  { %v2773_v5 = vmul.f32 %v8112_v30, %v2750_v4  ;;  %v2774_v32 = vmul.f32 %v8112_v30, %v2751_v36  ;;  %v2775_v41 = vmul.f32 %v8112_v30, %v2752_v18  ;;  %v2776_v12 = vmul.f32 %v8112_v30, %v2753_v49 }
 0x39d   :  { %v2777_v11 = vmul.f32 %v8112_v30, %v2754_v51  ;;  %v2778_v58 = vmul.f32 %v8112_v30, %v2755_v22  ;;  %v2779_v47 = vmul.f32 %v8112_v30, %v2756_v7  ;;  %v2780_v52 = vmul.f32 %v8112_v30, %v2757_v10 }
 0x39e   :  { %v2788_v57 = vadd.f32 %v8113_v62, %v2765_v19  ;;  %v2789_v35 = vadd.f32 %v8113_v62, %v2766_v23  ;;  %v2790_v26 = vadd.f32 %v8113_v62, %v2767_v8  ;;  %v2791_v2 = vadd.f32 %v8113_v62, %v2768_v15 }
 0x39f   :  { %v2792_v53 = vadd.f32 %v8113_v62, %v2769_v13  ;;  %v2793_v44 = vadd.f32 %v8113_v62, %v2770_v24  ;;  %v2794_v21 = vadd.f32 %v8113_v62, %v2771_v42  ;;  %v2795_v61 = vadd.f32 %v8113_v62, %v2772_v17 }
 0x3a0   :  { %v2796_v48 = vadd.f32 %v8113_v62, %v2773_v5  ;;  %v2797_v29 = vadd.f32 %v8113_v62, %v2774_v32  ;;  %v2798_v50 = vadd.f32 %v8113_v62, %v2775_v41  ;;  %v2799_v55 = vadd.f32 %v8113_v62, %v2776_v12 }
 0x3a1   :  { %v2800_v1 = vadd.f32 %v8113_v62, %v2777_v11  ;;  %v2801_v9 = vadd.f32 %v8113_v62, %v2778_v58  ;;  %v2802_v31 = vadd.f32 %v8113_v62, %v2779_v47  ;;  %v2803_v40 = vadd.f32 %v8113_v62, %v2780_v52 }
 0x3a2   :  { %vm2804_vm12 = vcmp.gt.f32.partialorder %v2788_v57, 0.0  ;;  %vm2805_vm14 = vcmp.gt.f32.partialorder %v2789_v35, 0.0  ;;  %vm2806_vm15 = vcmp.gt.f32.partialorder %v2790_v26, 0.0  ;;  %vm2807_vm2 = vcmp.gt.f32.partialorder %v2791_v2, 0.0 }
 0x3a3   :  { %vm2808_vm4 = vcmp.gt.f32.partialorder %v2792_v53, 0.0  ;;  %vm2809_vm5 = vcmp.gt.f32.partialorder %v2793_v44, 0.0  ;;  %vm2810_vm13 = vcmp.gt.f32.partialorder %v2794_v21, 0.0  ;;  %vm2811_vm3 = vcmp.gt.f32.partialorder %v2795_v61, 0.0 }
 0x3a4   :  { %vm2812_vm0 = vcmp.gt.f32.partialorder %v2796_v48, 0.0  ;;  %vm2813_vm1 = vcmp.gt.f32.partialorder %v2797_v29, 0.0  ;;  %vm2814_vm6 = vcmp.gt.f32.partialorder %v2798_v50, 0.0  ;;  %vm2815_vm11 = vcmp.gt.f32.partialorder %v2799_v55, 0.0 }
 0x3a5   :  { %vm2816_vm7 = vcmp.gt.f32.partialorder %v2800_v1, 0.0  ;;  %vm2817_vm9 = vcmp.gt.f32.partialorder %v2801_v9, 0.0  ;;  %vm2818_vm10 = vcmp.gt.f32.partialorder %v2802_v31, 0.0  ;;  %vm2819_vm8 = vcmp.gt.f32.partialorder %v2803_v40, 0.0 }
 0x3a6   :  { %v2820_v25 = vmul.f32 0.2, %v2788_v57  ;;  %v2821_v27 = vmul.f32 0.2, %v2789_v35  ;;  %v2822_v28 = vmul.f32 0.2, %v2790_v26 }
 0x3a7   :  { %v2823_v20 = vmul.f32 0.2, %v2791_v2  ;;  %v2824_v43 = vmul.f32 0.2, %v2792_v53  ;;  %v2825_v0 = vmul.f32 0.2, %v2793_v44 }
 0x3a8   :  { %v2826_v59 = vmul.f32 0.2, %v2794_v21  ;;  %v2827_v60 = vmul.f32 0.2, %v2795_v61  ;;  %v2828_v45 = vmul.f32 0.2, %v2796_v48  ;;  %v2836_v6 = vsel %vm2804_vm12, %v2788_v57, %v2820_v25 }
 0x3a9   :  { %v2829_v14 = vmul.f32 0.2, %v2797_v29  ;;  %v2830_v37 = vmul.f32 0.2, %v2798_v50  ;;  %v2831_v63 = vmul.f32 0.2, %v2799_v55  ;;  %v2837_v56 = vsel %vm2805_vm14, %v2789_v35, %v2821_v27 }
 0x3aa   :  { %v2832_v3 = vmul.f32 0.2, %v2800_v1  ;;  %v2833_v39 = vmul.f32 0.2, %v2801_v9  ;;  %v2834_v46 = vmul.f32 0.2, %v2802_v31  ;;  %v2838_v16 = vsel %vm2806_vm15, %v2790_v26, %v2822_v28 }
 0x3ab   :  { %v2835_v30 = vmul.f32 0.2, %v2803_v40  ;;  %v2839_v4 = vsel %vm2807_vm2, %v2791_v2, %v2823_v20  ;;  %v2840_v36 = vsel %vm2808_vm4, %v2792_v53, %v2824_v43  ;;  %v2841_v18 = vsel %vm2809_vm5, %v2793_v44, %v2825_v0 }
 0x3ac   :  { %v2842_v49 = vsel %vm2810_vm13, %v2794_v21, %v2826_v59  ;;  %v2843_v51 = vsel %vm2811_vm3, %v2795_v61, %v2827_v60  ;;  %v2844_v22 = vsel %vm2812_vm0, %v2796_v48, %v2828_v45  ;;  %v2845_v7 = vsel %vm2813_vm1, %v2797_v29, %v2829_v14 }
 0x3ad   :  { %v2846_v10 = vsel %vm2814_vm6, %v2798_v50, %v2830_v37  ;;  %v2847_v19 = vsel %vm2815_vm11, %v2799_v55, %v2831_v63  ;;  %v2848_v23 = vsel %vm2816_vm7, %v2800_v1, %v2832_v3  ;;  %v2849_v8 = vsel %vm2817_vm9, %v2801_v9, %v2833_v39 }
 0x3ae   :  { %v2850_v15 = vsel %vm2818_vm10, %v2802_v31, %v2834_v46  ;;  %v2851_v13 = vsel %vm2819_vm8, %v2803_v40, %v2835_v30  ;;  %v10254_v24 = vpack.c.bf16 %v2837_v56, %v2836_v6  ;;  %v10256_v42 = vpack.c.bf16 %v2839_v4, %v2838_v16 }
 0x3af   :  { %v10258_v17 = vpack.c.bf16 %v2841_v18, %v2840_v36  ;;  %v10260_v62 = vpack.c.bf16 %v2843_v51, %v2842_v49  ;;  %v10262_v5 = vpack.c.bf16 %v2845_v7, %v2844_v22  ;;  %v10264_v32 = vpack.c.bf16 %v2847_v19, %v2846_v10 }
 0x3b0   :  { %v10266_v41 = vpack.c.bf16 %v2849_v8, %v2848_v23  ;;  %v10268_v12 = vpack.c.bf16 %v2851_v13, %v2850_v15 }
 0x3b1   :  { %9215 = dma.done.wait [#allocation6], 131072 }
 0x3b2   :  { %9216 = vsyncadd [#allocation6], 4294836224  ;;  %v10952_v11 = vmov 0   ;;  %v2881_v58 = vld [vmem:[#allocation4 + $0x8] sm:$0xff]  ;;  %v2883_v47 = vld [vmem:[#allocation4 + $0x18] sm:$0xff]  ;;  %vm6986_vm12 = vcmp.lt.s32.totalorder %v9498_v33, 4 }
 0x3b3   :  { %2976 = vmatprep.mubr.bf16.mxu1 %v10952_v11  ;;  %3017 = vmatprep.mubr.bf16.mxu0 %v10952_v11  ;;  %v2880_v52 = vld [vmem:[#allocation4] sm:$0xff]  ;;  %v2882_v57 = vld [vmem:[#allocation4 + $0x10] sm:$0xff]  ;;  %v2889_v35 = vld [vmem:[#allocation4 + $0x48] sm:$0xff] }
 0x3b4   :  { %2944 = vmatprep.subr.bf16.mxu1 %v2881_v58  ;;  %2985 = vmatprep.subr.bf16.mxu0 %v2883_v47  ;;  %v2891_v26 = vld [vmem:[#allocation4 + $0x58] sm:$0xff]  ;;  %v2888_v2 = vld [vmem:[#allocation4 + $0x40] sm:$0xff]  ;;  %v2890_v53 = vld [vmem:[#allocation4 + $0x50] sm:$0xff] }
 0x3b5   :  { %2945 = vmatpush1.bf16.msra.mxu1 %v2880_v52  ;;  %2986 = vmatpush1.bf16.msra.mxu0 %v2882_v57  ;;  %v2897_v44 = vld [vmem:[#allocation4 + $0x88] sm:$0xff]  ;;  %v2899_v21 = vld [vmem:[#allocation4 + $0x98] sm:$0xff]  ;;  %v2896_v61 = vld [vmem:[#allocation4 + $0x80] sm:$0xff] }
 0x3b6   :  { %2946 = vmatprep.subr.bf16.mxu1 %v2889_v35  ;;  %2987 = vmatprep.subr.bf16.mxu0 %v2891_v26  ;;  %v2898_v48 = vld [vmem:[#allocation4 + $0x90] sm:$0xff]  ;;  %v2905_v29 = vld [vmem:[#allocation4 + $0xc8] sm:$0xff]  ;;  %v2907_v50 = vld [vmem:[#allocation4 + $0xd8] sm:$0xff] }
 0x3b7   :  { %v2904_v55 = vld [vmem:[#allocation4 + $0xc0] sm:$0xff]  ;;  %v2906_v1 = vld [vmem:[#allocation4 + $0xd0] sm:$0xff]  ;;  %v2913_v9 = vld [vmem:[#allocation4 + $0x108] sm:$0xff] }
 0x3b8   :  { %v2915_v31 = vld [vmem:[#allocation4 + $0x118] sm:$0xff]  ;;  %v2912_v40 = vld [vmem:[#allocation4 + $0x100] sm:$0xff]  ;;  %v2914_v25 = vld [vmem:[#allocation4 + $0x110] sm:$0xff] }
 0x3b9   :  { %2947 = vmatpush1.bf16.msra.mxu1 %v2888_v2  ;;  %2988 = vmatpush1.bf16.msra.mxu0 %v2890_v53  ;;  %v2921_v27 = vld [vmem:[#allocation4 + $0x148] sm:$0xff]  ;;  %v2923_v28 = vld [vmem:[#allocation4 + $0x158] sm:$0xff]  ;;  %v2920_v20 = vld [vmem:[#allocation4 + $0x140] sm:$0xff] }
 0x3ba   :  { %2948 = vmatprep.subr.bf16.mxu1 %v2897_v44  ;;  %2989 = vmatprep.subr.bf16.mxu0 %v2899_v21  ;;  %v2922_v43 = vld [vmem:[#allocation4 + $0x150] sm:$0xff]  ;;  %v2929_v0 = vld [vmem:[#allocation4 + $0x188] sm:$0xff]  ;;  %v2931_v59 = vld [vmem:[#allocation4 + $0x198] sm:$0xff] }
 0x3bb   :  { %v2928_v60 = vld [vmem:[#allocation4 + $0x180] sm:$0xff]  ;;  %v2930_v45 = vld [vmem:[#allocation4 + $0x190] sm:$0xff]  ;;  %v2937_v6 = vld [vmem:[#allocation4 + $0x1c8] sm:$0xff] }
 0x3bc   :  { %v2939_v14 = vld [vmem:[#allocation4 + $0x1d8] sm:$0xff]  ;;  %v2936_v37 = vld [vmem:[#allocation4 + $0x1c0] sm:$0xff]  ;;  %v2938_v63 = vld [vmem:[#allocation4 + $0x1d0] sm:$0xff] }
 0x3bd   :  { %2949 = vmatpush1.bf16.msra.mxu1 %v2896_v61  ;;  %2990 = vmatpush1.bf16.msra.mxu0 %v2898_v48  ;;  %v2885_v56 = vld [vmem:[#allocation4 + $0x28] sm:$0xff]  ;;  %v2887_v3 = vld [vmem:[#allocation4 + $0x38] sm:$0xff]  ;;  %v2884_v39 = vld [vmem:[#allocation4 + $0x20] sm:$0xff] }
 0x3be   :  { %2950 = vmatprep.subr.bf16.mxu1 %v2905_v29  ;;  %2991 = vmatprep.subr.bf16.mxu0 %v2907_v50  ;;  %v2886_v46 = vld [vmem:[#allocation4 + $0x30] sm:$0xff]  ;;  %v2893_v16 = vld [vmem:[#allocation4 + $0x68] sm:$0xff]  ;;  %v2895_v30 = vld [vmem:[#allocation4 + $0x78] sm:$0xff] }
 0x3bf   :  { %v2892_v4 = vld [vmem:[#allocation4 + $0x60] sm:$0xff]  ;;  %v2894_v36 = vld [vmem:[#allocation4 + $0x70] sm:$0xff]  ;;  %v2901_v18 = vld [vmem:[#allocation4 + $0xa8] sm:$0xff] }
 0x3c0   :  { %v2903_v49 = vld [vmem:[#allocation4 + $0xb8] sm:$0xff]  ;;  %v2900_v51 = vld [vmem:[#allocation4 + $0xa0] sm:$0xff]  ;;  %v2902_v22 = vld [vmem:[#allocation4 + $0xb0] sm:$0xff] }
 0x3c1   :  { %2951 = vmatpush1.bf16.msra.mxu1 %v2904_v55  ;;  %2992 = vmatpush1.bf16.msra.mxu0 %v2906_v1  ;;  %v2909_v7 = vld [vmem:[#allocation4 + $0xe8] sm:$0xff]  ;;  %v2911_v10 = vld [vmem:[#allocation4 + $0xf8] sm:$0xff]  ;;  %v2908_v19 = vld [vmem:[#allocation4 + $0xe0] sm:$0xff] }
 0x3c2   :  { %2952 = vmatprep.subr.bf16.mxu1 %v2913_v9  ;;  %2993 = vmatprep.subr.bf16.mxu0 %v2915_v31  ;;  %v2910_v23 = vld [vmem:[#allocation4 + $0xf0] sm:$0xff]  ;;  %v2917_v8 = vld [vmem:[#allocation4 + $0x128] sm:$0xff]  ;;  %v2919_v15 = vld [vmem:[#allocation4 + $0x138] sm:$0xff] }
 0x3c3   :  { %v2916_v13 = vld [vmem:[#allocation4 + $0x120] sm:$0xff]  ;;  %v2918_v58 = vld [vmem:[#allocation4 + $0x130] sm:$0xff]  ;;  %v2925_v47 = vld [vmem:[#allocation4 + $0x168] sm:$0xff] }
 0x3c4   :  { %v2927_v52 = vld [vmem:[#allocation4 + $0x178] sm:$0xff]  ;;  %v2924_v57 = vld [vmem:[#allocation4 + $0x160] sm:$0xff]  ;;  %v2926_v35 = vld [vmem:[#allocation4 + $0x170] sm:$0xff] }
 0x3c5   :  { %2953 = vmatpush1.bf16.msra.mxu1 %v2912_v40  ;;  %2994 = vmatpush1.bf16.msra.mxu0 %v2914_v25  ;;  %v2933_v26 = vld [vmem:[#allocation4 + $0x1a8] sm:$0xff]  ;;  %v2935_v2 = vld [vmem:[#allocation4 + $0x1b8] sm:$0xff]  ;;  %v2932_v53 = vld [vmem:[#allocation4 + $0x1a0] sm:$0xff] }
 0x3c6   :  { %2954 = vmatprep.subr.bf16.mxu1 %v2921_v27  ;;  %2995 = vmatprep.subr.bf16.mxu0 %v2923_v28  ;;  %v2934_v44 = vld [vmem:[#allocation4 + $0x1b0] sm:$0xff]  ;;  %v2941_v21 = vld [vmem:[#allocation4 + $0x1e8] sm:$0xff]  ;;  %v2943_v61 = vld [vmem:[#allocation4 + $0x1f8] sm:$0xff] }
 0x3c7   :  { %v2940_v48 = vld [vmem:[#allocation4 + $0x1e0] sm:$0xff]  ;;  %v2942_v29 = vld [vmem:[#allocation4 + $0x1f0] sm:$0xff]  ;;  %v3133_v50 = vld [vmem:[#allocation4 + $0x208] sm:$0xff] }
 0x3c8   :  { %v3135_v55 = vld [vmem:[#allocation4 + $0x218] sm:$0xff]  ;;  %v3132_v1 = vld [vmem:[#allocation4 + $0x200] sm:$0xff]  ;;  %v3134_v9 = vld [vmem:[#allocation4 + $0x210] sm:$0xff] }
 0x3c9   :  { %2955 = vmatpush1.bf16.msra.mxu1 %v2920_v20  ;;  %2996 = vmatpush1.bf16.msra.mxu0 %v2922_v43  ;;  %v3141_v31 = vld [vmem:[#allocation4 + $0x248] sm:$0xff]  ;;  %v3143_v40 = vld [vmem:[#allocation4 + $0x258] sm:$0xff]  ;;  %v3140_v25 = vld [vmem:[#allocation4 + $0x240] sm:$0xff] }
 0x3ca   :  { %2956 = vmatprep.subr.bf16.mxu1 %v2929_v0  ;;  %2997 = vmatprep.subr.bf16.mxu0 %v2931_v59  ;;  %v3142_v27 = vld [vmem:[#allocation4 + $0x250] sm:$0xff]  ;;  %v3149_v28 = vld [vmem:[#allocation4 + $0x288] sm:$0xff]  ;;  %v3151_v20 = vld [vmem:[#allocation4 + $0x298] sm:$0xff] }
 0x3cb   :  { %v3148_v43 = vld [vmem:[#allocation4 + $0x280] sm:$0xff]  ;;  %v3150_v0 = vld [vmem:[#allocation4 + $0x290] sm:$0xff]  ;;  %v3157_v59 = vld [vmem:[#allocation4 + $0x2c8] sm:$0xff] }
 0x3cd   :  { %2957 = vmatpush1.bf16.msra.mxu1 %v2928_v60  ;;  %2998 = vmatpush1.bf16.msra.mxu0 %v2930_v45  ;;  %v3159_v60 = vld [vmem:[#allocation4 + $0x2d8] sm:$0xff]  ;;  %v3156_v45 = vld [vmem:[#allocation4 + $0x2c0] sm:$0xff] }
 0x3ce   :  { %2958 = vmatprep.subr.bf16.mxu1 %v2937_v6  ;;  %2999 = vmatprep.subr.bf16.mxu0 %v2939_v14  ;;  %v3158_v6 = vld [vmem:[#allocation4 + $0x2d0] sm:$0xff]  ;;  %v3165_v14 = vld [vmem:[#allocation4 + $0x308] sm:$0xff] }
 0x3d1   :  { %2959 = vmatpush1.bf16.msra.mxu1 %v2936_v37  ;;  %3000 = vmatpush1.bf16.msra.mxu0 %v2938_v63  ;;  %v3167_v37 = vld [vmem:[#allocation4 + $0x318] sm:$0xff]  ;;  %v3164_v63 = vld [vmem:[#allocation4 + $0x300] sm:$0xff] }
 0x3d2   :  { %3026 = vmatprep.subr.bf16.mxu1 %v2885_v56  ;;  %3067 = vmatprep.subr.bf16.mxu0 %v2887_v3  ;;  %v3166_v56 = vld [vmem:[#allocation4 + $0x310] sm:$0xff]  ;;  %v3173_v3 = vld [vmem:[#allocation4 + $0x348] sm:$0xff] }
 0x3d4   :  { %2977 = vmatmul.mubr.bf16.vlgmr.msra.gmra.mrb[80].mxu1 %v10254_v24  ;;  %3018 = vmatmul.mubr.bf16.vlgmr.msra.gmra.mrb[88].mxu0 %v10254_v24 }
 0x3d5   :  { %3027 = vmatpush1.bf16.msra.mxu1 %v2884_v39  ;;  %3068 = vmatpush1.bf16.msra.mxu0 %v2886_v46  ;;  %v3175_v39 = vld [vmem:[#allocation4 + $0x358] sm:$0xff]  ;;  %v3172_v46 = vld [vmem:[#allocation4 + $0x340] sm:$0xff] }
 0x3d6   :  { %3028 = vmatprep.subr.bf16.mxu1 %v2893_v16  ;;  %3069 = vmatprep.subr.bf16.mxu0 %v2895_v30  ;;  %v3174_v16 = vld [vmem:[#allocation4 + $0x350] sm:$0xff]  ;;  %v3181_v30 = vld [vmem:[#allocation4 + $0x388] sm:$0xff] }
 0x3d7   :  { %3058 = vmatprep.mubr.bf16.mxu1 %v10952_v11  ;;  %3099 = vmatprep.mubr.bf16.mxu0 %v10952_v11 }
 0x3d9   :  { %3029 = vmatpush1.bf16.msra.mxu1 %v2892_v4  ;;  %3070 = vmatpush1.bf16.msra.mxu0 %v2894_v36  ;;  %v3183_v4 = vld [vmem:[#allocation4 + $0x398] sm:$0xff]  ;;  %v3180_v36 = vld [vmem:[#allocation4 + $0x380] sm:$0xff] }
 0x3da   :  { %3030 = vmatprep.subr.bf16.mxu1 %v2901_v18  ;;  %3071 = vmatprep.subr.bf16.mxu0 %v2903_v49  ;;  %v3182_v18 = vld [vmem:[#allocation4 + $0x390] sm:$0xff]  ;;  %v3189_v49 = vld [vmem:[#allocation4 + $0x3c8] sm:$0xff] }
 0x3dd   :  { %3031 = vmatpush1.bf16.msra.mxu1 %v2900_v51  ;;  %3072 = vmatpush1.bf16.msra.mxu0 %v2902_v22  ;;  %v3191_v51 = vld [vmem:[#allocation4 + $0x3d8] sm:$0xff]  ;;  %v3188_v22 = vld [vmem:[#allocation4 + $0x3c0] sm:$0xff] }
 0x3de   :  { %3032 = vmatprep.subr.bf16.mxu1 %v2909_v7  ;;  %3073 = vmatprep.subr.bf16.mxu0 %v2911_v10  ;;  %v3190_v7 = vld [vmem:[#allocation4 + $0x3d0] sm:$0xff]  ;;  %v3137_v10 = vld [vmem:[#allocation4 + $0x228] sm:$0xff] }
 0x3e1   :  { %3033 = vmatpush1.bf16.msra.mxu1 %v2908_v19  ;;  %3074 = vmatpush1.bf16.msra.mxu0 %v2910_v23  ;;  %v3139_v19 = vld [vmem:[#allocation4 + $0x238] sm:$0xff]  ;;  %v10281_v23 = vrot.slane %v10254_v24, 4 }
 0x3e2   :  { %3034 = vmatprep.subr.bf16.mxu1 %v2917_v8  ;;  %3075 = vmatprep.subr.bf16.mxu0 %v2919_v15  ;;  %v3136_v8 = vld [vmem:[#allocation4 + $0x220] sm:$0xff]  ;;  %v3138_v15 = vld [vmem:[#allocation4 + $0x230] sm:$0xff] }
 0x3e5   :  { %3035 = vmatpush1.bf16.msra.mxu1 %v2916_v13  ;;  %3076 = vmatpush1.bf16.msra.mxu0 %v2918_v58  ;;  %v3145_v13 = vld [vmem:[#allocation4 + $0x268] sm:$0xff]  ;;  %v3147_v58 = vld [vmem:[#allocation4 + $0x278] sm:$0xff] }
 0x3e6   :  { %3036 = vmatprep.subr.bf16.mxu1 %v2925_v47  ;;  %3077 = vmatprep.subr.bf16.mxu0 %v2927_v52  ;;  %v3144_v47 = vld [vmem:[#allocation4 + $0x260] sm:$0xff]  ;;  %v3146_v52 = vld [vmem:[#allocation4 + $0x270] sm:$0xff] }
 0x3e9   :  { %3037 = vmatpush1.bf16.msra.mxu1 %v2924_v57  ;;  %3078 = vmatpush1.bf16.msra.mxu0 %v2926_v35  ;;  %v3155_v57 = vld [vmem:[#allocation4 + $0x2b8] sm:$0xff]  ;;  %v3152_v35 = vld [vmem:[#allocation4 + $0x2a0] sm:$0xff] }
 0x3ea   :  { %3038 = vmatprep.subr.bf16.mxu1 %v2933_v26  ;;  %3079 = vmatprep.subr.bf16.mxu0 %v2935_v2  ;;  %v3154_v26 = vld [vmem:[#allocation4 + $0x2b0] sm:$0xff]  ;;  %v3161_v2 = vld [vmem:[#allocation4 + $0x2e8] sm:$0xff] }
 0x3ed   :  { %3039 = vmatpush1.bf16.msra.mxu1 %v2932_v53  ;;  %3080 = vmatpush1.bf16.msra.mxu0 %v2934_v44  ;;  %v3163_v53 = vld [vmem:[#allocation4 + $0x2f8] sm:$0xff]  ;;  %v3160_v44 = vld [vmem:[#allocation4 + $0x2e0] sm:$0xff] }
 0x3ee   :  { %3040 = vmatprep.subr.bf16.mxu1 %v2941_v21  ;;  %3081 = vmatprep.subr.bf16.mxu0 %v2943_v61  ;;  %v3162_v21 = vld [vmem:[#allocation4 + $0x2f0] sm:$0xff]  ;;  %v3169_v61 = vld [vmem:[#allocation4 + $0x328] sm:$0xff] }
 0x3f1   :  { %3041 = vmatpush1.bf16.msra.mxu1 %v2940_v48  ;;  %3082 = vmatpush1.bf16.msra.mxu0 %v2942_v29  ;;  %v3171_v48 = vld [vmem:[#allocation4 + $0x338] sm:$0xff]  ;;  %v3168_v29 = vld [vmem:[#allocation4 + $0x320] sm:$0xff] }
 0x3f2   :  { %3199 = vmatprep.subr.bf16.mxu1 %v3133_v50  ;;  %3240 = vmatprep.subr.bf16.mxu0 %v3135_v55  ;;  %v3170_v50 = vld [vmem:[#allocation4 + $0x330] sm:$0xff]  ;;  %v3177_v55 = vld [vmem:[#allocation4 + $0x368] sm:$0xff] }
 0x3f4   :  { %3059 = vmatmul.mubr.bf16.vlgmr.msra.gmra.mrb[84].mxu1 %v10254_v24  ;;  %3100 = vmatmul.mubr.bf16.vlgmr.msra.gmra.mrb[92].mxu0 %v10254_v24  ;;  %v3153_v24 = vld [vmem:[#allocation4 + $0x2a8] sm:$0xff] }
 0x3f5   :  { %3200 = vmatpush1.bf16.msra.mxu1 %v3132_v1  ;;  %3241 = vmatpush1.bf16.msra.mxu0 %v3134_v9  ;;  %v3179_v1 = vld [vmem:[#allocation4 + $0x378] sm:$0xff]  ;;  %v3176_v9 = vld [vmem:[#allocation4 + $0x360] sm:$0xff] }
 0x3f6   :  { %3201 = vmatprep.subr.bf16.mxu1 %v3141_v31  ;;  %3242 = vmatprep.subr.bf16.mxu0 %v3143_v40  ;;  %v3178_v31 = vld [vmem:[#allocation4 + $0x370] sm:$0xff]  ;;  %v3185_v40 = vld [vmem:[#allocation4 + $0x3a8] sm:$0xff] }
 0x3f7   :  { %3231 = vmatprep.mubr.bf16.mxu1 %v10952_v11  ;;  %3272 = vmatprep.mubr.bf16.mxu0 %v10952_v11 }
 0x3f9   :  { %3202 = vmatpush1.bf16.msra.mxu1 %v3140_v25  ;;  %3243 = vmatpush1.bf16.msra.mxu0 %v3142_v27  ;;  %v3187_v25 = vld [vmem:[#allocation4 + $0x3b8] sm:$0xff]  ;;  %v3184_v27 = vld [vmem:[#allocation4 + $0x3a0] sm:$0xff] }
 0x3fa   :  { %3203 = vmatprep.subr.bf16.mxu1 %v3149_v28  ;;  %3244 = vmatprep.subr.bf16.mxu0 %v3151_v20  ;;  %v3186_v28 = vld [vmem:[#allocation4 + $0x3b0] sm:$0xff]  ;;  %v3193_v20 = vld [vmem:[#allocation4 + $0x3e8] sm:$0xff] }
 0x3fd   :  { %3204 = vmatpush1.bf16.msra.mxu1 %v3148_v43  ;;  %3245 = vmatpush1.bf16.msra.mxu0 %v3150_v0  ;;  %v3195_v43 = vld [vmem:[#allocation4 + $0x3f8] sm:$0xff]  ;;  %v3192_v0 = vld [vmem:[#allocation4 + $0x3e0] sm:$0xff] }
 0x3fe   :  { %3205 = vmatprep.subr.bf16.mxu1 %v3157_v59  ;;  %3246 = vmatprep.subr.bf16.mxu0 %v3159_v60  ;;  %v3194_v59 = vld [vmem:[#allocation4 + $0x3f0] sm:$0xff]  ;;  %v3388_v60 = vld [vmem:[#allocation4 + $0x408] sm:$0xff] }
 0x401   :  { %3206 = vmatpush1.bf16.msra.mxu1 %v3156_v45  ;;  %3247 = vmatpush1.bf16.msra.mxu0 %v3158_v6  ;;  %v3390_v45 = vld [vmem:[#allocation4 + $0x418] sm:$0xff]  ;;  %v3387_v6 = vld [vmem:[#allocation4 + $0x400] sm:$0xff] }
 0x402   :  { %3207 = vmatprep.subr.bf16.mxu1 %v3165_v14  ;;  %3248 = vmatprep.subr.bf16.mxu0 %v3167_v37  ;;  %v3389_v14 = vld [vmem:[#allocation4 + $0x410] sm:$0xff]  ;;  %v3396_v37 = vld [vmem:[#allocation4 + $0x448] sm:$0xff] }
 0x405   :  { %3208 = vmatpush1.bf16.msra.mxu1 %v3164_v63  ;;  %3249 = vmatpush1.bf16.msra.mxu0 %v3166_v56  ;;  %v3398_v63 = vld [vmem:[#allocation4 + $0x458] sm:$0xff]  ;;  %v3395_v56 = vld [vmem:[#allocation4 + $0x440] sm:$0xff] }
 0x406   :  { %3209 = vmatprep.subr.bf16.mxu1 %v3173_v3  ;;  %3250 = vmatprep.subr.bf16.mxu0 %v3175_v39  ;;  %v3397_v3 = vld [vmem:[#allocation4 + $0x450] sm:$0xff]  ;;  %v3404_v39 = vld [vmem:[#allocation4 + $0x488] sm:$0xff] }
 0x409   :  { %3210 = vmatpush1.bf16.msra.mxu1 %v3172_v46  ;;  %3251 = vmatpush1.bf16.msra.mxu0 %v3174_v16  ;;  %v3406_v46 = vld [vmem:[#allocation4 + $0x498] sm:$0xff]  ;;  %v3403_v16 = vld [vmem:[#allocation4 + $0x480] sm:$0xff] }
 0x40a   :  { %3211 = vmatprep.subr.bf16.mxu1 %v3181_v30  ;;  %3252 = vmatprep.subr.bf16.mxu0 %v3183_v4  ;;  %v3405_v30 = vld [vmem:[#allocation4 + $0x490] sm:$0xff]  ;;  %v3412_v4 = vld [vmem:[#allocation4 + $0x4c8] sm:$0xff] }
 0x40d   :  { %3212 = vmatpush1.bf16.msra.mxu1 %v3180_v36  ;;  %3253 = vmatpush1.bf16.msra.mxu0 %v3182_v18  ;;  %v3414_v36 = vld [vmem:[#allocation4 + $0x4d8] sm:$0xff]  ;;  %v3411_v18 = vld [vmem:[#allocation4 + $0x4c0] sm:$0xff] }
 0x40e   :  { %3213 = vmatprep.subr.bf16.mxu1 %v3189_v49  ;;  %3254 = vmatprep.subr.bf16.mxu0 %v3191_v51  ;;  %v3413_v49 = vld [vmem:[#allocation4 + $0x4d0] sm:$0xff]  ;;  %v3420_v51 = vld [vmem:[#allocation4 + $0x508] sm:$0xff] }
 0x411   :  { %3214 = vmatpush1.bf16.msra.mxu1 %v3188_v22  ;;  %3255 = vmatpush1.bf16.msra.mxu0 %v3190_v7  ;;  %v3422_v22 = vld [vmem:[#allocation4 + $0x518] sm:$0xff]  ;;  %v3419_v7 = vld [vmem:[#allocation4 + $0x500] sm:$0xff] }
 0x412   :  { %3281 = vmatprep.subr.bf16.mxu1 %v3137_v10  ;;  %3322 = vmatprep.subr.bf16.mxu0 %v3139_v19  ;;  %v3421_v10 = vld [vmem:[#allocation4 + $0x510] sm:$0xff]  ;;  %v3428_v19 = vld [vmem:[#allocation4 + $0x548] sm:$0xff] }
 0x414   :  { %3232 = vmatmul.mubr.bf16.vlgmr.msra.gmra.mrb[88].mxu1 %v10281_v23  ;;  %3273 = vmatmul.mubr.bf16.vlgmr.msra.gmra.mrb[96].mxu0 %v10281_v23 }
 0x415   :  { %3282 = vmatpush1.bf16.msra.mxu1 %v3136_v8  ;;  %3323 = vmatpush1.bf16.msra.mxu0 %v3138_v15  ;;  %v3427_v8 = vld [vmem:[#allocation4 + $0x540] sm:$0xff]  ;;  %v3429_v15 = vld [vmem:[#allocation4 + $0x550] sm:$0xff] }
 0x416   :  { %3283 = vmatprep.subr.bf16.mxu1 %v3145_v13  ;;  %3324 = vmatprep.subr.bf16.mxu0 %v3147_v58  ;;  %v3436_v13 = vld [vmem:[#allocation4 + $0x588] sm:$0xff]  ;;  %v3438_v58 = vld [vmem:[#allocation4 + $0x598] sm:$0xff] }
 0x417   :  { %3313 = vmatprep.mubr.bf16.mxu1 %v10952_v11  ;;  %3354 = vmatprep.mubr.bf16.mxu0 %v10952_v11 }
 0x419   :  { %3284 = vmatpush1.bf16.msra.mxu1 %v3144_v47  ;;  %3325 = vmatpush1.bf16.msra.mxu0 %v3146_v52  ;;  %v3435_v47 = vld [vmem:[#allocation4 + $0x580] sm:$0xff]  ;;  %v3437_v52 = vld [vmem:[#allocation4 + $0x590] sm:$0xff] }
 0x41a   :  { %3285 = vmatprep.subr.bf16.mxu1 %v3153_v24  ;;  %3326 = vmatprep.subr.bf16.mxu0 %v3155_v57  ;;  %v3444_v24 = vld [vmem:[#allocation4 + $0x5c8] sm:$0xff]  ;;  %v3446_v57 = vld [vmem:[#allocation4 + $0x5d8] sm:$0xff] }
 0x41d   :  { %3286 = vmatpush1.bf16.msra.mxu1 %v3152_v35  ;;  %3327 = vmatpush1.bf16.msra.mxu0 %v3154_v26  ;;  %v3443_v35 = vld [vmem:[#allocation4 + $0x5c0] sm:$0xff]  ;;  %v3445_v26 = vld [vmem:[#allocation4 + $0x5d0] sm:$0xff] }
 0x41e   :  { %3287 = vmatprep.subr.bf16.mxu1 %v3161_v2  ;;  %3328 = vmatprep.subr.bf16.mxu0 %v3163_v53  ;;  %v3392_v2 = vld [vmem:[#allocation4 + $0x428] sm:$0xff]  ;;  %v3394_v53 = vld [vmem:[#allocation4 + $0x438] sm:$0xff] }
 0x421   :  { %3288 = vmatpush1.bf16.msra.mxu1 %v3160_v44  ;;  %3329 = vmatpush1.bf16.msra.mxu0 %v3162_v21  ;;  %v3391_v44 = vld [vmem:[#allocation4 + $0x420] sm:$0xff]  ;;  %v3393_v21 = vld [vmem:[#allocation4 + $0x430] sm:$0xff] }
 0x422   :  { %3289 = vmatprep.subr.bf16.mxu1 %v3169_v61  ;;  %3330 = vmatprep.subr.bf16.mxu0 %v3171_v48  ;;  %v3400_v61 = vld [vmem:[#allocation4 + $0x468] sm:$0xff]  ;;  %v3402_v48 = vld [vmem:[#allocation4 + $0x478] sm:$0xff] }
 0x425   :  { %3290 = vmatpush1.bf16.msra.mxu1 %v3168_v29  ;;  %3331 = vmatpush1.bf16.msra.mxu0 %v3170_v50  ;;  %v3399_v29 = vld [vmem:[#allocation4 + $0x460] sm:$0xff]  ;;  %v3401_v50 = vld [vmem:[#allocation4 + $0x470] sm:$0xff] }
 0x426   :  { %3291 = vmatprep.subr.bf16.mxu1 %v3177_v55  ;;  %3332 = vmatprep.subr.bf16.mxu0 %v3179_v1  ;;  %v3408_v55 = vld [vmem:[#allocation4 + $0x4a8] sm:$0xff]  ;;  %v3410_v1 = vld [vmem:[#allocation4 + $0x4b8] sm:$0xff] }
 0x429   :  { %3292 = vmatpush1.bf16.msra.mxu1 %v3176_v9  ;;  %3333 = vmatpush1.bf16.msra.mxu0 %v3178_v31  ;;  %v3407_v9 = vld [vmem:[#allocation4 + $0x4a0] sm:$0xff]  ;;  %v3409_v31 = vld [vmem:[#allocation4 + $0x4b0] sm:$0xff] }
 0x42a   :  { %3293 = vmatprep.subr.bf16.mxu1 %v3185_v40  ;;  %3334 = vmatprep.subr.bf16.mxu0 %v3187_v25  ;;  %v3416_v40 = vld [vmem:[#allocation4 + $0x4e8] sm:$0xff]  ;;  %v3418_v25 = vld [vmem:[#allocation4 + $0x4f8] sm:$0xff] }
 0x42d   :  { %3294 = vmatpush1.bf16.msra.mxu1 %v3184_v27  ;;  %3335 = vmatpush1.bf16.msra.mxu0 %v3186_v28  ;;  %v3415_v27 = vld [vmem:[#allocation4 + $0x4e0] sm:$0xff]  ;;  %v3417_v28 = vld [vmem:[#allocation4 + $0x4f0] sm:$0xff] }
 0x42e   :  { %3295 = vmatprep.subr.bf16.mxu1 %v3193_v20  ;;  %3336 = vmatprep.subr.bf16.mxu0 %v3195_v43  ;;  %v3424_v20 = vld [vmem:[#allocation4 + $0x528] sm:$0xff]  ;;  %v3426_v43 = vld [vmem:[#allocation4 + $0x538] sm:$0xff] }
 0x431   :  { %3296 = vmatpush1.bf16.msra.mxu1 %v3192_v0  ;;  %3337 = vmatpush1.bf16.msra.mxu0 %v3194_v59  ;;  %v3423_v0 = vld [vmem:[#allocation4 + $0x520] sm:$0xff]  ;;  %v3425_v59 = vld [vmem:[#allocation4 + $0x530] sm:$0xff] }
 0x432   :  { %3451 = vmatprep.subr.bf16.mxu1 %v3388_v60  ;;  %3492 = vmatprep.subr.bf16.mxu0 %v3390_v45  ;;  %v3432_v60 = vld [vmem:[#allocation4 + $0x568] sm:$0xff]  ;;  %v3434_v45 = vld [vmem:[#allocation4 + $0x578] sm:$0xff] }
 0x434   :  { %3314 = vmatmul.mubr.bf16.vlgmr.msra.gmra.mrb[92].mxu1 %v10281_v23  ;;  %3355 = vmatmul.mubr.bf16.vlgmr.msra.gmra.mrb[100].mxu0 %v10281_v23  ;;  %v3430_v23 = vld [vmem:[#allocation4 + $0x558] sm:$0xff] }
 0x435   :  { %3452 = vmatpush1.bf16.msra.mxu1 %v3387_v6  ;;  %3493 = vmatpush1.bf16.msra.mxu0 %v3389_v14  ;;  %v3431_v6 = vld [vmem:[#allocation4 + $0x560] sm:$0xff]  ;;  %v3433_v14 = vld [vmem:[#allocation4 + $0x570] sm:$0xff] }
 0x436   :  { %3453 = vmatprep.subr.bf16.mxu1 %v3396_v37  ;;  %3494 = vmatprep.subr.bf16.mxu0 %v3398_v63  ;;  %v3440_v37 = vld [vmem:[#allocation4 + $0x5a8] sm:$0xff]  ;;  %v3442_v63 = vld [vmem:[#allocation4 + $0x5b8] sm:$0xff] }
 0x437   :  { %3483 = vmatprep.mubr.bf16.mxu1 %v10952_v11  ;;  %3524 = vmatprep.mubr.bf16.mxu0 %v10952_v11 }
 0x439   :  { %3454 = vmatpush1.bf16.msra.mxu1 %v3395_v56  ;;  %3495 = vmatpush1.bf16.msra.mxu0 %v3397_v3  ;;  %v3439_v56 = vld [vmem:[#allocation4 + $0x5a0] sm:$0xff]  ;;  %v3441_v3 = vld [vmem:[#allocation4 + $0x5b0] sm:$0xff] }
 0x43a   :  { %3455 = vmatprep.subr.bf16.mxu1 %v3404_v39  ;;  %3496 = vmatprep.subr.bf16.mxu0 %v3406_v46  ;;  %v3448_v39 = vld [vmem:[#allocation4 + $0x5e8] sm:$0xff]  ;;  %v3450_v46 = vld [vmem:[#allocation4 + $0x5f8] sm:$0xff] }
 0x43d   :  { %3456 = vmatpush1.bf16.msra.mxu1 %v3403_v16  ;;  %3497 = vmatpush1.bf16.msra.mxu0 %v3405_v30  ;;  %v3447_v16 = vld [vmem:[#allocation4 + $0x5e0] sm:$0xff]  ;;  %v3449_v30 = vld [vmem:[#allocation4 + $0x5f0] sm:$0xff] }
 0x43e   :  { %3457 = vmatprep.subr.bf16.mxu1 %v3412_v4  ;;  %3498 = vmatprep.subr.bf16.mxu0 %v3414_v36  ;;  %v3640_v4 = vld [vmem:[#allocation4 + $0x608] sm:$0xff]  ;;  %v3642_v36 = vld [vmem:[#allocation4 + $0x618] sm:$0xff] }
 0x441   :  { %3458 = vmatpush1.bf16.msra.mxu1 %v3411_v18  ;;  %3499 = vmatpush1.bf16.msra.mxu0 %v3413_v49  ;;  %v3639_v18 = vld [vmem:[#allocation4 + $0x600] sm:$0xff]  ;;  %v3641_v49 = vld [vmem:[#allocation4 + $0x610] sm:$0xff] }
 0x442   :  { %3459 = vmatprep.subr.bf16.mxu1 %v3420_v51  ;;  %3500 = vmatprep.subr.bf16.mxu0 %v3422_v22  ;;  %v3648_v51 = vld [vmem:[#allocation4 + $0x648] sm:$0xff]  ;;  %v3650_v22 = vld [vmem:[#allocation4 + $0x658] sm:$0xff] }
 0x445   :  { %3460 = vmatpush1.bf16.msra.mxu1 %v3419_v7  ;;  %3501 = vmatpush1.bf16.msra.mxu0 %v3421_v10  ;;  %v3647_v7 = vld [vmem:[#allocation4 + $0x640] sm:$0xff]  ;;  %v3649_v10 = vld [vmem:[#allocation4 + $0x650] sm:$0xff] }
 0x446   :  { %3461 = vmatprep.subr.bf16.mxu1 %v3428_v19  ;;  %3502 = vmatprep.subr.bf16.mxu0 %v3430_v23  ;;  %v3656_v19 = vld [vmem:[#allocation4 + $0x688] sm:$0xff]  ;;  %v3658_v23 = vld [vmem:[#allocation4 + $0x698] sm:$0xff] }
 0x449   :  { %3462 = vmatpush1.bf16.msra.mxu1 %v3427_v8  ;;  %3503 = vmatpush1.bf16.msra.mxu0 %v3429_v15  ;;  %v3655_v8 = vld [vmem:[#allocation4 + $0x680] sm:$0xff]  ;;  %v3657_v15 = vld [vmem:[#allocation4 + $0x690] sm:$0xff] }
 0x44a   :  { %3463 = vmatprep.subr.bf16.mxu1 %v3436_v13  ;;  %3504 = vmatprep.subr.bf16.mxu0 %v3438_v58  ;;  %v3664_v13 = vld [vmem:[#allocation4 + $0x6c8] sm:$0xff]  ;;  %v3666_v58 = vld [vmem:[#allocation4 + $0x6d8] sm:$0xff] }
 0x44d   :  { %3464 = vmatpush1.bf16.msra.mxu1 %v3435_v47  ;;  %3505 = vmatpush1.bf16.msra.mxu0 %v3437_v52  ;;  %v3663_v47 = vld [vmem:[#allocation4 + $0x6c0] sm:$0xff]  ;;  %v3665_v52 = vld [vmem:[#allocation4 + $0x6d0] sm:$0xff] }
 0x44e   :  { %3465 = vmatprep.subr.bf16.mxu1 %v3444_v24  ;;  %3506 = vmatprep.subr.bf16.mxu0 %v3446_v57  ;;  %v3672_v24 = vld [vmem:[#allocation4 + $0x708] sm:$0xff]  ;;  %v3674_v57 = vld [vmem:[#allocation4 + $0x718] sm:$0xff] }
 0x451   :  { %3466 = vmatpush1.bf16.msra.mxu1 %v3443_v35  ;;  %3507 = vmatpush1.bf16.msra.mxu0 %v3445_v26  ;;  %v3671_v35 = vld [vmem:[#allocation4 + $0x700] sm:$0xff]  ;;  %v3673_v26 = vld [vmem:[#allocation4 + $0x710] sm:$0xff] }
 0x452   :  { %3533 = vmatprep.subr.bf16.mxu1 %v3392_v2  ;;  %3574 = vmatprep.subr.bf16.mxu0 %v3394_v53  ;;  %v3680_v2 = vld [vmem:[#allocation4 + $0x748] sm:$0xff]  ;;  %v3682_v53 = vld [vmem:[#allocation4 + $0x758] sm:$0xff] }
 0x454   :  { %3484 = vmatmul.mubr.bf16.vlgmr.msra.gmra.mrb[96].mxu1 %v10256_v42  ;;  %3525 = vmatmul.mubr.bf16.vlgmr.msra.gmra.mrb[104].mxu0 %v10256_v42 }
 0x455   :  { %3534 = vmatpush1.bf16.msra.mxu1 %v3391_v44  ;;  %3575 = vmatpush1.bf16.msra.mxu0 %v3393_v21  ;;  %v3679_v44 = vld [vmem:[#allocation4 + $0x740] sm:$0xff]  ;;  %v3681_v21 = vld [vmem:[#allocation4 + $0x750] sm:$0xff] }
 0x456   :  { %3535 = vmatprep.subr.bf16.mxu1 %v3400_v61  ;;  %3576 = vmatprep.subr.bf16.mxu0 %v3402_v48  ;;  %v3688_v61 = vld [vmem:[#allocation4 + $0x788] sm:$0xff]  ;;  %v3690_v48 = vld [vmem:[#allocation4 + $0x798] sm:$0xff] }
 0x457   :  { %3565 = vmatprep.mubr.bf16.mxu1 %v10952_v11  ;;  %3606 = vmatprep.mubr.bf16.mxu0 %v10952_v11 }
 0x459   :  { %3536 = vmatpush1.bf16.msra.mxu1 %v3399_v29  ;;  %3577 = vmatpush1.bf16.msra.mxu0 %v3401_v50  ;;  %v3687_v29 = vld [vmem:[#allocation4 + $0x780] sm:$0xff]  ;;  %v3689_v50 = vld [vmem:[#allocation4 + $0x790] sm:$0xff] }
 0x45a   :  { %3537 = vmatprep.subr.bf16.mxu1 %v3408_v55  ;;  %3578 = vmatprep.subr.bf16.mxu0 %v3410_v1  ;;  %v3696_v55 = vld [vmem:[#allocation4 + $0x7c8] sm:$0xff]  ;;  %v3698_v1 = vld [vmem:[#allocation4 + $0x7d8] sm:$0xff] }
 0x45d   :  { %3538 = vmatpush1.bf16.msra.mxu1 %v3407_v9  ;;  %3579 = vmatpush1.bf16.msra.mxu0 %v3409_v31  ;;  %v3695_v9 = vld [vmem:[#allocation4 + $0x7c0] sm:$0xff]  ;;  %v3697_v31 = vld [vmem:[#allocation4 + $0x7d0] sm:$0xff] }
 0x45e   :  { %3539 = vmatprep.subr.bf16.mxu1 %v3416_v40  ;;  %3580 = vmatprep.subr.bf16.mxu0 %v3418_v25  ;;  %v3644_v40 = vld [vmem:[#allocation4 + $0x628] sm:$0xff]  ;;  %v3646_v25 = vld [vmem:[#allocation4 + $0x638] sm:$0xff] }
 0x461   :  { %3540 = vmatpush1.bf16.msra.mxu1 %v3415_v27  ;;  %3581 = vmatpush1.bf16.msra.mxu0 %v3417_v28  ;;  %v10300_v27 = vrot.slane %v10256_v42, 4  ;;  %v3643_v28 = vld [vmem:[#allocation4 + $0x620] sm:$0xff] }
 0x462   :  { %3541 = vmatprep.subr.bf16.mxu1 %v3424_v20  ;;  %3582 = vmatprep.subr.bf16.mxu0 %v3426_v43  ;;  %v3645_v20 = vld [vmem:[#allocation4 + $0x630] sm:$0xff]  ;;  %v3652_v43 = vld [vmem:[#allocation4 + $0x668] sm:$0xff] }
 0x465   :  { %3542 = vmatpush1.bf16.msra.mxu1 %v3423_v0  ;;  %3583 = vmatpush1.bf16.msra.mxu0 %v3425_v59  ;;  %v3654_v0 = vld [vmem:[#allocation4 + $0x678] sm:$0xff]  ;;  %v3651_v59 = vld [vmem:[#allocation4 + $0x660] sm:$0xff] }
 0x466   :  { %3543 = vmatprep.subr.bf16.mxu1 %v3432_v60  ;;  %3584 = vmatprep.subr.bf16.mxu0 %v3434_v45  ;;  %v3653_v60 = vld [vmem:[#allocation4 + $0x670] sm:$0xff]  ;;  %v3662_v45 = vld [vmem:[#allocation4 + $0x6b8] sm:$0xff] }
 0x469   :  { %3544 = vmatpush1.bf16.msra.mxu1 %v3431_v6  ;;  %3585 = vmatpush1.bf16.msra.mxu0 %v3433_v14  ;;  %v3659_v6 = vld [vmem:[#allocation4 + $0x6a0] sm:$0xff]  ;;  %v3661_v14 = vld [vmem:[#allocation4 + $0x6b0] sm:$0xff] }
 0x46a   :  { %3545 = vmatprep.subr.bf16.mxu1 %v3440_v37  ;;  %3586 = vmatprep.subr.bf16.mxu0 %v3442_v63  ;;  %v3668_v37 = vld [vmem:[#allocation4 + $0x6e8] sm:$0xff]  ;;  %v3670_v63 = vld [vmem:[#allocation4 + $0x6f8] sm:$0xff] }
 0x46d   :  { %3546 = vmatpush1.bf16.msra.mxu1 %v3439_v56  ;;  %3587 = vmatpush1.bf16.msra.mxu0 %v3441_v3  ;;  %v3667_v56 = vld [vmem:[#allocation4 + $0x6e0] sm:$0xff]  ;;  %v3669_v3 = vld [vmem:[#allocation4 + $0x6f0] sm:$0xff] }
 0x46e   :  { %3547 = vmatprep.subr.bf16.mxu1 %v3448_v39  ;;  %3588 = vmatprep.subr.bf16.mxu0 %v3450_v46  ;;  %v3676_v39 = vld [vmem:[#allocation4 + $0x728] sm:$0xff]  ;;  %v3678_v46 = vld [vmem:[#allocation4 + $0x738] sm:$0xff] }
 0x471   :  { %3548 = vmatpush1.bf16.msra.mxu1 %v3447_v16  ;;  %3589 = vmatpush1.bf16.msra.mxu0 %v3449_v30  ;;  %v3675_v16 = vld [vmem:[#allocation4 + $0x720] sm:$0xff]  ;;  %v3677_v30 = vld [vmem:[#allocation4 + $0x730] sm:$0xff] }
 0x472   :  { %3706 = vmatprep.subr.bf16.mxu1 %v3640_v4  ;;  %3747 = vmatprep.subr.bf16.mxu0 %v3642_v36  ;;  %v3684_v4 = vld [vmem:[#allocation4 + $0x768] sm:$0xff]  ;;  %v3686_v36 = vld [vmem:[#allocation4 + $0x778] sm:$0xff] }
 0x474   :  { %3566 = vmatmul.mubr.bf16.vlgmr.msra.gmra.mrb[100].mxu1 %v10256_v42  ;;  %3607 = vmatmul.mubr.bf16.vlgmr.msra.gmra.mrb[108].mxu0 %v10256_v42  ;;  %v3660_v42 = vld [vmem:[#allocation4 + $0x6a8] sm:$0xff] }
 0x475   :  { %3707 = vmatpush1.bf16.msra.mxu1 %v3639_v18  ;;  %3748 = vmatpush1.bf16.msra.mxu0 %v3641_v49  ;;  %v3683_v18 = vld [vmem:[#allocation4 + $0x760] sm:$0xff]  ;;  %v3685_v49 = vld [vmem:[#allocation4 + $0x770] sm:$0xff] }
 0x476   :  { %3708 = vmatprep.subr.bf16.mxu1 %v3648_v51  ;;  %3749 = vmatprep.subr.bf16.mxu0 %v3650_v22 }
 0x477   :  { %3738 = vmatprep.mubr.bf16.mxu1 %v10952_v11  ;;  %3779 = vmatprep.mubr.bf16.mxu0 %v10952_v11 }
 0x479   :  { %3709 = vmatpush1.bf16.msra.mxu1 %v3647_v7  ;;  %3750 = vmatpush1.bf16.msra.mxu0 %v3649_v10  ;;  %v3692_v7 = vld [vmem:[#allocation4 + $0x7a8] sm:$0xff]  ;;  %v3694_v10 = vld [vmem:[#allocation4 + $0x7b8] sm:$0xff] }
 0x47a   :  { %3710 = vmatprep.subr.bf16.mxu1 %v3656_v19  ;;  %3751 = vmatprep.subr.bf16.mxu0 %v3658_v23 }
 0x47d   :  { %3711 = vmatpush1.bf16.msra.mxu1 %v3655_v8  ;;  %3752 = vmatpush1.bf16.msra.mxu0 %v3657_v15 }
 0x47e   :  { %3712 = vmatprep.subr.bf16.mxu1 %v3664_v13  ;;  %3753 = vmatprep.subr.bf16.mxu0 %v3666_v58 }
 0x481   :  { %3713 = vmatpush1.bf16.msra.mxu1 %v3663_v47  ;;  %3754 = vmatpush1.bf16.msra.mxu0 %v3665_v52  ;;  %v3691_v47 = vld [vmem:[#allocation4 + $0x7a0] sm:$0xff]  ;;  %v3693_v52 = vld [vmem:[#allocation4 + $0x7b0] sm:$0xff] }
 0x482   :  { %3714 = vmatprep.subr.bf16.mxu1 %v3672_v24  ;;  %3755 = vmatprep.subr.bf16.mxu0 %v3674_v57  ;;  %v3700_v24 = vld [vmem:[#allocation4 + $0x7e8] sm:$0xff]  ;;  %v3702_v57 = vld [vmem:[#allocation4 + $0x7f8] sm:$0xff] }
 0x485   :  { %3715 = vmatpush1.bf16.msra.mxu1 %v3671_v35  ;;  %3756 = vmatpush1.bf16.msra.mxu0 %v3673_v26  ;;  %v3699_v35 = vld [vmem:[#allocation4 + $0x7e0] sm:$0xff]  ;;  %v3701_v26 = vld [vmem:[#allocation4 + $0x7f0] sm:$0xff] }
 0x486   :  { %3716 = vmatprep.subr.bf16.mxu1 %v3680_v2  ;;  %3757 = vmatprep.subr.bf16.mxu0 %v3682_v53  ;;  %v3895_v2 = vld [vmem:[#allocation4 + $0x808] sm:$0xff]  ;;  %v3897_v53 = vld [vmem:[#allocation4 + $0x818] sm:$0xff] }
 0x489   :  { %3717 = vmatpush1.bf16.msra.mxu1 %v3679_v44  ;;  %3758 = vmatpush1.bf16.msra.mxu0 %v3681_v21  ;;  %v3894_v44 = vld [vmem:[#allocation4 + $0x800] sm:$0xff]  ;;  %v3896_v21 = vld [vmem:[#allocation4 + $0x810] sm:$0xff] }
 0x48a   :  { %3718 = vmatprep.subr.bf16.mxu1 %v3688_v61  ;;  %3759 = vmatprep.subr.bf16.mxu0 %v3690_v48  ;;  %v3903_v61 = vld [vmem:[#allocation4 + $0x848] sm:$0xff]  ;;  %v3905_v48 = vld [vmem:[#allocation4 + $0x858] sm:$0xff] }
 0x48d   :  { %3719 = vmatpush1.bf16.msra.mxu1 %v3687_v29  ;;  %3760 = vmatpush1.bf16.msra.mxu0 %v3689_v50  ;;  %v3902_v29 = vld [vmem:[#allocation4 + $0x840] sm:$0xff]  ;;  %v3904_v50 = vld [vmem:[#allocation4 + $0x850] sm:$0xff] }
 0x48e   :  { %3720 = vmatprep.subr.bf16.mxu1 %v3696_v55  ;;  %3761 = vmatprep.subr.bf16.mxu0 %v3698_v1  ;;  %v3911_v55 = vld [vmem:[#allocation4 + $0x888] sm:$0xff]  ;;  %v3913_v1 = vld [vmem:[#allocation4 + $0x898] sm:$0xff] }
 0x491   :  { %3721 = vmatpush1.bf16.msra.mxu1 %v3695_v9  ;;  %3762 = vmatpush1.bf16.msra.mxu0 %v3697_v31  ;;  %v3910_v9 = vld [vmem:[#allocation4 + $0x880] sm:$0xff]  ;;  %v3912_v31 = vld [vmem:[#allocation4 + $0x890] sm:$0xff] }
 0x492   :  { %3788 = vmatprep.subr.bf16.mxu1 %v3644_v40  ;;  %3829 = vmatprep.subr.bf16.mxu0 %v3646_v25  ;;  %v3919_v40 = vld [vmem:[#allocation4 + $0x8c8] sm:$0xff]  ;;  %v3921_v25 = vld [vmem:[#allocation4 + $0x8d8] sm:$0xff] }
 0x494   :  { %3739 = vmatmul.mubr.bf16.vlgmr.msra.gmra.mrb[104].mxu1 %v10300_v27  ;;  %3780 = vmatmul.mubr.bf16.vlgmr.msra.gmra.mrb[112].mxu0 %v10300_v27 }
 0x495   :  { %3789 = vmatpush1.bf16.msra.mxu1 %v3643_v28  ;;  %3830 = vmatpush1.bf16.msra.mxu0 %v3645_v20  ;;  %v3920_v28 = vld [vmem:[#allocation4 + $0x8d0] sm:$0xff]  ;;  %v3927_v20 = vld [vmem:[#allocation4 + $0x908] sm:$0xff] }
 0x496   :  { %3790 = vmatprep.subr.bf16.mxu1 %v3652_v43  ;;  %3831 = vmatprep.subr.bf16.mxu0 %v3654_v0  ;;  %v3929_v43 = vld [vmem:[#allocation4 + $0x918] sm:$0xff]  ;;  %v3926_v0 = vld [vmem:[#allocation4 + $0x900] sm:$0xff] }
 0x497   :  { %3820 = vmatprep.mubr.bf16.mxu1 %v10952_v11  ;;  %3861 = vmatprep.mubr.bf16.mxu0 %v10952_v11 }
 0x499   :  { %3791 = vmatpush1.bf16.msra.mxu1 %v3651_v59  ;;  %3832 = vmatpush1.bf16.msra.mxu0 %v3653_v60  ;;  %v3928_v59 = vld [vmem:[#allocation4 + $0x910] sm:$0xff]  ;;  %v3935_v60 = vld [vmem:[#allocation4 + $0x948] sm:$0xff] }
 0x49a   :  { %3792 = vmatprep.subr.bf16.mxu1 %v3660_v42  ;;  %3833 = vmatprep.subr.bf16.mxu0 %v3662_v45  ;;  %v3937_v42 = vld [vmem:[#allocation4 + $0x958] sm:$0xff]  ;;  %v3934_v45 = vld [vmem:[#allocation4 + $0x940] sm:$0xff] }
 0x49d   :  { %3793 = vmatpush1.bf16.msra.mxu1 %v3659_v6  ;;  %3834 = vmatpush1.bf16.msra.mxu0 %v3661_v14  ;;  %v3936_v6 = vld [vmem:[#allocation4 + $0x950] sm:$0xff] }
 0x49e   :  { %3794 = vmatprep.subr.bf16.mxu1 %v3668_v37  ;;  %3835 = vmatprep.subr.bf16.mxu0 %v3670_v63  ;;  %v3943_v63 = vld [vmem:[#allocation4 + $0x988] sm:$0xff] }
 0x4a1   :  { %3795 = vmatpush1.bf16.msra.mxu1 %v3667_v56  ;;  %3836 = vmatpush1.bf16.msra.mxu0 %v3669_v3  ;;  %v3945_v56 = vld [vmem:[#allocation4 + $0x998] sm:$0xff] }
 0x4a2   :  { %3796 = vmatprep.subr.bf16.mxu1 %v3676_v39  ;;  %3837 = vmatprep.subr.bf16.mxu0 %v3678_v46 }
 0x4a5   :  { %3797 = vmatpush1.bf16.msra.mxu1 %v3675_v16  ;;  %3838 = vmatpush1.bf16.msra.mxu0 %v3677_v30 }
 0x4a6   :  { %3798 = vmatprep.subr.bf16.mxu1 %v3684_v4  ;;  %3839 = vmatprep.subr.bf16.mxu0 %v3686_v36  ;;  %v3942_v36 = vld [vmem:[#allocation4 + $0x980] sm:$0xff] }
 0x4a7   :  { %v10306_v51 = vpop.f32.mrb[80].mxu1  ;;  %v10308_v22 = vpop.f32.mrb[88].mxu0 }
 0x4a8   :  { %v10310_v19 = vpop.f32.mrb[81].mxu1  ;;  %v10312_v23 = vpop.f32.mrb[89].mxu0 }
 0x4a9   :  { %v2982_v8 = vpop.f32.mrb[82].mxu1  ;;  %v3023_v15 = vpop.f32.mrb[90].mxu0  ;;  %3799 = vmatpush1.bf16.msra.mxu1 %v3683_v18  ;;  %3840 = vmatpush1.bf16.msra.mxu0 %v3685_v49  ;;  %v3944_v18 = vld [vmem:[#allocation4 + $0x990] sm:$0xff]  ;;  %v3951_v49 = vld [vmem:[#allocation4 + $0x9c8] sm:$0xff] }
 0x4aa   :  { %v2983_v13 = vpop.f32.mrb[83].mxu1  ;;  %v3024_v58 = vpop.f32.mrb[91].mxu0  ;;  %3800 = vmatprep.subr.bf16.mxu1 %v3692_v7  ;;  %3841 = vmatprep.subr.bf16.mxu0 %v3694_v10  ;;  %v3953_v7 = vld [vmem:[#allocation4 + $0x9d8] sm:$0xff]  ;;  %v3950_v10 = vld [vmem:[#allocation4 + $0x9c0] sm:$0xff]  ;;  %v3952_v8 = vld [vmem:[#allocation4 + $0x9d0] sm:$0xff] }
 0x4ab   :  { %v3899_v15 = vld [vmem:[#allocation4 + $0x828] sm:$0xff]  ;;  %v3901_v13 = vld [vmem:[#allocation4 + $0x838] sm:$0xff]  ;;  %v3898_v58 = vld [vmem:[#allocation4 + $0x820] sm:$0xff] }
 0x4ad   :  { %3801 = vmatpush1.bf16.msra.mxu1 %v3691_v47  ;;  %3842 = vmatpush1.bf16.msra.mxu0 %v3693_v52  ;;  %v3900_v47 = vld [vmem:[#allocation4 + $0x830] sm:$0xff]  ;;  %v3907_v52 = vld [vmem:[#allocation4 + $0x868] sm:$0xff] }
 0x4ae   :  { %3802 = vmatprep.subr.bf16.mxu1 %v3700_v24  ;;  %3843 = vmatprep.subr.bf16.mxu0 %v3702_v57  ;;  %v3909_v24 = vld [vmem:[#allocation4 + $0x878] sm:$0xff]  ;;  %v3906_v57 = vld [vmem:[#allocation4 + $0x860] sm:$0xff] }
 0x4b1   :  { %3803 = vmatpush1.bf16.msra.mxu1 %v3699_v35  ;;  %3844 = vmatpush1.bf16.msra.mxu0 %v3701_v26  ;;  %v3908_v35 = vld [vmem:[#allocation4 + $0x870] sm:$0xff]  ;;  %v3915_v26 = vld [vmem:[#allocation4 + $0x8a8] sm:$0xff] }
 0x4b2   :  { %3958 = vmatprep.subr.bf16.mxu1 %v3895_v2  ;;  %3999 = vmatprep.subr.bf16.mxu0 %v3897_v53  ;;  %v3917_v2 = vld [vmem:[#allocation4 + $0x8b8] sm:$0xff]  ;;  %v3914_v53 = vld [vmem:[#allocation4 + $0x8a0] sm:$0xff] }
 0x4b4   :  { %3821 = vmatmul.mubr.bf16.vlgmr.msra.gmra.mrb[108].mxu1 %v10300_v27  ;;  %3862 = vmatmul.mubr.bf16.vlgmr.msra.gmra.mrb[116].mxu0 %v10300_v27  ;;  %v3918_v27 = vld [vmem:[#allocation4 + $0x8c0] sm:$0xff] }
 0x4b5   :  { %3959 = vmatpush1.bf16.msra.mxu1 %v3894_v44  ;;  %4000 = vmatpush1.bf16.msra.mxu0 %v3896_v21  ;;  %v3916_v44 = vld [vmem:[#allocation4 + $0x8b0] sm:$0xff]  ;;  %v3923_v21 = vld [vmem:[#allocation4 + $0x8e8] sm:$0xff] }
 0x4b6   :  { %3960 = vmatprep.subr.bf16.mxu1 %v3903_v61  ;;  %4001 = vmatprep.subr.bf16.mxu0 %v3905_v48  ;;  %v3925_v61 = vld [vmem:[#allocation4 + $0x8f8] sm:$0xff]  ;;  %v3922_v48 = vld [vmem:[#allocation4 + $0x8e0] sm:$0xff] }
 0x4b7   :  { %3990 = vmatprep.mubr.bf16.mxu1 %v10952_v11  ;;  %4031 = vmatprep.mubr.bf16.mxu0 %v10952_v11 }
 0x4b9   :  { %3961 = vmatpush1.bf16.msra.mxu1 %v3902_v29  ;;  %4002 = vmatpush1.bf16.msra.mxu0 %v3904_v50  ;;  %v3924_v29 = vld [vmem:[#allocation4 + $0x8f0] sm:$0xff]  ;;  %v3931_v50 = vld [vmem:[#allocation4 + $0x928] sm:$0xff] }
 0x4ba   :  { %3962 = vmatprep.subr.bf16.mxu1 %v3911_v55  ;;  %4003 = vmatprep.subr.bf16.mxu0 %v3913_v1  ;;  %v3933_v55 = vld [vmem:[#allocation4 + $0x938] sm:$0xff]  ;;  %v3930_v1 = vld [vmem:[#allocation4 + $0x920] sm:$0xff] }
 0x4bd   :  { %3963 = vmatpush1.bf16.msra.mxu1 %v3910_v9  ;;  %4004 = vmatpush1.bf16.msra.mxu0 %v3912_v31  ;;  %v3932_v9 = vld [vmem:[#allocation4 + $0x930] sm:$0xff]  ;;  %v3939_v31 = vld [vmem:[#allocation4 + $0x968] sm:$0xff] }
 0x4be   :  { %3964 = vmatprep.subr.bf16.mxu1 %v3919_v40  ;;  %4005 = vmatprep.subr.bf16.mxu0 %v3921_v25  ;;  %v3941_v40 = vld [vmem:[#allocation4 + $0x978] sm:$0xff]  ;;  %v3938_v25 = vld [vmem:[#allocation4 + $0x960] sm:$0xff] }
 0x4c1   :  { %3965 = vmatpush1.bf16.msra.mxu1 %v3918_v27  ;;  %4006 = vmatpush1.bf16.msra.mxu0 %v3920_v28  ;;  %v3940_v27 = vld [vmem:[#allocation4 + $0x970] sm:$0xff] }
 0x4c2   :  { %3966 = vmatprep.subr.bf16.mxu1 %v3927_v20  ;;  %4007 = vmatprep.subr.bf16.mxu0 %v3929_v43  ;;  %v3947_v43 = vld [vmem:[#allocation4 + $0x9a8] sm:$0xff] }
 0x4c5   :  { %3967 = vmatpush1.bf16.msra.mxu1 %v3926_v0  ;;  %4008 = vmatpush1.bf16.msra.mxu0 %v3928_v59  ;;  %v3949_v0 = vld [vmem:[#allocation4 + $0x9b8] sm:$0xff] }
 0x4c6   :  { %3968 = vmatprep.subr.bf16.mxu1 %v3935_v60  ;;  %4009 = vmatprep.subr.bf16.mxu0 %v3937_v42 }
 0x4c7   :  { %v10318_v14 = vpop.f32.mrb[84].mxu1  ;;  %v10320_v37 = vpop.f32.mrb[92].mxu0 }
 0x4c8   :  { %v10322_v3 = vpop.f32.mrb[85].mxu1  ;;  %v10324_v39 = vpop.f32.mrb[93].mxu0 }
 0x4c9   :  { %v3064_v46 = vpop.f32.mrb[86].mxu1  ;;  %v3105_v16 = vpop.f32.mrb[94].mxu0  ;;  %3969 = vmatpush1.bf16.msra.mxu1 %v3934_v45  ;;  %4010 = vmatpush1.bf16.msra.mxu0 %v3936_v6 }
 0x4ca   :  { %v3065_v30 = vpop.f32.mrb[87].mxu1  ;;  %v3106_v4 = vpop.f32.mrb[95].mxu0  ;;  %3970 = vmatprep.subr.bf16.mxu1 %v3943_v63  ;;  %4011 = vmatprep.subr.bf16.mxu0 %v3945_v56 }
 0x4cb   :  { %v3948_v4 = vld [vmem:[#allocation4 + $0x9b0] sm:$0xff] }
 0x4cd   :  { %3971 = vmatpush1.bf16.msra.mxu1 %v3942_v36  ;;  %4012 = vmatpush1.bf16.msra.mxu0 %v3944_v18  ;;  %v3957_v36 = vld [vmem:[#allocation4 + $0x9f8] sm:$0xff]  ;;  %v3956_v18 = vld [vmem:[#allocation4 + $0x9f0] sm:$0xff] }
 0x4ce   :  { %3972 = vmatprep.subr.bf16.mxu1 %v3951_v49  ;;  %4013 = vmatprep.subr.bf16.mxu0 %v3953_v7  ;;  %v4149_v49 = vld [vmem:[#allocation4 + $0xa18] sm:$0xff]  ;;  %v4146_v7 = vld [vmem:[#allocation4 + $0xa00] sm:$0xff] }
 0x4d1   :  { %3973 = vmatpush1.bf16.msra.mxu1 %v3950_v10  ;;  %4014 = vmatpush1.bf16.msra.mxu0 %v3952_v8  ;;  %v4148_v10 = vld [vmem:[#allocation4 + $0xa10] sm:$0xff]  ;;  %v4155_v8 = vld [vmem:[#allocation4 + $0xa48] sm:$0xff] }
 0x4d2   :  { %4040 = vmatprep.subr.bf16.mxu1 %v3899_v15  ;;  %4081 = vmatprep.subr.bf16.mxu0 %v3901_v13  ;;  %v4157_v15 = vld [vmem:[#allocation4 + $0xa58] sm:$0xff]  ;;  %v4154_v13 = vld [vmem:[#allocation4 + $0xa40] sm:$0xff] }
 0x4d4   :  { %3991 = vmatmul.mubr.bf16.vlgmr.msra.gmra.mrb[112].mxu1 %v10258_v17  ;;  %4032 = vmatmul.mubr.bf16.vlgmr.msra.gmra.mrb[120].mxu0 %v10258_v17 }
 0x4d5   :  { %4041 = vmatpush1.bf16.msra.mxu1 %v3898_v58  ;;  %4082 = vmatpush1.bf16.msra.mxu0 %v3900_v47  ;;  %v4156_v58 = vld [vmem:[#allocation4 + $0xa50] sm:$0xff]  ;;  %v4163_v47 = vld [vmem:[#allocation4 + $0xa88] sm:$0xff] }
 0x4d6   :  { %4042 = vmatprep.subr.bf16.mxu1 %v3907_v52  ;;  %4083 = vmatprep.subr.bf16.mxu0 %v3909_v24  ;;  %v4165_v52 = vld [vmem:[#allocation4 + $0xa98] sm:$0xff]  ;;  %v4162_v24 = vld [vmem:[#allocation4 + $0xa80] sm:$0xff] }
 0x4d7   :  { %4072 = vmatprep.mubr.bf16.mxu1 %v10952_v11  ;;  %4113 = vmatprep.mubr.bf16.mxu0 %v10952_v11 }
 0x4d9   :  { %4043 = vmatpush1.bf16.msra.mxu1 %v3906_v57  ;;  %4084 = vmatpush1.bf16.msra.mxu0 %v3908_v35  ;;  %v4164_v57 = vld [vmem:[#allocation4 + $0xa90] sm:$0xff]  ;;  %v4171_v35 = vld [vmem:[#allocation4 + $0xac8] sm:$0xff] }
 0x4da   :  { %4044 = vmatprep.subr.bf16.mxu1 %v3915_v26  ;;  %4085 = vmatprep.subr.bf16.mxu0 %v3917_v2  ;;  %v4173_v26 = vld [vmem:[#allocation4 + $0xad8] sm:$0xff]  ;;  %v4170_v2 = vld [vmem:[#allocation4 + $0xac0] sm:$0xff] }
 0x4dd   :  { %4045 = vmatpush1.bf16.msra.mxu1 %v3914_v53  ;;  %4086 = vmatpush1.bf16.msra.mxu0 %v3916_v44  ;;  %v4172_v53 = vld [vmem:[#allocation4 + $0xad0] sm:$0xff]  ;;  %v4179_v44 = vld [vmem:[#allocation4 + $0xb08] sm:$0xff] }
 0x4de   :  { %4046 = vmatprep.subr.bf16.mxu1 %v3923_v21  ;;  %4087 = vmatprep.subr.bf16.mxu0 %v3925_v61  ;;  %v4181_v21 = vld [vmem:[#allocation4 + $0xb18] sm:$0xff]  ;;  %v4178_v61 = vld [vmem:[#allocation4 + $0xb00] sm:$0xff] }
 0x4e1   :  { %4047 = vmatpush1.bf16.msra.mxu1 %v3922_v48  ;;  %4088 = vmatpush1.bf16.msra.mxu0 %v3924_v29  ;;  %v4180_v48 = vld [vmem:[#allocation4 + $0xb10] sm:$0xff]  ;;  %v4187_v29 = vld [vmem:[#allocation4 + $0xb48] sm:$0xff] }
 0x4e2   :  { %4048 = vmatprep.subr.bf16.mxu1 %v3931_v50  ;;  %4089 = vmatprep.subr.bf16.mxu0 %v3933_v55  ;;  %v4189_v50 = vld [vmem:[#allocation4 + $0xb58] sm:$0xff]  ;;  %v4186_v55 = vld [vmem:[#allocation4 + $0xb40] sm:$0xff] }
 0x4e5   :  { %4049 = vmatpush1.bf16.msra.mxu1 %v3930_v1  ;;  %4090 = vmatpush1.bf16.msra.mxu0 %v3932_v9  ;;  %v4188_v1 = vld [vmem:[#allocation4 + $0xb50] sm:$0xff] }
 0x4e6   :  { %4050 = vmatprep.subr.bf16.mxu1 %v3939_v31  ;;  %4091 = vmatprep.subr.bf16.mxu0 %v3941_v40  ;;  %v4195_v40 = vld [vmem:[#allocation4 + $0xb88] sm:$0xff] }
 0x4e7   :  { %v3233_v28 = vpop.f32.mrb[88].mxu1  ;;  %v3274_v20 = vpop.f32.mrb[96].mxu0 }
 0x4e8   :  { %v10331_v59 = vadd.f32 %v3233_v28, %v10306_v51  ;;  %v10334_v60 = vadd.f32 %v3274_v20, %v10308_v22  ;;  %v3235_v42 = vpop.f32.mrb[89].mxu1  ;;  %v3276_v45 = vpop.f32.mrb[97].mxu0  ;;  %v3946_v51 = vld [vmem:[#allocation4 + $0x9a0] sm:$0xff]  ;;  %v3955_v22 = vld [vmem:[#allocation4 + $0x9e8] sm:$0xff] }
 0x4e9   :  { %v10337_v6 = vadd.f32 %v3235_v42, %v10310_v19  ;;  %v10340_v63 = vadd.f32 %v3276_v45, %v10312_v23  ;;  %v3237_v56 = vpop.f32.mrb[90].mxu1  ;;  %v3278_v46 = vpop.f32.mrb[98].mxu0  ;;  %4051 = vmatpush1.bf16.msra.mxu1 %v3938_v25  ;;  %4092 = vmatpush1.bf16.msra.mxu0 %v3940_v27  ;;  %v3954_v19 = vld [vmem:[#allocation4 + $0x9e0] sm:$0xff]  ;;  %v4147_v23 = vld [vmem:[#allocation4 + $0xa08] sm:$0xff]  ;;  %v4197_v25 = vld [vmem:[#allocation4 + $0xb98] sm:$0xff] }
 0x4ea   :  { %v3238_v16 = vpop.f32.mrb[91].mxu1  ;;  %v3279_v30 = vpop.f32.mrb[99].mxu0  ;;  %4052 = vmatprep.subr.bf16.mxu1 %v3947_v43  ;;  %4093 = vmatprep.subr.bf16.mxu0 %v3949_v0 }
 0x4eb   :  { %v4196_v30 = vld [vmem:[#allocation4 + $0xb90] sm:$0xff] }
 0x4ed   :  { %4053 = vmatpush1.bf16.msra.mxu1 %v3946_v51  ;;  %4094 = vmatpush1.bf16.msra.mxu0 %v3948_v4  ;;  %v4205_v51 = vld [vmem:[#allocation4 + $0xbd8] sm:$0xff]  ;;  %v4204_v4 = vld [vmem:[#allocation4 + $0xbd0] sm:$0xff] }
 0x4ee   :  { %4054 = vmatprep.subr.bf16.mxu1 %v3955_v22  ;;  %4095 = vmatprep.subr.bf16.mxu0 %v3957_v36  ;;  %v4153_v22 = vld [vmem:[#allocation4 + $0xa38] sm:$0xff]  ;;  %v10359_v36 = vrot.slane %v10258_v17, 4 }
 0x4f1   :  { %4055 = vmatpush1.bf16.msra.mxu1 %v3954_v19  ;;  %4096 = vmatpush1.bf16.msra.mxu0 %v3956_v18  ;;  %v4150_v19 = vld [vmem:[#allocation4 + $0xa20] sm:$0xff]  ;;  %v4152_v18 = vld [vmem:[#allocation4 + $0xa30] sm:$0xff] }
 0x4f2   :  { %4213 = vmatprep.subr.bf16.mxu1 %v4147_v23  ;;  %4254 = vmatprep.subr.bf16.mxu0 %v4149_v49  ;;  %v4159_v23 = vld [vmem:[#allocation4 + $0xa68] sm:$0xff]  ;;  %v4161_v49 = vld [vmem:[#allocation4 + $0xa78] sm:$0xff] }
 0x4f4   :  { %4073 = vmatmul.mubr.bf16.vlgmr.msra.gmra.mrb[116].mxu1 %v10258_v17  ;;  %4114 = vmatmul.mubr.bf16.vlgmr.msra.gmra.mrb[124].mxu0 %v10258_v17  ;;  %v4167_v17 = vld [vmem:[#allocation4 + $0xaa8] sm:$0xff] }
 0x4f5   :  { %4214 = vmatpush1.bf16.msra.mxu1 %v4146_v7  ;;  %4255 = vmatpush1.bf16.msra.mxu0 %v4148_v10  ;;  %v4158_v7 = vld [vmem:[#allocation4 + $0xa60] sm:$0xff]  ;;  %v4160_v10 = vld [vmem:[#allocation4 + $0xa70] sm:$0xff] }
 0x4f6   :  { %4215 = vmatprep.subr.bf16.mxu1 %v4155_v8  ;;  %4256 = vmatprep.subr.bf16.mxu0 %v4157_v15  ;;  %v4169_v8 = vld [vmem:[#allocation4 + $0xab8] sm:$0xff]  ;;  %v4166_v15 = vld [vmem:[#allocation4 + $0xaa0] sm:$0xff] }
 0x4f7   :  { %4245 = vmatprep.mubr.bf16.mxu1 %v10952_v11  ;;  %4286 = vmatprep.mubr.bf16.mxu0 %v10952_v11 }
 0x4f9   :  { %4216 = vmatpush1.bf16.msra.mxu1 %v4154_v13  ;;  %4257 = vmatpush1.bf16.msra.mxu0 %v4156_v58  ;;  %v4168_v13 = vld [vmem:[#allocation4 + $0xab0] sm:$0xff]  ;;  %v4175_v58 = vld [vmem:[#allocation4 + $0xae8] sm:$0xff] }
 0x4fa   :  { %4217 = vmatprep.subr.bf16.mxu1 %v4163_v47  ;;  %4258 = vmatprep.subr.bf16.mxu0 %v4165_v52  ;;  %v4177_v47 = vld [vmem:[#allocation4 + $0xaf8] sm:$0xff]  ;;  %v4174_v52 = vld [vmem:[#allocation4 + $0xae0] sm:$0xff] }
 0x4fd   :  { %4218 = vmatpush1.bf16.msra.mxu1 %v4162_v24  ;;  %4259 = vmatpush1.bf16.msra.mxu0 %v4164_v57  ;;  %v4176_v24 = vld [vmem:[#allocation4 + $0xaf0] sm:$0xff]  ;;  %v4183_v57 = vld [vmem:[#allocation4 + $0xb28] sm:$0xff] }
 0x4fe   :  { %4219 = vmatprep.subr.bf16.mxu1 %v4171_v35  ;;  %4260 = vmatprep.subr.bf16.mxu0 %v4173_v26  ;;  %v4185_v35 = vld [vmem:[#allocation4 + $0xb38] sm:$0xff]  ;;  %v4182_v26 = vld [vmem:[#allocation4 + $0xb20] sm:$0xff] }
 0x501   :  { %4220 = vmatpush1.bf16.msra.mxu1 %v4170_v2  ;;  %4261 = vmatpush1.bf16.msra.mxu0 %v4172_v53  ;;  %v4184_v2 = vld [vmem:[#allocation4 + $0xb30] sm:$0xff]  ;;  %v4191_v53 = vld [vmem:[#allocation4 + $0xb68] sm:$0xff] }
 0x502   :  { %4221 = vmatprep.subr.bf16.mxu1 %v4179_v44  ;;  %4262 = vmatprep.subr.bf16.mxu0 %v4181_v21  ;;  %v4193_v44 = vld [vmem:[#allocation4 + $0xb78] sm:$0xff]  ;;  %v4190_v21 = vld [vmem:[#allocation4 + $0xb60] sm:$0xff] }
 0x505   :  { %4222 = vmatpush1.bf16.msra.mxu1 %v4178_v61  ;;  %4263 = vmatpush1.bf16.msra.mxu0 %v4180_v48  ;;  %v4192_v61 = vld [vmem:[#allocation4 + $0xb70] sm:$0xff] }
 0x506   :  { %4223 = vmatprep.subr.bf16.mxu1 %v4187_v29  ;;  %4264 = vmatprep.subr.bf16.mxu0 %v4189_v50  ;;  %v4199_v50 = vld [vmem:[#allocation4 + $0xba8] sm:$0xff] }
 0x507   :  { %v3315_v9 = vpop.f32.mrb[92].mxu1  ;;  %v3356_v31 = vpop.f32.mrb[100].mxu0 }
 0x508   :  { %v10347_v27 = vadd.f32 %v3315_v9, %v10318_v14  ;;  %v10350_v28 = vadd.f32 %v3356_v31, %v10320_v37  ;;  %v3317_v20 = vpop.f32.mrb[93].mxu1  ;;  %v3358_v43 = vpop.f32.mrb[101].mxu0  ;;  %v4194_v14 = vld [vmem:[#allocation4 + $0xb80] sm:$0xff]  ;;  %v4203_v37 = vld [vmem:[#allocation4 + $0xbc8] sm:$0xff] }
 0x509   :  { %v10353_v0 = vadd.f32 %v3317_v20, %v10322_v3  ;;  %v10356_v42 = vadd.f32 %v3358_v43, %v10324_v39  ;;  %v3319_v45 = vpop.f32.mrb[94].mxu1  ;;  %v3360_v56 = vpop.f32.mrb[102].mxu0  ;;  %4224 = vmatpush1.bf16.msra.mxu1 %v4186_v55  ;;  %4265 = vmatpush1.bf16.msra.mxu0 %v4188_v1  ;;  %v4202_v3 = vld [vmem:[#allocation4 + $0xbc0] sm:$0xff]  ;;  %v4151_v39 = vld [vmem:[#allocation4 + $0xa28] sm:$0xff]  ;;  %v4201_v55 = vld [vmem:[#allocation4 + $0xbb8] sm:$0xff] }
 0x50a   :  { %v3320_v46 = vpop.f32.mrb[95].mxu1  ;;  %v3361_v16 = vpop.f32.mrb[103].mxu0  ;;  %4225 = vmatprep.subr.bf16.mxu1 %v4195_v40  ;;  %4266 = vmatprep.subr.bf16.mxu0 %v4197_v25 }
 0x50b   :  { %v4200_v16 = vld [vmem:[#allocation4 + $0xbb0] sm:$0xff] }
 0x50d   :  { %4226 = vmatpush1.bf16.msra.mxu1 %v4194_v14  ;;  %4267 = vmatpush1.bf16.msra.mxu0 %v4196_v30  ;;  %v4209_v14 = vld [vmem:[#allocation4 + $0xbf8] sm:$0xff]  ;;  %v4208_v30 = vld [vmem:[#allocation4 + $0xbf0] sm:$0xff] }
 0x50e   :  { %4227 = vmatprep.subr.bf16.mxu1 %v4203_v37  ;;  %4268 = vmatprep.subr.bf16.mxu0 %v4205_v51  ;;  %v4404_v37 = vld [vmem:[#allocation4 + $0xc18] sm:$0xff]  ;;  %v4401_v51 = vld [vmem:[#allocation4 + $0xc00] sm:$0xff] }
 0x511   :  { %4228 = vmatpush1.bf16.msra.mxu1 %v4202_v3  ;;  %4269 = vmatpush1.bf16.msra.mxu0 %v4204_v4  ;;  %v4403_v3 = vld [vmem:[#allocation4 + $0xc10] sm:$0xff]  ;;  %v4410_v4 = vld [vmem:[#allocation4 + $0xc48] sm:$0xff] }
 0x512   :  { %4295 = vmatprep.subr.bf16.mxu1 %v4151_v39  ;;  %4336 = vmatprep.subr.bf16.mxu0 %v4153_v22  ;;  %v4412_v39 = vld [vmem:[#allocation4 + $0xc58] sm:$0xff]  ;;  %v4409_v22 = vld [vmem:[#allocation4 + $0xc40] sm:$0xff] }
 0x514   :  { %4246 = vmatmul.mubr.bf16.vlgmr.msra.gmra.mrb[120].mxu1 %v10359_v36  ;;  %4287 = vmatmul.mubr.bf16.vlgmr.msra.gmra.mrb[128].mxu0 %v10359_v36 }
 0x515   :  { %4296 = vmatpush1.bf16.msra.mxu1 %v4150_v19  ;;  %4337 = vmatpush1.bf16.msra.mxu0 %v4152_v18  ;;  %v4411_v19 = vld [vmem:[#allocation4 + $0xc50] sm:$0xff]  ;;  %v4418_v18 = vld [vmem:[#allocation4 + $0xc88] sm:$0xff] }
 0x516   :  { %4297 = vmatprep.subr.bf16.mxu1 %v4159_v23  ;;  %4338 = vmatprep.subr.bf16.mxu0 %v4161_v49  ;;  %v4420_v23 = vld [vmem:[#allocation4 + $0xc98] sm:$0xff]  ;;  %v4417_v49 = vld [vmem:[#allocation4 + $0xc80] sm:$0xff] }
 0x517   :  { %4327 = vmatprep.mubr.bf16.mxu1 %v10952_v11  ;;  %4368 = vmatprep.mubr.bf16.mxu0 %v10952_v11 }
 0x519   :  { %4298 = vmatpush1.bf16.msra.mxu1 %v4158_v7  ;;  %4339 = vmatpush1.bf16.msra.mxu0 %v4160_v10  ;;  %v4419_v7 = vld [vmem:[#allocation4 + $0xc90] sm:$0xff]  ;;  %v4426_v10 = vld [vmem:[#allocation4 + $0xcc8] sm:$0xff] }
 0x51a   :  { %4299 = vmatprep.subr.bf16.mxu1 %v4167_v17  ;;  %4340 = vmatprep.subr.bf16.mxu0 %v4169_v8  ;;  %v4425_v17 = vld [vmem:[#allocation4 + $0xcc0] sm:$0xff]  ;;  %v4427_v8 = vld [vmem:[#allocation4 + $0xcd0] sm:$0xff] }
 0x51d   :  { %4300 = vmatpush1.bf16.msra.mxu1 %v4166_v15  ;;  %4341 = vmatpush1.bf16.msra.mxu0 %v4168_v13  ;;  %v4434_v15 = vld [vmem:[#allocation4 + $0xd08] sm:$0xff]  ;;  %v4436_v13 = vld [vmem:[#allocation4 + $0xd18] sm:$0xff] }
 0x51e   :  { %4301 = vmatprep.subr.bf16.mxu1 %v4175_v58  ;;  %4342 = vmatprep.subr.bf16.mxu0 %v4177_v47  ;;  %v4433_v58 = vld [vmem:[#allocation4 + $0xd00] sm:$0xff]  ;;  %v4435_v47 = vld [vmem:[#allocation4 + $0xd10] sm:$0xff] }
 0x521   :  { %4302 = vmatpush1.bf16.msra.mxu1 %v4174_v52  ;;  %4343 = vmatpush1.bf16.msra.mxu0 %v4176_v24  ;;  %v4442_v52 = vld [vmem:[#allocation4 + $0xd48] sm:$0xff]  ;;  %v4444_v24 = vld [vmem:[#allocation4 + $0xd58] sm:$0xff] }
 0x522   :  { %4303 = vmatprep.subr.bf16.mxu1 %v4183_v57  ;;  %4344 = vmatprep.subr.bf16.mxu0 %v4185_v35  ;;  %v4441_v57 = vld [vmem:[#allocation4 + $0xd40] sm:$0xff]  ;;  %v4443_v35 = vld [vmem:[#allocation4 + $0xd50] sm:$0xff] }
 0x525   :  { %4304 = vmatpush1.bf16.msra.mxu1 %v4182_v26  ;;  %4345 = vmatpush1.bf16.msra.mxu0 %v4184_v2 }
 0x526   :  { %4305 = vmatprep.subr.bf16.mxu1 %v4191_v53  ;;  %4346 = vmatprep.subr.bf16.mxu0 %v4193_v44  ;;  %v4450_v53 = vld [vmem:[#allocation4 + $0xd88] sm:$0xff]  ;;  %v4452_v44 = vld [vmem:[#allocation4 + $0xd98] sm:$0xff] }
 0x527   :  { %v3485_v48 = vpop.f32.mrb[96].mxu1  ;;  %v3526_v29 = vpop.f32.mrb[104].mxu0 }
 0x528   :  { %v10366_v1 = vadd.f32 %v3485_v48, %v10331_v59  ;;  %v10369_v9 = vadd.f32 %v3526_v29, %v10334_v60  ;;  %v3487_v31 = vpop.f32.mrb[97].mxu1  ;;  %v3528_v40 = vpop.f32.mrb[105].mxu0  ;;  %v4198_v59 = vld [vmem:[#allocation4 + $0xba0] sm:$0xff]  ;;  %v4207_v60 = vld [vmem:[#allocation4 + $0xbe8] sm:$0xff] }
 0x529   :  { %v10372_v25 = vadd.f32 %v3487_v31, %v10337_v6  ;;  %v10375_v20 = vadd.f32 %v3528_v40, %v10340_v63  ;;  %v3489_v43 = vpop.f32.mrb[98].mxu1  ;;  %v3530_v45 = vpop.f32.mrb[106].mxu0  ;;  %4306 = vmatpush1.bf16.msra.mxu1 %v4190_v21  ;;  %4347 = vmatpush1.bf16.msra.mxu0 %v4192_v61  ;;  %v4206_v6 = vld [vmem:[#allocation4 + $0xbe0] sm:$0xff]  ;;  %v4402_v63 = vld [vmem:[#allocation4 + $0xc08] sm:$0xff] }
 0x52a   :  { %v3490_v56 = vpop.f32.mrb[99].mxu1  ;;  %v3531_v46 = vpop.f32.mrb[107].mxu0  ;;  %4307 = vmatprep.subr.bf16.mxu1 %v4199_v50  ;;  %4348 = vmatprep.subr.bf16.mxu0 %v4201_v55 }
 0x52b   :  { %v4451_v56 = vld [vmem:[#allocation4 + $0xd90] sm:$0xff]  ;;  %v4460_v46 = vld [vmem:[#allocation4 + $0xdd8] sm:$0xff] }
 0x52d   :  { %4308 = vmatpush1.bf16.msra.mxu1 %v4198_v59  ;;  %4349 = vmatpush1.bf16.msra.mxu0 %v4200_v16  ;;  %v4459_v59 = vld [vmem:[#allocation4 + $0xdd0] sm:$0xff]  ;;  %v4408_v16 = vld [vmem:[#allocation4 + $0xc38] sm:$0xff] }
 0x52e   :  { %4309 = vmatprep.subr.bf16.mxu1 %v4207_v60  ;;  %4350 = vmatprep.subr.bf16.mxu0 %v4209_v14  ;;  %v4405_v60 = vld [vmem:[#allocation4 + $0xc20] sm:$0xff]  ;;  %v4407_v14 = vld [vmem:[#allocation4 + $0xc30] sm:$0xff] }
 0x531   :  { %4310 = vmatpush1.bf16.msra.mxu1 %v4206_v6  ;;  %4351 = vmatpush1.bf16.msra.mxu0 %v4208_v30  ;;  %v4414_v6 = vld [vmem:[#allocation4 + $0xc68] sm:$0xff]  ;;  %v4416_v30 = vld [vmem:[#allocation4 + $0xc78] sm:$0xff] }
 0x532   :  { %4465 = vmatprep.subr.bf16.mxu1 %v4402_v63  ;;  %4506 = vmatprep.subr.bf16.mxu0 %v4404_v37  ;;  %v4413_v63 = vld [vmem:[#allocation4 + $0xc60] sm:$0xff]  ;;  %v4415_v37 = vld [vmem:[#allocation4 + $0xc70] sm:$0xff] }
 0x534   :  { %4328 = vmatmul.mubr.bf16.vlgmr.msra.gmra.mrb[124].mxu1 %v10359_v36  ;;  %4369 = vmatmul.mubr.bf16.vlgmr.msra.gmra.mrb[132].mxu0 %v10359_v36  ;;  %v4428_v36 = vld [vmem:[#allocation4 + $0xcd8] sm:$0xff] }
 0x535   :  { %4466 = vmatpush1.bf16.msra.mxu1 %v4401_v51  ;;  %4507 = vmatpush1.bf16.msra.mxu0 %v4403_v3  ;;  %v4422_v51 = vld [vmem:[#allocation4 + $0xca8] sm:$0xff]  ;;  %v4424_v3 = vld [vmem:[#allocation4 + $0xcb8] sm:$0xff] }
 0x536   :  { %4467 = vmatprep.subr.bf16.mxu1 %v4410_v4  ;;  %4508 = vmatprep.subr.bf16.mxu0 %v4412_v39  ;;  %v4421_v4 = vld [vmem:[#allocation4 + $0xca0] sm:$0xff]  ;;  %v4423_v39 = vld [vmem:[#allocation4 + $0xcb0] sm:$0xff] }
 0x537   :  { %4497 = vmatprep.mubr.bf16.mxu1 %v10952_v11  ;;  %4538 = vmatprep.mubr.bf16.mxu0 %v10952_v11 }
 0x539   :  { %4468 = vmatpush1.bf16.msra.mxu1 %v4409_v22  ;;  %4509 = vmatpush1.bf16.msra.mxu0 %v4411_v19  ;;  %v4430_v22 = vld [vmem:[#allocation4 + $0xce8] sm:$0xff]  ;;  %v4432_v19 = vld [vmem:[#allocation4 + $0xcf8] sm:$0xff] }
 0x53a   :  { %4469 = vmatprep.subr.bf16.mxu1 %v4418_v18  ;;  %4510 = vmatprep.subr.bf16.mxu0 %v4420_v23  ;;  %v4429_v18 = vld [vmem:[#allocation4 + $0xce0] sm:$0xff]  ;;  %v4431_v23 = vld [vmem:[#allocation4 + $0xcf0] sm:$0xff] }
 0x53d   :  { %4470 = vmatpush1.bf16.msra.mxu1 %v4417_v49  ;;  %4511 = vmatpush1.bf16.msra.mxu0 %v4419_v7  ;;  %v4438_v49 = vld [vmem:[#allocation4 + $0xd28] sm:$0xff]  ;;  %v4440_v7 = vld [vmem:[#allocation4 + $0xd38] sm:$0xff] }
 0x53e   :  { %4471 = vmatprep.subr.bf16.mxu1 %v4426_v10  ;;  %4512 = vmatprep.subr.bf16.mxu0 %v4428_v36  ;;  %v4437_v10 = vld [vmem:[#allocation4 + $0xd20] sm:$0xff]  ;;  %v4439_v36 = vld [vmem:[#allocation4 + $0xd30] sm:$0xff] }
 0x541   :  { %4472 = vmatpush1.bf16.msra.mxu1 %v4425_v17  ;;  %4513 = vmatpush1.bf16.msra.mxu0 %v4427_v8  ;;  %v4446_v17 = vld [vmem:[#allocation4 + $0xd68] sm:$0xff]  ;;  %v4448_v8 = vld [vmem:[#allocation4 + $0xd78] sm:$0xff] }
 0x542   :  { %4473 = vmatprep.subr.bf16.mxu1 %v4434_v15  ;;  %4514 = vmatprep.subr.bf16.mxu0 %v4436_v13  ;;  %v4445_v15 = vld [vmem:[#allocation4 + $0xd60] sm:$0xff]  ;;  %v4447_v13 = vld [vmem:[#allocation4 + $0xd70] sm:$0xff] }
 0x545   :  { %4474 = vmatpush1.bf16.msra.mxu1 %v4433_v58  ;;  %4515 = vmatpush1.bf16.msra.mxu0 %v4435_v47 }
 0x546   :  { %4475 = vmatprep.subr.bf16.mxu1 %v4442_v52  ;;  %4516 = vmatprep.subr.bf16.mxu0 %v4444_v24  ;;  %v4454_v52 = vld [vmem:[#allocation4 + $0xda8] sm:$0xff]  ;;  %v4456_v24 = vld [vmem:[#allocation4 + $0xdb8] sm:$0xff] }
 0x547   :  { %v3567_v26 = vpop.f32.mrb[100].mxu1  ;;  %v3608_v2 = vpop.f32.mrb[108].mxu0 }
 0x548   :  { %v10382_v21 = vadd.f32 %v3567_v26, %v10347_v27  ;;  %v10385_v61 = vadd.f32 %v3608_v2, %v10350_v28  ;;  %v3569_v48 = vpop.f32.mrb[101].mxu1  ;;  %v3610_v29 = vpop.f32.mrb[109].mxu0  ;;  %v4449_v27 = vld [vmem:[#allocation4 + $0xd80] sm:$0xff]  ;;  %v4458_v28 = vld [vmem:[#allocation4 + $0xdc8] sm:$0xff] }
 0x549   :  { %v10388_v50 = vadd.f32 %v3569_v48, %v10353_v0  ;;  %v10391_v55 = vadd.f32 %v3610_v29, %v10356_v42  ;;  %v3571_v31 = vpop.f32.mrb[102].mxu1  ;;  %v3612_v40 = vpop.f32.mrb[110].mxu0  ;;  %4476 = vmatpush1.bf16.msra.mxu1 %v4441_v57  ;;  %4517 = vmatpush1.bf16.msra.mxu0 %v4443_v35  ;;  %v4457_v0 = vld [vmem:[#allocation4 + $0xdc0] sm:$0xff]  ;;  %v4406_v42 = vld [vmem:[#allocation4 + $0xc28] sm:$0xff] }
 0x54a   :  { %v3572_v43 = vpop.f32.mrb[103].mxu1  ;;  %v3613_v45 = vpop.f32.mrb[111].mxu0  ;;  %4477 = vmatprep.subr.bf16.mxu1 %v4450_v53  ;;  %4518 = vmatprep.subr.bf16.mxu0 %v4452_v44 }
 0x54b   :  { %v4455_v43 = vld [vmem:[#allocation4 + $0xdb0] sm:$0xff]  ;;  %v4464_v45 = vld [vmem:[#allocation4 + $0xdf8] sm:$0xff] }
 0x54d   :  { %4478 = vmatpush1.bf16.msra.mxu1 %v4449_v27  ;;  %4519 = vmatpush1.bf16.msra.mxu0 %v4451_v56  ;;  %v4463_v27 = vld [vmem:[#allocation4 + $0xdf0] sm:$0xff]  ;;  %v4656_v56 = vld [vmem:[#allocation4 + $0xe18] sm:$0xff] }
 0x54e   :  { %4479 = vmatprep.subr.bf16.mxu1 %v4458_v28  ;;  %4520 = vmatprep.subr.bf16.mxu0 %v4460_v46  ;;  %v4653_v28 = vld [vmem:[#allocation4 + $0xe00] sm:$0xff]  ;;  %v4655_v46 = vld [vmem:[#allocation4 + $0xe10] sm:$0xff] }
 0x551   :  { %4480 = vmatpush1.bf16.msra.mxu1 %v4457_v0  ;;  %4521 = vmatpush1.bf16.msra.mxu0 %v4459_v59  ;;  %v4662_v0 = vld [vmem:[#allocation4 + $0xe48] sm:$0xff]  ;;  %v4664_v59 = vld [vmem:[#allocation4 + $0xe58] sm:$0xff] }
 0x552   :  { %4547 = vmatprep.subr.bf16.mxu1 %v4406_v42  ;;  %4588 = vmatprep.subr.bf16.mxu0 %v4408_v16  ;;  %v4661_v42 = vld [vmem:[#allocation4 + $0xe40] sm:$0xff]  ;;  %v4663_v16 = vld [vmem:[#allocation4 + $0xe50] sm:$0xff] }
 0x554   :  { %4498 = vmatmul.mubr.bf16.vlgmr.msra.gmra.mrb[128].mxu1 %v10260_v62  ;;  %4539 = vmatmul.mubr.bf16.vlgmr.msra.gmra.mrb[136].mxu0 %v10260_v62 }
 0x555   :  { %4548 = vmatpush1.bf16.msra.mxu1 %v4405_v60  ;;  %4589 = vmatpush1.bf16.msra.mxu0 %v4407_v14  ;;  %v4670_v60 = vld [vmem:[#allocation4 + $0xe88] sm:$0xff]  ;;  %v4672_v14 = vld [vmem:[#allocation4 + $0xe98] sm:$0xff] }
 0x556   :  { %4549 = vmatprep.subr.bf16.mxu1 %v4414_v6  ;;  %4590 = vmatprep.subr.bf16.mxu0 %v4416_v30  ;;  %v4669_v6 = vld [vmem:[#allocation4 + $0xe80] sm:$0xff]  ;;  %v4671_v30 = vld [vmem:[#allocation4 + $0xe90] sm:$0xff] }
 0x557   :  { %4579 = vmatprep.mubr.bf16.mxu1 %v10952_v11  ;;  %4620 = vmatprep.mubr.bf16.mxu0 %v10952_v11 }
 0x559   :  { %4550 = vmatpush1.bf16.msra.mxu1 %v4413_v63  ;;  %4591 = vmatpush1.bf16.msra.mxu0 %v4415_v37  ;;  %v4678_v63 = vld [vmem:[#allocation4 + $0xec8] sm:$0xff]  ;;  %v4680_v37 = vld [vmem:[#allocation4 + $0xed8] sm:$0xff] }
 0x55a   :  { %4551 = vmatprep.subr.bf16.mxu1 %v4422_v51  ;;  %4592 = vmatprep.subr.bf16.mxu0 %v4424_v3  ;;  %v4677_v51 = vld [vmem:[#allocation4 + $0xec0] sm:$0xff]  ;;  %v4679_v3 = vld [vmem:[#allocation4 + $0xed0] sm:$0xff] }
 0x55d   :  { %4552 = vmatpush1.bf16.msra.mxu1 %v4421_v4  ;;  %4593 = vmatpush1.bf16.msra.mxu0 %v4423_v39  ;;  %v4686_v4 = vld [vmem:[#allocation4 + $0xf08] sm:$0xff]  ;;  %v4688_v39 = vld [vmem:[#allocation4 + $0xf18] sm:$0xff] }
 0x55e   :  { %4553 = vmatprep.subr.bf16.mxu1 %v4430_v22  ;;  %4594 = vmatprep.subr.bf16.mxu0 %v4432_v19  ;;  %v4685_v22 = vld [vmem:[#allocation4 + $0xf00] sm:$0xff]  ;;  %v4687_v19 = vld [vmem:[#allocation4 + $0xf10] sm:$0xff] }
 0x561   :  { %4554 = vmatpush1.bf16.msra.mxu1 %v4429_v18  ;;  %4595 = vmatpush1.bf16.msra.mxu0 %v4431_v23  ;;  %v4694_v18 = vld [vmem:[#allocation4 + $0xf48] sm:$0xff]  ;;  %v4696_v23 = vld [vmem:[#allocation4 + $0xf58] sm:$0xff] }
 0x562   :  { %4555 = vmatprep.subr.bf16.mxu1 %v4438_v49  ;;  %4596 = vmatprep.subr.bf16.mxu0 %v4440_v7  ;;  %v4693_v49 = vld [vmem:[#allocation4 + $0xf40] sm:$0xff]  ;;  %v4695_v7 = vld [vmem:[#allocation4 + $0xf50] sm:$0xff] }
 0x565   :  { %4556 = vmatpush1.bf16.msra.mxu1 %v4437_v10  ;;  %4597 = vmatpush1.bf16.msra.mxu0 %v4439_v36 }
 0x566   :  { %4557 = vmatprep.subr.bf16.mxu1 %v4446_v17  ;;  %4598 = vmatprep.subr.bf16.mxu0 %v4448_v8  ;;  %v4702_v17 = vld [vmem:[#allocation4 + $0xf88] sm:$0xff]  ;;  %v4704_v8 = vld [vmem:[#allocation4 + $0xf98] sm:$0xff] }
 0x567   :  { %v3740_v58 = vpop.f32.mrb[104].mxu1  ;;  %v3781_v47 = vpop.f32.mrb[112].mxu0 }
 0x568   :  { %v10398_v57 = vadd.f32 %v3740_v58, %v10366_v1  ;;  %v10401_v35 = vadd.f32 %v3781_v47, %v10369_v9  ;;  %v3742_v26 = vpop.f32.mrb[105].mxu1  ;;  %v3783_v2 = vpop.f32.mrb[113].mxu0  ;;  %v4453_v1 = vld [vmem:[#allocation4 + $0xda0] sm:$0xff]  ;;  %v4462_v9 = vld [vmem:[#allocation4 + $0xde8] sm:$0xff] }
 0x569   :  { %v10404_v53 = vadd.f32 %v3742_v26, %v10372_v25  ;;  %v10407_v44 = vadd.f32 %v3783_v2, %v10375_v20  ;;  %v3744_v48 = vpop.f32.mrb[106].mxu1  ;;  %v3785_v29 = vpop.f32.mrb[114].mxu0  ;;  %4558 = vmatpush1.bf16.msra.mxu1 %v4445_v15  ;;  %4599 = vmatpush1.bf16.msra.mxu0 %v4447_v13  ;;  %v4461_v25 = vld [vmem:[#allocation4 + $0xde0] sm:$0xff]  ;;  %v4654_v20 = vld [vmem:[#allocation4 + $0xe08] sm:$0xff] }
 0x56a   :  { %v3745_v31 = vpop.f32.mrb[107].mxu1  ;;  %v3786_v40 = vpop.f32.mrb[115].mxu0  ;;  %4559 = vmatprep.subr.bf16.mxu1 %v4454_v52  ;;  %4600 = vmatprep.subr.bf16.mxu0 %v4456_v24 }
 0x56b   :  { %v4703_v31 = vld [vmem:[#allocation4 + $0xf90] sm:$0xff]  ;;  %v4712_v40 = vld [vmem:[#allocation4 + $0xfd8] sm:$0xff] }
 0x56d   :  { %4560 = vmatpush1.bf16.msra.mxu1 %v4453_v1  ;;  %4601 = vmatpush1.bf16.msra.mxu0 %v4455_v43  ;;  %v4711_v1 = vld [vmem:[#allocation4 + $0xfd0] sm:$0xff]  ;;  %v4660_v43 = vld [vmem:[#allocation4 + $0xe38] sm:$0xff] }
 0x56e   :  { %4561 = vmatprep.subr.bf16.mxu1 %v4462_v9  ;;  %4602 = vmatprep.subr.bf16.mxu0 %v4464_v45  ;;  %v10426_v9 = vrot.slane %v10260_v62, 4  ;;  %v4657_v45 = vld [vmem:[#allocation4 + $0xe20] sm:$0xff] }
 0x571   :  { %4562 = vmatpush1.bf16.msra.mxu1 %v4461_v25  ;;  %4603 = vmatpush1.bf16.msra.mxu0 %v4463_v27  ;;  %v4659_v25 = vld [vmem:[#allocation4 + $0xe30] sm:$0xff]  ;;  %v4666_v27 = vld [vmem:[#allocation4 + $0xe68] sm:$0xff] }
 0x572   :  { %4720 = vmatprep.subr.bf16.mxu1 %v4654_v20  ;;  %4761 = vmatprep.subr.bf16.mxu0 %v4656_v56  ;;  %v4668_v20 = vld [vmem:[#allocation4 + $0xe78] sm:$0xff]  ;;  %v4665_v56 = vld [vmem:[#allocation4 + $0xe60] sm:$0xff] }
 0x574   :  { %4580 = vmatmul.mubr.bf16.vlgmr.msra.gmra.mrb[132].mxu1 %v10260_v62  ;;  %4621 = vmatmul.mubr.bf16.vlgmr.msra.gmra.mrb[140].mxu0 %v10260_v62  ;;  %v4674_v62 = vld [vmem:[#allocation4 + $0xea8] sm:$0xff] }
 0x575   :  { %4721 = vmatpush1.bf16.msra.mxu1 %v4653_v28  ;;  %4762 = vmatpush1.bf16.msra.mxu0 %v4655_v46  ;;  %v4667_v28 = vld [vmem:[#allocation4 + $0xe70] sm:$0xff]  ;;  %v4676_v46 = vld [vmem:[#allocation4 + $0xeb8] sm:$0xff] }
 0x576   :  { %4722 = vmatprep.subr.bf16.mxu1 %v4662_v0  ;;  %4763 = vmatprep.subr.bf16.mxu0 %v4664_v59  ;;  %v4673_v0 = vld [vmem:[#allocation4 + $0xea0] sm:$0xff]  ;;  %v4675_v59 = vld [vmem:[#allocation4 + $0xeb0] sm:$0xff] }
 0x577   :  { %4752 = vmatprep.mubr.bf16.mxu1 %v10952_v11  ;;  %4793 = vmatprep.mubr.bf16.mxu0 %v10952_v11 }
 0x579   :  { %4723 = vmatpush1.bf16.msra.mxu1 %v4661_v42  ;;  %4764 = vmatpush1.bf16.msra.mxu0 %v4663_v16  ;;  %v4682_v42 = vld [vmem:[#allocation4 + $0xee8] sm:$0xff]  ;;  %v4684_v16 = vld [vmem:[#allocation4 + $0xef8] sm:$0xff] }
 0x57a   :  { %4724 = vmatprep.subr.bf16.mxu1 %v4670_v60  ;;  %4765 = vmatprep.subr.bf16.mxu0 %v4672_v14  ;;  %v4681_v60 = vld [vmem:[#allocation4 + $0xee0] sm:$0xff]  ;;  %v4683_v14 = vld [vmem:[#allocation4 + $0xef0] sm:$0xff] }
 0x57d   :  { %4725 = vmatpush1.bf16.msra.mxu1 %v4669_v6  ;;  %4766 = vmatpush1.bf16.msra.mxu0 %v4671_v30  ;;  %v4690_v6 = vld [vmem:[#allocation4 + $0xf28] sm:$0xff]  ;;  %v4692_v30 = vld [vmem:[#allocation4 + $0xf38] sm:$0xff] }
 0x57e   :  { %4726 = vmatprep.subr.bf16.mxu1 %v4678_v63  ;;  %4767 = vmatprep.subr.bf16.mxu0 %v4680_v37  ;;  %v4689_v63 = vld [vmem:[#allocation4 + $0xf20] sm:$0xff]  ;;  %v4691_v37 = vld [vmem:[#allocation4 + $0xf30] sm:$0xff] }
 0x581   :  { %4727 = vmatpush1.bf16.msra.mxu1 %v4677_v51  ;;  %4768 = vmatpush1.bf16.msra.mxu0 %v4679_v3  ;;  %v4698_v51 = vld [vmem:[#allocation4 + $0xf68] sm:$0xff]  ;;  %v4700_v3 = vld [vmem:[#allocation4 + $0xf78] sm:$0xff] }
 0x582   :  { %4728 = vmatprep.subr.bf16.mxu1 %v4686_v4  ;;  %4769 = vmatprep.subr.bf16.mxu0 %v4688_v39  ;;  %v4697_v4 = vld [vmem:[#allocation4 + $0xf60] sm:$0xff]  ;;  %v4699_v39 = vld [vmem:[#allocation4 + $0xf70] sm:$0xff] }
 0x585   :  { %4729 = vmatpush1.bf16.msra.mxu1 %v4685_v22  ;;  %4770 = vmatpush1.bf16.msra.mxu0 %v4687_v19 }
 0x586   :  { %4730 = vmatprep.subr.bf16.mxu1 %v4694_v18  ;;  %4771 = vmatprep.subr.bf16.mxu0 %v4696_v23  ;;  %v4706_v18 = vld [vmem:[#allocation4 + $0xfa8] sm:$0xff]  ;;  %v4708_v23 = vld [vmem:[#allocation4 + $0xfb8] sm:$0xff] }
 0x587   :  { %v3822_v10 = vpop.f32.mrb[108].mxu1  ;;  %v3863_v36 = vpop.f32.mrb[116].mxu0 }
 0x588   :  { %v10414_v15 = vadd.f32 %v3822_v10, %v10382_v21  ;;  %v10417_v13 = vadd.f32 %v3863_v36, %v10385_v61  ;;  %v3824_v58 = vpop.f32.mrb[109].mxu1  ;;  %v3865_v47 = vpop.f32.mrb[117].mxu0  ;;  %v4701_v21 = vld [vmem:[#allocation4 + $0xf80] sm:$0xff]  ;;  %v4710_v61 = vld [vmem:[#allocation4 + $0xfc8] sm:$0xff] }
 0x589   :  { %v10420_v52 = vadd.f32 %v3824_v58, %v10388_v50  ;;  %v10423_v24 = vadd.f32 %v3865_v47, %v10391_v55  ;;  %v3826_v26 = vpop.f32.mrb[110].mxu1  ;;  %v3867_v2 = vpop.f32.mrb[118].mxu0  ;;  %4731 = vmatpush1.bf16.msra.mxu1 %v4693_v49  ;;  %4772 = vmatpush1.bf16.msra.mxu0 %v4695_v7  ;;  %v4709_v50 = vld [vmem:[#allocation4 + $0xfc0] sm:$0xff]  ;;  %v4658_v55 = vld [vmem:[#allocation4 + $0xe28] sm:$0xff] }
 0x58a   :  { %v3827_v48 = vpop.f32.mrb[111].mxu1  ;;  %v3868_v29 = vpop.f32.mrb[119].mxu0  ;;  %4732 = vmatprep.subr.bf16.mxu1 %v4702_v17  ;;  %4773 = vmatprep.subr.bf16.mxu0 %v4704_v8 }
 0x58b   :  { %v4707_v48 = vld [vmem:[#allocation4 + $0xfb0] sm:$0xff]  ;;  %v4716_v29 = vld [vmem:[#allocation4 + $0xff8] sm:$0xff] }
 0x58d   :  { %4733 = vmatpush1.bf16.msra.mxu1 %v4701_v21  ;;  %4774 = vmatpush1.bf16.msra.mxu0 %v4703_v31  ;;  %v4715_v21 = vld [vmem:[#allocation4 + $0xff0] sm:$0xff]  ;;  %v4911_v31 = vld [vmem:[#allocation4 + $0x1018] sm:$0xff] }
 0x58e   :  { %4734 = vmatprep.subr.bf16.mxu1 %v4710_v61  ;;  %4775 = vmatprep.subr.bf16.mxu0 %v4712_v40  ;;  %v4908_v61 = vld [vmem:[#allocation4 + $0x1000] sm:$0xff]  ;;  %v4910_v40 = vld [vmem:[#allocation4 + $0x1010] sm:$0xff] }
 0x591   :  { %4735 = vmatpush1.bf16.msra.mxu1 %v4709_v50  ;;  %4776 = vmatpush1.bf16.msra.mxu0 %v4711_v1  ;;  %v4917_v50 = vld [vmem:[#allocation4 + $0x1048] sm:$0xff]  ;;  %v4919_v1 = vld [vmem:[#allocation4 + $0x1058] sm:$0xff] }
 0x592   :  { %4802 = vmatprep.subr.bf16.mxu1 %v4658_v55  ;;  %4843 = vmatprep.subr.bf16.mxu0 %v4660_v43  ;;  %v4916_v55 = vld [vmem:[#allocation4 + $0x1040] sm:$0xff]  ;;  %v4918_v43 = vld [vmem:[#allocation4 + $0x1050] sm:$0xff] }
 0x594   :  { %4753 = vmatmul.mubr.bf16.vlgmr.msra.gmra.mrb[136].mxu1 %v10426_v9  ;;  %4794 = vmatmul.mubr.bf16.vlgmr.msra.gmra.mrb[144].mxu0 %v10426_v9 }
 0x595   :  { %4803 = vmatpush1.bf16.msra.mxu1 %v4657_v45  ;;  %4844 = vmatpush1.bf16.msra.mxu0 %v4659_v25  ;;  %v4925_v45 = vld [vmem:[#allocation4 + $0x1088] sm:$0xff]  ;;  %v4927_v25 = vld [vmem:[#allocation4 + $0x1098] sm:$0xff] }
 0x596   :  { %4804 = vmatprep.subr.bf16.mxu1 %v4666_v27  ;;  %4845 = vmatprep.subr.bf16.mxu0 %v4668_v20  ;;  %v4924_v27 = vld [vmem:[#allocation4 + $0x1080] sm:$0xff]  ;;  %v4926_v20 = vld [vmem:[#allocation4 + $0x1090] sm:$0xff] }
 0x597   :  { %4834 = vmatprep.mubr.bf16.mxu1 %v10952_v11  ;;  %4875 = vmatprep.mubr.bf16.mxu0 %v10952_v11 }
 0x599   :  { %4805 = vmatpush1.bf16.msra.mxu1 %v4665_v56  ;;  %4846 = vmatpush1.bf16.msra.mxu0 %v4667_v28  ;;  %v4933_v56 = vld [vmem:[#allocation4 + $0x10c8] sm:$0xff]  ;;  %v4932_v28 = vld [vmem:[#allocation4 + $0x10c0] sm:$0xff] }
 0x59a   :  { %4806 = vmatprep.subr.bf16.mxu1 %v4674_v62  ;;  %4847 = vmatprep.subr.bf16.mxu0 %v4676_v46  ;;  %v4934_v62 = vld [vmem:[#allocation4 + $0x10d0] sm:$0xff]  ;;  %v4941_v46 = vld [vmem:[#allocation4 + $0x1108] sm:$0xff] }
 0x59d   :  { %4807 = vmatpush1.bf16.msra.mxu1 %v4673_v0  ;;  %4848 = vmatpush1.bf16.msra.mxu0 %v4675_v59  ;;  %v4943_v0 = vld [vmem:[#allocation4 + $0x1118] sm:$0xff]  ;;  %v4940_v59 = vld [vmem:[#allocation4 + $0x1100] sm:$0xff] }
 0x59e   :  { %4808 = vmatprep.subr.bf16.mxu1 %v4682_v42  ;;  %4849 = vmatprep.subr.bf16.mxu0 %v4684_v16  ;;  %v4942_v42 = vld [vmem:[#allocation4 + $0x1110] sm:$0xff]  ;;  %v4949_v16 = vld [vmem:[#allocation4 + $0x1148] sm:$0xff] }
 0x5a1   :  { %4809 = vmatpush1.bf16.msra.mxu1 %v4681_v60  ;;  %4850 = vmatpush1.bf16.msra.mxu0 %v4683_v14  ;;  %v4951_v60 = vld [vmem:[#allocation4 + $0x1158] sm:$0xff]  ;;  %v4948_v14 = vld [vmem:[#allocation4 + $0x1140] sm:$0xff] }
 0x5a2   :  { %4810 = vmatprep.subr.bf16.mxu1 %v4690_v6  ;;  %4851 = vmatprep.subr.bf16.mxu0 %v4692_v30  ;;  %v4950_v6 = vld [vmem:[#allocation4 + $0x1150] sm:$0xff] }
 0x5a5   :  { %4811 = vmatpush1.bf16.msra.mxu1 %v4689_v63  ;;  %4852 = vmatpush1.bf16.msra.mxu0 %v4691_v37  ;;  %v4957_v37 = vld [vmem:[#allocation4 + $0x1188] sm:$0xff] }
 0x5a6   :  { %4812 = vmatprep.subr.bf16.mxu1 %v4698_v51  ;;  %4853 = vmatprep.subr.bf16.mxu0 %v4700_v3  ;;  %v4959_v51 = vld [vmem:[#allocation4 + $0x1198] sm:$0xff] }
 0x5a7   :  { %v3992_v22 = vpop.f32.mrb[112].mxu1  ;;  %v4033_v19 = vpop.f32.mrb[120].mxu0 }
 0x5a8   :  { %v10433_v49 = vadd.f32 %v3992_v22, %v10398_v57  ;;  %v10436_v7 = vadd.f32 %v4033_v19, %v10401_v35  ;;  %v3994_v10 = vpop.f32.mrb[113].mxu1  ;;  %v4035_v36 = vpop.f32.mrb[121].mxu0  ;;  %v4705_v57 = vld [vmem:[#allocation4 + $0xfa0] sm:$0xff]  ;;  %v4714_v35 = vld [vmem:[#allocation4 + $0xfe8] sm:$0xff] }
 0x5a9   :  { %v10439_v17 = vadd.f32 %v3994_v10, %v10404_v53  ;;  %v10442_v8 = vadd.f32 %v4035_v36, %v10407_v44  ;;  %v3996_v58 = vpop.f32.mrb[114].mxu1  ;;  %v4037_v47 = vpop.f32.mrb[122].mxu0  ;;  %4813 = vmatpush1.bf16.msra.mxu1 %v4697_v4  ;;  %4854 = vmatpush1.bf16.msra.mxu0 %v4699_v39  ;;  %v4713_v53 = vld [vmem:[#allocation4 + $0xfe0] sm:$0xff]  ;;  %v4909_v44 = vld [vmem:[#allocation4 + $0x1008] sm:$0xff] }
 0x5aa   :  { %v3997_v26 = vpop.f32.mrb[115].mxu1  ;;  %v4038_v2 = vpop.f32.mrb[123].mxu0  ;;  %4814 = vmatprep.subr.bf16.mxu1 %v4706_v18  ;;  %4855 = vmatprep.subr.bf16.mxu0 %v4708_v23  ;;  %v4958_v47 = vld [vmem:[#allocation4 + $0x1190] sm:$0xff] }
 0x5ab   :  { %v4967_v26 = vld [vmem:[#allocation4 + $0x11d8] sm:$0xff]  ;;  %v4966_v2 = vld [vmem:[#allocation4 + $0x11d0] sm:$0xff] }
 0x5ad   :  { %4815 = vmatpush1.bf16.msra.mxu1 %v4705_v57  ;;  %4856 = vmatpush1.bf16.msra.mxu0 %v4707_v48  ;;  %v4915_v57 = vld [vmem:[#allocation4 + $0x1038] sm:$0xff]  ;;  %v4912_v48 = vld [vmem:[#allocation4 + $0x1020] sm:$0xff] }
 0x5ae   :  { %4816 = vmatprep.subr.bf16.mxu1 %v4714_v35  ;;  %4857 = vmatprep.subr.bf16.mxu0 %v4716_v29  ;;  %v4914_v35 = vld [vmem:[#allocation4 + $0x1030] sm:$0xff]  ;;  %v4921_v29 = vld [vmem:[#allocation4 + $0x1068] sm:$0xff] }
 0x5b1   :  { %4817 = vmatpush1.bf16.msra.mxu1 %v4713_v53  ;;  %4858 = vmatpush1.bf16.msra.mxu0 %v4715_v21  ;;  %v4923_v53 = vld [vmem:[#allocation4 + $0x1078] sm:$0xff]  ;;  %v4920_v21 = vld [vmem:[#allocation4 + $0x1060] sm:$0xff] }
 0x5b2   :  { %4972 = vmatprep.subr.bf16.mxu1 %v4909_v44  ;;  %5013 = vmatprep.subr.bf16.mxu0 %v4911_v31  ;;  %v4922_v44 = vld [vmem:[#allocation4 + $0x1070] sm:$0xff]  ;;  %v4929_v31 = vld [vmem:[#allocation4 + $0x10a8] sm:$0xff] }
 0x5b4   :  { %4835 = vmatmul.mubr.bf16.vlgmr.msra.gmra.mrb[140].mxu1 %v10426_v9  ;;  %4876 = vmatmul.mubr.bf16.vlgmr.msra.gmra.mrb[148].mxu0 %v10426_v9  ;;  %v4935_v9 = vld [vmem:[#allocation4 + $0x10d8] sm:$0xff] }
 0x5b5   :  { %4973 = vmatpush1.bf16.msra.mxu1 %v4908_v61  ;;  %5014 = vmatpush1.bf16.msra.mxu0 %v4910_v40  ;;  %v4931_v61 = vld [vmem:[#allocation4 + $0x10b8] sm:$0xff]  ;;  %v4928_v40 = vld [vmem:[#allocation4 + $0x10a0] sm:$0xff] }
 0x5b6   :  { %4974 = vmatprep.subr.bf16.mxu1 %v4917_v50  ;;  %5015 = vmatprep.subr.bf16.mxu0 %v4919_v1  ;;  %v4930_v50 = vld [vmem:[#allocation4 + $0x10b0] sm:$0xff]  ;;  %v4937_v1 = vld [vmem:[#allocation4 + $0x10e8] sm:$0xff] }
 0x5b7   :  { %5004 = vmatprep.mubr.bf16.mxu1 %v10952_v11  ;;  %5045 = vmatprep.mubr.bf16.mxu0 %v10952_v11 }
 0x5b9   :  { %4975 = vmatpush1.bf16.msra.mxu1 %v4916_v55  ;;  %5016 = vmatpush1.bf16.msra.mxu0 %v4918_v43  ;;  %v4939_v55 = vld [vmem:[#allocation4 + $0x10f8] sm:$0xff]  ;;  %v4936_v43 = vld [vmem:[#allocation4 + $0x10e0] sm:$0xff] }
 0x5ba   :  { %4976 = vmatprep.subr.bf16.mxu1 %v4925_v45  ;;  %5017 = vmatprep.subr.bf16.mxu0 %v4927_v25  ;;  %v4938_v45 = vld [vmem:[#allocation4 + $0x10f0] sm:$0xff]  ;;  %v4945_v25 = vld [vmem:[#allocation4 + $0x1128] sm:$0xff] }
 0x5bd   :  { %4977 = vmatpush1.bf16.msra.mxu1 %v4924_v27  ;;  %5018 = vmatpush1.bf16.msra.mxu0 %v4926_v20  ;;  %v4947_v27 = vld [vmem:[#allocation4 + $0x1138] sm:$0xff]  ;;  %v4944_v20 = vld [vmem:[#allocation4 + $0x1120] sm:$0xff] }
 0x5be   :  { %4978 = vmatprep.subr.bf16.mxu1 %v4933_v56  ;;  %5019 = vmatprep.subr.bf16.mxu0 %v4935_v9  ;;  %v4946_v56 = vld [vmem:[#allocation4 + $0x1130] sm:$0xff]  ;;  %v4953_v9 = vld [vmem:[#allocation4 + $0x1168] sm:$0xff] }
 0x5c1   :  { %4979 = vmatpush1.bf16.msra.mxu1 %v4932_v28  ;;  %5020 = vmatpush1.bf16.msra.mxu0 %v4934_v62  ;;  %v4955_v28 = vld [vmem:[#allocation4 + $0x1178] sm:$0xff]  ;;  %v4952_v62 = vld [vmem:[#allocation4 + $0x1160] sm:$0xff] }
 0x5c2   :  { %4980 = vmatprep.subr.bf16.mxu1 %v4941_v46  ;;  %5021 = vmatprep.subr.bf16.mxu0 %v4943_v0  ;;  %v4954_v46 = vld [vmem:[#allocation4 + $0x1170] sm:$0xff] }
 0x5c5   :  { %4981 = vmatpush1.bf16.msra.mxu1 %v4940_v59  ;;  %5022 = vmatpush1.bf16.msra.mxu0 %v4942_v42  ;;  %v4961_v42 = vld [vmem:[#allocation4 + $0x11a8] sm:$0xff] }
 0x5c6   :  { %4982 = vmatprep.subr.bf16.mxu1 %v4949_v16  ;;  %5023 = vmatprep.subr.bf16.mxu0 %v4951_v60  ;;  %v4963_v16 = vld [vmem:[#allocation4 + $0x11b8] sm:$0xff] }
 0x5c7   :  { %v4074_v30 = vpop.f32.mrb[116].mxu1  ;;  %v4115_v63 = vpop.f32.mrb[124].mxu0 }
 0x5c8   :  { %v10449_v3 = vadd.f32 %v4074_v30, %v10414_v15  ;;  %v10452_v4 = vadd.f32 %v4115_v63, %v10417_v13  ;;  %v4076_v39 = vpop.f32.mrb[117].mxu1  ;;  %v4117_v22 = vpop.f32.mrb[125].mxu0  ;;  %v4956_v15 = vld [vmem:[#allocation4 + $0x1180] sm:$0xff]  ;;  %v4965_v13 = vld [vmem:[#allocation4 + $0x11c8] sm:$0xff] }
 0x5c9   :  { %v10455_v19 = vadd.f32 %v4076_v39, %v10420_v52  ;;  %v10458_v18 = vadd.f32 %v4117_v22, %v10423_v24  ;;  %v4078_v23 = vpop.f32.mrb[118].mxu1  ;;  %v4119_v10 = vpop.f32.mrb[126].mxu0  ;;  %4983 = vmatpush1.bf16.msra.mxu1 %v4948_v14  ;;  %5024 = vmatpush1.bf16.msra.mxu0 %v4950_v6  ;;  %v4964_v52 = vld [vmem:[#allocation4 + $0x11c0] sm:$0xff]  ;;  %v4913_v24 = vld [vmem:[#allocation4 + $0x1028] sm:$0xff] }
 0x5ca   :  { %v4079_v36 = vpop.f32.mrb[119].mxu1  ;;  %v4120_v58 = vpop.f32.mrb[127].mxu0  ;;  %4984 = vmatprep.subr.bf16.mxu1 %v4957_v37  ;;  %5025 = vmatprep.subr.bf16.mxu0 %v4959_v51  ;;  %v4962_v10 = vld [vmem:[#allocation4 + $0x11b0] sm:$0xff] }
 0x5cb   :  { %v4971_v36 = vld [vmem:[#allocation4 + $0x11f8] sm:$0xff]  ;;  %v4970_v58 = vld [vmem:[#allocation4 + $0x11f0] sm:$0xff] }
 0x5cd   :  { %4985 = vmatpush1.bf16.msra.mxu1 %v4956_v15  ;;  %5026 = vmatpush1.bf16.msra.mxu0 %v4958_v47  ;;  %v5163_v15 = vld [vmem:[#allocation4 + $0x1218] sm:$0xff]  ;;  %v5160_v47 = vld [vmem:[#allocation4 + $0x1200] sm:$0xff] }
 0x5ce   :  { %4986 = vmatprep.subr.bf16.mxu1 %v4965_v13  ;;  %5027 = vmatprep.subr.bf16.mxu0 %v4967_v26  ;;  %v5162_v13 = vld [vmem:[#allocation4 + $0x1210] sm:$0xff]  ;;  %v5169_v26 = vld [vmem:[#allocation4 + $0x1248] sm:$0xff] }
 0x5d1   :  { %4987 = vmatpush1.bf16.msra.mxu1 %v4964_v52  ;;  %5028 = vmatpush1.bf16.msra.mxu0 %v4966_v2  ;;  %v5171_v52 = vld [vmem:[#allocation4 + $0x1258] sm:$0xff]  ;;  %v5168_v2 = vld [vmem:[#allocation4 + $0x1240] sm:$0xff] }
 0x5d2   :  { %5054 = vmatprep.subr.bf16.mxu1 %v4913_v24  ;;  %5095 = vmatprep.subr.bf16.mxu0 %v4915_v57  ;;  %v5170_v24 = vld [vmem:[#allocation4 + $0x1250] sm:$0xff]  ;;  %v5177_v57 = vld [vmem:[#allocation4 + $0x1288] sm:$0xff] }
 0x5d4   :  { %5005 = vmatmul.mubr.bf16.vlgmr.msra.gmra.mrb[144].mxu1 %v10262_v5  ;;  %5046 = vmatmul.mubr.bf16.vlgmr.msra.gmra.mrb[152].mxu0 %v10262_v5 }
 0x5d5   :  { %5055 = vmatpush1.bf16.msra.mxu1 %v4912_v48  ;;  %5096 = vmatpush1.bf16.msra.mxu0 %v4914_v35  ;;  %v5179_v48 = vld [vmem:[#allocation4 + $0x1298] sm:$0xff]  ;;  %v5176_v35 = vld [vmem:[#allocation4 + $0x1280] sm:$0xff] }
 0x5d6   :  { %5056 = vmatprep.subr.bf16.mxu1 %v4921_v29  ;;  %5097 = vmatprep.subr.bf16.mxu0 %v4923_v53  ;;  %v5178_v29 = vld [vmem:[#allocation4 + $0x1290] sm:$0xff]  ;;  %v5185_v53 = vld [vmem:[#allocation4 + $0x12c8] sm:$0xff] }
 0x5d7   :  { %5086 = vmatprep.mubr.bf16.mxu1 %v10952_v11  ;;  %5127 = vmatprep.mubr.bf16.mxu0 %v10952_v11 }
 0x5d9   :  { %5057 = vmatpush1.bf16.msra.mxu1 %v4920_v21  ;;  %5098 = vmatpush1.bf16.msra.mxu0 %v4922_v44  ;;  %v5187_v21 = vld [vmem:[#allocation4 + $0x12d8] sm:$0xff]  ;;  %v5184_v44 = vld [vmem:[#allocation4 + $0x12c0] sm:$0xff] }
 0x5da   :  { %5058 = vmatprep.subr.bf16.mxu1 %v4929_v31  ;;  %5099 = vmatprep.subr.bf16.mxu0 %v4931_v61  ;;  %v5186_v31 = vld [vmem:[#allocation4 + $0x12d0] sm:$0xff]  ;;  %v5193_v61 = vld [vmem:[#allocation4 + $0x1308] sm:$0xff] }
 0x5dd   :  { %5059 = vmatpush1.bf16.msra.mxu1 %v4928_v40  ;;  %5100 = vmatpush1.bf16.msra.mxu0 %v4930_v50  ;;  %v5195_v40 = vld [vmem:[#allocation4 + $0x1318] sm:$0xff]  ;;  %v5192_v50 = vld [vmem:[#allocation4 + $0x1300] sm:$0xff] }
 0x5de   :  { %5060 = vmatprep.subr.bf16.mxu1 %v4937_v1  ;;  %5101 = vmatprep.subr.bf16.mxu0 %v4939_v55  ;;  %v5194_v1 = vld [vmem:[#allocation4 + $0x1310] sm:$0xff]  ;;  %v5201_v55 = vld [vmem:[#allocation4 + $0x1348] sm:$0xff] }
 0x5e1   :  { %5061 = vmatpush1.bf16.msra.mxu1 %v4936_v43  ;;  %5102 = vmatpush1.bf16.msra.mxu0 %v4938_v45  ;;  %v5203_v43 = vld [vmem:[#allocation4 + $0x1358] sm:$0xff]  ;;  %v5200_v45 = vld [vmem:[#allocation4 + $0x1340] sm:$0xff] }
 0x5e2   :  { %5062 = vmatprep.subr.bf16.mxu1 %v4945_v25  ;;  %5103 = vmatprep.subr.bf16.mxu0 %v4947_v27  ;;  %v5202_v25 = vld [vmem:[#allocation4 + $0x1350] sm:$0xff] }
 0x5e5   :  { %5063 = vmatpush1.bf16.msra.mxu1 %v4944_v20  ;;  %5104 = vmatpush1.bf16.msra.mxu0 %v4946_v56  ;;  %v5209_v56 = vld [vmem:[#allocation4 + $0x1388] sm:$0xff] }
 0x5e6   :  { %5064 = vmatprep.subr.bf16.mxu1 %v4953_v9  ;;  %5105 = vmatprep.subr.bf16.mxu0 %v4955_v28  ;;  %v5211_v9 = vld [vmem:[#allocation4 + $0x1398] sm:$0xff] }
 0x5e7   :  { %v4247_v0 = vpop.f32.mrb[120].mxu1  ;;  %v4288_v59 = vpop.f32.mrb[128].mxu0 }
 0x5e8   :  { %v10465_v60 = vadd.f32 %v4247_v0, %v10433_v49  ;;  %v10468_v14 = vadd.f32 %v4288_v59, %v10436_v7  ;;  %v4249_v6 = vpop.f32.mrb[121].mxu1  ;;  %v4290_v30 = vpop.f32.mrb[129].mxu0  ;;  %v4960_v49 = vld [vmem:[#allocation4 + $0x11a0] sm:$0xff]  ;;  %v4969_v7 = vld [vmem:[#allocation4 + $0x11e8] sm:$0xff] }
 0x5e9   :  { %v10471_v63 = vadd.f32 %v4249_v6, %v10439_v17  ;;  %v10474_v37 = vadd.f32 %v4290_v30, %v10442_v8  ;;  %v4251_v51 = vpop.f32.mrb[122].mxu1  ;;  %v4292_v39 = vpop.f32.mrb[130].mxu0  ;;  %5065 = vmatpush1.bf16.msra.mxu1 %v4952_v62  ;;  %5106 = vmatpush1.bf16.msra.mxu0 %v4954_v46  ;;  %v4968_v17 = vld [vmem:[#allocation4 + $0x11e0] sm:$0xff]  ;;  %v5161_v8 = vld [vmem:[#allocation4 + $0x1208] sm:$0xff] }
 0x5ea   :  { %v4252_v22 = vpop.f32.mrb[123].mxu1  ;;  %v4293_v23 = vpop.f32.mrb[131].mxu0  ;;  %5066 = vmatprep.subr.bf16.mxu1 %v4961_v42  ;;  %5107 = vmatprep.subr.bf16.mxu0 %v4963_v16  ;;  %v5210_v39 = vld [vmem:[#allocation4 + $0x1390] sm:$0xff] }
 0x5eb   :  { %v5219_v22 = vld [vmem:[#allocation4 + $0x13d8] sm:$0xff]  ;;  %v5218_v23 = vld [vmem:[#allocation4 + $0x13d0] sm:$0xff] }
 0x5ed   :  { %5067 = vmatpush1.bf16.msra.mxu1 %v4960_v49  ;;  %5108 = vmatpush1.bf16.msra.mxu0 %v4962_v10  ;;  %v5167_v49 = vld [vmem:[#allocation4 + $0x1238] sm:$0xff]  ;;  %v10493_v10 = vrot.slane %v10262_v5, 4 }
 0x5ee   :  { %5068 = vmatprep.subr.bf16.mxu1 %v4969_v7  ;;  %5109 = vmatprep.subr.bf16.mxu0 %v4971_v36  ;;  %v5164_v7 = vld [vmem:[#allocation4 + $0x1220] sm:$0xff]  ;;  %v5166_v36 = vld [vmem:[#allocation4 + $0x1230] sm:$0xff] }
 0x5f1   :  { %5069 = vmatpush1.bf16.msra.mxu1 %v4968_v17  ;;  %5110 = vmatpush1.bf16.msra.mxu0 %v4970_v58  ;;  %v5173_v17 = vld [vmem:[#allocation4 + $0x1268] sm:$0xff]  ;;  %v5175_v58 = vld [vmem:[#allocation4 + $0x1278] sm:$0xff] }
 0x5f2   :  { %5227 = vmatprep.subr.bf16.mxu1 %v5161_v8  ;;  %5268 = vmatprep.subr.bf16.mxu0 %v5163_v15  ;;  %v5172_v8 = vld [vmem:[#allocation4 + $0x1260] sm:$0xff]  ;;  %v5174_v15 = vld [vmem:[#allocation4 + $0x1270] sm:$0xff] }
 0x5f4   :  { %5087 = vmatmul.mubr.bf16.vlgmr.msra.gmra.mrb[148].mxu1 %v10262_v5  ;;  %5128 = vmatmul.mubr.bf16.vlgmr.msra.gmra.mrb[156].mxu0 %v10262_v5  ;;  %v5181_v5 = vld [vmem:[#allocation4 + $0x12a8] sm:$0xff] }
 0x5f5   :  { %5228 = vmatpush1.bf16.msra.mxu1 %v5160_v47  ;;  %5269 = vmatpush1.bf16.msra.mxu0 %v5162_v13  ;;  %v5183_v47 = vld [vmem:[#allocation4 + $0x12b8] sm:$0xff]  ;;  %v5180_v13 = vld [vmem:[#allocation4 + $0x12a0] sm:$0xff] }
 0x5f6   :  { %5229 = vmatprep.subr.bf16.mxu1 %v5169_v26  ;;  %5270 = vmatprep.subr.bf16.mxu0 %v5171_v52  ;;  %v5182_v26 = vld [vmem:[#allocation4 + $0x12b0] sm:$0xff]  ;;  %v5189_v52 = vld [vmem:[#allocation4 + $0x12e8] sm:$0xff] }
 0x5f7   :  { %5259 = vmatprep.mubr.bf16.mxu1 %v10952_v11  ;;  %5300 = vmatprep.mubr.bf16.mxu0 %v10952_v11 }
 0x5f9   :  { %5230 = vmatpush1.bf16.msra.mxu1 %v5168_v2  ;;  %5271 = vmatpush1.bf16.msra.mxu0 %v5170_v24  ;;  %v5191_v2 = vld [vmem:[#allocation4 + $0x12f8] sm:$0xff]  ;;  %v5188_v24 = vld [vmem:[#allocation4 + $0x12e0] sm:$0xff] }
 0x5fa   :  { %5231 = vmatprep.subr.bf16.mxu1 %v5177_v57  ;;  %5272 = vmatprep.subr.bf16.mxu0 %v5179_v48  ;;  %v5190_v57 = vld [vmem:[#allocation4 + $0x12f0] sm:$0xff]  ;;  %v5197_v48 = vld [vmem:[#allocation4 + $0x1328] sm:$0xff] }
 0x5fd   :  { %5232 = vmatpush1.bf16.msra.mxu1 %v5176_v35  ;;  %5273 = vmatpush1.bf16.msra.mxu0 %v5178_v29  ;;  %v5199_v35 = vld [vmem:[#allocation4 + $0x1338] sm:$0xff]  ;;  %v5196_v29 = vld [vmem:[#allocation4 + $0x1320] sm:$0xff] }
 0x5fe   :  { %5233 = vmatprep.subr.bf16.mxu1 %v5185_v53  ;;  %5274 = vmatprep.subr.bf16.mxu0 %v5187_v21  ;;  %v5198_v53 = vld [vmem:[#allocation4 + $0x1330] sm:$0xff]  ;;  %v5205_v21 = vld [vmem:[#allocation4 + $0x1368] sm:$0xff] }
 0x601   :  { %5234 = vmatpush1.bf16.msra.mxu1 %v5184_v44  ;;  %5275 = vmatpush1.bf16.msra.mxu0 %v5186_v31  ;;  %v5207_v44 = vld [vmem:[#allocation4 + $0x1378] sm:$0xff]  ;;  %v5204_v31 = vld [vmem:[#allocation4 + $0x1360] sm:$0xff] }
 0x602   :  { %5235 = vmatprep.subr.bf16.mxu1 %v5193_v61  ;;  %5276 = vmatprep.subr.bf16.mxu0 %v5195_v40  ;;  %v5206_v61 = vld [vmem:[#allocation4 + $0x1370] sm:$0xff] }
 0x605   :  { %5236 = vmatpush1.bf16.msra.mxu1 %v5192_v50  ;;  %5277 = vmatpush1.bf16.msra.mxu0 %v5194_v1  ;;  %v5213_v1 = vld [vmem:[#allocation4 + $0x13a8] sm:$0xff] }
 0x606   :  { %5237 = vmatprep.subr.bf16.mxu1 %v5201_v55  ;;  %5278 = vmatprep.subr.bf16.mxu0 %v5203_v43  ;;  %v5215_v55 = vld [vmem:[#allocation4 + $0x13b8] sm:$0xff] }
 0x607   :  { %v4329_v27 = vpop.f32.mrb[124].mxu1  ;;  %v4370_v20 = vpop.f32.mrb[132].mxu0 }
 0x608   :  { %v10481_v28 = vadd.f32 %v4329_v27, %v10449_v3  ;;  %v10484_v62 = vadd.f32 %v4370_v20, %v10452_v4  ;;  %v4331_v46 = vpop.f32.mrb[125].mxu1  ;;  %v4372_v0 = vpop.f32.mrb[133].mxu0  ;;  %v5208_v3 = vld [vmem:[#allocation4 + $0x1380] sm:$0xff]  ;;  %v5217_v4 = vld [vmem:[#allocation4 + $0x13c8] sm:$0xff] }
 0x609   :  { %v10487_v59 = vadd.f32 %v4331_v46, %v10455_v19  ;;  %v10490_v42 = vadd.f32 %v4372_v0, %v10458_v18  ;;  %v4333_v16 = vpop.f32.mrb[126].mxu1  ;;  %v4374_v6 = vpop.f32.mrb[134].mxu0  ;;  %5238 = vmatpush1.bf16.msra.mxu1 %v5200_v45  ;;  %5279 = vmatpush1.bf16.msra.mxu0 %v5202_v25  ;;  %v5216_v19 = vld [vmem:[#allocation4 + $0x13c0] sm:$0xff]  ;;  %v5165_v18 = vld [vmem:[#allocation4 + $0x1228] sm:$0xff] }
 0x60a   :  { %v4334_v30 = vpop.f32.mrb[127].mxu1  ;;  %v4375_v51 = vpop.f32.mrb[135].mxu0  ;;  %5239 = vmatprep.subr.bf16.mxu1 %v5209_v56  ;;  %5280 = vmatprep.subr.bf16.mxu0 %v5211_v9  ;;  %v5214_v6 = vld [vmem:[#allocation4 + $0x13b0] sm:$0xff] }
 0x60b   :  { %v5223_v30 = vld [vmem:[#allocation4 + $0x13f8] sm:$0xff]  ;;  %v5222_v51 = vld [vmem:[#allocation4 + $0x13f0] sm:$0xff] }
 0x60d   :  { %5240 = vmatpush1.bf16.msra.mxu1 %v5208_v3  ;;  %5281 = vmatpush1.bf16.msra.mxu0 %v5210_v39  ;;  %v5418_v3 = vld [vmem:[#allocation4 + $0x1418] sm:$0xff]  ;;  %v5415_v39 = vld [vmem:[#allocation4 + $0x1400] sm:$0xff] }
 0x60e   :  { %5241 = vmatprep.subr.bf16.mxu1 %v5217_v4  ;;  %5282 = vmatprep.subr.bf16.mxu0 %v5219_v22  ;;  %v5417_v4 = vld [vmem:[#allocation4 + $0x1410] sm:$0xff]  ;;  %v5424_v22 = vld [vmem:[#allocation4 + $0x1448] sm:$0xff] }
 0x611   :  { %5242 = vmatpush1.bf16.msra.mxu1 %v5216_v19  ;;  %5283 = vmatpush1.bf16.msra.mxu0 %v5218_v23  ;;  %v5426_v19 = vld [vmem:[#allocation4 + $0x1458] sm:$0xff]  ;;  %v5423_v23 = vld [vmem:[#allocation4 + $0x1440] sm:$0xff] }
 0x612   :  { %5309 = vmatprep.subr.bf16.mxu1 %v5165_v18  ;;  %5350 = vmatprep.subr.bf16.mxu0 %v5167_v49  ;;  %v5425_v18 = vld [vmem:[#allocation4 + $0x1450] sm:$0xff]  ;;  %v5432_v49 = vld [vmem:[#allocation4 + $0x1488] sm:$0xff] }
 0x614   :  { %5260 = vmatmul.mubr.bf16.vlgmr.msra.gmra.mrb[152].mxu1 %v10493_v10  ;;  %5301 = vmatmul.mubr.bf16.vlgmr.msra.gmra.mrb[160].mxu0 %v10493_v10 }
 0x615   :  { %5310 = vmatpush1.bf16.msra.mxu1 %v5164_v7  ;;  %5351 = vmatpush1.bf16.msra.mxu0 %v5166_v36  ;;  %v5434_v7 = vld [vmem:[#allocation4 + $0x1498] sm:$0xff]  ;;  %v5431_v36 = vld [vmem:[#allocation4 + $0x1480] sm:$0xff] }
 0x616   :  { %5311 = vmatprep.subr.bf16.mxu1 %v5173_v17  ;;  %5352 = vmatprep.subr.bf16.mxu0 %v5175_v58  ;;  %v5433_v17 = vld [vmem:[#allocation4 + $0x1490] sm:$0xff]  ;;  %v5440_v58 = vld [vmem:[#allocation4 + $0x14c8] sm:$0xff] }
 0x617   :  { %5341 = vmatprep.mubr.bf16.mxu1 %v10952_v11  ;;  %5382 = vmatprep.mubr.bf16.mxu0 %v10952_v11 }
 0x619   :  { %5312 = vmatpush1.bf16.msra.mxu1 %v5172_v8  ;;  %5353 = vmatpush1.bf16.msra.mxu0 %v5174_v15  ;;  %v5439_v8 = vld [vmem:[#allocation4 + $0x14c0] sm:$0xff]  ;;  %v5441_v15 = vld [vmem:[#allocation4 + $0x14d0] sm:$0xff] }
 0x61a   :  { %5313 = vmatprep.subr.bf16.mxu1 %v5181_v5  ;;  %5354 = vmatprep.subr.bf16.mxu0 %v5183_v47  ;;  %v5448_v5 = vld [vmem:[#allocation4 + $0x1508] sm:$0xff]  ;;  %v5450_v47 = vld [vmem:[#allocation4 + $0x1518] sm:$0xff] }
 0x61d   :  { %5314 = vmatpush1.bf16.msra.mxu1 %v5180_v13  ;;  %5355 = vmatpush1.bf16.msra.mxu0 %v5182_v26  ;;  %v5447_v13 = vld [vmem:[#allocation4 + $0x1500] sm:$0xff]  ;;  %v5449_v26 = vld [vmem:[#allocation4 + $0x1510] sm:$0xff] }
 0x61e   :  { %5315 = vmatprep.subr.bf16.mxu1 %v5189_v52  ;;  %5356 = vmatprep.subr.bf16.mxu0 %v5191_v2  ;;  %v5456_v52 = vld [vmem:[#allocation4 + $0x1548] sm:$0xff]  ;;  %v5458_v2 = vld [vmem:[#allocation4 + $0x1558] sm:$0xff] }
 0x621   :  { %5316 = vmatpush1.bf16.msra.mxu1 %v5188_v24  ;;  %5357 = vmatpush1.bf16.msra.mxu0 %v5190_v57  ;;  %v5455_v24 = vld [vmem:[#allocation4 + $0x1540] sm:$0xff]  ;;  %v5457_v57 = vld [vmem:[#allocation4 + $0x1550] sm:$0xff] }
 0x622   :  { %5317 = vmatprep.subr.bf16.mxu1 %v5197_v48  ;;  %5358 = vmatprep.subr.bf16.mxu0 %v5199_v35 }
 0x625   :  { %5318 = vmatpush1.bf16.msra.mxu1 %v5196_v29  ;;  %5359 = vmatpush1.bf16.msra.mxu0 %v5198_v53  ;;  %v5464_v29 = vld [vmem:[#allocation4 + $0x1588] sm:$0xff]  ;;  %v5466_v53 = vld [vmem:[#allocation4 + $0x1598] sm:$0xff] }
 0x626   :  { %5319 = vmatprep.subr.bf16.mxu1 %v5205_v21  ;;  %5360 = vmatprep.subr.bf16.mxu0 %v5207_v44 }
 0x627   :  { %v4499_v40 = vpop.f32.mrb[128].mxu1  ;;  %v4540_v50 = vpop.f32.mrb[136].mxu0 }
 0x628   :  { %v10500_v43 = vadd.f32 %v4499_v40, %v10465_v60  ;;  %v10503_v45 = vadd.f32 %v4540_v50, %v10468_v14  ;;  %v4501_v25 = vpop.f32.mrb[129].mxu1  ;;  %v4542_v27 = vpop.f32.mrb[137].mxu0  ;;  %v5212_v60 = vld [vmem:[#allocation4 + $0x13a0] sm:$0xff]  ;;  %v5221_v14 = vld [vmem:[#allocation4 + $0x13e8] sm:$0xff] }
 0x629   :  { %v10506_v20 = vadd.f32 %v4501_v25, %v10471_v63  ;;  %v10509_v56 = vadd.f32 %v4542_v27, %v10474_v37  ;;  %v4503_v9 = vpop.f32.mrb[130].mxu1  ;;  %v4544_v46 = vpop.f32.mrb[138].mxu0  ;;  %5320 = vmatpush1.bf16.msra.mxu1 %v5204_v31  ;;  %5361 = vmatpush1.bf16.msra.mxu0 %v5206_v61  ;;  %v5220_v63 = vld [vmem:[#allocation4 + $0x13e0] sm:$0xff]  ;;  %v5416_v37 = vld [vmem:[#allocation4 + $0x1408] sm:$0xff] }
 0x62a   :  { %v4504_v0 = vpop.f32.mrb[131].mxu1  ;;  %v4545_v16 = vpop.f32.mrb[139].mxu0  ;;  %5321 = vmatprep.subr.bf16.mxu1 %v5213_v1  ;;  %5362 = vmatprep.subr.bf16.mxu0 %v5215_v55  ;;  %v5465_v9 = vld [vmem:[#allocation4 + $0x1590] sm:$0xff]  ;;  %v5474_v46 = vld [vmem:[#allocation4 + $0x15d8] sm:$0xff] }
 0x62b   :  { %v5473_v0 = vld [vmem:[#allocation4 + $0x15d0] sm:$0xff]  ;;  %v5422_v16 = vld [vmem:[#allocation4 + $0x1438] sm:$0xff] }
 0x62d   :  { %5322 = vmatpush1.bf16.msra.mxu1 %v5212_v60  ;;  %5363 = vmatpush1.bf16.msra.mxu0 %v5214_v6  ;;  %v5419_v60 = vld [vmem:[#allocation4 + $0x1420] sm:$0xff]  ;;  %v5421_v6 = vld [vmem:[#allocation4 + $0x1430] sm:$0xff] }
 0x62e   :  { %5323 = vmatprep.subr.bf16.mxu1 %v5221_v14  ;;  %5364 = vmatprep.subr.bf16.mxu0 %v5223_v30  ;;  %v5428_v14 = vld [vmem:[#allocation4 + $0x1468] sm:$0xff]  ;;  %v5430_v30 = vld [vmem:[#allocation4 + $0x1478] sm:$0xff] }
 0x631   :  { %5324 = vmatpush1.bf16.msra.mxu1 %v5220_v63  ;;  %5365 = vmatpush1.bf16.msra.mxu0 %v5222_v51  ;;  %v5427_v63 = vld [vmem:[#allocation4 + $0x1460] sm:$0xff]  ;;  %v5429_v51 = vld [vmem:[#allocation4 + $0x1470] sm:$0xff] }
 0x632   :  { %5479 = vmatprep.subr.bf16.mxu1 %v5416_v37  ;;  %5520 = vmatprep.subr.bf16.mxu0 %v5418_v3  ;;  %v5436_v37 = vld [vmem:[#allocation4 + $0x14a8] sm:$0xff]  ;;  %v5438_v3 = vld [vmem:[#allocation4 + $0x14b8] sm:$0xff] }
 0x634   :  { %5342 = vmatmul.mubr.bf16.vlgmr.msra.gmra.mrb[156].mxu1 %v10493_v10  ;;  %5383 = vmatmul.mubr.bf16.vlgmr.msra.gmra.mrb[164].mxu0 %v10493_v10  ;;  %v5442_v10 = vld [vmem:[#allocation4 + $0x14d8] sm:$0xff] }
 0x635   :  { %5480 = vmatpush1.bf16.msra.mxu1 %v5415_v39  ;;  %5521 = vmatpush1.bf16.msra.mxu0 %v5417_v4  ;;  %v5435_v39 = vld [vmem:[#allocation4 + $0x14a0] sm:$0xff]  ;;  %v5437_v4 = vld [vmem:[#allocation4 + $0x14b0] sm:$0xff] }
 0x636   :  { %5481 = vmatprep.subr.bf16.mxu1 %v5424_v22  ;;  %5522 = vmatprep.subr.bf16.mxu0 %v5426_v19  ;;  %v5444_v22 = vld [vmem:[#allocation4 + $0x14e8] sm:$0xff]  ;;  %v5446_v19 = vld [vmem:[#allocation4 + $0x14f8] sm:$0xff] }
 0x637   :  { %5511 = vmatprep.mubr.bf16.mxu1 %v10952_v11  ;;  %5552 = vmatprep.mubr.bf16.mxu0 %v10952_v11 }
 0x639   :  { %5482 = vmatpush1.bf16.msra.mxu1 %v5423_v23  ;;  %5523 = vmatpush1.bf16.msra.mxu0 %v5425_v18  ;;  %v5443_v23 = vld [vmem:[#allocation4 + $0x14e0] sm:$0xff]  ;;  %v5445_v18 = vld [vmem:[#allocation4 + $0x14f0] sm:$0xff] }
 0x63a   :  { %5483 = vmatprep.subr.bf16.mxu1 %v5432_v49  ;;  %5524 = vmatprep.subr.bf16.mxu0 %v5434_v7  ;;  %v5452_v49 = vld [vmem:[#allocation4 + $0x1528] sm:$0xff]  ;;  %v5454_v7 = vld [vmem:[#allocation4 + $0x1538] sm:$0xff] }
 0x63d   :  { %5484 = vmatpush1.bf16.msra.mxu1 %v5431_v36  ;;  %5525 = vmatpush1.bf16.msra.mxu0 %v5433_v17  ;;  %v5451_v36 = vld [vmem:[#allocation4 + $0x1520] sm:$0xff]  ;;  %v5453_v17 = vld [vmem:[#allocation4 + $0x1530] sm:$0xff] }
 0x63e   :  { %5485 = vmatprep.subr.bf16.mxu1 %v5440_v58  ;;  %5526 = vmatprep.subr.bf16.mxu0 %v5442_v10  ;;  %v5460_v58 = vld [vmem:[#allocation4 + $0x1568] sm:$0xff]  ;;  %v5462_v10 = vld [vmem:[#allocation4 + $0x1578] sm:$0xff] }
 0x641   :  { %5486 = vmatpush1.bf16.msra.mxu1 %v5439_v8  ;;  %5527 = vmatpush1.bf16.msra.mxu0 %v5441_v15  ;;  %v5459_v8 = vld [vmem:[#allocation4 + $0x1560] sm:$0xff]  ;;  %v5461_v15 = vld [vmem:[#allocation4 + $0x1570] sm:$0xff] }
 0x642   :  { %5487 = vmatprep.subr.bf16.mxu1 %v5448_v5  ;;  %5528 = vmatprep.subr.bf16.mxu0 %v5450_v47 }
 0x645   :  { %5488 = vmatpush1.bf16.msra.mxu1 %v5447_v13  ;;  %5529 = vmatpush1.bf16.msra.mxu0 %v5449_v26  ;;  %v5468_v13 = vld [vmem:[#allocation4 + $0x15a8] sm:$0xff]  ;;  %v5470_v26 = vld [vmem:[#allocation4 + $0x15b8] sm:$0xff] }
 0x646   :  { %5489 = vmatprep.subr.bf16.mxu1 %v5456_v52  ;;  %5530 = vmatprep.subr.bf16.mxu0 %v5458_v2 }
 0x647   :  { %v4581_v48 = vpop.f32.mrb[132].mxu1  ;;  %v4622_v35 = vpop.f32.mrb[140].mxu0 }
 0x648   :  { %v10516_v21 = vadd.f32 %v4581_v48, %v10481_v28  ;;  %v10519_v44 = vadd.f32 %v4622_v35, %v10484_v62  ;;  %v4583_v31 = vpop.f32.mrb[133].mxu1  ;;  %v4624_v61 = vpop.f32.mrb[141].mxu0  ;;  %v5463_v28 = vld [vmem:[#allocation4 + $0x1580] sm:$0xff]  ;;  %v5472_v62 = vld [vmem:[#allocation4 + $0x15c8] sm:$0xff] }
 0x649   :  { %v10522_v40 = vadd.f32 %v4583_v31, %v10487_v59  ;;  %v10525_v50 = vadd.f32 %v4624_v61, %v10490_v42  ;;  %v4585_v1 = vpop.f32.mrb[134].mxu1  ;;  %v4626_v55 = vpop.f32.mrb[142].mxu0  ;;  %5490 = vmatpush1.bf16.msra.mxu1 %v5455_v24  ;;  %5531 = vmatpush1.bf16.msra.mxu0 %v5457_v57  ;;  %v5471_v59 = vld [vmem:[#allocation4 + $0x15c0] sm:$0xff]  ;;  %v5420_v42 = vld [vmem:[#allocation4 + $0x1428] sm:$0xff] }
 0x64a   :  { %v4586_v25 = vpop.f32.mrb[135].mxu1  ;;  %v4627_v27 = vpop.f32.mrb[143].mxu0  ;;  %5491 = vmatprep.subr.bf16.mxu1 %v5464_v29  ;;  %5532 = vmatprep.subr.bf16.mxu0 %v5466_v53  ;;  %v5469_v1 = vld [vmem:[#allocation4 + $0x15b0] sm:$0xff]  ;;  %v5478_v55 = vld [vmem:[#allocation4 + $0x15f8] sm:$0xff] }
 0x64b   :  { %v5477_v25 = vld [vmem:[#allocation4 + $0x15f0] sm:$0xff]  ;;  %v5670_v27 = vld [vmem:[#allocation4 + $0x1618] sm:$0xff] }
 0x64d   :  { %5492 = vmatpush1.bf16.msra.mxu1 %v5463_v28  ;;  %5533 = vmatpush1.bf16.msra.mxu0 %v5465_v9  ;;  %v5667_v28 = vld [vmem:[#allocation4 + $0x1600] sm:$0xff]  ;;  %v5669_v9 = vld [vmem:[#allocation4 + $0x1610] sm:$0xff] }
 0x64e   :  { %5493 = vmatprep.subr.bf16.mxu1 %v5472_v62  ;;  %5534 = vmatprep.subr.bf16.mxu0 %v5474_v46  ;;  %v5676_v62 = vld [vmem:[#allocation4 + $0x1648] sm:$0xff]  ;;  %v5678_v46 = vld [vmem:[#allocation4 + $0x1658] sm:$0xff] }
 0x651   :  { %5494 = vmatpush1.bf16.msra.mxu1 %v5471_v59  ;;  %5535 = vmatpush1.bf16.msra.mxu0 %v5473_v0  ;;  %v5675_v59 = vld [vmem:[#allocation4 + $0x1640] sm:$0xff]  ;;  %v5677_v0 = vld [vmem:[#allocation4 + $0x1650] sm:$0xff] }
 0x652   :  { %5561 = vmatprep.subr.bf16.mxu1 %v5420_v42  ;;  %5602 = vmatprep.subr.bf16.mxu0 %v5422_v16  ;;  %v5684_v42 = vld [vmem:[#allocation4 + $0x1688] sm:$0xff]  ;;  %v5686_v16 = vld [vmem:[#allocation4 + $0x1698] sm:$0xff] }
 0x654   :  { %5512 = vmatmul.mubr.bf16.vlgmr.msra.gmra.mrb[160].mxu1 %v10264_v32  ;;  %5553 = vmatmul.mubr.bf16.vlgmr.msra.gmra.mrb[168].mxu0 %v10264_v32 }
 0x655   :  { %5562 = vmatpush1.bf16.msra.mxu1 %v5419_v60  ;;  %5603 = vmatpush1.bf16.msra.mxu0 %v5421_v6  ;;  %v5683_v60 = vld [vmem:[#allocation4 + $0x1680] sm:$0xff]  ;;  %v5685_v6 = vld [vmem:[#allocation4 + $0x1690] sm:$0xff] }
 0x656   :  { %5563 = vmatprep.subr.bf16.mxu1 %v5428_v14  ;;  %5604 = vmatprep.subr.bf16.mxu0 %v5430_v30  ;;  %v5692_v14 = vld [vmem:[#allocation4 + $0x16c8] sm:$0xff]  ;;  %v5694_v30 = vld [vmem:[#allocation4 + $0x16d8] sm:$0xff] }
 0x657   :  { %5593 = vmatprep.mubr.bf16.mxu1 %v10952_v11  ;;  %5634 = vmatprep.mubr.bf16.mxu0 %v10952_v11 }
 0x659   :  { %5564 = vmatpush1.bf16.msra.mxu1 %v5427_v63  ;;  %5605 = vmatpush1.bf16.msra.mxu0 %v5429_v51  ;;  %v5691_v63 = vld [vmem:[#allocation4 + $0x16c0] sm:$0xff]  ;;  %v5693_v51 = vld [vmem:[#allocation4 + $0x16d0] sm:$0xff] }
 0x65a   :  { %5565 = vmatprep.subr.bf16.mxu1 %v5436_v37  ;;  %5606 = vmatprep.subr.bf16.mxu0 %v5438_v3  ;;  %v5700_v37 = vld [vmem:[#allocation4 + $0x1708] sm:$0xff]  ;;  %v5702_v3 = vld [vmem:[#allocation4 + $0x1718] sm:$0xff] }
 0x65d   :  { %5566 = vmatpush1.bf16.msra.mxu1 %v5435_v39  ;;  %5607 = vmatpush1.bf16.msra.mxu0 %v5437_v4  ;;  %v5699_v39 = vld [vmem:[#allocation4 + $0x1700] sm:$0xff]  ;;  %v5701_v4 = vld [vmem:[#allocation4 + $0x1710] sm:$0xff] }
 0x65e   :  { %5567 = vmatprep.subr.bf16.mxu1 %v5444_v22  ;;  %5608 = vmatprep.subr.bf16.mxu0 %v5446_v19  ;;  %v5708_v22 = vld [vmem:[#allocation4 + $0x1748] sm:$0xff]  ;;  %v5710_v19 = vld [vmem:[#allocation4 + $0x1758] sm:$0xff] }
 0x661   :  { %5568 = vmatpush1.bf16.msra.mxu1 %v5443_v23  ;;  %5609 = vmatpush1.bf16.msra.mxu0 %v5445_v18  ;;  %v5707_v23 = vld [vmem:[#allocation4 + $0x1740] sm:$0xff]  ;;  %v5709_v18 = vld [vmem:[#allocation4 + $0x1750] sm:$0xff] }
 0x662   :  { %5569 = vmatprep.subr.bf16.mxu1 %v5452_v49  ;;  %5610 = vmatprep.subr.bf16.mxu0 %v5454_v7 }
 0x665   :  { %5570 = vmatpush1.bf16.msra.mxu1 %v5451_v36  ;;  %5611 = vmatpush1.bf16.msra.mxu0 %v5453_v17  ;;  %v5716_v36 = vld [vmem:[#allocation4 + $0x1788] sm:$0xff]  ;;  %v5718_v17 = vld [vmem:[#allocation4 + $0x1798] sm:$0xff] }
 0x666   :  { %5571 = vmatprep.subr.bf16.mxu1 %v5460_v58  ;;  %5612 = vmatprep.subr.bf16.mxu0 %v5462_v10 }
 0x667   :  { %v4754_v5 = vpop.f32.mrb[136].mxu1  ;;  %v4795_v47 = vpop.f32.mrb[144].mxu0 }
 0x668   :  { %v10532_v52 = vadd.f32 %v4754_v5, %v10500_v43  ;;  %v10535_v2 = vadd.f32 %v4795_v47, %v10503_v45  ;;  %v4756_v24 = vpop.f32.mrb[137].mxu1  ;;  %v4797_v57 = vpop.f32.mrb[145].mxu0  ;;  %v5467_v43 = vld [vmem:[#allocation4 + $0x15a0] sm:$0xff]  ;;  %v5476_v45 = vld [vmem:[#allocation4 + $0x15e8] sm:$0xff] }
 0x669   :  { %v10538_v48 = vadd.f32 %v4756_v24, %v10506_v20  ;;  %v10541_v35 = vadd.f32 %v4797_v57, %v10509_v56  ;;  %v4758_v29 = vpop.f32.mrb[138].mxu1  ;;  %v4799_v53 = vpop.f32.mrb[146].mxu0  ;;  %5572 = vmatpush1.bf16.msra.mxu1 %v5459_v8  ;;  %5613 = vmatpush1.bf16.msra.mxu0 %v5461_v15  ;;  %v5475_v20 = vld [vmem:[#allocation4 + $0x15e0] sm:$0xff]  ;;  %v5668_v56 = vld [vmem:[#allocation4 + $0x1608] sm:$0xff] }
 0x66a   :  { %v4759_v31 = vpop.f32.mrb[139].mxu1  ;;  %v4800_v61 = vpop.f32.mrb[147].mxu0  ;;  %5573 = vmatprep.subr.bf16.mxu1 %v5468_v13  ;;  %5614 = vmatprep.subr.bf16.mxu0 %v5470_v26  ;;  %v5717_v29 = vld [vmem:[#allocation4 + $0x1790] sm:$0xff]  ;;  %v5726_v53 = vld [vmem:[#allocation4 + $0x17d8] sm:$0xff] }
 0x66b   :  { %v5725_v31 = vld [vmem:[#allocation4 + $0x17d0] sm:$0xff]  ;;  %v5674_v61 = vld [vmem:[#allocation4 + $0x1638] sm:$0xff] }
 0x66d   :  { %5574 = vmatpush1.bf16.msra.mxu1 %v5467_v43  ;;  %5615 = vmatpush1.bf16.msra.mxu0 %v5469_v1  ;;  %v10560_v43 = vrot.slane %v10264_v32, 4  ;;  %v5671_v1 = vld [vmem:[#allocation4 + $0x1620] sm:$0xff] }
 0x66e   :  { %5575 = vmatprep.subr.bf16.mxu1 %v5476_v45  ;;  %5616 = vmatprep.subr.bf16.mxu0 %v5478_v55  ;;  %v5673_v45 = vld [vmem:[#allocation4 + $0x1630] sm:$0xff]  ;;  %v5680_v55 = vld [vmem:[#allocation4 + $0x1668] sm:$0xff] }
 0x671   :  { %5576 = vmatpush1.bf16.msra.mxu1 %v5475_v20  ;;  %5617 = vmatpush1.bf16.msra.mxu0 %v5477_v25  ;;  %v5682_v20 = vld [vmem:[#allocation4 + $0x1678] sm:$0xff]  ;;  %v5679_v25 = vld [vmem:[#allocation4 + $0x1660] sm:$0xff] }
 0x672   :  { %5734 = vmatprep.subr.bf16.mxu1 %v5668_v56  ;;  %5775 = vmatprep.subr.bf16.mxu0 %v5670_v27  ;;  %v5681_v56 = vld [vmem:[#allocation4 + $0x1670] sm:$0xff]  ;;  %v5690_v27 = vld [vmem:[#allocation4 + $0x16b8] sm:$0xff] }
 0x674   :  { %5594 = vmatmul.mubr.bf16.vlgmr.msra.gmra.mrb[164].mxu1 %v10264_v32  ;;  %5635 = vmatmul.mubr.bf16.vlgmr.msra.gmra.mrb[172].mxu0 %v10264_v32  ;;  %v5688_v32 = vld [vmem:[#allocation4 + $0x16a8] sm:$0xff] }
 0x675   :  { %5735 = vmatpush1.bf16.msra.mxu1 %v5667_v28  ;;  %5776 = vmatpush1.bf16.msra.mxu0 %v5669_v9  ;;  %v5687_v28 = vld [vmem:[#allocation4 + $0x16a0] sm:$0xff]  ;;  %v5689_v9 = vld [vmem:[#allocation4 + $0x16b0] sm:$0xff] }
 0x676   :  { %5736 = vmatprep.subr.bf16.mxu1 %v5676_v62  ;;  %5777 = vmatprep.subr.bf16.mxu0 %v5678_v46  ;;  %v5696_v62 = vld [vmem:[#allocation4 + $0x16e8] sm:$0xff]  ;;  %v5698_v46 = vld [vmem:[#allocation4 + $0x16f8] sm:$0xff] }
 0x677   :  { %5766 = vmatprep.mubr.bf16.mxu1 %v10952_v11  ;;  %5807 = vmatprep.mubr.bf16.mxu0 %v10952_v11 }
 0x679   :  { %5737 = vmatpush1.bf16.msra.mxu1 %v5675_v59  ;;  %5778 = vmatpush1.bf16.msra.mxu0 %v5677_v0  ;;  %v5695_v59 = vld [vmem:[#allocation4 + $0x16e0] sm:$0xff]  ;;  %v5697_v0 = vld [vmem:[#allocation4 + $0x16f0] sm:$0xff] }
 0x67a   :  { %5738 = vmatprep.subr.bf16.mxu1 %v5684_v42  ;;  %5779 = vmatprep.subr.bf16.mxu0 %v5686_v16  ;;  %v5704_v42 = vld [vmem:[#allocation4 + $0x1728] sm:$0xff]  ;;  %v5706_v16 = vld [vmem:[#allocation4 + $0x1738] sm:$0xff] }
 0x67d   :  { %5739 = vmatpush1.bf16.msra.mxu1 %v5683_v60  ;;  %5780 = vmatpush1.bf16.msra.mxu0 %v5685_v6  ;;  %v5703_v60 = vld [vmem:[#allocation4 + $0x1720] sm:$0xff]  ;;  %v5705_v6 = vld [vmem:[#allocation4 + $0x1730] sm:$0xff] }
 0x67e   :  { %5740 = vmatprep.subr.bf16.mxu1 %v5692_v14  ;;  %5781 = vmatprep.subr.bf16.mxu0 %v5694_v30  ;;  %v5712_v14 = vld [vmem:[#allocation4 + $0x1768] sm:$0xff]  ;;  %v5714_v30 = vld [vmem:[#allocation4 + $0x1778] sm:$0xff] }
 0x681   :  { %5741 = vmatpush1.bf16.msra.mxu1 %v5691_v63  ;;  %5782 = vmatpush1.bf16.msra.mxu0 %v5693_v51  ;;  %v5711_v63 = vld [vmem:[#allocation4 + $0x1760] sm:$0xff]  ;;  %v5713_v51 = vld [vmem:[#allocation4 + $0x1770] sm:$0xff] }
 0x682   :  { %5742 = vmatprep.subr.bf16.mxu1 %v5700_v37  ;;  %5783 = vmatprep.subr.bf16.mxu0 %v5702_v3 }
 0x685   :  { %5743 = vmatpush1.bf16.msra.mxu1 %v5699_v39  ;;  %5784 = vmatpush1.bf16.msra.mxu0 %v5701_v4  ;;  %v5720_v39 = vld [vmem:[#allocation4 + $0x17a8] sm:$0xff]  ;;  %v5722_v4 = vld [vmem:[#allocation4 + $0x17b8] sm:$0xff] }
 0x686   :  { %5744 = vmatprep.subr.bf16.mxu1 %v5708_v22  ;;  %5785 = vmatprep.subr.bf16.mxu0 %v5710_v19 }
 0x687   :  { %v4836_v49 = vpop.f32.mrb[140].mxu1  ;;  %v4877_v7 = vpop.f32.mrb[148].mxu0 }
 0x688   :  { %v10548_v58 = vadd.f32 %v4836_v49, %v10516_v21  ;;  %v10551_v10 = vadd.f32 %v4877_v7, %v10519_v44  ;;  %v4838_v8 = vpop.f32.mrb[141].mxu1  ;;  %v4879_v15 = vpop.f32.mrb[149].mxu0  ;;  %v5715_v21 = vld [vmem:[#allocation4 + $0x1780] sm:$0xff]  ;;  %v5724_v44 = vld [vmem:[#allocation4 + $0x17c8] sm:$0xff] }
 0x689   :  { %v10554_v5 = vadd.f32 %v4838_v8, %v10522_v40  ;;  %v10557_v47 = vadd.f32 %v4879_v15, %v10525_v50  ;;  %v4840_v13 = vpop.f32.mrb[142].mxu1  ;;  %v4881_v26 = vpop.f32.mrb[150].mxu0  ;;  %5745 = vmatpush1.bf16.msra.mxu1 %v5707_v23  ;;  %5786 = vmatpush1.bf16.msra.mxu0 %v5709_v18  ;;  %v5723_v40 = vld [vmem:[#allocation4 + $0x17c0] sm:$0xff]  ;;  %v5672_v50 = vld [vmem:[#allocation4 + $0x1628] sm:$0xff] }
 0x68a   :  { %v4841_v24 = vpop.f32.mrb[143].mxu1  ;;  %v4882_v57 = vpop.f32.mrb[151].mxu0  ;;  %5746 = vmatprep.subr.bf16.mxu1 %v5716_v36  ;;  %5787 = vmatprep.subr.bf16.mxu0 %v5718_v17  ;;  %v5721_v13 = vld [vmem:[#allocation4 + $0x17b0] sm:$0xff]  ;;  %v5730_v26 = vld [vmem:[#allocation4 + $0x17f8] sm:$0xff] }
 0x68b   :  { %v5729_v24 = vld [vmem:[#allocation4 + $0x17f0] sm:$0xff]  ;;  %v5925_v57 = vld [vmem:[#allocation4 + $0x1818] sm:$0xff] }
 0x68d   :  { %5747 = vmatpush1.bf16.msra.mxu1 %v5715_v21  ;;  %5788 = vmatpush1.bf16.msra.mxu0 %v5717_v29  ;;  %v5922_v21 = vld [vmem:[#allocation4 + $0x1800] sm:$0xff]  ;;  %v5924_v29 = vld [vmem:[#allocation4 + $0x1810] sm:$0xff] }
 0x68e   :  { %5748 = vmatprep.subr.bf16.mxu1 %v5724_v44  ;;  %5789 = vmatprep.subr.bf16.mxu0 %v5726_v53  ;;  %v5931_v44 = vld [vmem:[#allocation4 + $0x1848] sm:$0xff]  ;;  %v5933_v53 = vld [vmem:[#allocation4 + $0x1858] sm:$0xff] }
 0x691   :  { %5749 = vmatpush1.bf16.msra.mxu1 %v5723_v40  ;;  %5790 = vmatpush1.bf16.msra.mxu0 %v5725_v31  ;;  %v5930_v40 = vld [vmem:[#allocation4 + $0x1840] sm:$0xff]  ;;  %v5932_v31 = vld [vmem:[#allocation4 + $0x1850] sm:$0xff] }
 0x692   :  { %5816 = vmatprep.subr.bf16.mxu1 %v5672_v50  ;;  %5857 = vmatprep.subr.bf16.mxu0 %v5674_v61  ;;  %v5939_v50 = vld [vmem:[#allocation4 + $0x1888] sm:$0xff]  ;;  %v5941_v61 = vld [vmem:[#allocation4 + $0x1898] sm:$0xff] }
 0x694   :  { %5767 = vmatmul.mubr.bf16.vlgmr.msra.gmra.mrb[168].mxu1 %v10560_v43  ;;  %5808 = vmatmul.mubr.bf16.vlgmr.msra.gmra.mrb[176].mxu0 %v10560_v43 }
 0x695   :  { %5817 = vmatpush1.bf16.msra.mxu1 %v5671_v1  ;;  %5858 = vmatpush1.bf16.msra.mxu0 %v5673_v45  ;;  %v5938_v1 = vld [vmem:[#allocation4 + $0x1880] sm:$0xff]  ;;  %v5940_v45 = vld [vmem:[#allocation4 + $0x1890] sm:$0xff] }
 0x696   :  { %5818 = vmatprep.subr.bf16.mxu1 %v5680_v55  ;;  %5859 = vmatprep.subr.bf16.mxu0 %v5682_v20  ;;  %v5947_v55 = vld [vmem:[#allocation4 + $0x18c8] sm:$0xff]  ;;  %v5946_v20 = vld [vmem:[#allocation4 + $0x18c0] sm:$0xff] }
 0x697   :  { %5848 = vmatprep.mubr.bf16.mxu1 %v10952_v11  ;;  %5889 = vmatprep.mubr.bf16.mxu0 %v10952_v11 }
 0x699   :  { %5819 = vmatpush1.bf16.msra.mxu1 %v5679_v25  ;;  %5860 = vmatpush1.bf16.msra.mxu0 %v5681_v56  ;;  %v5948_v25 = vld [vmem:[#allocation4 + $0x18d0] sm:$0xff]  ;;  %v5955_v56 = vld [vmem:[#allocation4 + $0x1908] sm:$0xff] }
 0x69a   :  { %5820 = vmatprep.subr.bf16.mxu1 %v5688_v32  ;;  %5861 = vmatprep.subr.bf16.mxu0 %v5690_v27  ;;  %v5957_v32 = vld [vmem:[#allocation4 + $0x1918] sm:$0xff]  ;;  %v5954_v27 = vld [vmem:[#allocation4 + $0x1900] sm:$0xff] }
 0x69d   :  { %5821 = vmatpush1.bf16.msra.mxu1 %v5687_v28  ;;  %5862 = vmatpush1.bf16.msra.mxu0 %v5689_v9  ;;  %v5956_v28 = vld [vmem:[#allocation4 + $0x1910] sm:$0xff]  ;;  %v5963_v9 = vld [vmem:[#allocation4 + $0x1948] sm:$0xff] }
 0x69e   :  { %5822 = vmatprep.subr.bf16.mxu1 %v5696_v62  ;;  %5863 = vmatprep.subr.bf16.mxu0 %v5698_v46  ;;  %v5965_v62 = vld [vmem:[#allocation4 + $0x1958] sm:$0xff]  ;;  %v5962_v46 = vld [vmem:[#allocation4 + $0x1940] sm:$0xff] }
 0x6a1   :  { %5823 = vmatpush1.bf16.msra.mxu1 %v5695_v59  ;;  %5864 = vmatpush1.bf16.msra.mxu0 %v5697_v0  ;;  %v5964_v59 = vld [vmem:[#allocation4 + $0x1950] sm:$0xff] }
 0x6a2   :  { %5824 = vmatprep.subr.bf16.mxu1 %v5704_v42  ;;  %5865 = vmatprep.subr.bf16.mxu0 %v5706_v16  ;;  %v5971_v16 = vld [vmem:[#allocation4 + $0x1988] sm:$0xff] }
 0x6a5   :  { %5825 = vmatpush1.bf16.msra.mxu1 %v5703_v60  ;;  %5866 = vmatpush1.bf16.msra.mxu0 %v5705_v6  ;;  %v5973_v60 = vld [vmem:[#allocation4 + $0x1998] sm:$0xff] }
 0x6a6   :  { %5826 = vmatprep.subr.bf16.mxu1 %v5712_v14  ;;  %5867 = vmatprep.subr.bf16.mxu0 %v5714_v30 }
 0x6a7   :  { %v5006_v37 = vpop.f32.mrb[144].mxu1  ;;  %v5047_v3 = vpop.f32.mrb[152].mxu0 }
 0x6a8   :  { %v10567_v22 = vadd.f32 %v5006_v37, %v10532_v52  ;;  %v10570_v19 = vadd.f32 %v5047_v3, %v10535_v2  ;;  %v5008_v23 = vpop.f32.mrb[145].mxu1  ;;  %v5049_v18 = vpop.f32.mrb[153].mxu0  ;;  %v5719_v52 = vld [vmem:[#allocation4 + $0x17a0] sm:$0xff]  ;;  %v5728_v2 = vld [vmem:[#allocation4 + $0x17e8] sm:$0xff] }
 0x6a9   :  { %v10573_v49 = vadd.f32 %v5008_v23, %v10538_v48  ;;  %v10576_v7 = vadd.f32 %v5049_v18, %v10541_v35  ;;  %v5010_v36 = vpop.f32.mrb[146].mxu1  ;;  %v5051_v17 = vpop.f32.mrb[154].mxu0  ;;  %5827 = vmatpush1.bf16.msra.mxu1 %v5711_v63  ;;  %5868 = vmatpush1.bf16.msra.mxu0 %v5713_v51  ;;  %v5727_v48 = vld [vmem:[#allocation4 + $0x17e0] sm:$0xff]  ;;  %v5923_v35 = vld [vmem:[#allocation4 + $0x1808] sm:$0xff]  ;;  %v5972_v18 = vld [vmem:[#allocation4 + $0x1990] sm:$0xff] }
 0x6aa   :  { %v5011_v8 = vpop.f32.mrb[147].mxu1  ;;  %v5052_v15 = vpop.f32.mrb[155].mxu0  ;;  %5828 = vmatprep.subr.bf16.mxu1 %v5720_v39  ;;  %5869 = vmatprep.subr.bf16.mxu0 %v5722_v4  ;;  %v5981_v36 = vld [vmem:[#allocation4 + $0x19d8] sm:$0xff]  ;;  %v5980_v17 = vld [vmem:[#allocation4 + $0x19d0] sm:$0xff] }
 0x6ab   :  { %v5929_v8 = vld [vmem:[#allocation4 + $0x1838] sm:$0xff]  ;;  %v5926_v15 = vld [vmem:[#allocation4 + $0x1820] sm:$0xff] }
 0x6ad   :  { %5829 = vmatpush1.bf16.msra.mxu1 %v5719_v52  ;;  %5870 = vmatpush1.bf16.msra.mxu0 %v5721_v13  ;;  %v5928_v52 = vld [vmem:[#allocation4 + $0x1830] sm:$0xff]  ;;  %v5935_v13 = vld [vmem:[#allocation4 + $0x1868] sm:$0xff] }
 0x6ae   :  { %5830 = vmatprep.subr.bf16.mxu1 %v5728_v2  ;;  %5871 = vmatprep.subr.bf16.mxu0 %v5730_v26  ;;  %v5937_v2 = vld [vmem:[#allocation4 + $0x1878] sm:$0xff]  ;;  %v5934_v26 = vld [vmem:[#allocation4 + $0x1860] sm:$0xff] }
 0x6b1   :  { %5831 = vmatpush1.bf16.msra.mxu1 %v5727_v48  ;;  %5872 = vmatpush1.bf16.msra.mxu0 %v5729_v24  ;;  %v5936_v48 = vld [vmem:[#allocation4 + $0x1870] sm:$0xff]  ;;  %v5943_v24 = vld [vmem:[#allocation4 + $0x18a8] sm:$0xff] }
 0x6b2   :  { %5986 = vmatprep.subr.bf16.mxu1 %v5923_v35  ;;  %6027 = vmatprep.subr.bf16.mxu0 %v5925_v57  ;;  %v5945_v35 = vld [vmem:[#allocation4 + $0x18b8] sm:$0xff]  ;;  %v5942_v57 = vld [vmem:[#allocation4 + $0x18a0] sm:$0xff] }
 0x6b4   :  { %5849 = vmatmul.mubr.bf16.vlgmr.msra.gmra.mrb[172].mxu1 %v10560_v43  ;;  %5890 = vmatmul.mubr.bf16.vlgmr.msra.gmra.mrb[180].mxu0 %v10560_v43  ;;  %v5949_v43 = vld [vmem:[#allocation4 + $0x18d8] sm:$0xff] }
 0x6b5   :  { %5987 = vmatpush1.bf16.msra.mxu1 %v5922_v21  ;;  %6028 = vmatpush1.bf16.msra.mxu0 %v5924_v29  ;;  %v5944_v21 = vld [vmem:[#allocation4 + $0x18b0] sm:$0xff]  ;;  %v5951_v29 = vld [vmem:[#allocation4 + $0x18e8] sm:$0xff] }
 0x6b6   :  { %5988 = vmatprep.subr.bf16.mxu1 %v5931_v44  ;;  %6029 = vmatprep.subr.bf16.mxu0 %v5933_v53  ;;  %v5953_v44 = vld [vmem:[#allocation4 + $0x18f8] sm:$0xff]  ;;  %v5950_v53 = vld [vmem:[#allocation4 + $0x18e0] sm:$0xff] }
 0x6b7   :  { %6018 = vmatprep.mubr.bf16.mxu1 %v10952_v11  ;;  %6059 = vmatprep.mubr.bf16.mxu0 %v10952_v11 }
 0x6b9   :  { %5989 = vmatpush1.bf16.msra.mxu1 %v5930_v40  ;;  %6030 = vmatpush1.bf16.msra.mxu0 %v5932_v31  ;;  %v5952_v40 = vld [vmem:[#allocation4 + $0x18f0] sm:$0xff]  ;;  %v5959_v31 = vld [vmem:[#allocation4 + $0x1928] sm:$0xff] }
 0x6ba   :  { %5990 = vmatprep.subr.bf16.mxu1 %v5939_v50  ;;  %6031 = vmatprep.subr.bf16.mxu0 %v5941_v61  ;;  %v5961_v50 = vld [vmem:[#allocation4 + $0x1938] sm:$0xff]  ;;  %v5958_v61 = vld [vmem:[#allocation4 + $0x1920] sm:$0xff] }
 0x6bd   :  { %5991 = vmatpush1.bf16.msra.mxu1 %v5938_v1  ;;  %6032 = vmatpush1.bf16.msra.mxu0 %v5940_v45  ;;  %v5960_v1 = vld [vmem:[#allocation4 + $0x1930] sm:$0xff]  ;;  %v5967_v45 = vld [vmem:[#allocation4 + $0x1968] sm:$0xff] }
 0x6be   :  { %5992 = vmatprep.subr.bf16.mxu1 %v5947_v55  ;;  %6033 = vmatprep.subr.bf16.mxu0 %v5949_v43  ;;  %v5969_v55 = vld [vmem:[#allocation4 + $0x1978] sm:$0xff]  ;;  %v5966_v43 = vld [vmem:[#allocation4 + $0x1960] sm:$0xff] }
 0x6c1   :  { %5993 = vmatpush1.bf16.msra.mxu1 %v5946_v20  ;;  %6034 = vmatpush1.bf16.msra.mxu0 %v5948_v25  ;;  %v5968_v20 = vld [vmem:[#allocation4 + $0x1970] sm:$0xff] }
 0x6c2   :  { %5994 = vmatprep.subr.bf16.mxu1 %v5955_v56  ;;  %6035 = vmatprep.subr.bf16.mxu0 %v5957_v32  ;;  %v5975_v32 = vld [vmem:[#allocation4 + $0x19a8] sm:$0xff] }
 0x6c5   :  { %5995 = vmatpush1.bf16.msra.mxu1 %v5954_v27  ;;  %6036 = vmatpush1.bf16.msra.mxu0 %v5956_v28  ;;  %v5977_v27 = vld [vmem:[#allocation4 + $0x19b8] sm:$0xff] }
 0x6c6   :  { %5996 = vmatprep.subr.bf16.mxu1 %v5963_v9  ;;  %6037 = vmatprep.subr.bf16.mxu0 %v5965_v62 }
 0x6c7   :  { %v5088_v0 = vpop.f32.mrb[148].mxu1  ;;  %v5129_v42 = vpop.f32.mrb[156].mxu0 }
 0x6c8   :  { %v10583_v6 = vadd.f32 %v5088_v0, %v10548_v58  ;;  %v10586_v14 = vadd.f32 %v5129_v42, %v10551_v10  ;;  %v5090_v30 = vpop.f32.mrb[149].mxu1  ;;  %v5131_v63 = vpop.f32.mrb[157].mxu0  ;;  %v5970_v58 = vld [vmem:[#allocation4 + $0x1980] sm:$0xff]  ;;  %v5979_v10 = vld [vmem:[#allocation4 + $0x19c8] sm:$0xff] }
 0x6c9   :  { %v10589_v51 = vadd.f32 %v5090_v30, %v10554_v5  ;;  %v10592_v37 = vadd.f32 %v5131_v63, %v10557_v47  ;;  %v5092_v3 = vpop.f32.mrb[150].mxu1  ;;  %v5133_v39 = vpop.f32.mrb[158].mxu0  ;;  %5997 = vmatpush1.bf16.msra.mxu1 %v5962_v46  ;;  %6038 = vmatpush1.bf16.msra.mxu0 %v5964_v59  ;;  %v5978_v5 = vld [vmem:[#allocation4 + $0x19c0] sm:$0xff]  ;;  %v5927_v47 = vld [vmem:[#allocation4 + $0x1828] sm:$0xff]  ;;  %v5976_v63 = vld [vmem:[#allocation4 + $0x19b0] sm:$0xff] }
 0x6ca   :  { %v5093_v4 = vpop.f32.mrb[151].mxu1  ;;  %v5134_v23 = vpop.f32.mrb[159].mxu0  ;;  %5998 = vmatprep.subr.bf16.mxu1 %v5971_v16  ;;  %6039 = vmatprep.subr.bf16.mxu0 %v5973_v60  ;;  %v5985_v3 = vld [vmem:[#allocation4 + $0x19f8] sm:$0xff]  ;;  %v5984_v39 = vld [vmem:[#allocation4 + $0x19f0] sm:$0xff] }
 0x6cb   :  { %v6177_v4 = vld [vmem:[#allocation4 + $0x1a18] sm:$0xff]  ;;  %v6174_v23 = vld [vmem:[#allocation4 + $0x1a00] sm:$0xff] }
 0x6cd   :  { %5999 = vmatpush1.bf16.msra.mxu1 %v5970_v58  ;;  %6040 = vmatpush1.bf16.msra.mxu0 %v5972_v18  ;;  %v6176_v58 = vld [vmem:[#allocation4 + $0x1a10] sm:$0xff]  ;;  %v6183_v18 = vld [vmem:[#allocation4 + $0x1a48] sm:$0xff] }
 0x6ce   :  { %6000 = vmatprep.subr.bf16.mxu1 %v5979_v10  ;;  %6041 = vmatprep.subr.bf16.mxu0 %v5981_v36  ;;  %v6185_v10 = vld [vmem:[#allocation4 + $0x1a58] sm:$0xff]  ;;  %v6182_v36 = vld [vmem:[#allocation4 + $0x1a40] sm:$0xff] }
 0x6d1   :  { %6001 = vmatpush1.bf16.msra.mxu1 %v5978_v5  ;;  %6042 = vmatpush1.bf16.msra.mxu0 %v5980_v17  ;;  %v6184_v5 = vld [vmem:[#allocation4 + $0x1a50] sm:$0xff]  ;;  %v6191_v17 = vld [vmem:[#allocation4 + $0x1a88] sm:$0xff] }
 0x6d2   :  { %6068 = vmatprep.subr.bf16.mxu1 %v5927_v47  ;;  %6109 = vmatprep.subr.bf16.mxu0 %v5929_v8  ;;  %v6193_v47 = vld [vmem:[#allocation4 + $0x1a98] sm:$0xff]  ;;  %v6190_v8 = vld [vmem:[#allocation4 + $0x1a80] sm:$0xff] }
 0x6d4   :  { %6019 = vmatmul.mubr.bf16.vlgmr.msra.gmra.mrb[176].mxu1 %v10266_v41  ;;  %6060 = vmatmul.mubr.bf16.vlgmr.msra.gmra.mrb[184].mxu0 %v10266_v41 }
 0x6d5   :  { %6069 = vmatpush1.bf16.msra.mxu1 %v5926_v15  ;;  %6110 = vmatpush1.bf16.msra.mxu0 %v5928_v52  ;;  %v6192_v15 = vld [vmem:[#allocation4 + $0x1a90] sm:$0xff]  ;;  %v6199_v52 = vld [vmem:[#allocation4 + $0x1ac8] sm:$0xff] }
 0x6d6   :  { %6070 = vmatprep.subr.bf16.mxu1 %v5935_v13  ;;  %6111 = vmatprep.subr.bf16.mxu0 %v5937_v2  ;;  %v6201_v13 = vld [vmem:[#allocation4 + $0x1ad8] sm:$0xff]  ;;  %v6198_v2 = vld [vmem:[#allocation4 + $0x1ac0] sm:$0xff] }
 0x6d7   :  { %6100 = vmatprep.mubr.bf16.mxu1 %v10952_v11  ;;  %6141 = vmatprep.mubr.bf16.mxu0 %v10952_v11 }
 0x6d9   :  { %6071 = vmatpush1.bf16.msra.mxu1 %v5934_v26  ;;  %6112 = vmatpush1.bf16.msra.mxu0 %v5936_v48  ;;  %v6200_v26 = vld [vmem:[#allocation4 + $0x1ad0] sm:$0xff]  ;;  %v6207_v48 = vld [vmem:[#allocation4 + $0x1b08] sm:$0xff] }
 0x6da   :  { %6072 = vmatprep.subr.bf16.mxu1 %v5943_v24  ;;  %6113 = vmatprep.subr.bf16.mxu0 %v5945_v35  ;;  %v6209_v24 = vld [vmem:[#allocation4 + $0x1b18] sm:$0xff]  ;;  %v6206_v35 = vld [vmem:[#allocation4 + $0x1b00] sm:$0xff] }
 0x6dd   :  { %6073 = vmatpush1.bf16.msra.mxu1 %v5942_v57  ;;  %6114 = vmatpush1.bf16.msra.mxu0 %v5944_v21  ;;  %v6208_v57 = vld [vmem:[#allocation4 + $0x1b10] sm:$0xff]  ;;  %v6215_v21 = vld [vmem:[#allocation4 + $0x1b48] sm:$0xff] }
 0x6de   :  { %6074 = vmatprep.subr.bf16.mxu1 %v5951_v29  ;;  %6115 = vmatprep.subr.bf16.mxu0 %v5953_v44  ;;  %v6217_v29 = vld [vmem:[#allocation4 + $0x1b58] sm:$0xff]  ;;  %v6214_v44 = vld [vmem:[#allocation4 + $0x1b40] sm:$0xff] }
 0x6e1   :  { %6075 = vmatpush1.bf16.msra.mxu1 %v5950_v53  ;;  %6116 = vmatpush1.bf16.msra.mxu0 %v5952_v40  ;;  %v6216_v53 = vld [vmem:[#allocation4 + $0x1b50] sm:$0xff] }
 0x6e2   :  { %6076 = vmatprep.subr.bf16.mxu1 %v5959_v31  ;;  %6117 = vmatprep.subr.bf16.mxu0 %v5961_v50  ;;  %v6223_v50 = vld [vmem:[#allocation4 + $0x1b88] sm:$0xff] }
 0x6e5   :  { %6077 = vmatpush1.bf16.msra.mxu1 %v5958_v61  ;;  %6118 = vmatpush1.bf16.msra.mxu0 %v5960_v1  ;;  %v6225_v61 = vld [vmem:[#allocation4 + $0x1b98] sm:$0xff] }
 0x6e6   :  { %6078 = vmatprep.subr.bf16.mxu1 %v5967_v45  ;;  %6119 = vmatprep.subr.bf16.mxu0 %v5969_v55 }
 0x6e7   :  { %v5261_v25 = vpop.f32.mrb[152].mxu1  ;;  %v5302_v56 = vpop.f32.mrb[160].mxu0 }
 0x6e8   :  { %v10599_v28 = vadd.f32 %v5261_v25, %v10567_v22  ;;  %v10602_v9 = vadd.f32 %v5302_v56, %v10570_v19  ;;  %v5263_v62 = vpop.f32.mrb[153].mxu1  ;;  %v5304_v46 = vpop.f32.mrb[161].mxu0  ;;  %v5974_v22 = vld [vmem:[#allocation4 + $0x19a0] sm:$0xff]  ;;  %v5983_v19 = vld [vmem:[#allocation4 + $0x19e8] sm:$0xff] }
 0x6e9   :  { %v10605_v59 = vadd.f32 %v5263_v62, %v10573_v49  ;;  %v10608_v0 = vadd.f32 %v5304_v46, %v10576_v7  ;;  %v5265_v42 = vpop.f32.mrb[154].mxu1  ;;  %v5306_v16 = vpop.f32.mrb[162].mxu0  ;;  %6079 = vmatpush1.bf16.msra.mxu1 %v5966_v43  ;;  %6120 = vmatpush1.bf16.msra.mxu0 %v5968_v20  ;;  %v5982_v49 = vld [vmem:[#allocation4 + $0x19e0] sm:$0xff]  ;;  %v6175_v7 = vld [vmem:[#allocation4 + $0x1a08] sm:$0xff]  ;;  %v6224_v46 = vld [vmem:[#allocation4 + $0x1b90] sm:$0xff] }
 0x6ea   :  { %v5266_v60 = vpop.f32.mrb[155].mxu1  ;;  %v5307_v30 = vpop.f32.mrb[163].mxu0  ;;  %6080 = vmatprep.subr.bf16.mxu1 %v5975_v32  ;;  %6121 = vmatprep.subr.bf16.mxu0 %v5977_v27  ;;  %v6233_v42 = vld [vmem:[#allocation4 + $0x1bd8] sm:$0xff]  ;;  %v6232_v16 = vld [vmem:[#allocation4 + $0x1bd0] sm:$0xff] }
 0x6eb   :  { %v6181_v60 = vld [vmem:[#allocation4 + $0x1a38] sm:$0xff]  ;;  %v10627_v30 = vrot.slane %v10266_v41, 4 }
 0x6ed   :  { %6081 = vmatpush1.bf16.msra.mxu1 %v5974_v22  ;;  %6122 = vmatpush1.bf16.msra.mxu0 %v5976_v63  ;;  %v6178_v22 = vld [vmem:[#allocation4 + $0x1a20] sm:$0xff]  ;;  %v6180_v63 = vld [vmem:[#allocation4 + $0x1a30] sm:$0xff] }
 0x6ee   :  { %6082 = vmatprep.subr.bf16.mxu1 %v5983_v19  ;;  %6123 = vmatprep.subr.bf16.mxu0 %v5985_v3  ;;  %v6187_v19 = vld [vmem:[#allocation4 + $0x1a68] sm:$0xff]  ;;  %v6189_v3 = vld [vmem:[#allocation4 + $0x1a78] sm:$0xff] }
 0x6f1   :  { %6083 = vmatpush1.bf16.msra.mxu1 %v5982_v49  ;;  %6124 = vmatpush1.bf16.msra.mxu0 %v5984_v39  ;;  %v6186_v49 = vld [vmem:[#allocation4 + $0x1a60] sm:$0xff]  ;;  %v6188_v39 = vld [vmem:[#allocation4 + $0x1a70] sm:$0xff] }
 0x6f2   :  { %6241 = vmatprep.subr.bf16.mxu1 %v6175_v7  ;;  %6282 = vmatprep.subr.bf16.mxu0 %v6177_v4  ;;  %v6197_v7 = vld [vmem:[#allocation4 + $0x1ab8] sm:$0xff]  ;;  %v6194_v4 = vld [vmem:[#allocation4 + $0x1aa0] sm:$0xff] }
 0x6f4   :  { %6101 = vmatmul.mubr.bf16.vlgmr.msra.gmra.mrb[180].mxu1 %v10266_v41  ;;  %6142 = vmatmul.mubr.bf16.vlgmr.msra.gmra.mrb[188].mxu0 %v10266_v41  ;;  %v6195_v41 = vld [vmem:[#allocation4 + $0x1aa8] sm:$0xff] }
 0x6f5   :  { %6242 = vmatpush1.bf16.msra.mxu1 %v6174_v23  ;;  %6283 = vmatpush1.bf16.msra.mxu0 %v6176_v58  ;;  %v6196_v23 = vld [vmem:[#allocation4 + $0x1ab0] sm:$0xff]  ;;  %v6203_v58 = vld [vmem:[#allocation4 + $0x1ae8] sm:$0xff] }
 0x6f6   :  { %6243 = vmatprep.subr.bf16.mxu1 %v6183_v18  ;;  %6284 = vmatprep.subr.bf16.mxu0 %v6185_v10  ;;  %v6205_v18 = vld [vmem:[#allocation4 + $0x1af8] sm:$0xff]  ;;  %v6202_v10 = vld [vmem:[#allocation4 + $0x1ae0] sm:$0xff] }
 0x6f7   :  { %6273 = vmatprep.mubr.bf16.mxu1 %v10952_v11  ;;  %6314 = vmatprep.mubr.bf16.mxu0 %v10952_v11 }
 0x6f9   :  { %6244 = vmatpush1.bf16.msra.mxu1 %v6182_v36  ;;  %6285 = vmatpush1.bf16.msra.mxu0 %v6184_v5  ;;  %v6204_v36 = vld [vmem:[#allocation4 + $0x1af0] sm:$0xff]  ;;  %v6211_v5 = vld [vmem:[#allocation4 + $0x1b28] sm:$0xff] }
 0x6fa   :  { %6245 = vmatprep.subr.bf16.mxu1 %v6191_v17  ;;  %6286 = vmatprep.subr.bf16.mxu0 %v6193_v47  ;;  %v6213_v17 = vld [vmem:[#allocation4 + $0x1b38] sm:$0xff]  ;;  %v6210_v47 = vld [vmem:[#allocation4 + $0x1b20] sm:$0xff] }
 0x6fd   :  { %6246 = vmatpush1.bf16.msra.mxu1 %v6190_v8  ;;  %6287 = vmatpush1.bf16.msra.mxu0 %v6192_v15  ;;  %v6212_v8 = vld [vmem:[#allocation4 + $0x1b30] sm:$0xff]  ;;  %v6219_v15 = vld [vmem:[#allocation4 + $0x1b68] sm:$0xff] }
 0x6fe   :  { %6247 = vmatprep.subr.bf16.mxu1 %v6199_v52  ;;  %6288 = vmatprep.subr.bf16.mxu0 %v6201_v13  ;;  %v6221_v52 = vld [vmem:[#allocation4 + $0x1b78] sm:$0xff]  ;;  %v6218_v13 = vld [vmem:[#allocation4 + $0x1b60] sm:$0xff] }
 0x701   :  { %6248 = vmatpush1.bf16.msra.mxu1 %v6198_v2  ;;  %6289 = vmatpush1.bf16.msra.mxu0 %v6200_v26  ;;  %v6220_v2 = vld [vmem:[#allocation4 + $0x1b70] sm:$0xff] }
 0x702   :  { %6249 = vmatprep.subr.bf16.mxu1 %v6207_v48  ;;  %6290 = vmatprep.subr.bf16.mxu0 %v6209_v24  ;;  %v6227_v24 = vld [vmem:[#allocation4 + $0x1ba8] sm:$0xff] }
 0x705   :  { %6250 = vmatpush1.bf16.msra.mxu1 %v6206_v35  ;;  %6291 = vmatpush1.bf16.msra.mxu0 %v6208_v57  ;;  %v6229_v35 = vld [vmem:[#allocation4 + $0x1bb8] sm:$0xff] }
 0x706   :  { %6251 = vmatprep.subr.bf16.mxu1 %v6215_v21  ;;  %6292 = vmatprep.subr.bf16.mxu0 %v6217_v29 }
 0x707   :  { %v5343_v40 = vpop.f32.mrb[156].mxu1  ;;  %v5384_v31 = vpop.f32.mrb[164].mxu0 }
 0x708   :  { %v10615_v1 = vadd.f32 %v5343_v40, %v10583_v6  ;;  %v10618_v45 = vadd.f32 %v5384_v31, %v10586_v14  ;;  %v5345_v55 = vpop.f32.mrb[157].mxu1  ;;  %v5386_v43 = vpop.f32.mrb[165].mxu0  ;;  %v6222_v6 = vld [vmem:[#allocation4 + $0x1b80] sm:$0xff]  ;;  %v6231_v14 = vld [vmem:[#allocation4 + $0x1bc8] sm:$0xff] }
 0x709   :  { %v10621_v20 = vadd.f32 %v5345_v55, %v10589_v51  ;;  %v10624_v25 = vadd.f32 %v5386_v43, %v10592_v37  ;;  %v5347_v56 = vpop.f32.mrb[158].mxu1  ;;  %v5388_v32 = vpop.f32.mrb[166].mxu0  ;;  %6252 = vmatpush1.bf16.msra.mxu1 %v6214_v44  ;;  %6293 = vmatpush1.bf16.msra.mxu0 %v6216_v53  ;;  %v6230_v51 = vld [vmem:[#allocation4 + $0x1bc0] sm:$0xff]  ;;  %v6179_v37 = vld [vmem:[#allocation4 + $0x1a28] sm:$0xff]  ;;  %v6228_v43 = vld [vmem:[#allocation4 + $0x1bb0] sm:$0xff] }
 0x70a   :  { %v5348_v27 = vpop.f32.mrb[159].mxu1  ;;  %v5389_v62 = vpop.f32.mrb[167].mxu0  ;;  %6253 = vmatprep.subr.bf16.mxu1 %v6223_v50  ;;  %6294 = vmatprep.subr.bf16.mxu0 %v6225_v61  ;;  %v6237_v56 = vld [vmem:[#allocation4 + $0x1bf8] sm:$0xff]  ;;  %v6236_v32 = vld [vmem:[#allocation4 + $0x1bf0] sm:$0xff] }
 0x70b   :  { %v6432_v27 = vld [vmem:[#allocation4 + $0x1c18] sm:$0xff]  ;;  %v6429_v62 = vld [vmem:[#allocation4 + $0x1c00] sm:$0xff] }
 0x70d   :  { %6254 = vmatpush1.bf16.msra.mxu1 %v6222_v6  ;;  %6295 = vmatpush1.bf16.msra.mxu0 %v6224_v46  ;;  %v6431_v6 = vld [vmem:[#allocation4 + $0x1c10] sm:$0xff]  ;;  %v6438_v46 = vld [vmem:[#allocation4 + $0x1c48] sm:$0xff] }
 0x70e   :  { %6255 = vmatprep.subr.bf16.mxu1 %v6231_v14  ;;  %6296 = vmatprep.subr.bf16.mxu0 %v6233_v42  ;;  %v6440_v14 = vld [vmem:[#allocation4 + $0x1c58] sm:$0xff]  ;;  %v6437_v42 = vld [vmem:[#allocation4 + $0x1c40] sm:$0xff] }
 0x711   :  { %6256 = vmatpush1.bf16.msra.mxu1 %v6230_v51  ;;  %6297 = vmatpush1.bf16.msra.mxu0 %v6232_v16  ;;  %v6439_v51 = vld [vmem:[#allocation4 + $0x1c50] sm:$0xff]  ;;  %v6446_v16 = vld [vmem:[#allocation4 + $0x1c88] sm:$0xff] }
 0x712   :  { %6323 = vmatprep.subr.bf16.mxu1 %v6179_v37  ;;  %6364 = vmatprep.subr.bf16.mxu0 %v6181_v60  ;;  %v6448_v37 = vld [vmem:[#allocation4 + $0x1c98] sm:$0xff]  ;;  %v6445_v60 = vld [vmem:[#allocation4 + $0x1c80] sm:$0xff] }
 0x714   :  { %6274 = vmatmul.mubr.bf16.vlgmr.msra.gmra.mrb[184].mxu1 %v10627_v30  ;;  %6315 = vmatmul.mubr.bf16.vlgmr.msra.gmra.mrb[192].mxu0 %v10627_v30 }
 0x715   :  { %6324 = vmatpush1.bf16.msra.mxu1 %v6178_v22  ;;  %6365 = vmatpush1.bf16.msra.mxu0 %v6180_v63  ;;  %v6447_v22 = vld [vmem:[#allocation4 + $0x1c90] sm:$0xff]  ;;  %v6454_v63 = vld [vmem:[#allocation4 + $0x1cc8] sm:$0xff] }
 0x716   :  { %6325 = vmatprep.subr.bf16.mxu1 %v6187_v19  ;;  %6366 = vmatprep.subr.bf16.mxu0 %v6189_v3  ;;  %v6453_v19 = vld [vmem:[#allocation4 + $0x1cc0] sm:$0xff]  ;;  %v6455_v3 = vld [vmem:[#allocation4 + $0x1cd0] sm:$0xff] }
 0x717   :  { %6355 = vmatprep.mubr.bf16.mxu1 %v10952_v11  ;;  %6396 = vmatprep.mubr.bf16.mxu0 %v10952_v11 }
 0x719   :  { %6326 = vmatpush1.bf16.msra.mxu1 %v6186_v49  ;;  %6367 = vmatpush1.bf16.msra.mxu0 %v6188_v39  ;;  %v6462_v49 = vld [vmem:[#allocation4 + $0x1d08] sm:$0xff]  ;;  %v6464_v39 = vld [vmem:[#allocation4 + $0x1d18] sm:$0xff] }
 0x71a   :  { %6327 = vmatprep.subr.bf16.mxu1 %v6195_v41  ;;  %6368 = vmatprep.subr.bf16.mxu0 %v6197_v7  ;;  %v6461_v41 = vld [vmem:[#allocation4 + $0x1d00] sm:$0xff]  ;;  %v6463_v7 = vld [vmem:[#allocation4 + $0x1d10] sm:$0xff] }
 0x71d   :  { %6328 = vmatpush1.bf16.msra.mxu1 %v6194_v4  ;;  %6369 = vmatpush1.bf16.msra.mxu0 %v6196_v23  ;;  %v6470_v4 = vld [vmem:[#allocation4 + $0x1d48] sm:$0xff]  ;;  %v6472_v23 = vld [vmem:[#allocation4 + $0x1d58] sm:$0xff] }
 0x71e   :  { %6329 = vmatprep.subr.bf16.mxu1 %v6203_v58  ;;  %6370 = vmatprep.subr.bf16.mxu0 %v6205_v18  ;;  %v6469_v58 = vld [vmem:[#allocation4 + $0x1d40] sm:$0xff]  ;;  %v6471_v18 = vld [vmem:[#allocation4 + $0x1d50] sm:$0xff] }
 0x721   :  { %6330 = vmatpush1.bf16.msra.mxu1 %v6202_v10  ;;  %6371 = vmatpush1.bf16.msra.mxu0 %v6204_v36 }
 0x722   :  { %6331 = vmatprep.subr.bf16.mxu1 %v6211_v5  ;;  %6372 = vmatprep.subr.bf16.mxu0 %v6213_v17  ;;  %v6478_v5 = vld [vmem:[#allocation4 + $0x1d88] sm:$0xff]  ;;  %v6480_v17 = vld [vmem:[#allocation4 + $0x1d98] sm:$0xff] }
 0x725   :  { %6332 = vmatpush1.bf16.msra.mxu1 %v6210_v47  ;;  %6373 = vmatpush1.bf16.msra.mxu0 %v6212_v8 }
 0x726   :  { %6333 = vmatprep.subr.bf16.mxu1 %v6219_v15  ;;  %6374 = vmatprep.subr.bf16.mxu0 %v6221_v52 }
 0x727   :  { %v5513_v26 = vpop.f32.mrb[160].mxu1  ;;  %v5554_v48 = vpop.f32.mrb[168].mxu0 }
 0x728   :  { %v10634_v57 = vadd.f32 %v5513_v26, %v10599_v28  ;;  %v10637_v21 = vadd.f32 %v5554_v48, %v10602_v9  ;;  %v5515_v29 = vpop.f32.mrb[161].mxu1  ;;  %v5556_v44 = vpop.f32.mrb[169].mxu0  ;;  %v6226_v28 = vld [vmem:[#allocation4 + $0x1ba0] sm:$0xff]  ;;  %v6235_v9 = vld [vmem:[#allocation4 + $0x1be8] sm:$0xff] }
 0x729   :  { %v10640_v53 = vadd.f32 %v5515_v29, %v10605_v59  ;;  %v10643_v40 = vadd.f32 %v5556_v44, %v10608_v0  ;;  %v5517_v31 = vpop.f32.mrb[162].mxu1  ;;  %v5558_v50 = vpop.f32.mrb[170].mxu0  ;;  %6334 = vmatpush1.bf16.msra.mxu1 %v6218_v13  ;;  %6375 = vmatpush1.bf16.msra.mxu0 %v6220_v2  ;;  %v6234_v59 = vld [vmem:[#allocation4 + $0x1be0] sm:$0xff]  ;;  %v6430_v0 = vld [vmem:[#allocation4 + $0x1c08] sm:$0xff]  ;;  %v6479_v29 = vld [vmem:[#allocation4 + $0x1d90] sm:$0xff] }
 0x72a   :  { %v5518_v61 = vpop.f32.mrb[163].mxu1  ;;  %v5559_v55 = vpop.f32.mrb[171].mxu0  ;;  %6335 = vmatprep.subr.bf16.mxu1 %v6227_v24  ;;  %6376 = vmatprep.subr.bf16.mxu0 %v6229_v35  ;;  %v6488_v44 = vld [vmem:[#allocation4 + $0x1dd8] sm:$0xff]  ;;  %v6487_v31 = vld [vmem:[#allocation4 + $0x1dd0] sm:$0xff] }
 0x72b   :  { %v6436_v50 = vld [vmem:[#allocation4 + $0x1c38] sm:$0xff]  ;;  %v6433_v61 = vld [vmem:[#allocation4 + $0x1c20] sm:$0xff]  ;;  %v6435_v55 = vld [vmem:[#allocation4 + $0x1c30] sm:$0xff] }
 0x72d   :  { %6336 = vmatpush1.bf16.msra.mxu1 %v6226_v28  ;;  %6377 = vmatpush1.bf16.msra.mxu0 %v6228_v43  ;;  %v6442_v28 = vld [vmem:[#allocation4 + $0x1c68] sm:$0xff]  ;;  %v6444_v43 = vld [vmem:[#allocation4 + $0x1c78] sm:$0xff] }
 0x72e   :  { %6337 = vmatprep.subr.bf16.mxu1 %v6235_v9  ;;  %6378 = vmatprep.subr.bf16.mxu0 %v6237_v56  ;;  %v6441_v9 = vld [vmem:[#allocation4 + $0x1c60] sm:$0xff]  ;;  %v6443_v56 = vld [vmem:[#allocation4 + $0x1c70] sm:$0xff] }
 0x731   :  { %6338 = vmatpush1.bf16.msra.mxu1 %v6234_v59  ;;  %6379 = vmatpush1.bf16.msra.mxu0 %v6236_v32  ;;  %v6450_v59 = vld [vmem:[#allocation4 + $0x1ca8] sm:$0xff]  ;;  %v6452_v32 = vld [vmem:[#allocation4 + $0x1cb8] sm:$0xff] }
 0x732   :  { %6493 = vmatprep.subr.bf16.mxu1 %v6430_v0  ;;  %6534 = vmatprep.subr.bf16.mxu0 %v6432_v27  ;;  %v6449_v0 = vld [vmem:[#allocation4 + $0x1ca0] sm:$0xff]  ;;  %v6451_v27 = vld [vmem:[#allocation4 + $0x1cb0] sm:$0xff] }
 0x734   :  { %6356 = vmatmul.mubr.bf16.vlgmr.msra.gmra.mrb[188].mxu1 %v10627_v30  ;;  %6397 = vmatmul.mubr.bf16.vlgmr.msra.gmra.mrb[196].mxu0 %v10627_v30  ;;  %v6456_v30 = vld [vmem:[#allocation4 + $0x1cd8] sm:$0xff] }
 0x735   :  { %6494 = vmatpush1.bf16.msra.mxu1 %v6429_v62  ;;  %6535 = vmatpush1.bf16.msra.mxu0 %v6431_v6  ;;  %v6458_v62 = vld [vmem:[#allocation4 + $0x1ce8] sm:$0xff]  ;;  %v6460_v6 = vld [vmem:[#allocation4 + $0x1cf8] sm:$0xff] }
 0x736   :  { %6495 = vmatprep.subr.bf16.mxu1 %v6438_v46  ;;  %6536 = vmatprep.subr.bf16.mxu0 %v6440_v14  ;;  %v6457_v46 = vld [vmem:[#allocation4 + $0x1ce0] sm:$0xff]  ;;  %v6459_v14 = vld [vmem:[#allocation4 + $0x1cf0] sm:$0xff] }
 0x737   :  { %6525 = vmatprep.mubr.bf16.mxu1 %v10952_v11  ;;  %6566 = vmatprep.mubr.bf16.mxu0 %v10952_v11 }
 0x739   :  { %6496 = vmatpush1.bf16.msra.mxu1 %v6437_v42  ;;  %6537 = vmatpush1.bf16.msra.mxu0 %v6439_v51  ;;  %v6466_v42 = vld [vmem:[#allocation4 + $0x1d28] sm:$0xff]  ;;  %v6468_v51 = vld [vmem:[#allocation4 + $0x1d38] sm:$0xff] }
 0x73a   :  { %6497 = vmatprep.subr.bf16.mxu1 %v6446_v16  ;;  %6538 = vmatprep.subr.bf16.mxu0 %v6448_v37  ;;  %v6465_v16 = vld [vmem:[#allocation4 + $0x1d20] sm:$0xff]  ;;  %v6467_v37 = vld [vmem:[#allocation4 + $0x1d30] sm:$0xff] }
 0x73d   :  { %6498 = vmatpush1.bf16.msra.mxu1 %v6445_v60  ;;  %6539 = vmatpush1.bf16.msra.mxu0 %v6447_v22  ;;  %v6474_v60 = vld [vmem:[#allocation4 + $0x1d68] sm:$0xff]  ;;  %v6476_v22 = vld [vmem:[#allocation4 + $0x1d78] sm:$0xff] }
 0x73e   :  { %6499 = vmatprep.subr.bf16.mxu1 %v6454_v63  ;;  %6540 = vmatprep.subr.bf16.mxu0 %v6456_v30  ;;  %v6473_v63 = vld [vmem:[#allocation4 + $0x1d60] sm:$0xff]  ;;  %v6475_v30 = vld [vmem:[#allocation4 + $0x1d70] sm:$0xff] }
 0x741   :  { %6500 = vmatpush1.bf16.msra.mxu1 %v6453_v19  ;;  %6541 = vmatpush1.bf16.msra.mxu0 %v6455_v3 }
 0x742   :  { %6501 = vmatprep.subr.bf16.mxu1 %v6462_v49  ;;  %6542 = vmatprep.subr.bf16.mxu0 %v6464_v39  ;;  %v6482_v49 = vld [vmem:[#allocation4 + $0x1da8] sm:$0xff]  ;;  %v6484_v39 = vld [vmem:[#allocation4 + $0x1db8] sm:$0xff] }
 0x745   :  { %6502 = vmatpush1.bf16.msra.mxu1 %v6461_v41  ;;  %6543 = vmatpush1.bf16.msra.mxu0 %v6463_v7 }
 0x746   :  { %6503 = vmatprep.subr.bf16.mxu1 %v6470_v4  ;;  %6544 = vmatprep.subr.bf16.mxu0 %v6472_v23 }
 0x747   :  { %v5595_v10 = vpop.f32.mrb[164].mxu1  ;;  %v5636_v36 = vpop.f32.mrb[172].mxu0 }
 0x748   :  { %v10650_v47 = vadd.f32 %v5595_v10, %v10615_v1  ;;  %v10653_v8 = vadd.f32 %v5636_v36, %v10618_v45  ;;  %v5597_v15 = vpop.f32.mrb[165].mxu1  ;;  %v5638_v52 = vpop.f32.mrb[173].mxu0  ;;  %v6477_v1 = vld [vmem:[#allocation4 + $0x1d80] sm:$0xff]  ;;  %v6486_v45 = vld [vmem:[#allocation4 + $0x1dc8] sm:$0xff] }
 0x749   :  { %v10656_v13 = vadd.f32 %v5597_v15, %v10621_v20  ;;  %v10659_v2 = vadd.f32 %v5638_v52, %v10624_v25  ;;  %v5599_v26 = vpop.f32.mrb[166].mxu1  ;;  %v5640_v48 = vpop.f32.mrb[174].mxu0  ;;  %6504 = vmatpush1.bf16.msra.mxu1 %v6469_v58  ;;  %6545 = vmatpush1.bf16.msra.mxu0 %v6471_v18  ;;  %v6485_v20 = vld [vmem:[#allocation4 + $0x1dc0] sm:$0xff]  ;;  %v6434_v25 = vld [vmem:[#allocation4 + $0x1c28] sm:$0xff]  ;;  %v6483_v15 = vld [vmem:[#allocation4 + $0x1db0] sm:$0xff] }
 0x74a   :  { %v5600_v24 = vpop.f32.mrb[167].mxu1  ;;  %v5641_v35 = vpop.f32.mrb[175].mxu0  ;;  %6505 = vmatprep.subr.bf16.mxu1 %v6478_v5  ;;  %6546 = vmatprep.subr.bf16.mxu0 %v6480_v17  ;;  %v6492_v52 = vld [vmem:[#allocation4 + $0x1df8] sm:$0xff]  ;;  %v6491_v26 = vld [vmem:[#allocation4 + $0x1df0] sm:$0xff] }
 0x74b   :  { %v6684_v48 = vld [vmem:[#allocation4 + $0x1e18] sm:$0xff]  ;;  %v6681_v24 = vld [vmem:[#allocation4 + $0x1e00] sm:$0xff]  ;;  %v6683_v35 = vld [vmem:[#allocation4 + $0x1e10] sm:$0xff] }
 0x74d   :  { %6506 = vmatpush1.bf16.msra.mxu1 %v6477_v1  ;;  %6547 = vmatpush1.bf16.msra.mxu0 %v6479_v29  ;;  %v6690_v1 = vld [vmem:[#allocation4 + $0x1e48] sm:$0xff]  ;;  %v6692_v29 = vld [vmem:[#allocation4 + $0x1e58] sm:$0xff] }
 0x74e   :  { %6507 = vmatprep.subr.bf16.mxu1 %v6486_v45  ;;  %6548 = vmatprep.subr.bf16.mxu0 %v6488_v44  ;;  %v6689_v45 = vld [vmem:[#allocation4 + $0x1e40] sm:$0xff]  ;;  %v6691_v44 = vld [vmem:[#allocation4 + $0x1e50] sm:$0xff] }
 0x751   :  { %6508 = vmatpush1.bf16.msra.mxu1 %v6485_v20  ;;  %6549 = vmatpush1.bf16.msra.mxu0 %v6487_v31  ;;  %v6698_v20 = vld [vmem:[#allocation4 + $0x1e88] sm:$0xff]  ;;  %v6700_v31 = vld [vmem:[#allocation4 + $0x1e98] sm:$0xff] }
 0x752   :  { %6575 = vmatprep.subr.bf16.mxu1 %v6434_v25  ;;  %6616 = vmatprep.subr.bf16.mxu0 %v6436_v50  ;;  %v6697_v25 = vld [vmem:[#allocation4 + $0x1e80] sm:$0xff]  ;;  %v6699_v50 = vld [vmem:[#allocation4 + $0x1e90] sm:$0xff] }
 0x754   :  { %6526 = vmatmul.mubr.bf16.vlgmr.msra.gmra.mrb[192].mxu1 %v10268_v12  ;;  %6567 = vmatmul.mubr.bf16.vlgmr.msra.gmra.mrb[200].mxu0 %v10268_v12 }
 0x755   :  { %6576 = vmatpush1.bf16.msra.mxu1 %v6433_v61  ;;  %6617 = vmatpush1.bf16.msra.mxu0 %v6435_v55  ;;  %v6706_v61 = vld [vmem:[#allocation4 + $0x1ec8] sm:$0xff]  ;;  %v6708_v55 = vld [vmem:[#allocation4 + $0x1ed8] sm:$0xff] }
 0x756   :  { %6577 = vmatprep.subr.bf16.mxu1 %v6442_v28  ;;  %6618 = vmatprep.subr.bf16.mxu0 %v6444_v43  ;;  %v6705_v28 = vld [vmem:[#allocation4 + $0x1ec0] sm:$0xff]  ;;  %v6707_v43 = vld [vmem:[#allocation4 + $0x1ed0] sm:$0xff] }
 0x757   :  { %6607 = vmatprep.mubr.bf16.mxu1 %v10952_v11  ;;  %6648 = vmatprep.mubr.bf16.mxu0 %v10952_v11 }
 0x759   :  { %6578 = vmatpush1.bf16.msra.mxu1 %v6441_v9  ;;  %6619 = vmatpush1.bf16.msra.mxu0 %v6443_v56  ;;  %v6714_v9 = vld [vmem:[#allocation4 + $0x1f08] sm:$0xff]  ;;  %v6716_v56 = vld [vmem:[#allocation4 + $0x1f18] sm:$0xff] }
 0x75a   :  { %6579 = vmatprep.subr.bf16.mxu1 %v6450_v59  ;;  %6620 = vmatprep.subr.bf16.mxu0 %v6452_v32  ;;  %v6713_v59 = vld [vmem:[#allocation4 + $0x1f00] sm:$0xff]  ;;  %v6715_v32 = vld [vmem:[#allocation4 + $0x1f10] sm:$0xff] }
 0x75d   :  { %6580 = vmatpush1.bf16.msra.mxu1 %v6449_v0  ;;  %6621 = vmatpush1.bf16.msra.mxu0 %v6451_v27  ;;  %v6722_v0 = vld [vmem:[#allocation4 + $0x1f48] sm:$0xff]  ;;  %v6724_v27 = vld [vmem:[#allocation4 + $0x1f58] sm:$0xff] }
 0x75e   :  { %6581 = vmatprep.subr.bf16.mxu1 %v6458_v62  ;;  %6622 = vmatprep.subr.bf16.mxu0 %v6460_v6  ;;  %v6721_v62 = vld [vmem:[#allocation4 + $0x1f40] sm:$0xff]  ;;  %v6723_v6 = vld [vmem:[#allocation4 + $0x1f50] sm:$0xff] }
 0x761   :  { %6582 = vmatpush1.bf16.msra.mxu1 %v6457_v46  ;;  %6623 = vmatpush1.bf16.msra.mxu0 %v6459_v14 }
 0x762   :  { %6583 = vmatprep.subr.bf16.mxu1 %v6466_v42  ;;  %6624 = vmatprep.subr.bf16.mxu0 %v6468_v51  ;;  %v6730_v42 = vld [vmem:[#allocation4 + $0x1f88] sm:$0xff]  ;;  %v6732_v51 = vld [vmem:[#allocation4 + $0x1f98] sm:$0xff] }
 0x765   :  { %6584 = vmatpush1.bf16.msra.mxu1 %v6465_v16  ;;  %6625 = vmatpush1.bf16.msra.mxu0 %v6467_v37 }
 0x766   :  { %6585 = vmatprep.subr.bf16.mxu1 %v6474_v60  ;;  %6626 = vmatprep.subr.bf16.mxu0 %v6476_v22 }
 0x767   :  { %v5768_v19 = vpop.f32.mrb[168].mxu1  ;;  %v5809_v3 = vpop.f32.mrb[176].mxu0 }
 0x768   :  { %v10666_v41 = vadd.f32 %v5768_v19, %v10634_v57  ;;  %v10669_v7 = vadd.f32 %v5809_v3, %v10637_v21  ;;  %v5770_v4 = vpop.f32.mrb[169].mxu1  ;;  %v5811_v23 = vpop.f32.mrb[177].mxu0  ;;  %v6481_v57 = vld [vmem:[#allocation4 + $0x1da0] sm:$0xff]  ;;  %v6490_v21 = vld [vmem:[#allocation4 + $0x1de8] sm:$0xff] }
 0x769   :  { %v10672_v58 = vadd.f32 %v5770_v4, %v10640_v53  ;;  %v10675_v18 = vadd.f32 %v5811_v23, %v10643_v40  ;;  %v5772_v10 = vpop.f32.mrb[170].mxu1  ;;  %v5813_v36 = vpop.f32.mrb[178].mxu0  ;;  %6586 = vmatpush1.bf16.msra.mxu1 %v6473_v63  ;;  %6627 = vmatpush1.bf16.msra.mxu0 %v6475_v30  ;;  %v6489_v53 = vld [vmem:[#allocation4 + $0x1de0] sm:$0xff]  ;;  %v6682_v40 = vld [vmem:[#allocation4 + $0x1e08] sm:$0xff]  ;;  %v6731_v4 = vld [vmem:[#allocation4 + $0x1f90] sm:$0xff] }
 0x76a   :  { %v5773_v5 = vpop.f32.mrb[171].mxu1  ;;  %v5814_v17 = vpop.f32.mrb[179].mxu0  ;;  %6587 = vmatprep.subr.bf16.mxu1 %v6482_v49  ;;  %6628 = vmatprep.subr.bf16.mxu0 %v6484_v39  ;;  %v6740_v23 = vld [vmem:[#allocation4 + $0x1fd8] sm:$0xff]  ;;  %v6739_v10 = vld [vmem:[#allocation4 + $0x1fd0] sm:$0xff] }
 0x76b   :  { %v6688_v36 = vld [vmem:[#allocation4 + $0x1e38] sm:$0xff]  ;;  %v10694_v5 = vrot.slane %v10268_v12, 4  ;;  %v6685_v17 = vld [vmem:[#allocation4 + $0x1e20] sm:$0xff] }
 0x76d   :  { %6588 = vmatpush1.bf16.msra.mxu1 %v6481_v57  ;;  %6629 = vmatpush1.bf16.msra.mxu0 %v6483_v15  ;;  %v6687_v57 = vld [vmem:[#allocation4 + $0x1e30] sm:$0xff]  ;;  %v6694_v15 = vld [vmem:[#allocation4 + $0x1e68] sm:$0xff] }
 0x76e   :  { %6589 = vmatprep.subr.bf16.mxu1 %v6490_v21  ;;  %6630 = vmatprep.subr.bf16.mxu0 %v6492_v52  ;;  %v6696_v21 = vld [vmem:[#allocation4 + $0x1e78] sm:$0xff]  ;;  %v6693_v52 = vld [vmem:[#allocation4 + $0x1e60] sm:$0xff] }
 0x771   :  { %6590 = vmatpush1.bf16.msra.mxu1 %v6489_v53  ;;  %6631 = vmatpush1.bf16.msra.mxu0 %v6491_v26  ;;  %v6695_v53 = vld [vmem:[#allocation4 + $0x1e70] sm:$0xff]  ;;  %v6704_v26 = vld [vmem:[#allocation4 + $0x1eb8] sm:$0xff] }
 0x772   :  { %6748 = vmatprep.subr.bf16.mxu1 %v6682_v40  ;;  %6789 = vmatprep.subr.bf16.mxu0 %v6684_v48  ;;  %v6701_v40 = vld [vmem:[#allocation4 + $0x1ea0] sm:$0xff]  ;;  %v6703_v48 = vld [vmem:[#allocation4 + $0x1eb0] sm:$0xff] }
 0x774   :  { %6608 = vmatmul.mubr.bf16.vlgmr.msra.gmra.mrb[196].mxu1 %v10268_v12  ;;  %6649 = vmatmul.mubr.bf16.vlgmr.msra.gmra.mrb[204].mxu0 %v10268_v12  ;;  %v6702_v12 = vld [vmem:[#allocation4 + $0x1ea8] sm:$0xff] }
 0x775   :  { %6749 = vmatpush1.bf16.msra.mxu1 %v6681_v24  ;;  %6790 = vmatpush1.bf16.msra.mxu0 %v6683_v35  ;;  %v6710_v24 = vld [vmem:[#allocation4 + $0x1ee8] sm:$0xff]  ;;  %v6712_v35 = vld [vmem:[#allocation4 + $0x1ef8] sm:$0xff] }
 0x776   :  { %6750 = vmatprep.subr.bf16.mxu1 %v6690_v1  ;;  %6791 = vmatprep.subr.bf16.mxu0 %v6692_v29  ;;  %v6709_v1 = vld [vmem:[#allocation4 + $0x1ee0] sm:$0xff]  ;;  %v6711_v29 = vld [vmem:[#allocation4 + $0x1ef0] sm:$0xff] }
 0x777   :  { %6780 = vmatprep.mubr.bf16.mxu1 %v10952_v11  ;;  %6821 = vmatprep.mubr.bf16.mxu0 %v10952_v11 }
 0x779   :  { %6751 = vmatpush1.bf16.msra.mxu1 %v6689_v45  ;;  %6792 = vmatpush1.bf16.msra.mxu0 %v6691_v44  ;;  %v6718_v45 = vld [vmem:[#allocation4 + $0x1f28] sm:$0xff]  ;;  %v6720_v44 = vld [vmem:[#allocation4 + $0x1f38] sm:$0xff] }
 0x77a   :  { %6752 = vmatprep.subr.bf16.mxu1 %v6698_v20  ;;  %6793 = vmatprep.subr.bf16.mxu0 %v6700_v31  ;;  %v6719_v20 = vld [vmem:[#allocation4 + $0x1f30] sm:$0xff]  ;;  %v6726_v31 = vld [vmem:[#allocation4 + $0x1f68] sm:$0xff] }
 0x77d   :  { %6753 = vmatpush1.bf16.msra.mxu1 %v6697_v25  ;;  %6794 = vmatpush1.bf16.msra.mxu0 %v6699_v50  ;;  %v6728_v25 = vld [vmem:[#allocation4 + $0x1f78] sm:$0xff]  ;;  %v6725_v50 = vld [vmem:[#allocation4 + $0x1f60] sm:$0xff] }
 0x77e   :  { %6754 = vmatprep.subr.bf16.mxu1 %v6706_v61  ;;  %6795 = vmatprep.subr.bf16.mxu0 %v6708_v55  ;;  %v6727_v61 = vld [vmem:[#allocation4 + $0x1f70] sm:$0xff] }
 0x781   :  { %6755 = vmatpush1.bf16.msra.mxu1 %v6705_v28  ;;  %6796 = vmatpush1.bf16.msra.mxu0 %v6707_v43  ;;  %v6734_v43 = vld [vmem:[#allocation4 + $0x1fa8] sm:$0xff] }
 0x782   :  { %6756 = vmatprep.subr.bf16.mxu1 %v6714_v9  ;;  %6797 = vmatprep.subr.bf16.mxu0 %v6716_v56  ;;  %v6736_v9 = vld [vmem:[#allocation4 + $0x1fb8] sm:$0xff] }
 0x785   :  { %6757 = vmatpush1.bf16.msra.mxu1 %v6713_v59  ;;  %6798 = vmatpush1.bf16.msra.mxu0 %v6715_v32 }
 0x786   :  { %6758 = vmatprep.subr.bf16.mxu1 %v6722_v0  ;;  %6799 = vmatprep.subr.bf16.mxu0 %v6724_v27 }
 0x787   :  { %v5850_v46 = vpop.f32.mrb[172].mxu1  ;;  %v5891_v14 = vpop.f32.mrb[180].mxu0 }
 0x788   :  { %v10682_v16 = vadd.f32 %v5850_v46, %v10650_v47  ;;  %v10685_v37 = vadd.f32 %v5891_v14, %v10653_v8  ;;  %v5852_v60 = vpop.f32.mrb[173].mxu1  ;;  %v5893_v22 = vpop.f32.mrb[181].mxu0  ;;  %v6729_v47 = vld [vmem:[#allocation4 + $0x1f80] sm:$0xff]  ;;  %v6738_v8 = vld [vmem:[#allocation4 + $0x1fc8] sm:$0xff] }
 0x789   :  { %v10688_v63 = vadd.f32 %v5852_v60, %v10656_v13  ;;  %v10691_v30 = vadd.f32 %v5893_v22, %v10659_v2  ;;  %v5854_v19 = vpop.f32.mrb[174].mxu1  ;;  %v5895_v3 = vpop.f32.mrb[182].mxu0  ;;  %6759 = vmatpush1.bf16.msra.mxu1 %v6721_v62  ;;  %6800 = vmatpush1.bf16.msra.mxu0 %v6723_v6  ;;  %v6737_v13 = vld [vmem:[#allocation4 + $0x1fc0] sm:$0xff]  ;;  %v6686_v2 = vld [vmem:[#allocation4 + $0x1e28] sm:$0xff]  ;;  %v6735_v60 = vld [vmem:[#allocation4 + $0x1fb0] sm:$0xff] }
 0x78a   :  { %v5855_v49 = vpop.f32.mrb[175].mxu1  ;;  %v5896_v39 = vpop.f32.mrb[183].mxu0  ;;  %6760 = vmatprep.subr.bf16.mxu1 %v6730_v42  ;;  %6801 = vmatprep.subr.bf16.mxu0 %v6732_v51  ;;  %v6733_v51 = vld [vmem:[#allocation4 + $0x1fa0] sm:$0xff]  ;;  %v6742_v22 = vld [vmem:[#allocation4 + $0x1fe8] sm:$0xff] }
 0x78d   :  { %6761 = vmatpush1.bf16.msra.mxu1 %v6729_v47  ;;  %6802 = vmatpush1.bf16.msra.mxu0 %v6731_v4 }
 0x78e   :  { %6762 = vmatprep.subr.bf16.mxu1 %v6738_v8  ;;  %6803 = vmatprep.subr.bf16.mxu0 %v6740_v23 }
 0x791   :  { %6763 = vmatpush1.bf16.msra.mxu1 %v6737_v13  ;;  %6804 = vmatpush1.bf16.msra.mxu0 %v6739_v10 }
 0x792   :  { %6830 = vmatprep.subr.bf16.mxu1 %v6686_v2  ;;  %6871 = vmatprep.subr.bf16.mxu0 %v6688_v36 }
 0x794   :  { %6781 = vmatmul.mubr.bf16.vlgmr.msra.gmra.mrb[200].mxu1 %v10694_v5  ;;  %6822 = vmatmul.mubr.bf16.vlgmr.msra.gmra.mrb[208].mxu0 %v10694_v5 }
 0x795   :  { %6831 = vmatpush1.bf16.msra.mxu1 %v6685_v17  ;;  %6872 = vmatpush1.bf16.msra.mxu0 %v6687_v57 }
 0x796   :  { %6832 = vmatprep.subr.bf16.mxu1 %v6694_v15  ;;  %6873 = vmatprep.subr.bf16.mxu0 %v6696_v21 }
 0x797   :  { %6862 = vmatprep.mubr.bf16.mxu1 %v10952_v11  ;;  %6903 = vmatprep.mubr.bf16.mxu0 %v10952_v11  ;;  %v6717_v11 = vld [vmem:[#allocation4 + $0x1f20] sm:$0xff] }
 0x799   :  { %6833 = vmatpush1.bf16.msra.mxu1 %v6693_v52  ;;  %6874 = vmatpush1.bf16.msra.mxu0 %v6695_v53 }
 0x79a   :  { %6834 = vmatprep.subr.bf16.mxu1 %v6702_v12  ;;  %6875 = vmatprep.subr.bf16.mxu0 %v6704_v26 }
 0x79d   :  { %6835 = vmatpush1.bf16.msra.mxu1 %v6701_v40  ;;  %6876 = vmatpush1.bf16.msra.mxu0 %v6703_v48 }
 0x79e   :  { %6836 = vmatprep.subr.bf16.mxu1 %v6710_v24  ;;  %6877 = vmatprep.subr.bf16.mxu0 %v6712_v35 }
 0x7a1   :  { %6837 = vmatpush1.bf16.msra.mxu1 %v6709_v1  ;;  %6878 = vmatpush1.bf16.msra.mxu0 %v6711_v29 }
 0x7a2   :  { %6838 = vmatprep.subr.bf16.mxu1 %v6718_v45  ;;  %6879 = vmatprep.subr.bf16.mxu0 %v6720_v44 }
 0x7a5   :  { %6839 = vmatpush1.bf16.msra.mxu1 %v6717_v11  ;;  %6880 = vmatpush1.bf16.msra.mxu0 %v6719_v20 }
 0x7a6   :  { %6840 = vmatprep.subr.bf16.mxu1 %v6726_v31  ;;  %6881 = vmatprep.subr.bf16.mxu0 %v6728_v25  ;;  %v8881_v31 = vld [vmem:[#allocation21 + $0x40] sm:$0xff]  }
 0x7a7   :  { %v6020_v55 = vpop.f32.mrb[176].mxu1  ;;  %v6061_v28 = vpop.f32.mrb[184].mxu0  ;;  %v8882_v25 = vld [vmem:[#allocation21 + $0xc0] sm:$0xff]  }
 0x7a8   :  { %v6150_v56 = vadd.f32 %v6020_v55, %v10666_v41  ;;  %v6152_v59 = vadd.f32 %v6061_v28, %v10669_v7  ;;  %v6022_v32 = vpop.f32.mrb[177].mxu1  ;;  %v6063_v0 = vpop.f32.mrb[185].mxu0  ;;  %v6744_v41 = vld [vmem:[#allocation4 + $0x1ff8] sm:$0xff]  ;;  %v6741_v7 = vld [vmem:[#allocation4 + $0x1fe0] sm:$0xff]  ;;  %v8885_v55 = vld [vmem:[#allocation21 + $0x48] sm:$0xff]  }
 0x7a9   :  { %v6151_v27 = vadd.f32 %v6022_v32, %v10672_v58  ;;  %v6153_v62 = vadd.f32 %v6063_v0, %v10675_v18  ;;  %v6024_v6 = vpop.f32.mrb[178].mxu1  ;;  %v6065_v46 = vpop.f32.mrb[186].mxu0  ;;  %6841 = vmatpush1.bf16.msra.mxu1 %v6725_v50  ;;  %6882 = vmatpush1.bf16.msra.mxu0 %v6727_v61  ;;  %v6743_v58 = vld [vmem:[#allocation4 + $0x1ff0] sm:$0xff]  ;;  %v8883_v50 = vld [vmem:[#allocation21] sm:$0xff]  }
 0x7aa   :  { %v6025_v14 = vpop.f32.mrb[179].mxu1  ;;  %v6066_v42 = vpop.f32.mrb[187].mxu0  ;;  %6842 = vmatprep.subr.bf16.mxu1 %v6734_v43  ;;  %6883 = vmatprep.subr.bf16.mxu0 %v6736_v9  ;;  %v8884_v61 = vld [vmem:[#allocation21 + $0x80] sm:$0xff]   ;;  %v8886_v28 = vld [vmem:[#allocation21 + $0xc8] sm:$0xff]   ;;  %v8891_v32 = vld [vmem:[#allocation21 + $0x10] sm:$0xff]  }
 0x7ab   :  { %v8887_v43 = vld [vmem:[#allocation21 + $0x8] sm:$0xff]   ;;  %v8892_v0 = vld [vmem:[#allocation21 + $0x90] sm:$0xff]   ;;  %v8895_v6 = vld [vmem:[#allocation21 + $0x18] sm:$0xff]  }
 0x7ac   :  { %v8888_v9 = vld [vmem:[#allocation21 + $0x88] sm:$0xff]   ;;  %v8896_v46 = vld [vmem:[#allocation21 + $0x98] sm:$0xff]   ;;  %v8897_v14 = vld [vmem:[#allocation21 + $0x60] sm:$0xff]  }
 0x7ad   :  { %6843 = vmatpush1.bf16.msra.mxu1 %v6733_v51  ;;  %6884 = vmatpush1.bf16.msra.mxu0 %v6735_v60  ;;  %v8898_v42 = vld [vmem:[#allocation21 + $0xe0] sm:$0xff]  }
 0x7ae   :  { %6844 = vmatprep.subr.bf16.mxu1 %v6742_v22  ;;  %6885 = vmatprep.subr.bf16.mxu0 %v6744_v41  ;;  %v8899_v51 = vld [vmem:[#allocation21 + $0x20] sm:$0xff]   ;;  %v8901_v22 = vld [vmem:[#allocation21 + $0x68] sm:$0xff]  }
 0x7af   :  { %v8900_v60 = vld [vmem:[#allocation21 + $0xa0] sm:$0xff]   ;;  %v8902_v41 = vld [vmem:[#allocation21 + $0xe8] sm:$0xff]  }
 0x7b1   :  { %6845 = vmatpush1.bf16.msra.mxu1 %v6741_v7  ;;  %6886 = vmatpush1.bf16.msra.mxu0 %v6743_v58  ;;  %v8903_v7 = vld [vmem:[#allocation21 + $0x28] sm:$0xff]  }
 0x7b2   :  { %8617 = vmatprep.subr.bf16.mxu1 %v8881_v31  ;;  %8639 = vmatprep.subr.bf16.mxu0 %v8882_v25  ;;  %v8904_v58 = vld [vmem:[#allocation21 + $0xa8] sm:$0xff]  }
 0x7b4   :  { %6863 = vmatmul.mubr.bf16.vlgmr.msra.gmra.mrb[204].mxu1 %v10694_v5  ;;  %6904 = vmatmul.mubr.bf16.vlgmr.msra.gmra.mrb[212].mxu0 %v10694_v5 }
 0x7b5   :  { %8618 = vmatpush3.bf16.msra.mxu1 %v8883_v50  ;;  %8640 = vmatpush3.bf16.msra.mxu0 %v8884_v61  ;;  %v10742_v50 = vld [vmem:[#allocation17] sm:$0xff] }
 0x7b6   :  { %8619 = vmatprep.subr.bf16.mxu1 %v8885_v55  ;;  %8641 = vmatprep.subr.bf16.mxu0 %v8886_v28  ;;  %v10953_v55 = vld [vmem:[#allocation33_spill] sm:$0xff]  ;;  %v10954_v28 = vld [vmem:[#allocation34_spill] sm:$0xff] }
 0x7b9   :  { %8620 = vmatpush3.bf16.msra.mxu1 %v8887_v43  ;;  %8642 = vmatpush3.bf16.msra.mxu0 %v8888_v9  ;;  %v6953_v43 = vrot.slane %v10742_v50, %v10954_v28 }
 0x7c7   :  { %v6102_v18 = vpop.f32.mrb[180].mxu1  ;;  %v6143_v19 = vpop.f32.mrb[188].mxu0 }
 0x7c8   :  { %v6154_v3 = vadd.f32 %v6102_v18, %v10682_v16  ;;  %v6156_v49 = vadd.f32 %v6143_v19, %v10685_v37  ;;  %v6104_v39 = vpop.f32.mrb[181].mxu1  ;;  %v6145_v47 = vpop.f32.mrb[189].mxu0  ;;  %v8905_v18 = vld [vmem:[#allocation21 + $0x70] sm:$0xff]  }
 0x7c9   :  { %v6155_v4 = vadd.f32 %v6104_v39, %v10688_v63  ;;  %v6157_v8 = vadd.f32 %v6145_v47, %v10691_v30  ;;  %v6106_v23 = vpop.f32.mrb[182].mxu1  ;;  %v6147_v13 = vpop.f32.mrb[190].mxu0  ;;  %v8906_v19 = vld [vmem:[#allocation21 + $0xf0] sm:$0xff]   ;;  %v8909_v39 = vld [vmem:[#allocation21 + $0x78] sm:$0xff]  }
 0x7ca   :  { %v6107_v10 = vpop.f32.mrb[183].mxu1  ;;  %v6148_v2 = vpop.f32.mrb[191].mxu0  ;;  %v8910_v47 = vld [vmem:[#allocation21 + $0xf8] sm:$0xff]  }
 0x7cb   :  { %v8911_v23 = vld [vmem:[#allocation21 + $0x38] sm:$0xff]  }
 0x7cc   :  { %v8912_v13 = vld [vmem:[#allocation21 + $0xb8] sm:$0xff]  }
 0x7e7   :  { %v6275_v36 = vpop.f32.mrb[184].mxu1  ;;  %v6316_v17 = vpop.f32.mrb[192].mxu0 }
 0x7e8   :  { %v10710_v57 = vadd.f32 %v6275_v36, %v6150_v56  ;;  %v10712_v5 = vadd.f32 %v6316_v17, %v6152_v59  ;;  %v6277_v15 = vpop.f32.mrb[185].mxu1  ;;  %v6318_v16 = vpop.f32.mrb[193].mxu0  ;;  %v8889_v56 = vld [vmem:[#allocation21 + $0x50] sm:$0xff]  }
 0x7e9   :  { %v10714_v21 = vadd.f32 %v6277_v15, %v6151_v27  ;;  %v10716_v37 = vadd.f32 %v6318_v16, %v6153_v62  ;;  %v6279_v52 = vpop.f32.mrb[186].mxu1  ;;  %v6320_v63 = vpop.f32.mrb[194].mxu0  ;;  %v8890_v59 = vld [vmem:[#allocation21 + $0xd0] sm:$0xff]   ;;  %8621 = vmatprep.subr.bf16.mxu1 %v8889_v56  ;;  %v8893_v27 = vld [vmem:[#allocation21 + $0x58] sm:$0xff]  }
 0x7ea   :  { %v6280_v53 = vpop.f32.mrb[187].mxu1  ;;  %v6321_v30 = vpop.f32.mrb[195].mxu0  ;;  %8643 = vmatprep.subr.bf16.mxu0 %v8890_v59  ;;  %8622 = vmatpush3.bf16.msra.mxu1 %v8891_v32  ;;  %v8894_v62 = vld [vmem:[#allocation21 + $0xd8] sm:$0xff]  }
 0x7eb   :  { %8644 = vmatpush3.bf16.msra.mxu0 %v8892_v0  ;;  %8623 = vmatprep.subr.bf16.mxu1 %v8893_v27  ;;  %v10754_v0 = vsel %vm6986_vm12, 1.0, %v9242_v54 }
 0x7ec   :  { %8645 = vmatprep.subr.bf16.mxu0 %v8894_v62 }
 0x7ee   :  { %8624 = vmatpush3.bf16.msra.mxu1 %v8895_v6 }
 0x7ef   :  { %8646 = vmatpush3.bf16.msra.mxu0 %v8896_v46  ;;  %8625 = vmatprep.subr.bf16.mxu1 %v8897_v14 }
 0x7f0   :  { %8647 = vmatprep.subr.bf16.mxu0 %v8898_v42 }
 0x7f2   :  { %8626 = vmatpush3.bf16.msra.mxu1 %v8899_v51 }
 0x7f3   :  { %8648 = vmatpush3.bf16.msra.mxu0 %v8900_v60  ;;  %8627 = vmatprep.subr.bf16.mxu1 %v8901_v22 }
 0x7f4   :  { %8649 = vmatprep.subr.bf16.mxu0 %v8902_v41 }
 0x7f6   :  { %8628 = vmatpush3.bf16.msra.mxu1 %v8903_v7 }
 0x7f7   :  { %8650 = vmatpush3.bf16.msra.mxu0 %v8904_v58  ;;  %8629 = vmatprep.subr.bf16.mxu1 %v8905_v18 }
 0x7f8   :  { %8651 = vmatprep.subr.bf16.mxu0 %v8906_v19 }
 0x807   :  { %v6357_v12 = vpop.f32.mrb[188].mxu1  ;;  %v6398_v26 = vpop.f32.mrb[196].mxu0 }
 0x808   :  { %v10718_v40 = vadd.f32 %v6357_v12, %v6154_v3  ;;  %v10720_v48 = vadd.f32 %v6398_v26, %v6156_v49  ;;  %v6359_v24 = vpop.f32.mrb[189].mxu1  ;;  %v6400_v35 = vpop.f32.mrb[197].mxu0  ;;  %v8907_v3 = vld [vmem:[#allocation21 + $0x30] sm:$0xff]   ;;  %v8913_v12 = vld [vmem:[#allocation21 + $0x140] sm:$0xff]  }
 0x809   :  { %v10722_v1 = vadd.f32 %v6359_v24, %v6155_v4  ;;  %v10724_v29 = vadd.f32 %v6400_v35, %v6157_v8  ;;  %v6361_v45 = vpop.f32.mrb[190].mxu1  ;;  %v6402_v44 = vpop.f32.mrb[198].mxu0  ;;  %v8908_v49 = vld [vmem:[#allocation21 + $0xb0] sm:$0xff]   ;;  %8630 = vmatpush3.bf16.msra.mxu1 %v8907_v3  ;;  %v8914_v26 = vld [vmem:[#allocation21 + $0x1c0] sm:$0xff]  }
 0x80a   :  { %v6362_v11 = vpop.f32.mrb[191].mxu1  ;;  %v6403_v20 = vpop.f32.mrb[199].mxu0  ;;  %8652 = vmatpush3.bf16.msra.mxu0 %v8908_v49  ;;  %8631 = vmatprep.subr.bf16.mxu1 %v8909_v39 }
 0x80b   :  { %8653 = vmatprep.subr.bf16.mxu0 %v8910_v47 }
 0x80d   :  { %8632 = vmatpush3.bf16.msra.mxu1 %v8911_v23 }
 0x80e   :  { %8654 = vmatpush3.bf16.msra.mxu0 %v8912_v13  ;;  %8661 = vmatprep.subr.bf16.mxu1 %v8913_v12 }
 0x80f   :  { %8683 = vmatprep.subr.bf16.mxu0 %v8914_v26 }
 0x827   :  { %v6527_v4 = vpop.f32.mrb[192].mxu1  ;;  %v6568_v8 = vpop.f32.mrb[200].mxu0 }
 0x828   :  { %v6657_v10 = vadd.f32 %v6527_v4, %v10710_v57  ;;  %v6659_v2 = vadd.f32 %v6568_v8, %v10712_v5  ;;  %v6529_v36 = vpop.f32.mrb[193].mxu1  ;;  %v6570_v17 = vpop.f32.mrb[201].mxu0 }
 0x829   :  { %v6658_v15 = vadd.f32 %v6529_v36, %v10714_v21  ;;  %v6660_v16 = vadd.f32 %v6570_v17, %v10716_v37  ;;  %v6531_v52 = vpop.f32.mrb[194].mxu1  ;;  %v6572_v63 = vpop.f32.mrb[202].mxu0 }
 0x82a   :  { %v6532_v53 = vpop.f32.mrb[195].mxu1  ;;  %v6573_v30 = vpop.f32.mrb[203].mxu0 }
 0x847   :  { %v6609_v57 = vpop.f32.mrb[196].mxu1  ;;  %v6650_v5 = vpop.f32.mrb[204].mxu0 }
 0x848   :  { %v10731_v24 = vadd.f32 %v6609_v57, %v10718_v40  ;;  %v10734_v35 = vadd.f32 %v6650_v5, %v10720_v48  ;;  %v6611_v21 = vpop.f32.mrb[197].mxu1  ;;  %v6652_v37 = vpop.f32.mrb[205].mxu0  ;;  %v6941_v40 = vrot.slane %v10742_v50, %v9501_v34  ;;  %v6949_v48 = vrot.slane %v10742_v50, %v9508_v38 }
 0x849   :  { %v10737_v45 = vadd.f32 %v6611_v21, %v10722_v1  ;;  %v10740_v44 = vadd.f32 %v6652_v37, %v10724_v29  ;;  %v6613_v11 = vpop.f32.mrb[198].mxu1  ;;  %v6654_v20 = vpop.f32.mrb[206].mxu0  ;;  %v6945_v29 = vrot.slane %v10742_v50, %v10953_v55 }
 0x84a   :  { %v6614_v31 = vpop.f32.mrb[199].mxu1  ;;  %v6655_v25 = vpop.f32.mrb[207].mxu0 }
 0x867   :  { %v6782_v61 = vpop.f32.mrb[200].mxu1  ;;  %v6823_v1 = vpop.f32.mrb[208].mxu0 }
 0x868   :  { %v6912_v9 = vadd.f32 %v6782_v61, %v6657_v10  ;;  %v6914_v56 = vadd.f32 %v6823_v1, %v6659_v2  ;;  %v6784_v59 = vpop.f32.mrb[201].mxu1  ;;  %v6825_v32 = vpop.f32.mrb[209].mxu0 }
 0x869   :  { %v6913_v27 = vadd.f32 %v6784_v59, %v6658_v15  ;;  %v6915_v62 = vadd.f32 %v6825_v32, %v6660_v16  ;;  %v6786_v6 = vpop.f32.mrb[202].mxu1  ;;  %v6827_v46 = vpop.f32.mrb[210].mxu0 }
 0x86a   :  { %v6978_v14 = vadd.f32 %v6941_v40, %v6912_v9  ;;  %v6980_v42 = vadd.f32 %v6949_v48, %v6914_v56  ;;  %v6787_v51 = vpop.f32.mrb[203].mxu1  ;;  %v6828_v60 = vpop.f32.mrb[211].mxu0  ;;  %v10781_v46 = vsub.s32 6, %v9498_v33 }
 0x86b   :  { %v6979_v22 = vadd.f32 %v6945_v29, %v6913_v27  ;;  %v6981_v41 = vadd.f32 %v6953_v43, %v6915_v62  ;;  %v10784_v51 = vsub.s32 5, %v9498_v33  ;;  %v10787_v60 = vsub.s32 7, %v9498_v33 }
 0x86c   :  { %v6989_v7 = vmul.f32 %v10754_v0, %v6978_v14  ;;  %v6991_v58 = vmul.f32 %v10754_v0, %v6980_v42 }
 0x86d   :  { %v6990_v18 = vmul.f32 %v10754_v0, %v6979_v22  ;;  %v6992_v19 = vmul.f32 %v10754_v0, %v6981_v41  ;;  %v6961_v33 = vrot.slane %v10742_v50, %v10784_v51 }
 0x86e   :  { %v6997_v54 = vrot.slane %v6989_v7, 4  ;;  %v7009_v3 = vrot.slane %v6991_v58, 4 }
 0x86f   :  { %v7003_v49 = vrot.slane %v6990_v18, 4  ;;  %v7015_v39 = vrot.slane %v6992_v19, 4 }
 0x870   :  { %v6998_v47 = vadd.f32 %v6997_v54, %v6989_v7  ;;  %v7010_v4 = vadd.f32 %v7009_v3, %v6991_v58  ;;  %v10955_v54 = vld [vmem:[#allocation35_spill] sm:$0xff] }
 0x871   :  { %v7004_v8 = vadd.f32 %v7003_v49, %v6990_v18  ;;  %v7016_v23 = vadd.f32 %v7015_v39, %v6992_v19  ;;  %v6957_v3 = vrot.slane %v10742_v50, %v10955_v54  ;;  %v6965_v49 = vrot.slane %v10742_v50, %v10781_v46 }
 0x872   :  { %v6999_v13 = vrot.slane %v6998_v47, 2  ;;  %v7011_v10 = vrot.slane %v7010_v4, 2 }
 0x873   :  { %v7005_v2 = vrot.slane %v7004_v8, 2  ;;  %v7017_v36 = vrot.slane %v7016_v23, 2 }
 0x874   :  { %v7000_v17 = vadd.f32 %v6999_v13, %v6998_v47  ;;  %v7012_v15 = vadd.f32 %v7011_v10, %v7010_v4 }
 0x875   :  { %v7006_v16 = vadd.f32 %v7005_v2, %v7004_v8  ;;  %v7018_v52 = vadd.f32 %v7017_v36, %v7016_v23  ;;  %v6969_v23 = vrot.slane %v10742_v50, %v10787_v60 }
 0x876   :  { %v7001_v63 = vrot.slane %v7000_v17, 1  ;;  %v7013_v53 = vrot.slane %v7012_v15, 1 }
 0x877   :  { %v7007_v30 = vrot.slane %v7006_v16, 1  ;;  %v7019_v12 = vrot.slane %v7018_v52, 1 }
 0x878   :  { %v7002_v26 = vadd.f32 %v7001_v63, %v7000_v17  ;;  %v7014_v57 = vadd.f32 %v7013_v53, %v7012_v15 }
 0x879   :  { %v7008_v5 = vadd.f32 %v7007_v30, %v7006_v16  ;;  %v7020_v21 = vadd.f32 %v7019_v12, %v7018_v52 }
 0x87a   :  { %v7045_v37 = vmul.f32 0.25, %v7002_v26  ;;  %v7047_v11 = vmul.f32 0.25, %v7014_v57 }
 0x87b   :  { %v7046_v20 = vmul.f32 0.25, %v7008_v5  ;;  %v7048_v31 = vmul.f32 0.25, %v7020_v21 }
 0x87c   :  { %v10760_v25 = vsub.f32 %v6978_v14, %v7045_v37  ;;  %v10762_v40 = vsub.f32 %v6980_v42, %v7047_v11 }
 0x87d   :  { %v10764_v48 = vsub.f32 %v6979_v22, %v7046_v20  ;;  %v10766_v61 = vsub.f32 %v6981_v41, %v7048_v31 }
 0x87e   :  { %v7061_v1 = vmul.f32 %v10760_v25, %v10760_v25  ;;  %v7063_v29 = vmul.f32 %v10762_v40, %v10762_v40 }
 0x87f   :  { %v7062_v43 = vmul.f32 %v10764_v48, %v10764_v48  ;;  %v7064_v9 = vmul.f32 %v10766_v61, %v10766_v61 }
 0x880   :  { %v7069_v56 = vmul.f32 %v10754_v0, %v7061_v1  ;;  %v7071_v59 = vmul.f32 %v10754_v0, %v7063_v29 }
 0x881   :  { %v7070_v32 = vmul.f32 %v10754_v0, %v7062_v43  ;;  %v7072_v27 = vmul.f32 %v10754_v0, %v7064_v9 }
 0x882   :  { %v7077_v62 = vrot.slane %v7069_v56, 4  ;;  %v7089_v6 = vrot.slane %v7071_v59, 4 }
 0x883   :  { %v7083_v14 = vrot.slane %v7070_v32, 4  ;;  %v7095_v42 = vrot.slane %v7072_v27, 4 }
 0x884   :  { %v7078_v22 = vadd.f32 %v7077_v62, %v7069_v56  ;;  %v7090_v41 = vadd.f32 %v7089_v6, %v7071_v59 }
 0x885   :  { %v7084_v7 = vadd.f32 %v7083_v14, %v7070_v32  ;;  %v7096_v58 = vadd.f32 %v7095_v42, %v7072_v27 }
 0x886   :  { %v7079_v18 = vrot.slane %v7078_v22, 2  ;;  %v7091_v19 = vrot.slane %v7090_v41, 2 }
 0x887   :  { %v7085_v39 = vrot.slane %v7084_v7, 2  ;;  %v7097_v47 = vrot.slane %v7096_v58, 2  ;;  %v6864_v4 = vpop.f32.mrb[204].mxu1  ;;  %v6905_v8 = vpop.f32.mrb[212].mxu0 }
 0x888   :  { %v7080_v13 = vadd.f32 %v7079_v18, %v7078_v22  ;;  %v7092_v10 = vadd.f32 %v7091_v19, %v7090_v41  ;;  %v6916_v2 = vadd.f32 %v6864_v4, %v10731_v24  ;;  %v6918_v36 = vadd.f32 %v6905_v8, %v10734_v35  ;;  %v6866_v17 = vpop.f32.mrb[205].mxu1  ;;  %v6907_v15 = vpop.f32.mrb[213].mxu0 }
 0x889   :  { %v7086_v16 = vadd.f32 %v7085_v39, %v7084_v7  ;;  %v7098_v52 = vadd.f32 %v7097_v47, %v7096_v58  ;;  %v6917_v63 = vadd.f32 %v6866_v17, %v10737_v45  ;;  %v6919_v53 = vadd.f32 %v6907_v15, %v10740_v44  ;;  %v6868_v30 = vpop.f32.mrb[206].mxu1  ;;  %v6909_v12 = vpop.f32.mrb[214].mxu0  ;;  %v10817_v15 = vld [vmem:[#allocation18] sm:$0xff] }
 0x88a   :  { %v7081_v26 = vrot.slane %v7080_v13, 1  ;;  %v7093_v57 = vrot.slane %v7092_v10, 1  ;;  %v10801_v5 = vadd.f32 %v6957_v3, %v6916_v2  ;;  %v10803_v50 = vadd.f32 %v6965_v49, %v6918_v36  ;;  %v6869_v21 = vpop.f32.mrb[207].mxu1  ;;  %v6910_v24 = vpop.f32.mrb[215].mxu0 }
 0x88b   :  { %v7087_v37 = vrot.slane %v7086_v16, 1  ;;  %v7099_v35 = vrot.slane %v7098_v52, 1  ;;  %v10805_v11 = vadd.f32 %v6961_v33, %v6917_v63  ;;  %v10807_v20 = vadd.f32 %v6969_v23, %v6919_v53  ;;  %v10819_v63 = vld [vmem:[#allocation20] sm:$0xff] }
 0x88c   :  { %v7082_v31 = vadd.f32 %v7081_v26, %v7080_v13  ;;  %v7094_v45 = vadd.f32 %v7093_v57, %v7092_v10  ;;  %v6993_v44 = vmul.f32 %v10754_v0, %v10801_v5  ;;  %v6995_v1 = vmul.f32 %v10754_v0, %v10803_v50 }
 0x88d   :  { %v7088_v29 = vadd.f32 %v7087_v37, %v7086_v16  ;;  %v7100_v43 = vadd.f32 %v7099_v35, %v7098_v52  ;;  %v6994_v9 = vmul.f32 %v10754_v0, %v10805_v11  ;;  %v6996_v56 = vmul.f32 %v10754_v0, %v10807_v20 }
 0x88e   :  { %v7125_v59 = vmul.f32 0.25, %v7082_v31  ;;  %v7127_v32 = vmul.f32 0.25, %v7094_v45  ;;  %v7021_v27 = vrot.slane %v6993_v44, 4  ;;  %v7033_v62 = vrot.slane %v6995_v1, 4 }
 0x88f   :  { %v7126_v6 = vmul.f32 0.25, %v7088_v29  ;;  %v7128_v14 = vmul.f32 0.25, %v7100_v43  ;;  %v7027_v42 = vrot.slane %v6994_v9, 4  ;;  %v7039_v22 = vrot.slane %v6996_v56, 4 }
 0x890   :  { %v7133_v41 = vadd.f32 1e-05, %v7125_v59  ;;  %v7135_v7 = vadd.f32 1e-05, %v7127_v32  ;;  %v7022_v58 = vadd.f32 %v7021_v27, %v6993_v44  ;;  %v7034_v18 = vadd.f32 %v7033_v62, %v6995_v1 }
 0x891   :  { %v7134_v19 = vadd.f32 1e-05, %v7126_v6  ;;  %v7136_v3 = vadd.f32 1e-05, %v7128_v14  ;;  %v7028_v49 = vadd.f32 %v7027_v42, %v6994_v9  ;;  %v7040_v39 = vadd.f32 %v7039_v22, %v6996_v56 }
 0x892   :  { %8945 = vrsqrt.f32 %v7133_v41  ;;  %v7023_v47 = vrot.slane %v7022_v58, 2  ;;  %v7035_v4 = vrot.slane %v7034_v18, 2  ;;  %v7162_v57 = vrot.slane %v10817_v15, %v9501_v34 }
 0x893   :  { %8947 = vrsqrt.f32 %v7135_v7  ;;  %v7029_v8 = vrot.slane %v7028_v49, 2  ;;  %v7041_v33 = vrot.slane %v7040_v39, 2  ;;  %v7170_v21 = vrot.slane %v10817_v15, %v9508_v38 }
 0x894   :  { %8949 = vrsqrt.f32 %v7134_v19  ;;  %v7024_v23 = vadd.f32 %v7023_v47, %v7022_v58  ;;  %v7036_v13 = vadd.f32 %v7035_v4, %v7034_v18  ;;  %v7212_v35 = vrot.slane %v10819_v63, %v9501_v34 }
 0x895   :  { %8951 = vrsqrt.f32 %v7136_v3  ;;  %v7030_v10 = vadd.f32 %v7029_v8, %v7028_v49  ;;  %v7042_v2 = vadd.f32 %v7041_v33, %v7040_v39  ;;  %v7166_v31 = vrot.slane %v10817_v15, %v10953_v55 }
 0x896   :  { %v7025_v36 = vrot.slane %v7024_v23, 1  ;;  %v7037_v17 = vrot.slane %v7036_v13, 1  ;;  %v7220_v29 = vrot.slane %v10819_v63, %v9508_v38  ;;  %v7174_v43 = vrot.slane %v10817_v15, %v10954_v28 }
 0x897   :  { %v7031_v16 = vrot.slane %v7030_v10, 1  ;;  %v7043_v52 = vrot.slane %v7042_v2, 1  ;;  %v7216_v38 = vrot.slane %v10819_v63, %v10953_v55 }
 0x898   :  { %v7026_v53 = vadd.f32 %v7025_v36, %v7024_v23  ;;  %v7038_v30 = vadd.f32 %v7037_v17, %v7036_v13 }
 0x899   :  { %v7032_v12 = vadd.f32 %v7031_v16, %v7030_v10  ;;  %v7044_v26 = vadd.f32 %v7043_v52, %v7042_v2 }
 0x89a   :  { %v7049_v24 = vmul.f32 0.25, %v7026_v53  ;;  %v7051_v37 = vmul.f32 0.25, %v7038_v30 }
 0x89b   :  { %v7050_v45 = vmul.f32 0.25, %v7032_v12  ;;  %v7052_v44 = vmul.f32 0.25, %v7044_v26 }
 0x89c   :  { %v8946_v1 = vpop.eup %8945  ;;  %v10834_v9 = vsub.f32 %v10801_v5, %v7049_v24  ;;  %v10837_v56 = vsub.f32 %v10803_v50, %v7051_v37  ;;  %v8915_v37 = vld [vmem:[#allocation21 + $0x100] sm:$0xff]  }
 0x89d   :  { %v8948_v59 = vpop.eup %8947  ;;  %v7149_v34 = vmul.f32 %v8946_v1, %v10760_v25  ;;  %v10841_v32 = vsub.f32 %v10805_v11, %v7050_v45  ;;  %v10844_v27 = vsub.f32 %v10807_v20, %v7052_v44  ;;  %v7224_v25 = vrot.slane %v10819_v63, %v10954_v28  ;;  %v8917_v1 = vld [vmem:[#allocation21 + $0x148] sm:$0xff]  }
 0x89e   :  { %v8950_v62 = vpop.eup %8949  ;;  %v7151_v6 = vmul.f32 %v8948_v59, %v10762_v40  ;;  %v7065_v5 = vmul.f32 %v10834_v9, %v10834_v9  ;;  %v7067_v50 = vmul.f32 %v10837_v56, %v10837_v56 }
 0x89f   :  { %v8952_v11 = vpop.eup %8951  ;;  %v7199_v14 = vmul.f32 %v7162_v57, %v7149_v34  ;;  %v7150_v20 = vmul.f32 %v8950_v62, %v10764_v48  ;;  %v7066_v42 = vmul.f32 %v10841_v32, %v10841_v32  ;;  %v7068_v55 = vmul.f32 %v10844_v27, %v10844_v27 }
 0x8a0   :  { %v7201_v40 = vmul.f32 %v7170_v21, %v7151_v6  ;;  %v7152_v22 = vmul.f32 %v8952_v11, %v10766_v61  ;;  %v7073_v41 = vmul.f32 %v10754_v0, %v7065_v5  ;;  %v7075_v7 = vmul.f32 %v10754_v0, %v7067_v50  ;;  %v8916_v50 = vld [vmem:[#allocation21 + $0x180] sm:$0xff]  }
 0x8a1   :  { %v7249_v58 = vadd.f32 %v7212_v35, %v7199_v14  ;;  %v7200_v18 = vmul.f32 %v7166_v31, %v7150_v20  ;;  %v7074_v28 = vmul.f32 %v10754_v0, %v7066_v42  ;;  %v7076_v19 = vmul.f32 %v10754_v0, %v7068_v55  ;;  %v8918_v42 = vld [vmem:[#allocation21 + $0x1c8] sm:$0xff]   ;;  %v8921_v55 = vld [vmem:[#allocation21 + $0x150] sm:$0xff]  }
 0x8a2   :  { %v7251_v48 = vadd.f32 %v7220_v29, %v7201_v40  ;;  %v7202_v3 = vmul.f32 %v7174_v43, %v7152_v22  ;;  %v7101_v49 = vrot.slane %v7073_v41, 4  ;;  %v7113_v39 = vrot.slane %v7075_v7, 4 }
 0x8a3   :  { %v7107_v47 = vrot.slane %v7074_v28, 4  ;;  %v7119_v4 = vrot.slane %v7076_v19, 4  ;;  %v7250_v8 = vadd.f32 %v7216_v38, %v7200_v18  ;;  %vm7257_vm14 = vcmp.gt.f32.partialorder %v7249_v58, 0.0 }
 0x8a4   :  { %v7102_v33 = vadd.f32 %v7101_v49, %v7073_v41  ;;  %v7114_v61 = vadd.f32 %v7113_v39, %v7075_v7  ;;  %v7252_v23 = vadd.f32 %v7224_v25, %v7202_v3  ;;  %v7265_v13 = vmul.f32 0.2, %v7249_v58  ;;  %v8919_v25 = vld [vmem:[#allocation21 + $0x108] sm:$0xff]   ;;  %v8922_v49 = vld [vmem:[#allocation21 + $0x1d0] sm:$0xff]   ;;  %v8925_v39 = vld [vmem:[#allocation21 + $0x158] sm:$0xff]  }
 0x8a5   :  { %v7108_v10 = vadd.f32 %v7107_v47, %v7074_v28  ;;  %v7120_v2 = vadd.f32 %v7119_v4, %v7076_v19  ;;  %vm7258_vm15 = vcmp.gt.f32.partialorder %v7250_v8, 0.0  ;;  %v7266_v36 = vmul.f32 0.2, %v7250_v8  ;;  %v8920_v28 = vld [vmem:[#allocation21 + $0x188] sm:$0xff]   ;;  %v8923_v19 = vld [vmem:[#allocation21 + $0x110] sm:$0xff]   ;;  %v8927_v4 = vld [vmem:[#allocation21 + $0x118] sm:$0xff]  }
 0x8a6   :  { %v7103_v17 = vrot.slane %v7102_v33, 2  ;;  %v7115_v16 = vrot.slane %v7114_v61, 2  ;;  %vm7260_vm2 = vcmp.gt.f32.partialorder %v7252_v23, 0.0  ;;  %v7268_v0 = vmul.f32 0.2, %v7252_v23  ;;  %v8924_v47 = vld [vmem:[#allocation21 + $0x190] sm:$0xff]  }
 0x8a7   :  { %v7109_v52 = vrot.slane %v7108_v10, 2  ;;  %v7121_v53 = vrot.slane %v7120_v2, 2  ;;  %v7274_v30 = vsel %vm7258_vm15, %v7250_v8, %v7266_v36  ;;  %v7273_v12 = vsel %vm7257_vm14, %v7249_v58, %v7265_v13  ;;  %v8926_v8 = vld [vmem:[#allocation21 + $0x1d8] sm:$0xff]   ;;  %v8930_v13 = vld [vmem:[#allocation21 + $0x1e0] sm:$0xff]  }
 0x8a8   :  { %v7104_v26 = vadd.f32 %v7103_v17, %v7102_v33  ;;  %v7116_v57 = vadd.f32 %v7115_v16, %v7114_v61  ;;  %v7282_v21 = vpack.c.bf16 %v7274_v30, %v7274_v30  ;;  %v7276_v24 = vsel %vm7260_vm2, %v7252_v23, %v7268_v0  ;;  %v8929_v33 = vld [vmem:[#allocation21 + $0x160] sm:$0xff]   ;;  %v8928_v61 = vld [vmem:[#allocation21 + $0x198] sm:$0xff]   ;;  %v8935_v0 = vld [vmem:[#allocation21 + $0x128] sm:$0xff]  }
 0x8a9   :  { %v7110_v35 = vadd.f32 %v7109_v52, %v7108_v10  ;;  %v7122_v31 = vadd.f32 %v7121_v53, %v7120_v2  ;;  %v7284_v45 = vpack.c.bf16 %v7276_v24, %v7276_v24  ;;  %v7281_v44 = vpack.c.bf16 %v7273_v12, %v7273_v12  ;;  %v8931_v23 = vld [vmem:[#allocation21 + $0x120] sm:$0xff]   ;;  %v8933_v10 = vld [vmem:[#allocation21 + $0x168] sm:$0xff]  }
 0x8aa   :  { %v7105_v29 = vrot.slane %v7104_v26, 1  ;;  %v7117_v43 = vrot.slane %v7116_v57, 1  ;;  %7840 = vmatprep.mubr.bf16.mxu1 %v7282_v21  ;;  %vm7259_vm4 = vcmp.gt.f32.partialorder %v7251_v48, 0.0  ;;  %v7267_v59 = vmul.f32 0.2, %v7251_v48  ;;  %v8932_v16 = vld [vmem:[#allocation21 + $0x1a0] sm:$0xff]  }
 0x8ab   :  { %v7111_v34 = vrot.slane %v7110_v35, 1  ;;  %v7123_v38 = vrot.slane %v7122_v31, 1  ;;  %7880 = vmatprep.mubr.bf16.mxu0 %v7284_v45  ;;  %7841 = vmatmul.mubr.bf16.vlgmr.msra.gmra.mrb[208].mxu1 %v7281_v44  ;;  %v7178_v2 = vrot.slane %v10817_v15, %v10955_v54  ;;  %v7186_v17 = vrot.slane %v10817_v15, %v10781_v46 }
 0x8ac   :  { %v7106_v62 = vadd.f32 %v7105_v29, %v7104_v26  ;;  %v7118_v6 = vadd.f32 %v7117_v43, %v7116_v57  ;;  %v7275_v5 = vsel %vm7259_vm4, %v7251_v48, %v7267_v59  ;;  %8662 = vmatpush3.bf16.msra.mxu1 %v8915_v37  ;;  %v7228_v30 = vrot.slane %v10819_v63, %v10955_v54  ;;  %v8934_v26 = vld [vmem:[#allocation21 + $0x1e8] sm:$0xff]   ;;  %v8937_v57 = vld [vmem:[#allocation21 + $0x170] sm:$0xff]  }
 0x8ad   :  { %v7112_v11 = vadd.f32 %v7111_v34, %v7110_v35  ;;  %v7124_v14 = vadd.f32 %v7123_v38, %v7122_v31  ;;  %v7283_v20 = vpack.c.bf16 %v7275_v5, %v7275_v5  ;;  %8663 = vmatprep.subr.bf16.mxu1 %v8917_v1  ;;  %v7182_v12 = vrot.slane %v10817_v15, %v10784_v51  ;;  %v8936_v29 = vld [vmem:[#allocation21 + $0x1a8] sm:$0xff]   ;;  %v8941_v34 = vld [vmem:[#allocation21 + $0x178] sm:$0xff]  }
 0x8ae   :  { %v7129_v40 = vmul.f32 0.25, %v7106_v62  ;;  %v7131_v22 = vmul.f32 0.25, %v7118_v6  ;;  %v7236_v37 = vrot.slane %v10819_v63, %v10781_v46  ;;  %v7190_v35 = vrot.slane %v10817_v15, %v10787_v60  ;;  %v8938_v15 = vld [vmem:[#allocation21 + $0x1f0] sm:$0xff]   ;;  %v8943_v6 = vld [vmem:[#allocation21 + $0x138] sm:$0xff]  }
 0x8af   :  { %v7130_v41 = vmul.f32 0.25, %v7112_v11  ;;  %v7132_v7 = vmul.f32 0.25, %v7124_v14  ;;  %7881 = vmatmul.mubr.bf16.vlgmr.msra.gmra.mrb[216].mxu0 %v7283_v20  ;;  %v7232_v45 = vrot.slane %v10819_v63, %v10784_v51  ;;  %v7240_v46 = vrot.slane %v10819_v63, %v10787_v60  ;;  %v8944_v20 = vld [vmem:[#allocation21 + $0x1b8] sm:$0xff]  }
 0x8b0   :  { %v7137_v58 = vadd.f32 1e-05, %v7129_v40  ;;  %v7139_v18 = vadd.f32 1e-05, %v7131_v22  ;;  %8684 = vmatpush3.bf16.msra.mxu0 %v8916_v50  ;;  %8664 = vmatpush3.bf16.msra.mxu1 %v8919_v25  ;;  %v8942_v50 = vld [vmem:[#allocation21 + $0x1f8] sm:$0xff]  }
 0x8b1   :  { %v7138_v48 = vadd.f32 1e-05, %v7130_v41  ;;  %v7140_v3 = vadd.f32 1e-05, %v7132_v7  ;;  %8685 = vmatprep.subr.bf16.mxu0 %v8918_v42  ;;  %8665 = vmatprep.subr.bf16.mxu1 %v8921_v55 }
 0x8b2   :  { %8953 = vrsqrt.f32 %v7137_v58 }
 0x8b3   :  { %8955 = vrsqrt.f32 %v7139_v18  ;;  %v8115_v18 = vld [vmem:[#allocation23] ss:$0 sm:$0xff] }
 0x8b4   :  { %8957 = vrsqrt.f32 %v7138_v48  ;;  %8686 = vmatpush3.bf16.msra.mxu0 %v8920_v28  ;;  %8666 = vmatpush3.bf16.msra.mxu1 %v8923_v19 }
 0x8b5   :  { %8959 = vrsqrt.f32 %v7140_v3  ;;  %8687 = vmatprep.subr.bf16.mxu0 %v8922_v49  ;;  %8667 = vmatprep.subr.bf16.mxu1 %v8925_v39 }
 0x8b8   :  { %8688 = vmatpush3.bf16.msra.mxu0 %v8924_v47  ;;  %8668 = vmatpush3.bf16.msra.mxu1 %v8927_v4 }
 0x8b9   :  { %8689 = vmatprep.subr.bf16.mxu0 %v8926_v8  ;;  %8669 = vmatprep.subr.bf16.mxu1 %v8929_v33 }
 0x8bc   :  { %v8954_v36 = vpop.eup %8953  ;;  %8690 = vmatpush3.bf16.msra.mxu0 %v8928_v61  ;;  %8670 = vmatpush3.bf16.msra.mxu1 %v8931_v23 }
 0x8bd   :  { %v8956_v52 = vpop.eup %8955  ;;  %v7153_v53 = vmul.f32 %v8954_v36, %v10834_v9  ;;  %8691 = vmatprep.subr.bf16.mxu0 %v8930_v13  ;;  %8671 = vmatprep.subr.bf16.mxu1 %v8933_v10 }
 0x8be   :  { %v8958_v21 = vpop.eup %8957  ;;  %v7155_v24 = vmul.f32 %v8956_v52, %v10837_v56  ;;  %v8939_v56 = vld [vmem:[#allocation21 + $0x130] sm:$0xff]  }
 0x8bf   :  { %v8960_v9 = vpop.eup %8959  ;;  %v7203_v31 = vmul.f32 %v7178_v2, %v7153_v53  ;;  %v7154_v54 = vmul.f32 %v8958_v21, %v10841_v32 }
 0x8c0   :  { %v7205_v44 = vmul.f32 %v7186_v17, %v7155_v24  ;;  %v7156_v1 = vmul.f32 %v8960_v9, %v10844_v27  ;;  %8692 = vmatpush3.bf16.msra.mxu0 %v8932_v16  ;;  %8672 = vmatpush3.bf16.msra.mxu1 %v8935_v0  ;;  %v8940_v27 = vld [vmem:[#allocation21 + $0x1b0] sm:$0xff]  }
 0x8c1   :  { %v7253_v43 = vadd.f32 %v7228_v30, %v7203_v31  ;;  %v7204_v59 = vmul.f32 %v7182_v12, %v7154_v54  ;;  %8693 = vmatprep.subr.bf16.mxu0 %v8934_v26  ;;  %8673 = vmatprep.subr.bf16.mxu1 %v8937_v57 }
 0x8c2   :  { %v7255_v32 = vadd.f32 %v7236_v37, %v7205_v44  ;;  %v7206_v38 = vmul.f32 %v7190_v35, %v7156_v1 }
 0x8c3   :  { %v7254_v62 = vadd.f32 %v7232_v45, %v7204_v59  ;;  %vm7261_vm5 = vcmp.gt.f32.partialorder %v7253_v43, 0.0  ;;  %v7269_v51 = vmul.f32 0.2, %v7253_v43 }
 0x8c4   :  { %8694 = vmatpush3.bf16.msra.mxu0 %v8936_v29  ;;  %8674 = vmatpush3.bf16.msra.mxu1 %v8939_v56  ;;  %v7256_v5 = vadd.f32 %v7240_v46, %v7206_v38  ;;  %v7271_v11 = vmul.f32 0.2, %v7255_v32  ;;  %vm7263_vm0 = vcmp.gt.f32.partialorder %v7255_v32, 0.0 }
 0x8c5   :  { %8695 = vmatprep.subr.bf16.mxu0 %v8938_v15  ;;  %8675 = vmatprep.subr.bf16.mxu1 %v8941_v34  ;;  %vm7262_vm13 = vcmp.gt.f32.partialorder %v7254_v62, 0.0  ;;  %v7270_v60 = vmul.f32 0.2, %v7254_v62  ;;  %v7277_v25 = vsel %vm7261_vm5, %v7253_v43, %v7269_v51 }
 0x8c6   :  { %vm7264_vm3 = vcmp.gt.f32.partialorder %v7256_v5, 0.0  ;;  %v7272_v63 = vmul.f32 0.2, %v7256_v5  ;;  %v7285_v22 = vpack.c.bf16 %v7277_v25, %v7277_v25  ;;  %v7279_v41 = vsel %vm7263_vm0, %v7255_v32, %v7271_v11 }
 0x8c7   :  { %v7278_v14 = vsel %vm7262_vm13, %v7254_v62, %v7270_v60  ;;  %v7287_v7 = vpack.c.bf16 %v7279_v41, %v7279_v41 }
 0x8c8   :  { %8696 = vmatpush3.bf16.msra.mxu0 %v8940_v27  ;;  %8676 = vmatpush3.bf16.msra.mxu1 %v8943_v6  ;;  %v7286_v42 = vpack.c.bf16 %v7278_v14, %v7278_v14  ;;  %v7280_v55 = vsel %vm7264_vm3, %v7256_v5, %v7272_v63 }
 0x8c9   :  { %8697 = vmatprep.subr.bf16.mxu0 %v8942_v50  ;;  %v7288_v40 = vpack.c.bf16 %v7280_v55, %v7280_v55 }
 0x8ca   :  { %7920 = vmatprep.mubr.bf16.mxu1 %v7286_v42 }
 0x8cb   :  { %7960 = vmatprep.mubr.bf16.mxu0 %v7288_v40  ;;  %7921 = vmatmul.mubr.bf16.vlgmr.msra.gmra.mrb[212].mxu1 %v7285_v22 }
 0x8cc   :  { %8698 = vmatpush3.bf16.msra.mxu0 %v8944_v20 }
 0x8cf   :  { %7961 = vmatmul.mubr.bf16.vlgmr.msra.gmra.mrb[220].mxu0 %v7287_v7 }
 0x97e   :  { %v8633_v58 = vpop.f32.mrb[208].mxu1 }
 0x97f   :  { %v8634_v28 = vpop.f32.mrb[209].mxu1 }
 0x980   :  { %v8635_v19 = vadd.f32 %v8634_v28, %v8633_v58  ;;  %v8636_v48 = vpop.f32.mrb[210].mxu1 }
 0x981   :  { %v8637_v3 = vpop.f32.mrb[211].mxu1 }
 0x982   :  { %v8655_v49 = vpop.f32.mrb[216].mxu0  ;;  %v7843_v39 = vadd.f32 %v8635_v19, %v8115_v18 }
 0x983   :  { %v8656_v47 = vpop.f32.mrb[217].mxu0 }
 0x984   :  { %v8657_v4 = vadd.f32 %v8656_v47, %v8655_v49  ;;  %v8658_v8 = vpop.f32.mrb[218].mxu0 }
 0x985   :  { %v8659_v33 = vpop.f32.mrb[219].mxu0 }
 0x986   :  { %v7883_v61 = vadd.f32 %v8657_v4, %v7843_v39 }
 0x99e   :  { %v8677_v23 = vpop.f32.mrb[212].mxu1 }
 0x99f   :  { %v8678_v13 = vpop.f32.mrb[213].mxu1 }
 0x9a0   :  { %v8679_v10 = vadd.f32 %v8678_v13, %v8677_v23  ;;  %v8680_v2 = vpop.f32.mrb[214].mxu1 }
 0x9a1   :  { %v8681_v36 = vpop.f32.mrb[215].mxu1 }
 0x9a2   :  { %v8699_v17 = vpop.f32.mrb[220].mxu0  ;;  %v7923_v16 = vadd.f32 %v8679_v10, %v7883_v61 }
 0x9a3   :  { %v8700_v0 = vpop.f32.mrb[221].mxu0 }
 0x9a4   :  { %v8701_v52 = vadd.f32 %v8700_v0, %v8699_v17  ;;  %v8702_v53 = vpop.f32.mrb[222].mxu0 }
 0x9a5   :  { %v8703_v30 = vpop.f32.mrb[223].mxu0 }
 0x9a6   :  { %v7963_v12 = vadd.f32 %v8701_v52, %v7923_v16 }
 0x9a8   :  { %7968 = vst [vmem:[%s10902_s13] sm:$0xff] %v7963_v12 }
 0x9a9   :  { %7973 = vsyncpa [#allocation8], 1 }
 0x9aa   :  { %7974 = vsyncpa [#allocation10], 1 }
 0x9ab   :  { %7975 = vsyncpa [#allocation13], 1 }
 0x9ac   :  { %7976 = vsyncpa [#allocation16], 1 }
 0x9ad   :  { %7977 = vsyncpa [#allocation19], 1 }
 0x9ae   :  { %7978 = vsyncpa [#allocation22], 1 }
 0x9af   :  { %7979 = vsyncmov [#allocation6] }
 0x9b2   :  { %s7980_s27 = vpop.sfrf %7979 }
 0x9b3   :  { %p8180_p4 = scmp.ne.s32.totalorder %s7980_s27, 0 }
 0x9b5   :  { %7984 = shalt.err (%p8180_p4)  }

</bundles_post_ra>
